<compile_context>
chip_gen: v5e
topology: v5e:2x2
jax: 0.10.0
libtpu: 0.0.40
codegen_flags: <defaults>
</compile_context>

<pallas_src>
import math
from functools import partial

import jax
import jax.numpy as jnp
from jax.experimental import pallas as pl
from jax.experimental.pallas import tpu as pltpu

LANE = 128


def _ceil_to(n, m):
    return ((n + m - 1) // m) * m


# ----------------------------------------------------------------------------
# Pallas kernel: full Mlp forward for a block of `bb` images per grid step.
# ----------------------------------------------------------------------------
def mlp_kernel(x_ref, w1_ref, b1_ref, wdf_ref, bd_ref, w2_ref, b2_ref,
               o_ref, pad_ref, patch_ref, *, bb, h, w, chp):
    # x_ref     : (bb*h*w, Cin)        f32   flattened NHWC pixels
    # w1_ref    : (Cin, chp)           bf16  fc1 weight, hidden padded to 128 lanes
    # b1_ref    : (1, chp)             f32
    # wdf_ref   : (9*chp, chp)         bf16  3x3 conv weight, im2col rows (kh, kw, cin_pad)
    # bd_ref    : (1, chp)             f32
    # w2_ref    : (chp, Cout)          bf16  fc2 weight (zero rows on padded hidden)
    # b2_ref    : (1, Cout)            f32
    # o_ref     : (bb*h*w, Cout)       f32
    # pad_ref   : VMEM (bb, h+2, w+2, chp) f32   zero-padded hidden activation
    # patch_ref : VMEM (bb*h*w, 9*chp)     bf16  im2col patch matrix
    n = bb * h * w

    # --- fc1: quaternion 1x1 conv == channel matmul (bf16 operands, f32 acc) --
    x = x_ref[...].astype(jnp.bfloat16)
    h1 = jnp.dot(x, w1_ref[...],
                 preferred_element_type=jnp.float32) + b1_ref[...]

    # --- zero-padded hidden activation in VMEM scratch ------------------------
    # Only the 1-wide halo is zeroed (tiny); the interior is overwritten every
    # step.  The halo is re-zeroed each step on purpose: with a "parallel" grid
    # axis a core may never execute program_id == 0, so one-time init is unsafe.
    zrow = jnp.zeros((bb, 1, w + 2, chp), jnp.float32)
    pad_ref[:, 0:1, :, :] = zrow
    pad_ref[:, h + 1:h + 2, :, :] = zrow
    zcol = jnp.zeros((bb, h + 2, 1, chp), jnp.float32)
    pad_ref[:, :, 0:1, :] = zcol
    pad_ref[:, :, w + 1:w + 2, :] = zcol
    pad_ref[:, 1:h + 1, 1:w + 1, :] = h1.reshape(bb, h, w, chp)
    # TODO(synk): pad_ref could also be bf16 (halves its VMEM traffic), but the
    # 1-wide halo column writes then become sub-sublane packed stores; kept f32
    # for robust lowering.  All matmul operands below are bf16 regardless.

    # --- DWConv (dense 3x3, stride 1, pad 1) as ONE im2col matmul -------------
    # Each tap slab is chp (a multiple of 128) lanes wide at a 128-aligned lane
    # offset, so every patch write is an unmasked, lane-dense full-vreg store.
    for tap in range(9):                      # static taps; offsets are 128-aligned
        dh, dw = divmod(tap, 3)
        win = pad_ref[:, dh:dh + h, dw:dw + w, :]            # (bb, h, w, chp)
        patch_ref[:, tap * chp:(tap + 1) * chp] = (
            win.reshape(n, chp).astype(jnp.bfloat16))
    # TODO(synk): at PVT scale (rows ~ 3136, ch = 512) the materialized patch
    # alone exceeds v7x's 64 MiB VMEM -- switch to row-strip tiling
    # (pltpu.emit_pipeline over row strips) or 3 accumulated kh-slab matmuls.

    acc = jnp.dot(patch_ref[...], wdf_ref[...],
                  preferred_element_type=jnp.float32) + bd_ref[...]

    # --- GELU ------------------------------------------------------------------
    # tanh form runs on the EUP (its own VLIW slot, otherwise idle here) instead
    # of a long erf polynomial on the VALU.  The (chp - ch) padded lanes are
    # exact zeros (gelu(0) = 0), so the padding stays inert.
    h2 = jax.nn.gelu(acc, approximate=True).astype(jnp.bfloat16)

    # --- fc2: quaternion 1x1 conv == channel matmul ----------------------------
    out = jnp.dot(h2, w2_ref[...],
                  preferred_element_type=jnp.float32) + b2_ref[...]
    o_ref[...] = out.astype(o_ref.dtype)


# ----------------------------------------------------------------------------
# VMEM budgeting / block picking (v7x-safe by default)
# ----------------------------------------------------------------------------
def _vmem_estimate(bb, h, w, cin, chp, cout):
    """Rough per-step VMEM bytes: double-buffered in/out blocks + scratch +
    double-buffered weights + live intermediates."""
    rows = bb * h * w
    in_block = rows * cin * 4
    out_block = rows * cout * 4
    pad = bb * (h + 2) * (w + 2) * chp * 4
    patch = rows * 9 * chp * 2
    weights = (cin * chp + 9 * chp * chp + chp * cout) * 2 + (2 * chp + cout) * 4
    live = 3 * rows * chp * 4 + patch          # h1 / acc / h2 values + patch load
    return 2 * (in_block + out_block) + pad + patch + 2 * weights + live


def _pick_block_b(batch, h, w, cin, chp, cout, budget_bytes):
    """Largest per-step image count whose VMEM estimate fits the budget, with
    grid length >= 2 and (preferably) even for v7x's two TensorCores."""
    valid = []
    for cand in range(1, batch + 1):
        if batch % cand:
            continue
        if (cand * h * w) % 8:
            continue
        if _vmem_estimate(cand, h, w, cin, chp, cout) > budget_bytes:
            continue
        if (batch // cand) < min(2, batch):
            continue
        valid.append(cand)
    if not valid:
        return 1
    even_grid = [c for c in valid if (batch // c) % 2 == 0]
    return max(even_grid) if even_grid else max(valid)


# ----------------------------------------------------------------------------
# Wrapper
# ----------------------------------------------------------------------------
def mlp_forward(x_nchw, w1, b1, wd, bd, w2, b2, *, block_b=None,
                vmem_budget_bytes=48 << 20):
    """x_nchw: (B, Cin, H, W) f32.  wd: (3, 3, Ch, Ch) laid out (kh, kw, in, out).
    Returns (B, Cout, H, W)."""
    B, Cin, H, W = x_nchw.shape
    Ch = w1.shape[1]
    Cout = w2.shape[1]
    Chp = _ceil_to(Ch, LANE)

    if block_b is None:
        block_b = _pick_block_b(B, H, W, Cin, Chp, Cout, vmem_budget_bytes)
    assert B % block_b == 0
    rows = block_b * H * W
    assert rows % 8 == 0

    # Hidden channels are zero-padded up to the 128-lane width from fc1 on: the
    # im2col tap slabs, GELU input and fc2 contraction are all lane-dense and
    # 128-aligned, and K = 9*Chp is a multiple of 128 (full MXU passes).  Zero
    # padding keeps the math exact (zero weight rows/cols, gelu(0)=0).
    w1_p = jnp.pad(w1, ((0, 0), (0, Chp - Ch))).astype(jnp.bfloat16)
    b1_p = jnp.pad(b1, ((0, 0), (0, Chp - Ch))).astype(jnp.float32)
    wd_p = jnp.pad(wd, ((0, 0), (0, 0), (0, Chp - Ch), (0, Chp - Ch)))
    wdf_p = wd_p.reshape(9 * Chp, Chp).astype(jnp.bfloat16)   # rows: (kh, kw, cin_pad)
    bd_p = jnp.pad(bd, ((0, 0), (0, Chp - Ch))).astype(jnp.float32)
    w2_p = jnp.pad(w2, ((0, Chp - Ch), (0, 0))).astype(jnp.bfloat16)
    b2_p = b2.astype(jnp.float32)

    # NCHW -> NHWC -> flat (rows, Cin): channels on the lane axis.
    # TODO(synk): these wrapper transposes are an extra HBM round-trip each; in
    # a full model keep activations channels-last (or tokens (B, N, C)) so they
    # fold into neighbouring ops instead.
    x2d = jnp.transpose(x_nchw, (0, 2, 3, 1)).reshape(B * H * W, Cin)

    est = _vmem_estimate(block_b, H, W, Cin, Chp, Cout)
    vmem_limit = int(min(max(est + est // 2 + (8 << 20), 32 << 20), 64 << 20))

    out_flat = pl.pallas_call(
        partial(mlp_kernel, bb=block_b, h=H, w=W, chp=Chp),
        out_shape=jax.ShapeDtypeStruct((B * H * W, Cout), jnp.float32),
        grid=(B // block_b,),
        in_specs=[
            pl.BlockSpec((rows, Cin), lambda b: (b, 0)),
            # Weights/biases: constant index_map -> fetched once, reused.
            # TODO(synk): at real ViT sizes single-buffer these
            # (pipeline_mode=pl.Buffered(1)) to save the redundant second copy
            # inside v7x's 64 MiB VMEM; negligible at these toy sizes.
            pl.BlockSpec((Cin, Chp), lambda b: (0, 0)),
            pl.BlockSpec((1, Chp), lambda b: (0, 0)),
            pl.BlockSpec((9 * Chp, Chp), lambda b: (0, 0)),
            pl.BlockSpec((1, Chp), lambda b: (0, 0)),
            pl.BlockSpec((Chp, Cout), lambda b: (0, 0)),
            pl.BlockSpec((1, Cout), lambda b: (0, 0)),
        ],
        # Output written at its true channel width: no 16x padded writeback and
        # no wrapper-side slice pass (Cout equals the full array dim -> legal).
        out_specs=pl.BlockSpec((rows, Cout), lambda b: (b, 0)),
        scratch_shapes=[
            pltpu.VMEM((block_b, H + 2, W + 2, Chp), jnp.float32),
            pltpu.VMEM((rows, 9 * Chp), jnp.bfloat16),
        ],
        compiler_params=pltpu.CompilerParams(
            dimension_semantics=("parallel",),
            vmem_limit_bytes=vmem_limit),
    )(x2d, w1_p, b1_p, wdf_p, bd_p, w2_p, b2_p)

    out = out_flat.reshape(B, H, W, Cout)
    return jnp.transpose(out, (0, 3, 1, 2))              # NHWC -> NCHW


# ----------------------------------------------------------------------------
# Deterministic parameter construction (synthetic init, not a checkpoint)
# ----------------------------------------------------------------------------
def make_quaternion_weight(key, in_ch, out_ch, std=0.1):
    """Full (in_ch, out_ch) matmul weight of a quaternion 1x1 conv (Hamilton
    block matrix), returned transposed so the kernel computes x @ W."""
    assert in_ch % 4 == 0 and out_ch % 4 == 0
    qi, qo = in_ch // 4, out_ch // 4
    kr, ki, kj, kk = jax.random.split(key, 4)
    r = jax.random.normal(kr, (qo, qi), jnp.float32) * std
    i = jax.random.normal(ki, (qo, qi), jnp.float32) * std
    j = jax.random.normal(kj, (qo, qi), jnp.float32) * std
    k = jax.random.normal(kk, (qo, qi), jnp.float32) * std
    w_conv = jnp.concatenate([
        jnp.concatenate([r, -i, -j, -k], axis=1),
        jnp.concatenate([i,  r, -k,  j], axis=1),
        jnp.concatenate([j,  k,  r, -i], axis=1),
        jnp.concatenate([k, -j,  i,  r], axis=1),
    ], axis=0)                                  # (out_ch, in_ch)
    return w_conv.T                             # (in_ch, out_ch)


# Pure-JAX reference.  mimic_bf16/gelu_approx=True mirrors the kernel numerics
# (tight check); False gives the exact f32 / erf-GELU module math (loose check).
def mlp_reference(x_nchw, w1, b1, wd, bd, w2, b2, *, mimic_bf16=True,
                  gelu_approx=True):
    B, Cin, H, W = x_nchw.shape
    Ch = w1.shape[1]
    f = (lambda a: a.astype(jnp.bfloat16)) if mimic_bf16 else (lambda a: a)
    x = jnp.transpose(x_nchw, (0, 2, 3, 1))
    h1 = jnp.dot(f(x), f(w1), preferred_element_type=jnp.float32) + b1
    pad = jnp.pad(h1, ((0, 0), (1, 1), (1, 1), (0, 0)))
    h2 = jnp.broadcast_to(bd, (B, H, W, Ch)).astype(jnp.float32)
    for dh in range(3):
        for dw in range(3):
            h2 = h2 + jnp.dot(f(pad[:, dh:dh + H, dw:dw + W, :]), f(wd[dh, dw]),
                              preferred_element_type=jnp.float32)
    h2 = jax.nn.gelu(h2, approximate=gelu_approx)
    out = jnp.dot(f(h2), f(w2), preferred_element_type=jnp.float32) + b2
    return jnp.transpose(out, (0, 3, 1, 2))


if __name__ == "__main__":
    # Small shapes consistent with the module (in_features must be /4).
    B, Cin, H, W = 4, 8, 16, 16
    hidden = 32            # hidden_features
    Cout = Cin             # out_features defaults to in_features

    key = jax.random.PRNGKey(0)
    kx, k1, kb1, k2, kb2, kd, kbd = jax.random.split(key, 7)

    x = jax.random.normal(kx, (B, Cin, H, W), jnp.float32)

    # fc1 / fc2: quaternion 1x1 convs (deterministic synthetic init)
    w1 = make_quaternion_weight(k1, Cin, hidden)
    b1 = jax.random.normal(kb1, (1, hidden), jnp.float32) * 0.05
    w2 = make_quaternion_weight(k2, hidden, Cout)
    b2 = jax.random.normal(kb2, (1, Cout), jnp.float32) * 0.05

    # DWConv: Conv2d(hidden, hidden, 3, padding=1): normal(0, sqrt(2/fan_out))
    fan_out = 3 * 3 * hidden
    wd = jax.random.normal(kd, (3, 3, hidden, hidden), jnp.float32) \
        * math.sqrt(2.0 / fan_out)              # layout (kh, kw, in, out)
    bd = jax.random.normal(kbd, (1, hidden), jnp.float32) * 0.05

    out = mlp_forward(x, w1, b1, wd, bd, w2, b2)
    out = jax.block_until_ready(out)
    assert out.shape == (B, Cout, H, W)

    # Structural check: reference mirrors the kernel's bf16-operand / tanh-GELU
    # numerics, so the tolerance can be tight.
    ref_mimic = mlp_reference(x, w1, b1, wd, bd, w2, b2,
                              mimic_bf16=True, gelu_approx=True)
    assert jnp.allclose(out, ref_mimic, atol=2e-3, rtol=2e-3)

    # Semantic check vs the exact f32 / erf-GELU module math (bf16-level tol).
    ref_exact = mlp_reference(x, w1, b1, wd, bd, w2, b2,
                              mimic_bf16=False, gelu_approx=False)
    assert jnp.allclose(out, ref_exact, atol=7e-2, rtol=7e-2)

    print("KERNEL_OK")
</pallas_src>

<mosaic_0001>
module attributes {stable_mosaic.version = 11 : i64} {
  func.func @mlp_kernel(%arg0: i32, %arg1: memref<512x8xf32, #tpu.memory_space<vmem>>, %arg2: memref<8x128xbf16, #tpu.memory_space<vmem>>, %arg3: memref<1x128xf32, #tpu.memory_space<vmem>>, %arg4: memref<1152x128xbf16, #tpu.memory_space<vmem>>, %arg5: memref<1x128xf32, #tpu.memory_space<vmem>>, %arg6: memref<128x8xbf16, #tpu.memory_space<vmem>>, %arg7: memref<1x8xf32, #tpu.memory_space<vmem>>, %arg8: memref<512x8xf32, #tpu.memory_space<vmem>>, %arg9: memref<2x18x18x128xf32, #tpu.memory_space<vmem>>, %arg10: memref<512x1152xbf16, #tpu.memory_space<vmem>>) attributes {dimension_semantics = [#tpu.dimension_semantics<parallel>], iteration_bounds = array<i64: 2>, scalar_prefetch = 0 : i64, scratch_operands = 2 : i64, tpu.core_type = #tpu.core_type<tc>, window_params = [{transform_indices = @transform_0, window_bounds = array<i64: 512, 8>}, {pipeline_mode = #tpu.pipeline_mode<synchronous>, transform_indices = @transform_1, window_bounds = array<i64: 8, 128>}, {pipeline_mode = #tpu.pipeline_mode<synchronous>, transform_indices = @transform_2, window_bounds = array<i64: 1, 128>}, {pipeline_mode = #tpu.pipeline_mode<synchronous>, transform_indices = @transform_3, window_bounds = array<i64: 1152, 128>}, {pipeline_mode = #tpu.pipeline_mode<synchronous>, transform_indices = @transform_4, window_bounds = array<i64: 1, 128>}, {pipeline_mode = #tpu.pipeline_mode<synchronous>, transform_indices = @transform_5, window_bounds = array<i64: 128, 8>}, {pipeline_mode = #tpu.pipeline_mode<synchronous>, transform_indices = @transform_6, window_bounds = array<i64: 1, 8>}, {transform_indices = @transform_7, window_bounds = array<i64: 512, 8>}]} {
    %c0 = arith.constant 0 : index
    %c0_0 = arith.constant 0 : index
    %0 = vector.load %arg1[%c0, %c0_0] : memref<512x8xf32, #tpu.memory_space<vmem>>, vector<512x8xf32>
    %1 = arith.truncf %0 : vector<512x8xf32> to vector<512x8xbf16>
    %c0_1 = arith.constant 0 : index
    %c0_2 = arith.constant 0 : index
    %2 = vector.load %arg2[%c0_1, %c0_2] : memref<8x128xbf16, #tpu.memory_space<vmem>>, vector<8x128xbf16>
    %cst = arith.constant dense<0.000000e+00> : vector<512x128xf32>
    %3 = tpu.matmul %1, %2, %cst {dimension_numbers = #tpu.dot_dimension_numbers<[1], [0], [0], [1], [0, 0, 1, 1], [], []>} : vector<512x8xbf16>, vector<8x128xbf16>, vector<512x128xf32> -> vector<512x128xf32>
    %c0_3 = arith.constant 0 : index
    %c0_4 = arith.constant 0 : index
    %4 = vector.load %arg3[%c0_3, %c0_4] : memref<1x128xf32, #tpu.memory_space<vmem>>, vector<1x128xf32>
    %5 = vector.broadcast %4 : vector<1x128xf32> to vector<512x128xf32>
    %6 = arith.addf %3, %5 : vector<512x128xf32>
    %cst_5 = arith.constant 0.000000e+00 : f32
    %7 = vector.broadcast %cst_5 : f32 to vector<2x1x18x128xf32>
    %c0_6 = arith.constant 0 : index
    %c0_7 = arith.constant 0 : index
    %c0_8 = arith.constant 0 : index
    %c0_9 = arith.constant 0 : index
    %8 = vector.load %arg9[%c0_6, %c0_7, %c0_8, %c0_9] : memref<2x18x18x128xf32, #tpu.memory_space<vmem>>, vector<2x1x18x128xf32>
    tpu.vector_store %arg9[%c0_6, %c0_7, %c0_8, %c0_9], %7 {strides = array<i32>} : memref<2x18x18x128xf32, #tpu.memory_space<vmem>>, vector<2x1x18x128xf32>,
    %c0_10 = arith.constant 0 : index
    %c17 = arith.constant 17 : index
    %c0_11 = arith.constant 0 : index
    %c0_12 = arith.constant 0 : index
    %9 = vector.load %arg9[%c0_10, %c17, %c0_11, %c0_12] : memref<2x18x18x128xf32, #tpu.memory_space<vmem>>, vector<2x1x18x128xf32>
    tpu.vector_store %arg9[%c0_10, %c17, %c0_11, %c0_12], %7 {strides = array<i32>} : memref<2x18x18x128xf32, #tpu.memory_space<vmem>>, vector<2x1x18x128xf32>,
    %cst_13 = arith.constant 0.000000e+00 : f32
    %10 = vector.broadcast %cst_13 : f32 to vector<2x18x1x128xf32>
    %c0_14 = arith.constant 0 : index
    %c0_15 = arith.constant 0 : index
    %c0_16 = arith.constant 0 : index
    %c0_17 = arith.constant 0 : index
    %11 = vector.load %arg9[%c0_14, %c0_15, %c0_16, %c0_17] : memref<2x18x18x128xf32, #tpu.memory_space<vmem>>, vector<2x18x1x128xf32>
    tpu.vector_store %arg9[%c0_14, %c0_15, %c0_16, %c0_17], %10 {strides = array<i32>} : memref<2x18x18x128xf32, #tpu.memory_space<vmem>>, vector<2x18x1x128xf32>,
    %c0_18 = arith.constant 0 : index
    %c0_19 = arith.constant 0 : index
    %c17_20 = arith.constant 17 : index
    %c0_21 = arith.constant 0 : index
    %12 = vector.load %arg9[%c0_18, %c0_19, %c17_20, %c0_21] : memref<2x18x18x128xf32, #tpu.memory_space<vmem>>, vector<2x18x1x128xf32>
    tpu.vector_store %arg9[%c0_18, %c0_19, %c17_20, %c0_21], %10 {strides = array<i32>} : memref<2x18x18x128xf32, #tpu.memory_space<vmem>>, vector<2x18x1x128xf32>,
    %13 = vector.shape_cast %6 : vector<512x128xf32> to vector<2x16x16x128xf32>
    %c0_22 = arith.constant 0 : index
    %c1 = arith.constant 1 : index
    %c1_23 = arith.constant 1 : index
    %c0_24 = arith.constant 0 : index
    %14 = vector.load %arg9[%c0_22, %c1, %c1_23, %c0_24] : memref<2x18x18x128xf32, #tpu.memory_space<vmem>>, vector<2x16x16x128xf32>
    tpu.vector_store %arg9[%c0_22, %c1, %c1_23, %c0_24], %13 {strides = array<i32>} : memref<2x18x18x128xf32, #tpu.memory_space<vmem>>, vector<2x16x16x128xf32>,
    %c0_25 = arith.constant 0 : index
    %c0_26 = arith.constant 0 : index
    %c0_27 = arith.constant 0 : index
    %c0_28 = arith.constant 0 : index
    %15 = vector.load %arg9[%c0_25, %c0_26, %c0_27, %c0_28] : memref<2x18x18x128xf32, #tpu.memory_space<vmem>>, vector<2x16x16x128xf32>
    %16 = vector.shape_cast %15 : vector<2x16x16x128xf32> to vector<512x128xf32>
    %17 = arith.truncf %16 : vector<512x128xf32> to vector<512x128xbf16>
    %c0_29 = arith.constant 0 : index
    %c0_30 = arith.constant 0 : index
    %18 = vector.load %arg10[%c0_29, %c0_30] : memref<512x1152xbf16, #tpu.memory_space<vmem>>, vector<512x128xbf16>
    tpu.vector_store %arg10[%c0_29, %c0_30], %17 {strides = array<i32>} : memref<512x1152xbf16, #tpu.memory_space<vmem>>, vector<512x128xbf16>,
    %c0_31 = arith.constant 0 : index
    %c0_32 = arith.constant 0 : index
    %c1_33 = arith.constant 1 : index
    %c0_34 = arith.constant 0 : index
    %19 = vector.load %arg9[%c0_31, %c0_32, %c1_33, %c0_34] : memref<2x18x18x128xf32, #tpu.memory_space<vmem>>, vector<2x16x16x128xf32>
    %20 = vector.shape_cast %19 : vector<2x16x16x128xf32> to vector<512x128xf32>
    %21 = arith.truncf %20 : vector<512x128xf32> to vector<512x128xbf16>
    %c0_35 = arith.constant 0 : index
    %c128 = arith.constant 128 : index
    %22 = vector.load %arg10[%c0_35, %c128] : memref<512x1152xbf16, #tpu.memory_space<vmem>>, vector<512x128xbf16>
    tpu.vector_store %arg10[%c0_35, %c128], %21 {strides = array<i32>} : memref<512x1152xbf16, #tpu.memory_space<vmem>>, vector<512x128xbf16>,
    %c0_36 = arith.constant 0 : index
    %c0_37 = arith.constant 0 : index
    %c2 = arith.constant 2 : index
    %c0_38 = arith.constant 0 : index
    %23 = vector.load %arg9[%c0_36, %c0_37, %c2, %c0_38] : memref<2x18x18x128xf32, #tpu.memory_space<vmem>>, vector<2x16x16x128xf32>
    %24 = vector.shape_cast %23 : vector<2x16x16x128xf32> to vector<512x128xf32>
    %25 = arith.truncf %24 : vector<512x128xf32> to vector<512x128xbf16>
    %c0_39 = arith.constant 0 : index
    %c256 = arith.constant 256 : index
    %26 = vector.load %arg10[%c0_39, %c256] : memref<512x1152xbf16, #tpu.memory_space<vmem>>, vector<512x128xbf16>
    tpu.vector_store %arg10[%c0_39, %c256], %25 {strides = array<i32>} : memref<512x1152xbf16, #tpu.memory_space<vmem>>, vector<512x128xbf16>,
    %c0_40 = arith.constant 0 : index
    %c1_41 = arith.constant 1 : index
    %c0_42 = arith.constant 0 : index
    %c0_43 = arith.constant 0 : index
    %27 = vector.load %arg9[%c0_40, %c1_41, %c0_42, %c0_43] : memref<2x18x18x128xf32, #tpu.memory_space<vmem>>, vector<2x16x16x128xf32>
    %28 = vector.shape_cast %27 : vector<2x16x16x128xf32> to vector<512x128xf32>
    %29 = arith.truncf %28 : vector<512x128xf32> to vector<512x128xbf16>
    %c0_44 = arith.constant 0 : index
    %c384 = arith.constant 384 : index
    %30 = vector.load %arg10[%c0_44, %c384] : memref<512x1152xbf16, #tpu.memory_space<vmem>>, vector<512x128xbf16>
    tpu.vector_store %arg10[%c0_44, %c384], %29 {strides = array<i32>} : memref<512x1152xbf16, #tpu.memory_space<vmem>>, vector<512x128xbf16>,
    %c0_45 = arith.constant 0 : index
    %c1_46 = arith.constant 1 : index
    %c1_47 = arith.constant 1 : index
    %c0_48 = arith.constant 0 : index
    %31 = vector.load %arg9[%c0_45, %c1_46, %c1_47, %c0_48] : memref<2x18x18x128xf32, #tpu.memory_space<vmem>>, vector<2x16x16x128xf32>
    %32 = vector.shape_cast %31 : vector<2x16x16x128xf32> to vector<512x128xf32>
    %33 = arith.truncf %32 : vector<512x128xf32> to vector<512x128xbf16>
    %c0_49 = arith.constant 0 : index
    %c512 = arith.constant 512 : index
    %34 = vector.load %arg10[%c0_49, %c512] : memref<512x1152xbf16, #tpu.memory_space<vmem>>, vector<512x128xbf16>
    tpu.vector_store %arg10[%c0_49, %c512], %33 {strides = array<i32>} : memref<512x1152xbf16, #tpu.memory_space<vmem>>, vector<512x128xbf16>,
    %c0_50 = arith.constant 0 : index
    %c1_51 = arith.constant 1 : index
    %c2_52 = arith.constant 2 : index
    %c0_53 = arith.constant 0 : index
    %35 = vector.load %arg9[%c0_50, %c1_51, %c2_52, %c0_53] : memref<2x18x18x128xf32, #tpu.memory_space<vmem>>, vector<2x16x16x128xf32>
    %36 = vector.shape_cast %35 : vector<2x16x16x128xf32> to vector<512x128xf32>
    %37 = arith.truncf %36 : vector<512x128xf32> to vector<512x128xbf16>
    %c0_54 = arith.constant 0 : index
    %c640 = arith.constant 640 : index
    %38 = vector.load %arg10[%c0_54, %c640] : memref<512x1152xbf16, #tpu.memory_space<vmem>>, vector<512x128xbf16>
    tpu.vector_store %arg10[%c0_54, %c640], %37 {strides = array<i32>} : memref<512x1152xbf16, #tpu.memory_space<vmem>>, vector<512x128xbf16>,
    %c0_55 = arith.constant 0 : index
    %c2_56 = arith.constant 2 : index
    %c0_57 = arith.constant 0 : index
    %c0_58 = arith.constant 0 : index
    %39 = vector.load %arg9[%c0_55, %c2_56, %c0_57, %c0_58] : memref<2x18x18x128xf32, #tpu.memory_space<vmem>>, vector<2x16x16x128xf32>
    %40 = vector.shape_cast %39 : vector<2x16x16x128xf32> to vector<512x128xf32>
    %41 = arith.truncf %40 : vector<512x128xf32> to vector<512x128xbf16>
    %c0_59 = arith.constant 0 : index
    %c768 = arith.constant 768 : index
    %42 = vector.load %arg10[%c0_59, %c768] : memref<512x1152xbf16, #tpu.memory_space<vmem>>, vector<512x128xbf16>
    tpu.vector_store %arg10[%c0_59, %c768], %41 {strides = array<i32>} : memref<512x1152xbf16, #tpu.memory_space<vmem>>, vector<512x128xbf16>,
    %c0_60 = arith.constant 0 : index
    %c2_61 = arith.constant 2 : index
    %c1_62 = arith.constant 1 : index
    %c0_63 = arith.constant 0 : index
    %43 = vector.load %arg9[%c0_60, %c2_61, %c1_62, %c0_63] : memref<2x18x18x128xf32, #tpu.memory_space<vmem>>, vector<2x16x16x128xf32>
    %44 = vector.shape_cast %43 : vector<2x16x16x128xf32> to vector<512x128xf32>
    %45 = arith.truncf %44 : vector<512x128xf32> to vector<512x128xbf16>
    %c0_64 = arith.constant 0 : index
    %c896 = arith.constant 896 : index
    %46 = vector.load %arg10[%c0_64, %c896] : memref<512x1152xbf16, #tpu.memory_space<vmem>>, vector<512x128xbf16>
    tpu.vector_store %arg10[%c0_64, %c896], %45 {strides = array<i32>} : memref<512x1152xbf16, #tpu.memory_space<vmem>>, vector<512x128xbf16>,
    %c0_65 = arith.constant 0 : index
    %c2_66 = arith.constant 2 : index
    %c2_67 = arith.constant 2 : index
    %c0_68 = arith.constant 0 : index
    %47 = vector.load %arg9[%c0_65, %c2_66, %c2_67, %c0_68] : memref<2x18x18x128xf32, #tpu.memory_space<vmem>>, vector<2x16x16x128xf32>
    %48 = vector.shape_cast %47 : vector<2x16x16x128xf32> to vector<512x128xf32>
    %49 = arith.truncf %48 : vector<512x128xf32> to vector<512x128xbf16>
    %c0_69 = arith.constant 0 : index
    %c1024 = arith.constant 1024 : index
    %50 = vector.load %arg10[%c0_69, %c1024] : memref<512x1152xbf16, #tpu.memory_space<vmem>>, vector<512x128xbf16>
    tpu.vector_store %arg10[%c0_69, %c1024], %49 {strides = array<i32>} : memref<512x1152xbf16, #tpu.memory_space<vmem>>, vector<512x128xbf16>,
    %c0_70 = arith.constant 0 : index
    %c0_71 = arith.constant 0 : index
    %51 = vector.load %arg10[%c0_70, %c0_71] : memref<512x1152xbf16, #tpu.memory_space<vmem>>, vector<512x1152xbf16>
    %c0_72 = arith.constant 0 : index
    %c0_73 = arith.constant 0 : index
    %52 = vector.load %arg4[%c0_72, %c0_73] : memref<1152x128xbf16, #tpu.memory_space<vmem>>, vector<1152x128xbf16>
    %cst_74 = arith.constant dense<0.000000e+00> : vector<512x128xf32>
    %53 = tpu.matmul %51, %52, %cst_74 {dimension_numbers = #tpu.dot_dimension_numbers<[1], [0], [0], [1], [0, 0, 1, 1], [], []>} : vector<512x1152xbf16>, vector<1152x128xbf16>, vector<512x128xf32> -> vector<512x128xf32>
    %c0_75 = arith.constant 0 : index
    %c0_76 = arith.constant 0 : index
    %54 = vector.load %arg5[%c0_75, %c0_76] : memref<1x128xf32, #tpu.memory_space<vmem>>, vector<1x128xf32>
    %55 = vector.broadcast %54 : vector<1x128xf32> to vector<512x128xf32>
    %56 = arith.addf %53, %55 : vector<512x128xf32>
    %57 = arith.mulf %56, %56 : vector<512x128xf32>
    %58 = arith.mulf %56, %57 : vector<512x128xf32>
    %cst_77 = arith.constant 4.471500e-02 : f32
    %59 = vector.broadcast %cst_77 : f32 to vector<512x128xf32>
    %60 = arith.mulf %59, %58 : vector<512x128xf32>
    %61 = arith.addf %56, %60 : vector<512x128xf32>
    %cst_78 = arith.constant 0.797884583 : f32
    %62 = vector.broadcast %cst_78 : f32 to vector<512x128xf32>
    %63 = arith.mulf %62, %61 : vector<512x128xf32>
    %64 = math.tanh %63 : vector<512x128xf32>
    %cst_79 = arith.constant 1.000000e+00 : f32
    %65 = vector.broadcast %cst_79 : f32 to vector<512x128xf32>
    %66 = arith.addf %65, %64 : vector<512x128xf32>
    %cst_80 = arith.constant 5.000000e-01 : f32
    %67 = vector.broadcast %cst_80 : f32 to vector<512x128xf32>
    %68 = arith.mulf %67, %66 : vector<512x128xf32>
    %69 = arith.mulf %56, %68 : vector<512x128xf32>
    %70 = arith.truncf %69 : vector<512x128xf32> to vector<512x128xbf16>
    %c0_81 = arith.constant 0 : index
    %c0_82 = arith.constant 0 : index
    %71 = vector.load %arg6[%c0_81, %c0_82] : memref<128x8xbf16, #tpu.memory_space<vmem>>, vector<128x8xbf16>
    %cst_83 = arith.constant dense<0.000000e+00> : vector<512x8xf32>
    %72 = tpu.matmul %70, %71, %cst_83 {dimension_numbers = #tpu.dot_dimension_numbers<[1], [0], [0], [1], [0, 0, 1, 1], [], []>} : vector<512x128xbf16>, vector<128x8xbf16>, vector<512x8xf32> -> vector<512x8xf32>
    %c0_84 = arith.constant 0 : index
    %c0_85 = arith.constant 0 : index
    %73 = vector.load %arg7[%c0_84, %c0_85] : memref<1x8xf32, #tpu.memory_space<vmem>>, vector<1x8xf32>
    %74 = vector.broadcast %73 : vector<1x8xf32> to vector<512x8xf32>
    %75 = arith.addf %72, %74 : vector<512x8xf32>
    %c0_86 = arith.constant 0 : index
    %c0_87 = arith.constant 0 : index
    %76 = vector.load %arg8[%c0_86, %c0_87] : memref<512x8xf32, #tpu.memory_space<vmem>>, vector<512x8xf32>
    tpu.vector_store %arg8[%c0_86, %c0_87], %75 {strides = array<i32>} : memref<512x8xf32, #tpu.memory_space<vmem>>, vector<512x8xf32>,
    return
  }
  func.func @transform_0(%arg0: i32) -> (i32, i32) {
    %c0_i32 = arith.constant 0 : i32
    %c0_i32_0 = arith.constant 0 : i32
    return %arg0, %c0_i32 : i32, i32
  }
  func.func @transform_1(%arg0: i32) -> (i32, i32) {
    %c0_i32 = arith.constant 0 : i32
    %c0_i32_0 = arith.constant 0 : i32
    %c0_i32_1 = arith.constant 0 : i32
    return %c0_i32, %c0_i32_0 : i32, i32
  }
  func.func @transform_2(%arg0: i32) -> (i32, i32) {
    %c0_i32 = arith.constant 0 : i32
    %c0_i32_0 = arith.constant 0 : i32
    %c0_i32_1 = arith.constant 0 : i32
    return %c0_i32, %c0_i32_0 : i32, i32
  }
  func.func @transform_3(%arg0: i32) -> (i32, i32) {
    %c0_i32 = arith.constant 0 : i32
    %c0_i32_0 = arith.constant 0 : i32
    %c0_i32_1 = arith.constant 0 : i32
    return %c0_i32, %c0_i32_0 : i32, i32
  }
  func.func @transform_4(%arg0: i32) -> (i32, i32) {
    %c0_i32 = arith.constant 0 : i32
    %c0_i32_0 = arith.constant 0 : i32
    %c0_i32_1 = arith.constant 0 : i32
    return %c0_i32, %c0_i32_0 : i32, i32
  }
  func.func @transform_5(%arg0: i32) -> (i32, i32) {
    %c0_i32 = arith.constant 0 : i32
    %c0_i32_0 = arith.constant 0 : i32
    %c0_i32_1 = arith.constant 0 : i32
    return %c0_i32, %c0_i32_0 : i32, i32
  }
  func.func @transform_6(%arg0: i32) -> (i32, i32) {
    %c0_i32 = arith.constant 0 : i32
    %c0_i32_0 = arith.constant 0 : i32
    %c0_i32_1 = arith.constant 0 : i32
    return %c0_i32, %c0_i32_0 : i32, i32
  }
  func.func @transform_7(%arg0: i32) -> (i32, i32) {
    %c0_i32 = arith.constant 0 : i32
    %c0_i32_0 = arith.constant 0 : i32
    return %arg0, %c0_i32 : i32, i32
  }
}

</mosaic_0001>

<bundles_post_ra>
// kernel: tpu_custom_call.1
= control target key start
LH: loop header
LB: loop body
LE: loop exit
PB: predicated region body
PF: predicated region fallthrough
CT: control target
= control target key end

     0   :  { %s9502_s24 = smov 0   ;;  %s12226_s0 = inlined_call_operand.vmem [shape: f32[1024,8], index: 0, kind: input, shape index: {}]   ;;  %s12227_s1 = inlined_call_operand.vmem [shape: bf16[8,128], index: 1, kind: input, shape index: {}]   ;;  %s12228_s2 = inlined_call_operand.vmem [shape: f32[1,128], index: 2, kind: input, shape index: {}]   ;;  %s12229_s3 = inlined_call_operand.vmem [shape: bf16[1152,128], index: 3, kind: input, shape index: {}]   ;;  %s12230_s4 = inlined_call_operand.vmem [shape: f32[1,128], index: 4, kind: input, shape index: {}]   ;;  %s12231_s5 = inlined_call_operand.vmem [shape: bf16[128,8], index: 5, kind: input, shape index: {}]   ;;  %s12232_s6 = inlined_call_operand.vmem [shape: f32[1,8], index: 6, kind: input, shape index: {}]   ;;  %s12233_s7 = inlined_call_operand.vmem [shape: f32[1024,8], index: 7, kind: output, shape index: {}]  }
   0x1 LB: > { %s7391_s25 = sadd.s32 4294967295, %s9458_s24   ;;  %p7395_p0 = scmp.ge.s32.totalorder %s9458_s24, 1  ;;  %s9458_s24 = sphi %s9502_s24, %s17_s24  }
   0x2   : > { %p238_p1 = scmp.lt.s32.totalorder %s9458_s24, 3 }
   0x4   : > { %p239_p2 = pnand %p7395_p0, %p238_p1 }
   0x6   : > { %242 = sbr.rel (%p239_p2) target bundleno = 2285 (0x8ed), region = 48 }
   0xb   : > { %v379_v0 = vld [vmem:[%s12227_s1] sm:$0xf]  ;;  %vm481_vm0 = vcmask 1043456   ;;  %s7396_s28 = sshll.u32 %s7391_s25, 6  ;;  %vm384_vm1 = vcmask 64512   ;;  %v9201_v17 = vld [vmem:[%s12229_s3 + $0x38] sm:$0xff] }
   0xc   : > { %v483_v1 = vsel %vm481_vm0, %v379_v0, 0  ;;  %p271_p3 = scmp.lt.s32.totalorder %s7396_s28, 127  ;;  %v9209_v18 = vld [vmem:[%s12229_s3 + $0x78] sm:$0xff]  ;;  %4905 = vmatpush.bf16.msra.mxu1 %v9201_v17  ;;  %v9208_v19 = vld [vmem:[%s12229_s3 + $0x70] sm:$0xff]  ;;  %v9207_v22 = vld [vmem:[%s12229_s3 + $0x68] sm:$0xff]  ;;  %v9460_v26 = vmov 0.0  }
   0xd   : > { %492 = vmatpush.bf16.msra.mxu0 %v483_v1  ;;  %9274 = vmatpush.bf16.msra.mxu3 %v483_v1  ;;  %v9200_v24 = vld [vmem:[%s12229_s3 + $0x30] sm:$0xff]  ;;  %v9206_v25 = vld [vmem:[%s12229_s3 + $0x60] sm:$0xff]  ;;  %668 = vst [vmem:[#allocation2 + $0x18] sm:$0x1] %v9460_v26  ;;  %v9199_v27 = vld [vmem:[%s12229_s3 + $0x28] sm:$0xff] }
   0xe   : > { %s12837_s28 = smov (!%p271_p3, %s7396_s28), 127  ;;  %5074 = vmatpush.bf16.msra.mxu2 %v9209_v18  ;;  %654 = vst [vmem:[#allocation2] sm:$0xff] %v9460_v26  ;;  %v9198_v28 = vld [vmem:[%s12229_s3 + $0x20] sm:$0xff]  ;;  %v9197_v32 = vld [vmem:[%s12229_s3 + $0x18] sm:$0xff]  ;;  %v9204_v41 = vld [vmem:[%s12229_s3 + $0x50] sm:$0xff] }
   0xf   : > { %s7397_s29 = sshll.u32 %s12837_s28, 3  ;;  %655 = vst [vmem:[#allocation2 + $0x8] sm:$0xff] %v9460_v26  ;;  %v9619_v36 = vld [vmem:[%s12228_s2] ss:$0 sm:$0xff]  ;;  %v9205_v37 = vld [vmem:[%s12229_s3 + $0x58] sm:$0xff]  ;;  %v9203_v42 = vld [vmem:[%s12229_s3 + $0x48] sm:$0xff] }
  0x10   : > { %s9521_s9 = scalar_lea.vmem %s12226_s0, %s7397_s29  ;;  %4906 = vmatpush.bf16.msra.mxu1 %v9200_v24  ;;  %656 = vst [vmem:[#allocation2 + $0x10] sm:$0x3] %v9460_v26  ;;  %v9196_v48 = vld [vmem:[%s12229_s3 + $0x10] sm:$0xff]  ;;  %v9202_v49 = vld [vmem:[%s12229_s3 + $0x40] sm:$0xff]  ;;  %v9195_v50 = vld [vmem:[%s12229_s3 + $0x8] sm:$0xff]  ;;  %s11441_s14 = scalar_lea.vmem %s12233_s7, %s7397_s29 }
  0x11   : > { %v283_v2 = vld [vmem:[%s9521_s9] sm:$0xff]  ;;  %v284_v3 = vld [vmem:[%s9521_s9 + $0x8] sm:$0xff]  ;;  %v285_v5 = vld [vmem:[%s9521_s9 + $0x10] sm:$0xff]  ;;  %9275 = vmatpush.bf16.msrb.mxu3 %v9201_v17  ;;  %657 = vst [vmem:[#allocation2 + $0x1b0] sm:$0xff] %v9460_v26 }
  0x12   : > { %v347_v4 = vpack.c.bf16 %v284_v3, %v283_v2  ;;  %v286_v6 = vld [vmem:[%s9521_s9 + $0x18] sm:$0xff]  ;;  %v287_v8 = vld [vmem:[%s9521_s9 + $0x20] sm:$0xff]  ;;  %v288_v9 = vld [vmem:[%s9521_s9 + $0x28] sm:$0xff]  ;;  %5075 = vmatpush.bf16.msra.mxu2 %v9208_v19  ;;  %658 = vst [vmem:[#allocation2 + $0x1b8] sm:$0xff] %v9460_v26  ;;  %v9461_v3 = vmov 0.0|0.0  }
  0x13   : > { %v348_v7 = vpack.c.bf16 %v286_v6, %v285_v5  ;;  %v349_v10 = vpack.c.bf16 %v288_v9, %v287_v8  ;;  %v289_v11 = vld [vmem:[%s9521_s9 + $0x30] sm:$0xff]  ;;  %v290_v12 = vld [vmem:[%s9521_s9 + $0x38] sm:$0xff]  ;;  %v291_v14 = vld [vmem:[%s9521_s9 + $0x40] sm:$0xff]  ;;  %659 = vst [vmem:[#allocation2 + $0x1c0] sm:$0x3] %v9460_v26 }
  0x14   : > { %7400 = vmatmul.msk.bf16.vlgmr.msra.gmra.mxu0 %vm384_vm1, %v347_v4  ;;  %v350_v13 = vpack.c.bf16 %v290_v12, %v289_v11  ;;  %v292_v15 = vld [vmem:[%s9521_s9 + $0x48] sm:$0xff]  ;;  %v293_v20 = vld [vmem:[%s9521_s9 + $0x50] sm:$0xff]  ;;  %v294_v21 = vld [vmem:[%s9521_s9 + $0x58] sm:$0xff]  ;;  %4907 = vmatpush.bf16.msra.mxu1 %v9199_v27  ;;  %661 = vst [vmem:[#allocation2 + $0x198] sm:$0xff] %v9460_v26 }
  0x15   : > { %v351_v16 = vpack.c.bf16 %v292_v15, %v291_v14  ;;  %v352_v23 = vpack.c.bf16 %v294_v21, %v293_v20  ;;  %9276 = vmatpush.bf16.msrb.mxu3 %v9200_v24  ;;  %662 = vst [vmem:[#allocation2 + $0x1a0] sm:$0xff] %v9460_v26  ;;  %v295_v29 = vld [vmem:[%s9521_s9 + $0x60] sm:$0xff]  ;;  %v296_v30 = vld [vmem:[%s9521_s9 + $0x68] sm:$0xff]  ;;  %v297_v33 = vld [vmem:[%s9521_s9 + $0x70] sm:$0xff] }
  0x16   : > { %5076 = vmatpush.bf16.msra.mxu2 %v9207_v22  ;;  %663 = vst [vmem:[#allocation2 + $0x1a8] sm:$0x3] %v9460_v26  ;;  %v353_v31 = vpack.c.bf16 %v296_v30, %v295_v29  ;;  %v298_v34 = vld [vmem:[%s9521_s9 + $0x78] sm:$0xff]  ;;  %v299_v43 = vld [vmem:[%s9521_s9 + $0x80] sm:$0xff]  ;;  %v300_v44 = vld [vmem:[%s9521_s9 + $0x88] sm:$0xff] }
  0x17   : > { %664 = vst [vmem:[#allocation2 + $0x348] sm:$0xff] %v9460_v26  ;;  %v354_v35 = vpack.c.bf16 %v298_v34, %v297_v33  ;;  %v355_v46 = vpack.c.bf16 %v300_v44, %v299_v43  ;;  %v9194_v51 = vld [vmem:[%s12229_s3] sm:$0xff]  ;;  %v301_v54 = vld [vmem:[%s9521_s9 + $0x90] sm:$0xff]  ;;  %v302_v55 = vld [vmem:[%s9521_s9 + $0x98] sm:$0xff] }
  0x18   : > { %4908 = vmatpush.bf16.msra.mxu1 %v9198_v28  ;;  %665 = vst [vmem:[#allocation2 + $0x350] sm:$0xff] %v9460_v26  ;;  %v356_v56 = vpack.c.bf16 %v302_v55, %v301_v54  ;;  %v996_v60 = vld [vmem:[#allocation2 + $0x1] sm:$0xff]  ;;  %v997_v62 = vld [vmem:[#allocation2 + $0x9] sm:$0xff] }
  0x19   : > { %9277 = vmatpush.bf16.msrb.mxu3 %v9199_v27  ;;  %666 = vst [vmem:[#allocation2 + $0x358] sm:$0x3] %v9460_v26  ;;  %v1060_v1 = vpack.c.bf16 %v996_v60, %v996_v60  ;;  %v1061_v2 = vpack.c.bf16 %v997_v62, %v997_v62  ;;  %v303_v12 = vld [vmem:[%s9521_s9 + $0xa0] sm:$0xff]  ;;  %v305_v34 = vld [vmem:[%s9521_s9 + $0xb0] sm:$0xff] }
  0x1a   : > { %5077 = vmatpush.bf16.msra.mxu2 %v9206_v25  ;;  %669 = vst [vmem:[#allocation2 + $0x30] sm:$0x1] %v9460_v26 }
  0x1b   : > { %670 = vst [vmem:[#allocation2 + $0x48] sm:$0x1] %v9460_v26 }
  0x1c   : > { %4909 = vmatpush.bf16.msra.mxu1 %v9197_v32  ;;  %671 = vst [vmem:[#allocation2 + $0x60] sm:$0x1] %v9460_v26 }
  0x1d   : > { %9278 = vmatpush.bf16.msrb.mxu3 %v9198_v28  ;;  %672 = vst [vmem:[#allocation2 + $0x78] sm:$0x1] %v9460_v26 }
  0x1e   : > { %673 = vst [vmem:[#allocation2 + $0x90] sm:$0x1] %v9460_v26  ;;  %5078 = vmatpush.bf16.msra.mxu2 %v9205_v37 }
  0x1f   : > { %674 = vst [vmem:[#allocation2 + $0xa8] sm:$0x1] %v9460_v26 }
  0x20   : > { %675 = vst [vmem:[#allocation2 + $0xc0] sm:$0x1] %v9460_v26  ;;  %4910 = vmatpush.bf16.msra.mxu1 %v9196_v48 }
  0x21   : > { %9279 = vmatpush.bf16.msrb.mxu3 %v9197_v32  ;;  %676 = vst [vmem:[#allocation2 + $0xd8] sm:$0x1] %v9460_v26 }
  0x22   : > { %677 = vst [vmem:[#allocation2 + $0xf0] sm:$0x1] %v9460_v26  ;;  %5079 = vmatpush.bf16.msra.mxu2 %v9204_v41 }
  0x23   : > { %678 = vst [vmem:[#allocation2 + $0x108] sm:$0x1] %v9460_v26 }
  0x24   : > { %7401 = vmatmul.msk.bf16.gmra.mxu0 %vm384_vm1, %v348_v7  ;;  %679 = vst [vmem:[#allocation2 + $0x120] sm:$0x1] %v9460_v26  ;;  %4911 = vmatpush.bf16.msra.mxu1 %v9195_v50 }
  0x25   : > { %680 = vst [vmem:[#allocation2 + $0x138] sm:$0x1] %v9460_v26  ;;  %9280 = vmatpush.bf16.msrb.mxu3 %v9196_v48 }
  0x26   : > { %681 = vst [vmem:[#allocation2 + $0x150] sm:$0x1] %v9460_v26  ;;  %5080 = vmatpush.bf16.msra.mxu2 %v9203_v42 }
  0x27   : > { %682 = vst [vmem:[#allocation2 + $0x168] sm:$0x1] %v9460_v26 }
  0x28   : > { %683 = vst [vmem:[#allocation2 + $0x180] sm:$0x1] %v9460_v26  ;;  %4912 = vmatpush.bf16.msra.mxu1 %v9194_v51 }
  0x29   : > { %686 = vst [vmem:[#allocation2 + $0x1c8] sm:$0x1] %v9460_v26  ;;  %9281 = vmatpush.bf16.msrb.mxu3 %v9195_v50 }
  0x2a   : > { %687 = vst [vmem:[#allocation2 + $0x1e0] sm:$0x1] %v9460_v26  ;;  %5081 = vmatpush.bf16.msra.mxu2 %v9202_v49 }
  0x2b   : > { %688 = vst [vmem:[#allocation2 + $0x1f8] sm:$0x1] %v9460_v26 }
  0x2c   : > { %689 = vst [vmem:[#allocation2 + $0x210] sm:$0x1] %v9460_v26 }
  0x2d   : > { %690 = vst [vmem:[#allocation2 + $0x228] sm:$0x1] %v9460_v26  ;;  %9282 = vmatpush.bf16.msrb.mxu3 %v9194_v51 }
  0x2e   : > { %691 = vst [vmem:[#allocation2 + $0x240] sm:$0x1] %v9460_v26 }
  0x2f   : > { %692 = vst [vmem:[#allocation2 + $0x258] sm:$0x1] %v9460_v26 }
  0x30   : > { %693 = vst [vmem:[#allocation2 + $0x270] sm:$0x1] %v9460_v26 }
  0x31   : > { %694 = vst [vmem:[#allocation2 + $0x288] sm:$0x1] %v9460_v26 }
  0x32   : > { %695 = vst [vmem:[#allocation2 + $0x2a0] sm:$0x1] %v9460_v26 }
  0x33   : > { %696 = vst [vmem:[#allocation2 + $0x2b8] sm:$0x1] %v9460_v26 }
  0x34   : > { %7402 = vmatmul.msk.bf16.gmra.mxu0 %vm384_vm1, %v349_v10  ;;  %697 = vst [vmem:[#allocation2 + $0x2d0] sm:$0x1] %v9460_v26 }
  0x35   : > { %698 = vst [vmem:[#allocation2 + $0x2e8] sm:$0x1] %v9460_v26 }
  0x36   : > { %699 = vst [vmem:[#allocation2 + $0x300] sm:$0x1] %v9460_v26 }
  0x37   : > { %700 = vst [vmem:[#allocation2 + $0x318] sm:$0x1] %v9460_v26 }
  0x38   : > { %701 = vst [vmem:[#allocation2 + $0x330] sm:$0x1] %v9460_v26 }
  0x39   : > { %704 = vst [vmem:[#allocation2 + $0x29] sm:$0x1] %v9460_v26 }
  0x3a   : > { %705 = vst [vmem:[#allocation2 + $0x41] sm:$0x1] %v9460_v26 }
  0x3b   : > { %706 = vst [vmem:[#allocation2 + $0x59] sm:$0x1] %v9460_v26 }
  0x3c   : > { %707 = vst [vmem:[#allocation2 + $0x71] sm:$0x1] %v9460_v26 }
  0x3d   : > { %708 = vst [vmem:[#allocation2 + $0x89] sm:$0x1] %v9460_v26 }
  0x3e   : > { %709 = vst [vmem:[#allocation2 + $0xa1] sm:$0x1] %v9460_v26 }
  0x3f   : > { %710 = vst [vmem:[#allocation2 + $0xb9] sm:$0x1] %v9460_v26 }
  0x40   : > { %711 = vst [vmem:[#allocation2 + $0xd1] sm:$0x1] %v9460_v26 }
  0x41   : > { %712 = vst [vmem:[#allocation2 + $0xe9] sm:$0x1] %v9460_v26 }
  0x42   : > { %713 = vst [vmem:[#allocation2 + $0x101] sm:$0x1] %v9460_v26 }
  0x43   : > { %714 = vst [vmem:[#allocation2 + $0x119] sm:$0x1] %v9460_v26 }
  0x44   : > { %7403 = vmatmul.msk.bf16.gmra.mxu0 %vm384_vm1, %v350_v13  ;;  %715 = vst [vmem:[#allocation2 + $0x131] sm:$0x1] %v9460_v26  ;;  %v304_v13 = vld [vmem:[%s9521_s9 + $0xa8] sm:$0xff] }
  0x45   : > { %716 = vst [vmem:[#allocation2 + $0x149] sm:$0x1] %v9460_v26  ;;  %v357_v15 = vpack.c.bf16 %v304_v13, %v303_v12 }
  0x46   : > { %717 = vst [vmem:[#allocation2 + $0x161] sm:$0x1] %v9460_v26 }
  0x47   : > { %718 = vst [vmem:[#allocation2 + $0x179] sm:$0x1] %v9460_v26 }
  0x48   : > { %719 = vst [vmem:[#allocation2 + $0x191] sm:$0x1] %v9460_v26 }
  0x49   : > { %722 = vst [vmem:[#allocation2 + $0x1d9] sm:$0x1] %v9460_v26 }
  0x4a   : > { %723 = vst [vmem:[#allocation2 + $0x1f1] sm:$0x1] %v9460_v26 }
  0x4b   : > { %724 = vst [vmem:[#allocation2 + $0x209] sm:$0x1] %v9460_v26 }
  0x4c   : > { %725 = vst [vmem:[#allocation2 + $0x221] sm:$0x1] %v9460_v26 }
  0x4d   : > { %726 = vst [vmem:[#allocation2 + $0x239] sm:$0x1] %v9460_v26 }
  0x4e   : > { %727 = vst [vmem:[#allocation2 + $0x251] sm:$0x1] %v9460_v26 }
  0x4f   : > { %728 = vst [vmem:[#allocation2 + $0x269] sm:$0x1] %v9460_v26 }
  0x50   : > { %729 = vst [vmem:[#allocation2 + $0x281] sm:$0x1] %v9460_v26 }
  0x51   : > { %730 = vst [vmem:[#allocation2 + $0x299] sm:$0x1] %v9460_v26 }
  0x52   : > { %731 = vst [vmem:[#allocation2 + $0x2b1] sm:$0x1] %v9460_v26 }
  0x53   : > { %732 = vst [vmem:[#allocation2 + $0x2c9] sm:$0x1] %v9460_v26 }
  0x54   : > { %7404 = vmatmul.msk.bf16.gmra.mxu0 %vm384_vm1, %v351_v16  ;;  %733 = vst [vmem:[#allocation2 + $0x2e1] sm:$0x1] %v9460_v26 }
  0x55   : > { %734 = vst [vmem:[#allocation2 + $0x2f9] sm:$0x1] %v9460_v26 }
  0x56   : > { %735 = vst [vmem:[#allocation2 + $0x311] sm:$0x1] %v9460_v26 }
  0x57   : > { %736 = vst [vmem:[#allocation2 + $0x329] sm:$0x1] %v9460_v26 }
  0x58   : > { %737 = vst [vmem:[#allocation2 + $0x341] sm:$0x1] %v9460_v26 }
  0x59   : > { %667 = vst [vmem:[#allocation2] sm:$0x1] %v9460_v26 }
  0x5a   : > { %684 = vst [vmem:[#allocation2 + $0x198] sm:$0x1] %v9460_v26 }
  0x5b   : > { %685 = vst [vmem:[#allocation2 + $0x1b0] sm:$0x1] %v9460_v26 }
  0x5c   : > { %702 = vst [vmem:[#allocation2 + $0x348] sm:$0x1] %v9460_v26 }
  0x5d   : > { %703 = vst [vmem:[#allocation2 + $0x11] sm:$0x1] %v9460_v26 }
  0x5e   : > { %720 = vst [vmem:[#allocation2 + $0x1a9] sm:$0x1] %v9460_v26 }
  0x5f   : > { %721 = vst [vmem:[#allocation2 + $0x1c1] sm:$0x1] %v9460_v26 }
  0x60   : > { %738 = vst [vmem:[#allocation2 + $0x359] sm:$0x1] %v9460_v26  ;;  %v804_v61 = vld [vmem:[#allocation2] sm:$0xff] }
  0x61   : > { %v868_v63 = vpack.c.bf16 %v804_v61, %v804_v61  ;;  %933 = vst [vmem:[#allocation3 + $0x24] sm:$0xf] %v9461_v3 }
  0x62   : > { %1124 = vst [vmem:[#allocation3 + $0x4] sm:$0xf] %v1060_v1 }
  0x63   : > { %932 = vst [vmem:[#allocation3] sm:$0xf] %v868_v63 }
  0x64   : > { %7405 = vmatmul.msk.bf16.gmra.mxu0 %vm384_vm1, %v352_v23  ;;  %1125 = vst [vmem:[#allocation3 + $0x28] sm:$0xf] %v1061_v2 }
  0x68   : > { %v8910_v16 = vld [vmem:[#allocation3 + $0x20] sm:$0xf0] }
  0x69   : > { %v8906_v18 = vld [vmem:[#allocation3 + $0x4] sm:$0xf] }
  0x6a   : > { %v7434_v14 = vld [vmem:[#allocation3] sm:$0xf] }
  0x6b   : > { %v7435_v17 = vor.u32 %v8910_v16, %v7434_v14  ;;  %v7436_v19 = vld [vmem:[#allocation3 + $0x24] sm:$0xf0] }
  0x6c   : > { %v7439_v21 = vor.u32 %v8906_v18, %v7436_v19  ;;  %v310_v18 = vld [vmem:[%s9521_s9 + $0xd8] sm:$0xff] }
  0x6d   : > { %4913 = vmatmul.bf16.vlgmr.msra.gmra.mxu1 %v7435_v17  ;;  %v309_v17 = vld [vmem:[%s9521_s9 + $0xd0] sm:$0xff] }
  0x6e   : > { %5082 = vmatmul.bf16.vlgmr.msra.gmra.mxu2 %v7439_v21 }
  0x74   : > { %7406 = vmatmul.msk.bf16.gmra.mxu0 %vm384_vm1, %v353_v31 }
  0x84   : > { %7407 = vmatmul.msk.bf16.gmra.mxu0 %vm384_vm1, %v354_v35  ;;  %v306_v35 = vld [vmem:[%s9521_s9 + $0xb8] sm:$0xff] }
  0x91   : > { %v494_v38 = vpop.f32.mrf.mxu0 }
  0x92   : > { %v495_v39 = vadd.f32 %v9619_v36, %v494_v38 }
  0x94   : > { %740 = vst [vmem:[#allocation2 + $0x19] sm:$0xff] %v495_v39  ;;  %v1062_v40 = vpack.c.bf16 %v495_v39, %v495_v39  ;;  %7408 = vmatmul.msk.bf16.gmra.mxu0 %vm384_vm1, %v355_v46  ;;  %v358_v39 = vpack.c.bf16 %v306_v35, %v305_v34 }
  0x96   : > { %1126 = vst [vmem:[#allocation3 + $0x4c] sm:$0xf] %v1062_v40 }
  0x97   : > { %1700 = vst [vmem:[#allocation3 + $0x10] sm:$0xf] %v1062_v40 }
  0x99   : > { %v496_v52 = vpop.f32.mrf.mxu0 }
  0x9a   : > { %v497_v57 = vadd.f32 %v9619_v36, %v496_v52 }
  0x9b   : > { %v806_v45 = vld [vmem:[#allocation2 + $0x18] sm:$0xff] }
  0x9c   : > { %v870_v47 = vpack.c.bf16 %v806_v45, %v806_v45  ;;  %v1063_v59 = vpack.c.bf16 %v497_v57, %v497_v57  ;;  %741 = vst [vmem:[#allocation2 + $0x21] sm:$0xff] %v497_v57 }
  0x9d   : > { %v8915_v38 = vld [vmem:[#allocation3 + $0x4c] sm:$0xf] }
  0x9e   : > { %934 = vst [vmem:[#allocation3 + $0x48] sm:$0xf] %v870_v47 }
  0x9f   : > { %1508 = vst [vmem:[#allocation3 + $0xc] sm:$0xf] %v870_v47 }
  0xa0   : > { %1701 = vst [vmem:[#allocation3 + $0x34] sm:$0xf] %v1063_v59 }
  0xa1   : > { %v499_v53 = vpop.f32.mrf.mxu0  ;;  %1127 = vst [vmem:[#allocation3 + $0x70] sm:$0xf] %v1063_v59  ;;  %v308_v59 = vld [vmem:[%s9521_s9 + $0xc8] sm:$0xff] }
  0xa2   : > { %v500_v0 = vadd.f32 %v9619_v36, %v499_v53 }
  0xa3   : > { %v807_v6 = vld [vmem:[#allocation2 + $0x20] sm:$0xff] }
  0xa4   : > { %7409 = vmatmul.msk.bf16.gmra.mxu0 %vm384_vm1, %v356_v56  ;;  %v1064_v4 = vpack.c.bf16 %v500_v0, %v500_v0  ;;  %v1190_v7 = vld [vmem:[#allocation2 + $0x1a] sm:$0xff]  ;;  %v1191_v8 = vld [vmem:[#allocation2 + $0x22] sm:$0xff]  ;;  %742 = vst [vmem:[#allocation2 + $0x31] sm:$0xff] %v500_v0  ;;  %v871_v9 = vpack.c.bf16 %v807_v6, %v807_v6 }
  0xa5   : > { %v1254_v10 = vpack.c.bf16 %v1190_v7, %v1190_v7  ;;  %v1255_v11 = vpack.c.bf16 %v1191_v8, %v1191_v8  ;;  %v7470_v31 = vld [vmem:[#allocation3 + $0x48] sm:$0xf] }
  0xa6   : > { %1128 = vst [vmem:[#allocation3 + $0x94] sm:$0xf] %v1064_v4 }
  0xa7   : > { %1702 = vst [vmem:[#allocation3 + $0x58] sm:$0xf] %v1064_v4 }
  0xa8   : > { %1318 = vst [vmem:[#allocation3 + $0x50] sm:$0xf] %v1254_v10  ;;  %v7472_v32 = vld [vmem:[#allocation3 + $0x6c] sm:$0xf0] }
  0xa9   : > { %v501_v58 = vpop.f32.mrf.mxu0  ;;  %1319 = vst [vmem:[#allocation3 + $0x74] sm:$0xf] %v1255_v11  ;;  %v7475_v46 = vor.u32 %v8915_v38, %v7472_v32 }
  0xaa   : > { %1509 = vst [vmem:[#allocation3 + $0x30] sm:$0xf] %v871_v9  ;;  %v502_v20 = vadd.f32 %v9619_v36, %v501_v58  ;;  %v307_v58 = vld [vmem:[%s9521_s9 + $0xc0] sm:$0xff] }
  0xab   : > { %1892 = vst [vmem:[#allocation3 + $0x14] sm:$0xf] %v1254_v10  ;;  %v808_v22 = vld [vmem:[#allocation2 + $0x30] sm:$0xff]  ;;  %5087 = vmatmul.bf16.gmra.mxu2 %v7475_v46  ;;  %v359_v61 = vpack.c.bf16 %v308_v59, %v307_v58 }
  0xac   : > { %1893 = vst [vmem:[#allocation3 + $0x38] sm:$0xf] %v1255_v11  ;;  %v872_v24 = vpack.c.bf16 %v808_v22, %v808_v22  ;;  %v1065_v25 = vpack.c.bf16 %v502_v20, %v502_v20 }
  0xad   : > { %935 = vst [vmem:[#allocation3 + $0x6c] sm:$0xf] %v871_v9  ;;  %v8924_v60 = vld [vmem:[#allocation3 + $0x94] sm:$0xf] }
  0xae   : > { %2277 = vst [vmem:[#allocation3 + $0x1c] sm:$0xf] %v1064_v4 }
  0xaf   : > { %936 = vst [vmem:[#allocation3 + $0x90] sm:$0xf] %v872_v24 }
  0xb0   : > { %1510 = vst [vmem:[#allocation3 + $0x54] sm:$0xf] %v872_v24 }
  0xb1   : > { %v504_v5 = vpop.f32.mrf.mxu0  ;;  %2085 = vst [vmem:[#allocation3 + $0x18] sm:$0xf] %v872_v24 }
  0xb2   : > { %v505_v26 = vadd.f32 %v9619_v36, %v504_v5  ;;  %743 = vst [vmem:[#allocation2 + $0x39] sm:$0xff] %v502_v20  ;;  %v360_v20 = vpack.c.bf16 %v310_v18, %v309_v17 }
  0xb3   : > { %1703 = vst [vmem:[#allocation3 + $0x7c] sm:$0xf] %v1065_v25 }
  0xb4   : > { %7410 = vmatmul.msk.bf16.gmra.mxu0 %vm384_vm1, %v357_v15  ;;  %v1066_v27 = vpack.c.bf16 %v505_v26, %v505_v26  ;;  %2278 = vst [vmem:[#allocation3 + $0x40] sm:$0xf] %v1065_v25  ;;  %v8919_v29 = vld [vmem:[#allocation3 + $0x68] sm:$0xf0] }
  0xb5   : > { %1129 = vst [vmem:[#allocation3 + $0xb8] sm:$0xf] %v1065_v25  ;;  %v7471_v37 = vor.u32 %v8919_v29, %v7470_v31 }
  0xb6   : > { %744 = vst [vmem:[#allocation2 + $0x49] sm:$0xff] %v505_v26  ;;  %v7506_v63 = vld [vmem:[#allocation3 + $0x90] sm:$0xf] }
  0xb7   : > { %1130 = vst [vmem:[#allocation3 + $0xdc] sm:$0xf] %v1066_v27  ;;  %4918 = vmatmul.bf16.gmra.mxu1 %v7471_v37 }
  0xb8   : > { %1704 = vst [vmem:[#allocation3 + $0xa0] sm:$0xf] %v1066_v27 }
  0xb9   : > { %v506_v23 = vpop.f32.mrf.mxu0  ;;  %v809_v40 = vld [vmem:[#allocation2 + $0x38] sm:$0xff]  ;;  %2279 = vst [vmem:[#allocation3 + $0x64] sm:$0xf] %v1066_v27 }
  0xba   : > { %v507_v28 = vadd.f32 %v9619_v36, %v506_v23  ;;  %v1192_v41 = vld [vmem:[#allocation2 + $0x32] sm:$0xff]  ;;  %v1193_v42 = vld [vmem:[#allocation2 + $0x3a] sm:$0xff]  ;;  %v873_v43 = vpack.c.bf16 %v809_v40, %v809_v40 }
  0xbb   : > { %v1256_v44 = vpack.c.bf16 %v1192_v41, %v1192_v41  ;;  %v1257_v45 = vpack.c.bf16 %v1193_v42, %v1193_v42 }
  0xbc   : > { %v9699_v33 = vpack.c.bf16 %v507_v28, %v507_v28  ;;  %745 = vst [vmem:[#allocation2 + $0x51] sm:$0xff] %v507_v28  ;;  %v7508_v56 = vld [vmem:[#allocation3 + $0xb4] sm:$0xf0] }
  0xbd   : > { %1320 = vst [vmem:[#allocation3 + $0x98] sm:$0xf] %v1256_v44  ;;  %v810_v47 = vld [vmem:[#allocation2 + $0x48] sm:$0xff]  ;;  %v7511_v62 = vor.u32 %v8924_v60, %v7508_v56 }
  0xbe   : > { %1705 = vst [vmem:[#allocation3 + $0xc4] sm:$0xf] %v9699_v33  ;;  %v874_v49 = vpack.c.bf16 %v810_v47, %v810_v47  ;;  %v8933_v9 = vld [vmem:[#allocation3 + $0xdc] sm:$0xf] }
  0xbf   : > { %1321 = vst [vmem:[#allocation3 + $0xbc] sm:$0xf] %v1257_v45  ;;  %5092 = vmatmul.bf16.gmra.mxu2 %v7511_v62 }
  0xc0   : > { %1511 = vst [vmem:[#allocation3 + $0x78] sm:$0xf] %v873_v43 }
  0xc1   : > { %v509_v30 = vpop.f32.mrf.mxu0  ;;  %1894 = vst [vmem:[#allocation3 + $0x5c] sm:$0xf] %v1256_v44 }
  0xc2   : > { %1895 = vst [vmem:[#allocation3 + $0x80] sm:$0xf] %v1257_v45  ;;  %v510_v2 = vadd.f32 %v9619_v36, %v509_v30 }
  0xc3   : > { %2086 = vst [vmem:[#allocation3 + $0x3c] sm:$0xf] %v873_v43  ;;  %v1194_v50 = vld [vmem:[#allocation2 + $0x4a] sm:$0xff]  ;;  %v1195_v51 = vld [vmem:[#allocation2 + $0x52] sm:$0xff] }
  0xc4   : > { %7411 = vmatmul.msk.bf16.gmra.mxu0 %vm384_vm1, %v358_v39  ;;  %2469 = vst [vmem:[#allocation3 + $0x20] sm:$0xf] %v1256_v44  ;;  %v811_v52 = vld [vmem:[#allocation2 + $0x50] sm:$0xff]  ;;  %v1258_v53 = vpack.c.bf16 %v1194_v50, %v1194_v50  ;;  %v1259_v54 = vpack.c.bf16 %v1195_v51, %v1195_v51  ;;  %v1068_v3 = vpack.c.bf16 %v510_v2, %v510_v2  ;;  %v312_v44 = vld [vmem:[%s9521_s9 + $0xe8] sm:$0xff] }
  0xc5   : > { %2470 = vst [vmem:[#allocation3 + $0x44] sm:$0xf] %v1257_v45  ;;  %v875_v55 = vpack.c.bf16 %v811_v52, %v811_v52 }
  0xc6   : > { %937 = vst [vmem:[#allocation3 + $0xb4] sm:$0xf] %v873_v43  ;;  %v311_v43 = vld [vmem:[%s9521_s9 + $0xe0] sm:$0xff] }
  0xc7   : > { %938 = vst [vmem:[#allocation3 + $0xd8] sm:$0xf] %v874_v49  ;;  %v361_v45 = vpack.c.bf16 %v312_v44, %v311_v43 }
  0xc8   : > { %1512 = vst [vmem:[#allocation3 + $0x9c] sm:$0xf] %v874_v49 }
  0xc9   : > { %v511_v48 = vpop.f32.mrf.mxu0  ;;  %2087 = vst [vmem:[#allocation3 + $0x60] sm:$0xf] %v874_v49 }
  0xca   : > { %1322 = vst [vmem:[#allocation3 + $0xe0] sm:$0xf] %v1258_v53  ;;  %v512_v4 = vadd.f32 %v9619_v36, %v511_v48 }
  0xcb   : > { %1323 = vst [vmem:[#allocation3 + $0x104] sm:$0xf] %v1259_v54 }
  0xcc   : > { %1513 = vst [vmem:[#allocation3 + $0xc0] sm:$0xf] %v875_v55  ;;  %v1069_v6 = vpack.c.bf16 %v512_v4, %v512_v4 }
  0xcd   : > { %1896 = vst [vmem:[#allocation3 + $0xa4] sm:$0xf] %v1258_v53  ;;  %v8928_v0 = vld [vmem:[#allocation3 + $0xb0] sm:$0xf0] }
  0xce   : > { %1897 = vst [vmem:[#allocation3 + $0xc8] sm:$0xf] %v1259_v54  ;;  %v7507_v1 = vor.u32 %v8928_v0, %v7506_v63  ;;  %v7542_v11 = vld [vmem:[#allocation3 + $0xd8] sm:$0xf] }
  0xcf   : > { %2088 = vst [vmem:[#allocation3 + $0x84] sm:$0xf] %v875_v55 }
  0xd0   : > { %2280 = vst [vmem:[#allocation3 + $0x88] sm:$0xf] %v9699_v33  ;;  %4923 = vmatmul.bf16.gmra.mxu1 %v7507_v1 }
  0xd1   : > { %v514_v57 = vpop.f32.mrf.mxu0  ;;  %2471 = vst [vmem:[#allocation3 + $0x68] sm:$0xf] %v1258_v53 }
  0xd2   : > { %2472 = vst [vmem:[#allocation3 + $0x8c] sm:$0xf] %v1259_v54  ;;  %v515_v7 = vadd.f32 %v9619_v36, %v514_v57 }
  0xd3   : > { %939 = vst [vmem:[#allocation3 + $0xfc] sm:$0xf] %v875_v55 }
  0xd4   : > { %7412 = vmatmul.msk.bf16.gmra.mxu0 %vm384_vm1, %v359_v61  ;;  %1131 = vst [vmem:[#allocation3 + $0x100] sm:$0xf] %v9699_v33  ;;  %v1070_v10 = vpack.c.bf16 %v515_v7, %v515_v7 }
  0xd5   : > { %746 = vst [vmem:[#allocation2 + $0x61] sm:$0xff] %v510_v2  ;;  %v313_v2 = vld [vmem:[%s9521_s9 + $0xf0] sm:$0xff] }
  0xd6   : > { %1132 = vst [vmem:[#allocation3 + $0x124] sm:$0xf] %v1068_v3 }
  0xd7   : > { %1706 = vst [vmem:[#allocation3 + $0xe8] sm:$0xf] %v1068_v3 }
  0xd8   : > { %2281 = vst [vmem:[#allocation3 + $0xac] sm:$0xf] %v1068_v3  ;;  %v314_v3 = vld [vmem:[%s9521_s9 + $0xf8] sm:$0xff] }
  0xd9   : > { %v516_v5 = vpop.f32.mrf.mxu0  ;;  %747 = vst [vmem:[#allocation2 + $0x69] sm:$0xff] %v512_v4  ;;  %v362_v4 = vpack.c.bf16 %v314_v3, %v313_v2 }
  0xda   : > { %1707 = vst [vmem:[#allocation3 + $0x10c] sm:$0xf] %v1069_v6  ;;  %v8937_v8 = vld [vmem:[#allocation3 + $0xf8] sm:$0xf0]  ;;  %v517_v30 = vadd.f32 %v9619_v36, %v516_v5 }
  0xdb   : > { %2282 = vst [vmem:[#allocation3 + $0xd0] sm:$0xf] %v1069_v6  ;;  %v7544_v12 = vld [vmem:[#allocation3 + $0xfc] sm:$0xf0]  ;;  %v7543_v14 = vor.u32 %v8937_v8, %v7542_v11 }
  0xdc   : > { %v812_v13 = vld [vmem:[#allocation2 + $0x60] sm:$0xff]  ;;  %1133 = vst [vmem:[#allocation3 + $0x148] sm:$0xf] %v1069_v6  ;;  %v7547_v15 = vor.u32 %v8933_v9, %v7544_v12  ;;  %v1071_v34 = vpack.c.bf16 %v517_v30, %v517_v30 }
  0xdd   : > { %v876_v16 = vpack.c.bf16 %v812_v13, %v812_v13  ;;  %748 = vst [vmem:[#allocation2 + $0x79] sm:$0xff] %v515_v7  ;;  %v8942_v32 = vld [vmem:[#allocation3 + $0x124] sm:$0xf] }
  0xde   : > { %1134 = vst [vmem:[#allocation3 + $0x16c] sm:$0xf] %v1070_v10  ;;  %5097 = vmatmul.bf16.gmra.mxu2 %v7547_v15 }
  0xdf   : > { %940 = vst [vmem:[#allocation3 + $0x120] sm:$0xf] %v876_v16 }
  0xe0   : > { %1514 = vst [vmem:[#allocation3 + $0xe4] sm:$0xf] %v876_v16  ;;  %v813_v21 = vld [vmem:[#allocation2 + $0x68] sm:$0xff]  ;;  %4928 = vmatmul.bf16.gmra.mxu1 %v7543_v14 }
  0xe1   : > { %v519_v19 = vpop.f32.mrf.mxu0  ;;  %v1196_v22 = vld [vmem:[#allocation2 + $0x62] sm:$0xff]  ;;  %v1197_v23 = vld [vmem:[#allocation2 + $0x6a] sm:$0xff]  ;;  %2089 = vst [vmem:[#allocation3 + $0xa8] sm:$0xf] %v876_v16  ;;  %v877_v24 = vpack.c.bf16 %v813_v21, %v813_v21 }
  0xe2   : > { %v1260_v25 = vpack.c.bf16 %v1196_v22, %v1196_v22  ;;  %v1261_v26 = vpack.c.bf16 %v1197_v23, %v1197_v23  ;;  %1708 = vst [vmem:[#allocation3 + $0x130] sm:$0xf] %v1070_v10  ;;  %v520_v35 = vadd.f32 %v9619_v36, %v519_v19  ;;  %v315_v23 = vld [vmem:[%s9521_s9 + $0x100] sm:$0xff] }
  0xe3   : > { %1515 = vst [vmem:[#allocation3 + $0x108] sm:$0xf] %v877_v24  ;;  %v7580_v31 = vld [vmem:[#allocation3 + $0x144] sm:$0xf0] }
  0xe4   : > { %7413 = vmatmul.msk.bf16.gmra.mxu0 %vm384_vm1, %v360_v20  ;;  %1324 = vst [vmem:[#allocation3 + $0x128] sm:$0xf] %v1260_v25  ;;  %v814_v27 = vld [vmem:[#allocation2 + $0x78] sm:$0xff]  ;;  %v7583_v33 = vor.u32 %v8942_v32, %v7580_v31  ;;  %v1072_v37 = vpack.c.bf16 %v520_v35, %v520_v35 }
  0xe5   : > { %1325 = vst [vmem:[#allocation3 + $0x14c] sm:$0xf] %v1261_v26  ;;  %v878_v28 = vpack.c.bf16 %v814_v27, %v814_v27  ;;  %v8951_v54 = vld [vmem:[#allocation3 + $0x16c] sm:$0xf] }
  0xe6   : > { %1898 = vst [vmem:[#allocation3 + $0xec] sm:$0xf] %v1260_v25  ;;  %v7578_v39 = vld [vmem:[#allocation3 + $0x120] sm:$0xf] }
  0xe7   : > { %1899 = vst [vmem:[#allocation3 + $0x110] sm:$0xf] %v1261_v26 }
  0xe8   : > { %2090 = vst [vmem:[#allocation3 + $0xcc] sm:$0xf] %v877_v24 }
  0xe9   : > { %v521_v29 = vpop.f32.mrf.mxu0  ;;  %2473 = vst [vmem:[#allocation3 + $0xb0] sm:$0xf] %v1260_v25 }
  0xea   : > { %2474 = vst [vmem:[#allocation3 + $0xd4] sm:$0xf] %v1261_v26  ;;  %v522_v38 = vadd.f32 %v9619_v36, %v521_v29  ;;  %v4914_v43 = vpop.f32.mrf.mxu1 }
  0xeb   : > { %941 = vst [vmem:[#allocation3 + $0x144] sm:$0xf] %v877_v24  ;;  %v316_v24 = vld [vmem:[%s9521_s9 + $0x108] sm:$0xff] }
  0xec   : > { %942 = vst [vmem:[#allocation3 + $0x168] sm:$0xf] %v878_v28  ;;  %v1073_v46 = vpack.c.bf16 %v522_v38, %v522_v38  ;;  %v363_v26 = vpack.c.bf16 %v316_v24, %v315_v23 }
  0xed   : > { %1516 = vst [vmem:[#allocation3 + $0x12c] sm:$0xf] %v878_v28 }
  0xee   : > { %2091 = vst [vmem:[#allocation3 + $0xf0] sm:$0xf] %v878_v28  ;;  %5102 = vmatmul.bf16.gmra.mxu2 %v7583_v33 }
  0xef   : > { %2283 = vst [vmem:[#allocation3 + $0xf4] sm:$0xf] %v1070_v10 }
  0xf0   : > { %749 = vst [vmem:[#allocation2 + $0x81] sm:$0xff] %v517_v30 }
  0xf1   : > { %1709 = vst [vmem:[#allocation3 + $0x154] sm:$0xf] %v1071_v34  ;;  %v524_v41 = vpop.f32.mrf.mxu0 }
  0xf2   : > { %2284 = vst [vmem:[#allocation3 + $0x118] sm:$0xf] %v1071_v34  ;;  %v8946_v40 = vld [vmem:[#allocation3 + $0x140] sm:$0xf0]  ;;  %v525_v8 = vadd.f32 %v9619_v36, %v524_v41 }
  0xf3   : > { %1135 = vst [vmem:[#allocation3 + $0x190] sm:$0xf] %v1071_v34  ;;  %v7579_v42 = vor.u32 %v8946_v40, %v7578_v39  ;;  %v7614_v5 = vld [vmem:[#allocation3 + $0x168] sm:$0xf] }
  0xf4   : > { %750 = vst [vmem:[#allocation2 + $0x91] sm:$0xff] %v520_v35  ;;  %7414 = vmatmul.msk.bf16.gmra.mxu0 %vm384_vm1, %v361_v45  ;;  %v1074_v9 = vpack.c.bf16 %v525_v8, %v525_v8 }
  0xf5   : > { %4933 = vmatmul.bf16.gmra.mxu1 %v7579_v42  ;;  %1136 = vst [vmem:[#allocation3 + $0x1b4] sm:$0xf] %v1072_v37 }
  0xf6   : > { %1710 = vst [vmem:[#allocation3 + $0x178] sm:$0xf] %v1072_v37 }
  0xf7   : > { %v815_v47 = vld [vmem:[#allocation2 + $0x80] sm:$0xff]  ;;  %2285 = vst [vmem:[#allocation3 + $0x13c] sm:$0xf] %v1072_v37 }
  0xf8   : > { %v1198_v48 = vld [vmem:[#allocation2 + $0x7a] sm:$0xff]  ;;  %v1199_v49 = vld [vmem:[#allocation2 + $0x82] sm:$0xff]  ;;  %v879_v50 = vpack.c.bf16 %v815_v47, %v815_v47  ;;  %751 = vst [vmem:[#allocation2 + $0x99] sm:$0xff] %v522_v38 }
  0xf9   : > { %v1262_v51 = vpack.c.bf16 %v1198_v48, %v1198_v48  ;;  %v1263_v52 = vpack.c.bf16 %v1199_v49, %v1199_v49  ;;  %1711 = vst [vmem:[#allocation3 + $0x19c] sm:$0xf] %v1073_v46  ;;  %v526_v57 = vpop.f32.mrf.mxu0 }
  0xfa   : > { %v7616_v53 = vld [vmem:[#allocation3 + $0x18c] sm:$0xf0]  ;;  %1517 = vst [vmem:[#allocation3 + $0x150] sm:$0xf] %v879_v50  ;;  %v527_v10 = vadd.f32 %v9619_v36, %v526_v57 }
  0xfb   : > { %1326 = vst [vmem:[#allocation3 + $0x170] sm:$0xf] %v1262_v51  ;;  %v816_v55 = vld [vmem:[#allocation2 + $0x90] sm:$0xff]  ;;  %v7619_v56 = vor.u32 %v8951_v54, %v7616_v53  ;;  %v9743_v54 = vld [vmem:[%s12230_s4] ss:$0 sm:$0xff] }
  0xfc   : > { %1327 = vst [vmem:[#allocation3 + $0x194] sm:$0xf] %v1263_v52  ;;  %v880_v58 = vpack.c.bf16 %v816_v55, %v816_v55  ;;  %v1075_v12 = vpack.c.bf16 %v527_v10, %v527_v10  ;;  %v8960_v15 = vld [vmem:[#allocation3 + $0x1b4] sm:$0xf] }
  0xfd   : > { %1900 = vst [vmem:[#allocation3 + $0x134] sm:$0xf] %v1262_v51 }
  0xfe   : > { %1901 = vst [vmem:[#allocation3 + $0x158] sm:$0xf] %v1263_v52  ;;  %5107 = vmatmul.bf16.gmra.mxu2 %v7619_v56 }
  0xff   : > { %2092 = vst [vmem:[#allocation3 + $0x114] sm:$0xf] %v879_v50  ;;  %v1200_v59 = vld [vmem:[#allocation2 + $0x92] sm:$0xff]  ;;  %v1201_v60 = vld [vmem:[#allocation2 + $0x9a] sm:$0xff] }
 0x100   : > { %2475 = vst [vmem:[#allocation3 + $0xf8] sm:$0xf] %v1262_v51  ;;  %v817_v61 = vld [vmem:[#allocation2 + $0x98] sm:$0xff]  ;;  %v1264_v62 = vpack.c.bf16 %v1200_v59, %v1200_v59  ;;  %v1265_v63 = vpack.c.bf16 %v1201_v60, %v1201_v60  ;;  %v9746_v59 = vpop.f32.mrf.mxu1 }
 0x101   : > { %2476 = vst [vmem:[#allocation3 + $0x11c] sm:$0xf] %v1263_v52  ;;  %v881_v0 = vpack.c.bf16 %v817_v61, %v817_v61  ;;  %v529_v1 = vpop.f32.mrf.mxu0  ;;  %v318_v51 = vld [vmem:[%s9521_s9 + $0x118] sm:$0xff] }
 0x102   : > { %943 = vst [vmem:[#allocation3 + $0x18c] sm:$0xf] %v879_v50  ;;  %v530_v13 = vadd.f32 %v9619_v36, %v529_v1  ;;  %v317_v50 = vld [vmem:[%s9521_s9 + $0x110] sm:$0xff] }
 0x103   : > { %944 = vst [vmem:[#allocation3 + $0x1b0] sm:$0xf] %v880_v58  ;;  %v364_v52 = vpack.c.bf16 %v318_v51, %v317_v50 }
 0x104   : > { %1518 = vst [vmem:[#allocation3 + $0x174] sm:$0xf] %v880_v58  ;;  %7415 = vmatmul.msk.bf16.gmra.mxu0 %vm384_vm1, %v362_v4  ;;  %v1076_v16 = vpack.c.bf16 %v530_v13, %v530_v13 }
 0x105   : > { %2093 = vst [vmem:[#allocation3 + $0x138] sm:$0xf] %v880_v58  ;;  %v5083_v58 = vpop.f32.mrf.mxu2 }
 0x106   : > { %1328 = vst [vmem:[#allocation3 + $0x1b8] sm:$0xf] %v1264_v62 }
 0x107   : > { %1329 = vst [vmem:[#allocation3 + $0x1dc] sm:$0xf] %v1265_v63 }
 0x108   : > { %1519 = vst [vmem:[#allocation3 + $0x198] sm:$0xf] %v881_v0 }
 0x109   : > { %1902 = vst [vmem:[#allocation3 + $0x17c] sm:$0xf] %v1264_v62  ;;  %v8955_v6 = vld [vmem:[#allocation3 + $0x188] sm:$0xf0]  ;;  %v531_v11 = vpop.f32.mrf.mxu0 }
 0x10a   : > { %1903 = vst [vmem:[#allocation3 + $0x1a0] sm:$0xf] %v1265_v63  ;;  %v7615_v7 = vor.u32 %v8955_v6, %v7614_v5  ;;  %v7650_v17 = vld [vmem:[#allocation3 + $0x1b0] sm:$0xf]  ;;  %v532_v38 = vadd.f32 %v9619_v36, %v531_v11 }
 0x10b   : > { %2094 = vst [vmem:[#allocation3 + $0x15c] sm:$0xf] %v881_v0 }
 0x10c   : > { %2286 = vst [vmem:[#allocation3 + $0x160] sm:$0xf] %v1073_v46  ;;  %4938 = vmatmul.bf16.gmra.mxu1 %v7615_v7  ;;  %v1077_v41 = vpack.c.bf16 %v532_v38, %v532_v38 }
 0x10d   : > { %2477 = vst [vmem:[#allocation3 + $0x140] sm:$0xf] %v1264_v62 }
 0x10e   : > { %2478 = vst [vmem:[#allocation3 + $0x164] sm:$0xf] %v1265_v63  ;;  %v4915_v63 = vadd.f32 %v9743_v54, %v4914_v43 }
 0x10f   : > { %945 = vst [vmem:[#allocation3 + $0x1d4] sm:$0xf] %v881_v0 }
 0x110   : > { %1137 = vst [vmem:[#allocation3 + $0x1d8] sm:$0xf] %v1073_v46  ;;  %v9750_v5 = vadd.f32 %v5083_v58, %v4915_v63 }
 0x111   : > { %752 = vst [vmem:[#allocation2 + $0xa9] sm:$0xff] %v525_v8  ;;  %v534_v25 = vpop.f32.mrf.mxu0  ;;  %v9752_v8 = vpop.f32.mrf.mxu2 }
 0x112   : > { %1138 = vst [vmem:[#allocation3 + $0x1fc] sm:$0xf] %v1074_v9  ;;  %v535_v42 = vadd.f32 %v9619_v36, %v534_v25 }
 0x113   : > { %1712 = vst [vmem:[#allocation3 + $0x1c0] sm:$0xf] %v1074_v9 }
 0x114   : > { %2287 = vst [vmem:[#allocation3 + $0x184] sm:$0xf] %v1074_v9  ;;  %7416 = vmatmul.msk.bf16.gmra.mxu0 %vm384_vm1, %v363_v26  ;;  %v1078_v44 = vpack.c.bf16 %v535_v42, %v535_v42 }
 0x115   : > { %753 = vst [vmem:[#allocation2 + $0xb1] sm:$0xff] %v527_v10 }
 0x116   : > { %1713 = vst [vmem:[#allocation3 + $0x1e4] sm:$0xf] %v1075_v12  ;;  %v8964_v14 = vld [vmem:[#allocation3 + $0x1d0] sm:$0xf0] }
 0x117   : > { %2288 = vst [vmem:[#allocation3 + $0x1a8] sm:$0xf] %v1075_v12  ;;  %v7652_v18 = vld [vmem:[#allocation3 + $0x1d4] sm:$0xf0]  ;;  %v7651_v20 = vor.u32 %v8964_v14, %v7650_v17  ;;  %v319_v17 = vld [vmem:[%s9521_s9 + $0x120] sm:$0xff] }
 0x118   : > { %v818_v19 = vld [vmem:[#allocation2 + $0xa8] sm:$0xff]  ;;  %1139 = vst [vmem:[#allocation3 + $0x220] sm:$0xf] %v1075_v12  ;;  %v7655_v21 = vor.u32 %v8960_v15, %v7652_v18 }
 0x119   : > { %v882_v22 = vpack.c.bf16 %v818_v19, %v818_v19  ;;  %754 = vst [vmem:[#allocation2 + $0xc1] sm:$0xff] %v530_v13  ;;  %v536_v37 = vpop.f32.mrf.mxu0  ;;  %v8969_v39 = vld [vmem:[#allocation3 + $0x1fc] sm:$0xf]  ;;  %v320_v18 = vld [vmem:[%s9521_s9 + $0x128] sm:$0xff] }
 0x11a   : > { %5112 = vmatmul.bf16.gmra.mxu2 %v7655_v21  ;;  %1140 = vst [vmem:[#allocation3 + $0x244] sm:$0xf] %v1076_v16  ;;  %v537_v45 = vadd.f32 %v9619_v36, %v536_v37 }
 0x11b   : > { %946 = vst [vmem:[#allocation3 + $0x1f8] sm:$0xf] %v882_v22 }
 0x11c   : > { %1520 = vst [vmem:[#allocation3 + $0x1bc] sm:$0xf] %v882_v22  ;;  %v819_v27 = vld [vmem:[#allocation2 + $0xb0] sm:$0xff]  ;;  %4943 = vmatmul.bf16.gmra.mxu1 %v7651_v20  ;;  %v9738_v53 = vpack.c.bf16 %v537_v45, %v537_v45  ;;  %v365_v20 = vpack.c.bf16 %v320_v18, %v319_v17 }
 0x11d   : > { %v1202_v28 = vld [vmem:[#allocation2 + $0xaa] sm:$0xff]  ;;  %v1203_v29 = vld [vmem:[#allocation2 + $0xb2] sm:$0xff]  ;;  %2095 = vst [vmem:[#allocation3 + $0x180] sm:$0xf] %v882_v22  ;;  %v883_v30 = vpack.c.bf16 %v819_v27, %v819_v27 }
 0x11e   : > { %v1266_v31 = vpack.c.bf16 %v1202_v28, %v1202_v28  ;;  %v1267_v32 = vpack.c.bf16 %v1203_v29, %v1203_v29  ;;  %1714 = vst [vmem:[#allocation3 + $0x208] sm:$0xf] %v1076_v16 }
 0x11f   : > { %1521 = vst [vmem:[#allocation3 + $0x1e0] sm:$0xf] %v883_v30  ;;  %v7688_v34 = vld [vmem:[#allocation3 + $0x21c] sm:$0xf0] }
 0x120   : > { %1330 = vst [vmem:[#allocation3 + $0x200] sm:$0xf] %v1266_v31  ;;  %v820_v33 = vld [vmem:[#allocation2 + $0xc0] sm:$0xff]  ;;  %v7691_v40 = vor.u32 %v8969_v39, %v7688_v34 }
 0x121   : > { %1331 = vst [vmem:[#allocation3 + $0x224] sm:$0xf] %v1267_v32  ;;  %v884_v35 = vpack.c.bf16 %v820_v33, %v820_v33  ;;  %v9734_v48 = vpop.f32.mrf.mxu0  ;;  %v8978_v0 = vld [vmem:[#allocation3 + $0x244] sm:$0xf] }
 0x122   : > { %1904 = vst [vmem:[#allocation3 + $0x1c4] sm:$0xf] %v1266_v31  ;;  %v7686_v46 = vld [vmem:[#allocation3 + $0x1f8] sm:$0xf]  ;;  %v540_v25 = vadd.f32 %v9619_v36, %v9734_v48 }
 0x123   : > { %1905 = vst [vmem:[#allocation3 + $0x1e8] sm:$0xf] %v1267_v32 }
 0x124   : > { %2096 = vst [vmem:[#allocation3 + $0x1a4] sm:$0xf] %v883_v30  ;;  %7417 = vmatmul.msk.bf16.gmra.mxu0 %vm384_vm1, %v364_v52  ;;  %v1080_v27 = vpack.c.bf16 %v540_v25, %v540_v25 }
 0x125   : > { %2479 = vst [vmem:[#allocation3 + $0x188] sm:$0xf] %v1266_v31 }
 0x126   : > { %2480 = vst [vmem:[#allocation3 + $0x1ac] sm:$0xf] %v1267_v32 }
 0x127   : > { %947 = vst [vmem:[#allocation3 + $0x21c] sm:$0xf] %v883_v30 }
 0x128   : > { %948 = vst [vmem:[#allocation3 + $0x240] sm:$0xf] %v884_v35 }
 0x129   : > { %1522 = vst [vmem:[#allocation3 + $0x204] sm:$0xf] %v884_v35  ;;  %v541_v4 = vpop.f32.mrf.mxu0 }
 0x12a   : > { %2097 = vst [vmem:[#allocation3 + $0x1c8] sm:$0xf] %v884_v35  ;;  %5117 = vmatmul.bf16.gmra.mxu2 %v7691_v40  ;;  %v542_v28 = vadd.f32 %v9619_v36, %v541_v4 }
 0x12b   : > { %2289 = vst [vmem:[#allocation3 + $0x1cc] sm:$0xf] %v1076_v16 }
 0x12c   : > { %755 = vst [vmem:[#allocation2 + $0xc9] sm:$0xff] %v532_v38  ;;  %v1081_v31 = vpack.c.bf16 %v542_v28, %v542_v28 }
 0x12d   : > { %1715 = vst [vmem:[#allocation3 + $0x22c] sm:$0xf] %v1077_v41 }
 0x12e   : > { %2290 = vst [vmem:[#allocation3 + $0x1f0] sm:$0xf] %v1077_v41  ;;  %v8973_v47 = vld [vmem:[#allocation3 + $0x218] sm:$0xf0]  ;;  %v5088_v19 = vpop.f32.mrf.mxu2 }
 0x12f   : > { %1141 = vst [vmem:[#allocation3 + $0x268] sm:$0xf] %v1077_v41  ;;  %v7687_v49 = vor.u32 %v8973_v47, %v7686_v46  ;;  %v7722_v22 = vld [vmem:[#allocation3 + $0x240] sm:$0xf]  ;;  %v321_v46 = vld [vmem:[%s9521_s9 + $0x130] sm:$0xff]  ;;  %v322_v47 = vld [vmem:[%s9521_s9 + $0x138] sm:$0xff] }
 0x130   : > { %756 = vst [vmem:[#allocation2 + $0xd9] sm:$0xff] %v535_v42 }
 0x131   : > { %4948 = vmatmul.bf16.gmra.mxu1 %v7687_v49  ;;  %1142 = vst [vmem:[#allocation3 + $0x28c] sm:$0xf] %v1078_v44  ;;  %v544_v16 = vpop.f32.mrf.mxu0  ;;  %v366_v49 = vpack.c.bf16 %v322_v47, %v321_v46 }
 0x132   : > { %1716 = vst [vmem:[#allocation3 + $0x250] sm:$0xf] %v1078_v44  ;;  %v545_v32 = vadd.f32 %v9619_v36, %v544_v16 }
 0x133   : > { %v821_v55 = vld [vmem:[#allocation2 + $0xc8] sm:$0xff]  ;;  %2291 = vst [vmem:[#allocation3 + $0x214] sm:$0xf] %v1078_v44 }
 0x134   : > { %v1204_v56 = vld [vmem:[#allocation2 + $0xc2] sm:$0xff]  ;;  %v1205_v57 = vld [vmem:[#allocation2 + $0xca] sm:$0xff]  ;;  %12234 = vst [vmem:[#allocation4_spill] sm:$0xff] %v9746_v59  ;;  %v885_v60 = vpack.c.bf16 %v821_v55, %v821_v55  ;;  %v4919_v11 = vpop.f32.mrf.mxu1  ;;  %7418 = vmatmul.msk.bf16.gmra.mxu0 %vm384_vm1, %v365_v20  ;;  %v1082_v37 = vpack.c.bf16 %v545_v32, %v545_v32 }
 0x135   : > { %v1268_v61 = vpack.c.bf16 %v1204_v56, %v1204_v56  ;;  %v1269_v62 = vpack.c.bf16 %v1205_v57, %v1205_v57  ;;  %757 = vst [vmem:[#allocation2 + $0xe1] sm:$0xff] %v537_v45  ;;  %v4920_v15 = vadd.f32 %v9743_v54, %v4919_v11 }
 0x136   : > { %1717 = vst [vmem:[#allocation3 + $0x274] sm:$0xf] %v9738_v53  ;;  %v7724_v1 = vld [vmem:[#allocation3 + $0x264] sm:$0xf0]  ;;  %v9766_v29 = vpop.f32.mrf.mxu2 }
 0x137   : > { %1332 = vst [vmem:[#allocation3 + $0x248] sm:$0xf] %v1268_v61  ;;  %v7727_v2 = vor.u32 %v8978_v0, %v7724_v1  ;;  %v822_v3 = vld [vmem:[#allocation2 + $0xd8] sm:$0xff]  ;;  %v9757_v21 = vadd.f32 %v5088_v19, %v4920_v15  ;;  %v9783_v0 = vld [vmem:[%s12228_s2] ss:$0 sm:$0xff]  ;;  %v324_v15 = vld [vmem:[%s9521_s9 + $0x148] sm:$0xff] }
 0x138   : > { %1333 = vst [vmem:[#allocation3 + $0x26c] sm:$0xf] %v1269_v62  ;;  %v886_v6 = vpack.c.bf16 %v822_v3, %v822_v3  ;;  %v8987_v35 = vld [vmem:[#allocation3 + $0x28c] sm:$0xf] }
 0x139   : > { %1523 = vst [vmem:[#allocation3 + $0x228] sm:$0xf] %v885_v60  ;;  %v546_v30 = vpop.f32.mrf.mxu0 }
 0x13a   : > { %1906 = vst [vmem:[#allocation3 + $0x20c] sm:$0xf] %v1268_v61  ;;  %5122 = vmatmul.bf16.gmra.mxu2 %v7727_v2  ;;  %v547_v1 = vadd.f32 %v9783_v0, %v546_v30 }
 0x13b   : > { %1907 = vst [vmem:[#allocation3 + $0x230] sm:$0xf] %v1269_v62 }
 0x13c   : > { %2098 = vst [vmem:[#allocation3 + $0x1ec] sm:$0xf] %v885_v60  ;;  %v1206_v7 = vld [vmem:[#allocation2 + $0xda] sm:$0xff]  ;;  %v1207_v9 = vld [vmem:[#allocation2 + $0xe2] sm:$0xff]  ;;  %v9762_v26 = vpop.f32.mrf.mxu1  ;;  %v1083_v4 = vpack.c.bf16 %v547_v1, %v547_v1 }
 0x13d   : > { %12235 = vst [vmem:[#allocation5_spill] sm:$0xff] %v9752_v8  ;;  %v823_v10 = vld [vmem:[#allocation2 + $0xe0] sm:$0xff]  ;;  %v1270_v12 = vpack.c.bf16 %v1206_v7, %v1206_v7  ;;  %v1271_v13 = vpack.c.bf16 %v1207_v9, %v1207_v9 }
 0x13e   : > { %2481 = vst [vmem:[#allocation3 + $0x1d0] sm:$0xf] %v1268_v61  ;;  %v887_v14 = vpack.c.bf16 %v823_v10, %v823_v10 }
 0x13f   : > { %2482 = vst [vmem:[#allocation3 + $0x1f4] sm:$0xf] %v1269_v62 }
 0x140   : > { %949 = vst [vmem:[#allocation3 + $0x264] sm:$0xf] %v885_v60 }
 0x141   : > { %950 = vst [vmem:[#allocation3 + $0x288] sm:$0xf] %v886_v6  ;;  %v549_v48 = vpop.f32.mrf.mxu0 }
 0x142   : > { %1524 = vst [vmem:[#allocation3 + $0x24c] sm:$0xf] %v886_v6  ;;  %v5093_v41 = vpop.f32.mrf.mxu2 }
 0x143   : > { %2099 = vst [vmem:[#allocation3 + $0x210] sm:$0xf] %v886_v6  ;;  %v550_v6 = vadd.f32 %v9783_v0, %v549_v48 }
 0x144   : > { %1334 = vst [vmem:[#allocation3 + $0x290] sm:$0xf] %v1270_v12  ;;  %7419 = vmatmul.msk.bf16.gmra.mxu0 %vm384_vm1, %v366_v49 }
 0x145   : > { %1335 = vst [vmem:[#allocation3 + $0x2b4] sm:$0xf] %v1271_v13 }
 0x146   : > { %1525 = vst [vmem:[#allocation3 + $0x270] sm:$0xf] %v887_v14 }
 0x147   : > { %1908 = vst [vmem:[#allocation3 + $0x254] sm:$0xf] %v1270_v12  ;;  %v8982_v23 = vld [vmem:[#allocation3 + $0x260] sm:$0xf0] }
 0x148   : > { %1909 = vst [vmem:[#allocation3 + $0x278] sm:$0xf] %v1271_v13  ;;  %v7723_v24 = vor.u32 %v8982_v23, %v7722_v22  ;;  %v7758_v39 = vld [vmem:[#allocation3 + $0x288] sm:$0xf] }
 0x149   : > { %2100 = vst [vmem:[#allocation3 + $0x234] sm:$0xf] %v887_v14  ;;  %v551_v63 = vpop.f32.mrf.mxu0 }
 0x14a   : > { %12236 = vst [vmem:[#allocation6_spill] sm:$0xff] %v9762_v26  ;;  %4953 = vmatmul.bf16.gmra.mxu1 %v7723_v24  ;;  %v9778_v58 = vpop.f32.mrf.mxu2 }
 0x14b   : > { %2292 = vst [vmem:[#allocation3 + $0x238] sm:$0xf] %v9738_v53 }
 0x14c   : > { %2483 = vst [vmem:[#allocation3 + $0x218] sm:$0xf] %v1270_v12  ;;  %v1084_v12 = vpack.c.bf16 %v550_v6, %v550_v6 }
 0x14d   : > { %2484 = vst [vmem:[#allocation3 + $0x23c] sm:$0xf] %v1271_v13  ;;  %v4924_v33 = vpop.f32.mrf.mxu1  ;;  %v552_v13 = vadd.f32 %v9783_v0, %v551_v63 }
 0x14e   : > { %951 = vst [vmem:[#allocation3 + $0x2ac] sm:$0xf] %v887_v14  ;;  %v4925_v38 = vadd.f32 %v9743_v54, %v4924_v33  ;;  %v323_v14 = vld [vmem:[%s9521_s9 + $0x140] sm:$0xff] }
 0x14f   : > { %12237 = vst [vmem:[#allocation7_spill] sm:$0xff] %v9766_v29  ;;  %v367_v19 = vpack.c.bf16 %v324_v15, %v323_v14  ;;  %v9796_v22 = vpack.c.bf16 %v552_v13, %v552_v13 }
 0x150   : > { %1143 = vst [vmem:[#allocation3 + $0x2b0] sm:$0xf] %v9738_v53  ;;  %v9771_v44 = vadd.f32 %v5093_v41, %v4925_v38 }
 0x151   : > { %758 = vst [vmem:[#allocation2 + $0xf1] sm:$0xff] %v540_v25  ;;  %v9793_v18 = vpop.f32.mrf.mxu0 }
 0x152   : > { %1144 = vst [vmem:[#allocation3 + $0x2d4] sm:$0xf] %v1080_v27  ;;  %v555_v63 = vadd.f32 %v9783_v0, %v9793_v18 }
 0x153   : > { %1718 = vst [vmem:[#allocation3 + $0x298] sm:$0xf] %v1080_v27 }
 0x154   : > { %2293 = vst [vmem:[#allocation3 + $0x25c] sm:$0xf] %v1080_v27  ;;  %7420 = vmatmul.msk.bf16.gmra.mxu0 %vm384_vm1, %v367_v19 }
 0x155   : > { %759 = vst [vmem:[#allocation2 + $0xf9] sm:$0xff] %v542_v28  ;;  %v8991_v34 = vld [vmem:[#allocation3 + $0x2a8] sm:$0xf0]  ;;  %v9776_v57 = vpop.f32.mrf.mxu1 }
 0x156   : > { %1719 = vst [vmem:[#allocation3 + $0x2bc] sm:$0xf] %v1081_v31  ;;  %v7759_v43 = vor.u32 %v8991_v34, %v7758_v39 }
 0x157   : > { %2294 = vst [vmem:[#allocation3 + $0x280] sm:$0xf] %v1081_v31  ;;  %v7760_v40 = vld [vmem:[#allocation3 + $0x2ac] sm:$0xf0] }
 0x158   : > { %v824_v42 = vld [vmem:[#allocation2 + $0xf0] sm:$0xff]  ;;  %1145 = vst [vmem:[#allocation3 + $0x2f8] sm:$0xf] %v1081_v31  ;;  %v7763_v36 = vor.u32 %v8987_v35, %v7760_v40 }
 0x159   : > { %v888_v45 = vpack.c.bf16 %v824_v42, %v824_v42  ;;  %760 = vst [vmem:[#allocation2 + $0x109] sm:$0xff] %v545_v32  ;;  %v8996_v2 = vld [vmem:[#allocation3 + $0x2d4] sm:$0xf]  ;;  %v556_v38 = vpop.f32.mrf.mxu0 }
 0x15a   : > { %5127 = vmatmul.bf16.gmra.mxu2 %v7763_v36  ;;  %1146 = vst [vmem:[#allocation3 + $0x31c] sm:$0xf] %v1082_v37  ;;  %4958 = vmatmul.bf16.gmra.mxu1 %v7759_v43 }
 0x15b   : > { %952 = vst [vmem:[#allocation3 + $0x2d0] sm:$0xf] %v888_v45 }
 0x15c   : > { %1526 = vst [vmem:[#allocation3 + $0x294] sm:$0xf] %v888_v45  ;;  %v825_v50 = vld [vmem:[#allocation2 + $0xf8] sm:$0xff] }
 0x15d   : > { %v1208_v51 = vld [vmem:[#allocation2 + $0xf2] sm:$0xff]  ;;  %v1209_v52 = vld [vmem:[#allocation2 + $0xfa] sm:$0xff]  ;;  %2101 = vst [vmem:[#allocation3 + $0x258] sm:$0xf] %v888_v45  ;;  %v889_v53 = vpack.c.bf16 %v825_v50, %v825_v50  ;;  %v4929_v7 = vpop.f32.mrf.mxu1 }
 0x15e   : > { %v1272_v55 = vpack.c.bf16 %v1208_v51, %v1208_v51  ;;  %v1273_v56 = vpack.c.bf16 %v1209_v52, %v1209_v52  ;;  %1720 = vst [vmem:[#allocation3 + $0x2e0] sm:$0xf] %v1082_v37  ;;  %v4930_v10 = vadd.f32 %v9743_v54, %v4929_v7  ;;  %v325_v51 = vld [vmem:[%s9521_s9 + $0x150] sm:$0xff]  ;;  %v326_v52 = vld [vmem:[%s9521_s9 + $0x158] sm:$0xff] }
 0x15f   : > { %12238 = vst [vmem:[#allocation8_spill] sm:$0xff] %v9776_v57  ;;  %v7796_v61 = vld [vmem:[#allocation3 + $0x2f4] sm:$0xf0] }
 0x160   : > { %1336 = vst [vmem:[#allocation3 + $0x2d8] sm:$0xf] %v1272_v55  ;;  %v826_v60 = vld [vmem:[#allocation2 + $0x108] sm:$0xff]  ;;  %v7799_v3 = vor.u32 %v8996_v2, %v7796_v61 }
 0x161   : > { %12239 = vst [vmem:[#allocation9_spill] sm:$0xff] %v9778_v58  ;;  %v890_v62 = vpack.c.bf16 %v826_v60, %v826_v60  ;;  %v5098_v9 = vpop.f32.mrf.mxu2  ;;  %v9005_v33 = vld [vmem:[#allocation3 + $0x31c] sm:$0xf]  ;;  %v559_v50 = vpop.f32.mrf.mxu0 }
 0x162   : > { %1337 = vst [vmem:[#allocation3 + $0x2fc] sm:$0xf] %v1273_v56  ;;  %v9788_v11 = vadd.f32 %v5098_v9, %v4930_v10  ;;  %v7794_v16 = vld [vmem:[#allocation3 + $0x2d0] sm:$0xf]  ;;  %v560_v10 = vadd.f32 %v9783_v0, %v559_v50 }
 0x163   : > { %1527 = vst [vmem:[#allocation3 + $0x2b8] sm:$0xf] %v889_v53 }
 0x164   : > { %1910 = vst [vmem:[#allocation3 + $0x29c] sm:$0xf] %v1272_v55  ;;  %v1088_v15 = vpack.c.bf16 %v560_v10, %v560_v10 }
 0x165   : > { %1911 = vst [vmem:[#allocation3 + $0x2c0] sm:$0xf] %v1273_v56  ;;  %v9798_v23 = vpop.f32.mrf.mxu1 }
 0x166   : > { %2102 = vst [vmem:[#allocation3 + $0x27c] sm:$0xf] %v889_v53 }
 0x167   : > { %2485 = vst [vmem:[#allocation3 + $0x260] sm:$0xf] %v1272_v55  ;;  %v368_v55 = vpack.c.bf16 %v326_v52, %v325_v51 }
 0x168   : > { %2486 = vst [vmem:[#allocation3 + $0x284] sm:$0xf] %v1273_v56 }
 0x169   : > { %953 = vst [vmem:[#allocation3 + $0x2f4] sm:$0xf] %v889_v53  ;;  %v9800_v28 = vpop.f32.mrf.mxu2  ;;  %7421 = vmatmul.msk.bf16.gmra.mxu0 %vm384_vm1, %v368_v55  ;;  %v561_v7 = vpop.f32.mrf.mxu0 }
 0x16a   : > { %954 = vst [vmem:[#allocation3 + $0x318] sm:$0xf] %v890_v62  ;;  %5132 = vmatmul.bf16.gmra.mxu2 %v7799_v3 }
 0x16b   : > { %1528 = vst [vmem:[#allocation3 + $0x2dc] sm:$0xf] %v890_v62 }
 0x16c   : > { %2103 = vst [vmem:[#allocation3 + $0x2a0] sm:$0xf] %v890_v62 }
 0x16d   : > { %2295 = vst [vmem:[#allocation3 + $0x2a4] sm:$0xf] %v1082_v37 }
 0x16e   : > { %761 = vst [vmem:[#allocation2 + $0x111] sm:$0xff] %v547_v1 }
 0x16f   : > { %1721 = vst [vmem:[#allocation3 + $0x304] sm:$0xf] %v1083_v4 }
 0x170   : > { %2296 = vst [vmem:[#allocation3 + $0x2c8] sm:$0xf] %v1083_v4  ;;  %v9000_v17 = vld [vmem:[#allocation3 + $0x2f0] sm:$0xf0] }
 0x171   : > { %1147 = vst [vmem:[#allocation3 + $0x340] sm:$0xf] %v1083_v4  ;;  %v7795_v20 = vor.u32 %v9000_v17, %v7794_v16  ;;  %v5103_v45 = vpop.f32.mrf.mxu2  ;;  %v7830_v56 = vld [vmem:[#allocation3 + $0x318] sm:$0xf]  ;;  %v1086_v4 = vpack.c.bf16 %v555_v63, %v555_v63 }
 0x172   : > { %762 = vst [vmem:[#allocation2 + $0x121] sm:$0xff] %v550_v6  ;;  %v4934_v39 = vpop.f32.mrf.mxu1  ;;  %v557_v6 = vadd.f32 %v9783_v0, %v556_v38 }
 0x173   : > { %4963 = vmatmul.bf16.gmra.mxu1 %v7795_v20  ;;  %1148 = vst [vmem:[#allocation3 + $0x364] sm:$0xf] %v1084_v12  ;;  %v4935_v36 = vadd.f32 %v9743_v54, %v4934_v39 }
 0x174   : > { %12240 = vst [vmem:[#allocation10_spill] sm:$0xff] %v9798_v23  ;;  %v1087_v9 = vpack.c.bf16 %v557_v6, %v557_v6 }
 0x175   : > { %1722 = vst [vmem:[#allocation3 + $0x328] sm:$0xf] %v1084_v12  ;;  %v827_v24 = vld [vmem:[#allocation2 + $0x110] sm:$0xff]  ;;  %v9804_v49 = vadd.f32 %v5103_v45, %v4935_v36 }
 0x176   : > { %v1210_v25 = vld [vmem:[#allocation2 + $0x10a] sm:$0xff]  ;;  %v1211_v27 = vld [vmem:[#allocation2 + $0x112] sm:$0xff]  ;;  %2297 = vst [vmem:[#allocation3 + $0x2ec] sm:$0xf] %v1084_v12  ;;  %v891_v30 = vpack.c.bf16 %v827_v24, %v827_v24  ;;  %v327_v24 = vld [vmem:[%s9521_s9 + $0x160] sm:$0xff] }
 0x177   : > { %12241 = vst [vmem:[#allocation11_spill] sm:$0xff] %v9800_v28  ;;  %v1274_v31 = vpack.c.bf16 %v1210_v25, %v1210_v25  ;;  %v1275_v32 = vpack.c.bf16 %v1211_v27, %v1211_v27  ;;  %v328_v25 = vld [vmem:[%s9521_s9 + $0x168] sm:$0xff]  ;;  %v564_v27 = vpop.f32.mrf.mxu0 }
 0x178   : > { %763 = vst [vmem:[#allocation2 + $0x129] sm:$0xff] %v552_v13  ;;  %v7832_v34 = vld [vmem:[#allocation3 + $0x33c] sm:$0xf0] }
 0x179   : > { %1149 = vst [vmem:[#allocation3 + $0x388] sm:$0xf] %v9796_v22  ;;  %v7835_v35 = vor.u32 %v9005_v33, %v7832_v34  ;;  %v828_v37 = vld [vmem:[#allocation2 + $0x120] sm:$0xff]  ;;  %v9814_v3 = vpop.f32.mrf.mxu2 }
 0x17a   : > { %1338 = vst [vmem:[#allocation3 + $0x320] sm:$0xf] %v1274_v31  ;;  %v892_v40 = vpack.c.bf16 %v828_v37, %v828_v37  ;;  %v9014_v61 = vld [vmem:[#allocation3 + $0x364] sm:$0xf]  ;;  %v9812_v2 = vpop.f32.mrf.mxu1 }
 0x17b   : > { %1339 = vst [vmem:[#allocation3 + $0x344] sm:$0xf] %v1275_v32  ;;  %5137 = vmatmul.bf16.gmra.mxu2 %v7835_v35 }
 0x17c   : > { %1529 = vst [vmem:[#allocation3 + $0x300] sm:$0xf] %v891_v30  ;;  %v7846_v58 = vld [vmem:[#allocation3 + $0x328] sm:$0xf] }
 0x17d   : > { %1912 = vst [vmem:[#allocation3 + $0x2e4] sm:$0xf] %v1274_v31 }
 0x17e   : > { %1913 = vst [vmem:[#allocation3 + $0x308] sm:$0xf] %v1275_v32 }
 0x17f   : > { %2104 = vst [vmem:[#allocation3 + $0x2c4] sm:$0xf] %v891_v30  ;;  %v829_v41 = vld [vmem:[#allocation2 + $0x128] sm:$0xff]  ;;  %v566_v45 = vpop.f32.mrf.mxu0 }
 0x180   : > { %2487 = vst [vmem:[#allocation3 + $0x2a8] sm:$0xf] %v1274_v31  ;;  %v1212_v42 = vld [vmem:[#allocation2 + $0x122] sm:$0xff]  ;;  %v1213_v43 = vld [vmem:[#allocation2 + $0x12a] sm:$0xff]  ;;  %v893_v46 = vpack.c.bf16 %v829_v41, %v829_v41 }
 0x181   : > { %2488 = vst [vmem:[#allocation3 + $0x2cc] sm:$0xf] %v1275_v32  ;;  %v1276_v47 = vpack.c.bf16 %v1212_v42, %v1212_v42  ;;  %v1277_v48 = vpack.c.bf16 %v1213_v43, %v1213_v43  ;;  %v7868_v53 = vld [vmem:[#allocation3 + $0x384] sm:$0xf0]  ;;  %v5108_v14 = vpop.f32.mrf.mxu2 }
 0x182   : > { %955 = vst [vmem:[#allocation3 + $0x33c] sm:$0xf] %v891_v30  ;;  %v7871_v1 = vor.u32 %v9014_v61, %v7868_v53  ;;  %v369_v30 = vpack.c.bf16 %v328_v25, %v327_v24  ;;  %v565_v53 = vadd.f32 %v9783_v0, %v564_v27  ;;  %v9224_v24 = vld [vmem:[%s12229_s3 + $0xf0] sm:$0xff]  ;;  %v9223_v27 = vld [vmem:[%s12229_s3 + $0xe8] sm:$0xff] }
 0x183   : > { %956 = vst [vmem:[#allocation3 + $0x360] sm:$0xf] %v892_v40 }
 0x184   : > { %1530 = vst [vmem:[#allocation3 + $0x324] sm:$0xf] %v892_v40  ;;  %7422 = vmatmul.msk.bf16.gmra.mxu0 %vm384_vm1, %v369_v30  ;;  %v1090_v61 = vpack.c.bf16 %v565_v53, %v565_v53 }
 0x185   : > { %2105 = vst [vmem:[#allocation3 + $0x2e8] sm:$0xf] %v892_v40 }
 0x186   : > { %957 = vst [vmem:[#allocation3 + $0x384] sm:$0xf] %v893_v46 }
 0x187   : > { %1340 = vst [vmem:[#allocation3 + $0x368] sm:$0xf] %v1276_v47 }
 0x188   : > { %1341 = vst [vmem:[#allocation3 + $0x38c] sm:$0xf] %v1277_v48 }
 0x189   : > { %1531 = vst [vmem:[#allocation3 + $0x348] sm:$0xf] %v893_v46  ;;  %v9009_v60 = vld [vmem:[#allocation3 + $0x338] sm:$0xf0]  ;;  %v4939_v13 = vpop.f32.mrf.mxu1  ;;  %v9827_v42 = vpop.f32.mrf.mxu2 }
 0x18a   : > { %1723 = vst [vmem:[#allocation3 + $0x34c] sm:$0xf] %v9796_v22  ;;  %v7831_v62 = vor.u32 %v9009_v60, %v7830_v56  ;;  %v4940_v16 = vadd.f32 %v9743_v54, %v4939_v13  ;;  %v7866_v17 = vld [vmem:[#allocation3 + $0x360] sm:$0xf] }
 0x18b   : > { %1914 = vst [vmem:[#allocation3 + $0x32c] sm:$0xf] %v1276_v47  ;;  %5142 = vmatmul.bf16.gmra.mxu2 %v7871_v1  ;;  %v330_v1 = vld [vmem:[%s9521_s9 + $0x178] sm:$0xff] }
 0x18c   : > { %12242 = vst [vmem:[#allocation12_spill] sm:$0xff] %v9812_v2  ;;  %4968 = vmatmul.bf16.gmra.mxu1 %v7831_v62  ;;  %v9820_v20 = vadd.f32 %v5108_v14, %v4940_v16  ;;  %v567_v62 = vadd.f32 %v9783_v0, %v566_v45 }
 0x18d   : > { %12243 = vst [vmem:[#allocation13_spill] sm:$0xff] %v9814_v3  ;;  %v9018_v12 = vld [vmem:[#allocation3 + $0x380] sm:$0xf0] }
 0x18e   : > { %1915 = vst [vmem:[#allocation3 + $0x350] sm:$0xf] %v1277_v48  ;;  %v7867_v19 = vor.u32 %v9018_v12, %v7866_v17 }
 0x18f   : > { %2106 = vst [vmem:[#allocation3 + $0x30c] sm:$0xf] %v893_v46  ;;  %v562_v46 = vadd.f32 %v9783_v0, %v561_v7  ;;  %v9225_v7 = vld [vmem:[%s12229_s3 + $0xf8] sm:$0xff] }
 0x190   : > { %2298 = vst [vmem:[#allocation3 + $0x310] sm:$0xf] %v9796_v22  ;;  %5412 = vmatpush.bf16.msrb.mxu0 %v9225_v7 }
 0x191   : > { %2489 = vst [vmem:[#allocation3 + $0x2f0] sm:$0xf] %v1276_v47  ;;  %v9825_v41 = vpop.f32.mrf.mxu1  ;;  %v1089_v52 = vpack.c.bf16 %v562_v46, %v562_v46 }
 0x192   : > { %2490 = vst [vmem:[#allocation3 + $0x314] sm:$0xf] %v1277_v48 }
 0x193   : > { %764 = vst [vmem:[#allocation2 + $0x139] sm:$0xff] %v555_v63  ;;  %v329_v63 = vld [vmem:[%s9521_s9 + $0x170] sm:$0xff] }
 0x194   : > { %1150 = vst [vmem:[#allocation3 + $0x3ac] sm:$0xf] %v1086_v4  ;;  %5413 = vmatpush.bf16.msrb.mxu0 %v9224_v24 }
 0x195   : > { %1724 = vst [vmem:[#allocation3 + $0x370] sm:$0xf] %v1086_v4 }
 0x196   : > { %2299 = vst [vmem:[#allocation3 + $0x334] sm:$0xf] %v1086_v4  ;;  %v9837_v4 = vpop.f32.mrf.mxu0 }
 0x197   : > { %765 = vst [vmem:[#allocation2 + $0x141] sm:$0xff] %v557_v6  ;;  %v370_v6 = vpack.c.bf16 %v330_v1, %v329_v63 }
 0x198   : > { %1151 = vst [vmem:[#allocation3 + $0x3d0] sm:$0xf] %v1087_v9  ;;  %5414 = vmatpush.bf16.msrb.mxu0 %v9223_v27 }
 0x199   : > { %1725 = vst [vmem:[#allocation3 + $0x394] sm:$0xf] %v1087_v9  ;;  %v4944_v55 = vpop.f32.mrf.mxu1  ;;  %7423 = vmatmul.msk.bf16.gmra.mxu0 %vm384_vm1, %v370_v6 }
 0x19a   : > { %v830_v18 = vld [vmem:[#allocation2 + $0x138] sm:$0xff]  ;;  %2300 = vst [vmem:[#allocation3 + $0x358] sm:$0xf] %v1087_v9  ;;  %v4945_v56 = vadd.f32 %v9743_v54, %v4944_v55  ;;  %v9843_v9 = vpack.c.bf16 %v567_v62, %v567_v62  ;;  %v333_v55 = vld [vmem:[%s9521_s9 + $0x190] sm:$0xff] }
 0x19b   : > { %v894_v22 = vpack.c.bf16 %v830_v18, %v830_v18  ;;  %766 = vst [vmem:[#allocation2 + $0x151] sm:$0xff] %v560_v10  ;;  %v9023_v38 = vld [vmem:[#allocation3 + $0x3ac] sm:$0xf] }
 0x19c   : > { %1152 = vst [vmem:[#allocation3 + $0x3f4] sm:$0xf] %v1088_v15  ;;  %4973 = vmatmul.bf16.gmra.mxu1 %v7867_v19 }
 0x19d   : > { %958 = vst [vmem:[#allocation3 + $0x3a8] sm:$0xf] %v894_v22  ;;  %v5113_v50 = vpop.f32.mrf.mxu2 }
 0x19e   : > { %1532 = vst [vmem:[#allocation3 + $0x36c] sm:$0xf] %v894_v22  ;;  %v831_v31 = vld [vmem:[#allocation2 + $0x140] sm:$0xff]  ;;  %v9832_v60 = vadd.f32 %v5113_v50, %v4945_v56  ;;  %v334_v56 = vld [vmem:[%s9521_s9 + $0x198] sm:$0xff] }
 0x19f   : > { %v1214_v32 = vld [vmem:[#allocation2 + $0x13a] sm:$0xff]  ;;  %v1215_v33 = vld [vmem:[#allocation2 + $0x142] sm:$0xff]  ;;  %2107 = vst [vmem:[#allocation3 + $0x330] sm:$0xf] %v894_v22  ;;  %v895_v34 = vpack.c.bf16 %v831_v31, %v831_v31  ;;  %v7904_v39 = vld [vmem:[#allocation3 + $0x3cc] sm:$0xf0]  ;;  %v571_v31 = vpop.f32.mrf.mxu0  ;;  %v372_v63 = vpack.c.bf16 %v334_v56, %v333_v55 }
 0x1a0   : > { %v1278_v35 = vpack.c.bf16 %v1214_v32, %v1214_v32  ;;  %v1279_v37 = vpack.c.bf16 %v1215_v33, %v1215_v33  ;;  %1726 = vst [vmem:[#allocation3 + $0x3b8] sm:$0xf] %v1088_v15  ;;  %v7907_v40 = vor.u32 %v9023_v38, %v7904_v39  ;;  %v7444_v56 = vld [vmem:[#allocation3 + $0x2c] sm:$0xf0] }
 0x1a1   : > { %959 = vst [vmem:[#allocation3 + $0x3cc] sm:$0xf] %v895_v34  ;;  %v9845_v10 = vpop.f32.mrf.mxu1  ;;  %7425 = vmatmul.msk.bf16.vlgmr.msra.gmra.mxu3 %vm384_vm1, %v372_v63 }
 0x1a2   : > { %12244 = vst [vmem:[#allocation14_spill] sm:$0xff] %v9825_v41  ;;  %5147 = vmatmul.bf16.gmra.mxu2 %v7907_v40  ;;  %v832_v43 = vld [vmem:[#allocation2 + $0x150] sm:$0xff] }
 0x1a3   : > { %12245 = vst [vmem:[#allocation15_spill] sm:$0xff] %v9827_v42  ;;  %v896_v36 = vpack.c.bf16 %v832_v43, %v832_v43  ;;  %v9032_v19 = vld [vmem:[#allocation3 + $0x3f4] sm:$0xf]  ;;  %v9222_v43 = vld [vmem:[%s12229_s3 + $0xe0] sm:$0xff] }
 0x1a4   : > { %1342 = vst [vmem:[#allocation3 + $0x3b0] sm:$0xf] %v1278_v35  ;;  %v7902_v48 = vld [vmem:[#allocation3 + $0x3a8] sm:$0xf]  ;;  %5415 = vmatpush.bf16.msrb.mxu0 %v9222_v43 }
 0x1a5   : > { %1343 = vst [vmem:[#allocation3 + $0x3d4] sm:$0xf] %v1279_v37  ;;  %v9847_v12 = vpop.f32.mrf.mxu2 }
 0x1a6   : > { %1533 = vst [vmem:[#allocation3 + $0x390] sm:$0xf] %v895_v34 }
 0x1a7   : > { %1916 = vst [vmem:[#allocation3 + $0x374] sm:$0xf] %v1278_v35  ;;  %v574_v6 = vpop.f32.mrf.mxu0 }
 0x1a8   : > { %1917 = vst [vmem:[#allocation3 + $0x398] sm:$0xf] %v1279_v37  ;;  %v9027_v47 = vld [vmem:[#allocation3 + $0x3c8] sm:$0xf0] }
 0x1a9   : > { %2108 = vst [vmem:[#allocation3 + $0x354] sm:$0xf] %v895_v34  ;;  %v7903_v51 = vor.u32 %v9027_v47, %v7902_v48  ;;  %v332_v47 = vld [vmem:[%s9521_s9 + $0x188] sm:$0xff] }
 0x1aa   : > { %2491 = vst [vmem:[#allocation3 + $0x338] sm:$0xf] %v1278_v35 }
 0x1ab   : > { %2492 = vst [vmem:[#allocation3 + $0x35c] sm:$0xf] %v1279_v37 }
 0x1ac   : > { %960 = vst [vmem:[#allocation3 + $0x3f0] sm:$0xf] %v896_v36  ;;  %4978 = vmatmul.bf16.gmra.mxu1 %v7903_v51 }
 0x1ad   : > { %1534 = vst [vmem:[#allocation3 + $0x3b4] sm:$0xf] %v896_v36  ;;  %v5118_v38 = vpop.f32.mrf.mxu2 }
 0x1ae   : > { %2109 = vst [vmem:[#allocation3 + $0x378] sm:$0xf] %v896_v36  ;;  %v4949_v32 = vpop.f32.mrf.mxu1 }
 0x1af   : > { %2301 = vst [vmem:[#allocation3 + $0x37c] sm:$0xf] %v1088_v15  ;;  %v4950_v33 = vadd.f32 %v9743_v54, %v4949_v32  ;;  %v576_v32 = vpop.f32.mrf.mxu0 }
 0x1b0   : > { %767 = vst [vmem:[#allocation2 + $0x159] sm:$0xff] %v562_v46  ;;  %v331_v46 = vld [vmem:[%s9521_s9 + $0x180] sm:$0xff] }
 0x1b1   : > { %1153 = vst [vmem:[#allocation3 + $0x418] sm:$0xf] %v1089_v52  ;;  %v9860_v36 = vadd.f32 %v5118_v38, %v4950_v33  ;;  %v371_v51 = vpack.c.bf16 %v332_v47, %v331_v46  ;;  %v9436_v38 = vld [vmem:[%s12229_s3 + $0x58] sm:$0xff] }
 0x1b2   : > { %1727 = vst [vmem:[#allocation3 + $0x3dc] sm:$0xf] %v1089_v52 }
 0x1b3   : > { %2302 = vst [vmem:[#allocation3 + $0x3a0] sm:$0xf] %v1089_v52  ;;  %v7938_v37 = vld [vmem:[#allocation3 + $0x3f0] sm:$0xf]  ;;  %7424 = vmatmul.msk.bf16.gmra.mxu0 %vm384_vm1, %v371_v51 }
 0x1b4   : > { %768 = vst [vmem:[#allocation2 + $0x169] sm:$0xff] %v565_v53  ;;  %v9221_v53 = vld [vmem:[%s12229_s3 + $0xd8] sm:$0xff]  ;;  %v9437_v51 = vld [vmem:[%s12229_s3 + $0x50] sm:$0xff] }
 0x1b5   : > { %1154 = vst [vmem:[#allocation3 + $0x43c] sm:$0xf] %v1090_v61  ;;  %5416 = vmatpush.bf16.msrb.mxu0 %v9221_v53 }
 0x1b6   : > { %12246 = vst [vmem:[#allocation16_spill] sm:$0xff] %v9845_v10  ;;  %v7630_v10 = vld [vmem:[#allocation3 + $0x178] sm:$0xf] }
 0x1b7   : > { %12247 = vst [vmem:[#allocation17_spill] sm:$0xff] %v9847_v12  ;;  %v833_v13 = vld [vmem:[#allocation2 + $0x158] sm:$0xff]  ;;  %v579_v46 = vpop.f32.mrf.mxu0 }
 0x1b8   : > { %1728 = vst [vmem:[#allocation3 + $0x400] sm:$0xf] %v1090_v61  ;;  %v1216_v14 = vld [vmem:[#allocation2 + $0x152] sm:$0xff]  ;;  %v1217_v15 = vld [vmem:[#allocation2 + $0x15a] sm:$0xff]  ;;  %v897_v16 = vpack.c.bf16 %v833_v13, %v833_v13 }
 0x1b9   : > { %2303 = vst [vmem:[#allocation3 + $0x3c4] sm:$0xf] %v1090_v61  ;;  %v1280_v17 = vpack.c.bf16 %v1216_v14, %v1216_v14  ;;  %v1281_v18 = vpack.c.bf16 %v1217_v15, %v1217_v15  ;;  %v7940_v22 = vld [vmem:[#allocation3 + $0x414] sm:$0xf0]  ;;  %v9220_v13 = vld [vmem:[%s12229_s3 + $0xd0] sm:$0xff]  ;;  %v9877_v15 = vpop.f32.mrf.mxu1 }
 0x1ba   : > { %769 = vst [vmem:[#allocation2 + $0x171] sm:$0xff] %v567_v62  ;;  %v7943_v25 = vor.u32 %v9032_v19, %v7940_v22  ;;  %v9432_v14 = vld [vmem:[%s12229_s3 + $0x78] sm:$0xff]  ;;  %5417 = vmatpush.bf16.msrb.mxu0 %v9220_v13  ;;  %v572_v19 = vadd.f32 %v9783_v0, %v571_v31  ;;  %v9894_v31 = vpop.f32.mrf.mxu2 }
 0x1bb   : > { %1155 = vst [vmem:[#allocation3 + $0x460] sm:$0xf] %v9843_v9  ;;  %v834_v30 = vld [vmem:[#allocation2 + $0x168] sm:$0xff]  ;;  %9283 = vmatpush.bf16.msra.mxu3 %v9432_v14 }
 0x1bc   : > { %961 = vst [vmem:[#allocation3 + $0x414] sm:$0xf] %v897_v16  ;;  %5152 = vmatmul.bf16.gmra.mxu2 %v7943_v25  ;;  %v898_v34 = vpack.c.bf16 %v834_v30, %v834_v30  ;;  %v9041_v1 = vld [vmem:[#allocation3 + $0x43c] sm:$0xf]  ;;  %v9434_v25 = vld [vmem:[%s12229_s3 + $0x68] sm:$0xff]  ;;  %v575_v30 = vadd.f32 %v9783_v0, %v574_v6  ;;  %v1667_v33 = vpack.c.bf16 %v572_v19, %v572_v19 }
 0x1bd   : > { %1344 = vst [vmem:[#allocation3 + $0x3f8] sm:$0xf] %v1280_v17  ;;  %v336_v6 = vld [vmem:[%s9521_s9 + $0x1a8] sm:$0xff] }
 0x1be   : > { %1345 = vst [vmem:[#allocation3 + $0x41c] sm:$0xf] %v1281_v18 }
 0x1bf   : > { %1535 = vst [vmem:[#allocation3 + $0x3d8] sm:$0xf] %v897_v16 }
 0x1c0   : > { %1918 = vst [vmem:[#allocation3 + $0x3bc] sm:$0xf] %v1280_v17 }
 0x1c1   : > { %1919 = vst [vmem:[#allocation3 + $0x3e0] sm:$0xf] %v1281_v18  ;;  %v835_v35 = vld [vmem:[#allocation2 + $0x170] sm:$0xff] }
 0x1c2   : > { %2110 = vst [vmem:[#allocation3 + $0x39c] sm:$0xf] %v897_v16  ;;  %v1218_v39 = vld [vmem:[#allocation2 + $0x16a] sm:$0xff]  ;;  %v1219_v40 = vld [vmem:[#allocation2 + $0x172] sm:$0xff]  ;;  %v899_v48 = vpack.c.bf16 %v835_v35, %v835_v35  ;;  %v7976_v62 = vld [vmem:[#allocation3 + $0x45c] sm:$0xf0]  ;;  %v570_v16 = vadd.f32 %v9783_v0, %v9837_v4  ;;  %v1094_v35 = vpack.c.bf16 %v575_v30, %v575_v30 }
 0x1c3   : > { %2493 = vst [vmem:[#allocation3 + $0x380] sm:$0xf] %v1280_v17  ;;  %v9036_v45 = vld [vmem:[#allocation3 + $0x410] sm:$0xf0]  ;;  %v1282_v52 = vpack.c.bf16 %v1218_v39, %v1218_v39  ;;  %v1283_v61 = vpack.c.bf16 %v1219_v40, %v1219_v40  ;;  %v7979_v7 = vor.u32 %v9041_v1, %v7976_v62  ;;  %v9219_v17 = vld [vmem:[%s12229_s3 + $0xc8] sm:$0xff]  ;;  %v5123_v62 = vpop.f32.mrf.mxu2  ;;  %v335_v1 = vld [vmem:[%s9521_s9 + $0x1a0] sm:$0xff] }
 0x1c4   : > { %2494 = vst [vmem:[#allocation3 + $0x3a4] sm:$0xf] %v1281_v18  ;;  %v7939_v50 = vor.u32 %v9036_v45, %v7938_v37  ;;  %v9433_v18 = vld [vmem:[%s12229_s3 + $0x70] sm:$0xff]  ;;  %v1666_v4 = vpack.c.bf16 %v570_v16, %v570_v16  ;;  %5418 = vmatpush.bf16.msrb.mxu0 %v9219_v17  ;;  %v577_v37 = vadd.f32 %v9783_v0, %v576_v32  ;;  %v9438_v17 = vld [vmem:[%s12229_s3 + $0x48] sm:$0xff]  ;;  %v9439_v32 = vld [vmem:[%s12229_s3 + $0x40] sm:$0xff] }
 0x1c5   : > { %962 = vst [vmem:[#allocation3 + $0x438] sm:$0xf] %v898_v34  ;;  %9284 = vmatpush.bf16.msra.mxu3 %v9433_v18  ;;  %v373_v14 = vpack.c.bf16 %v336_v6, %v335_v1  ;;  %v7480_v1 = vld [vmem:[#allocation3 + $0x74] sm:$0xf0] }
 0x1c6   : > { %1536 = vst [vmem:[#allocation3 + $0x3fc] sm:$0xf] %v898_v34  ;;  %4983 = vmatmul.bf16.gmra.mxu1 %v7939_v50  ;;  %v1095_v43 = vpack.c.bf16 %v577_v37, %v577_v37 }
 0x1c7   : > { %2111 = vst [vmem:[#allocation3 + $0x3c0] sm:$0xf] %v898_v34  ;;  %v9435_v34 = vld [vmem:[%s12229_s3 + $0x60] sm:$0xff]  ;;  %7426 = vmatmul.msk.bf16.gmra.mxu3 %vm384_vm1, %v373_v14 }
 0x1c8   : > { %963 = vst [vmem:[#allocation3 + $0x45c] sm:$0xf] %v899_v48 }
 0x1c9   : > { %1346 = vst [vmem:[#allocation3 + $0x440] sm:$0xf] %v1282_v52  ;;  %9285 = vmatpush.bf16.msra.mxu3 %v9434_v25 }
 0x1ca   : > { %1347 = vst [vmem:[#allocation3 + $0x464] sm:$0xf] %v1283_v61 }
 0x1cb   : > { %1537 = vst [vmem:[#allocation3 + $0x420] sm:$0xf] %v899_v48 }
 0x1cc   : > { %12248 = vst [vmem:[#allocation18_spill] sm:$0xff] %v9877_v15  ;;  %5157 = vmatmul.bf16.gmra.mxu2 %v7979_v7  ;;  %v7974_v24 = vld [vmem:[#allocation3 + $0x438] sm:$0xf] }
 0x1cd   : > { %1729 = vst [vmem:[#allocation3 + $0x424] sm:$0xf] %v9843_v9  ;;  %9286 = vmatpush.bf16.msra.mxu3 %v9435_v34  ;;  %v836_v34 = vld [vmem:[#allocation2 + $0x1b0] sm:$0xff]  ;;  %v7596_v15 = vld [vmem:[#allocation3 + $0x154] sm:$0xf0] }
 0x1ce   : > { %1920 = vst [vmem:[#allocation3 + $0x404] sm:$0xf] %v1282_v52 }
 0x1cf   : > { %1921 = vst [vmem:[#allocation3 + $0x428] sm:$0xf] %v1283_v61  ;;  %v9045_v22 = vld [vmem:[#allocation3 + $0x458] sm:$0xf0] }
 0x1d0   : > { %2112 = vst [vmem:[#allocation3 + $0x3e4] sm:$0xf] %v899_v48  ;;  %v7975_v27 = vor.u32 %v9045_v22, %v7974_v24 }
 0x1d1   : > { %2304 = vst [vmem:[#allocation3 + $0x3e8] sm:$0xf] %v9843_v9  ;;  %v4954_v9 = vpop.f32.mrf.mxu1  ;;  %9287 = vmatpush.bf16.msra.mxu3 %v9436_v38  ;;  %v1028_v38 = vld [vmem:[#allocation2 + $0x1b1] sm:$0xff] }
 0x1d2   : > { %2495 = vst [vmem:[#allocation3 + $0x3c8] sm:$0xf] %v1282_v52  ;;  %v4955_v45 = vadd.f32 %v9743_v54, %v4954_v9  ;;  %v9923_v9 = vpop.f32.mrf.mxu2 }
 0x1d3   : > { %2496 = vst [vmem:[#allocation3 + $0x3ec] sm:$0xf] %v1283_v61  ;;  %v9218_v61 = vld [vmem:[%s12229_s3 + $0xc0] sm:$0xff] }
 0x1d4   : > { %770 = vst [vmem:[#allocation2 + $0x181] sm:$0xff] %v570_v16  ;;  %v9914_v13 = vadd.f32 %v5123_v62, %v4955_v45  ;;  %5419 = vmatpush.bf16.msrb.mxu0 %v9218_v61  ;;  %v8907_v16 = vld [vmem:[#allocation3 + $0xc] sm:$0xf] }
 0x1d5   : > { %1730 = vst [vmem:[#allocation3 + $0x448] sm:$0xf] %v1666_v4  ;;  %9288 = vmatpush.bf16.msra.mxu3 %v9437_v51  ;;  %v9440_v45 = vld [vmem:[#allocation2 + $0x8] sm:$0xff]  ;;  %v1092_v51 = vpack.c.bf16 %v1028_v38, %v1028_v38 }
 0x1d6   : > { %2305 = vst [vmem:[#allocation3 + $0x40c] sm:$0xf] %v1666_v4  ;;  %4988 = vmatmul.bf16.gmra.mxu1 %v7975_v27  ;;  %v581_v27 = vpop.f32.mrf.mxu0 }
 0x1d7   : > { %12249 = vst [vmem:[#allocation19_spill] sm:$0xff] %v9894_v31 }
 0x1d8   : > { %771 = vst [vmem:[#allocation2 + $0x189] sm:$0xff] %v572_v19  ;;  %v7447_v19 = vor.u32 %v8907_v16, %v7444_v56 }
 0x1d9   : > { %1731 = vst [vmem:[#allocation3 + $0x46c] sm:$0xf] %v1667_v33  ;;  %v9910_v63 = vpop.f32.mrf.mxu1  ;;  %9289 = vmatpush.bf16.msra.mxu3 %v9438_v17 }
 0x1da   : > { %2306 = vst [vmem:[#allocation3 + $0x430] sm:$0xf] %v1667_v33  ;;  %5420 = vmatmul.bf16.vlgmr.msrb.gmra.mxu0 %v7447_v19 }
 0x1db   : > { %772 = vst [vmem:[#allocation2 + $0x1c9] sm:$0xff] %v575_v30  ;;  %v1410_v39 = vld [vmem:[#allocation2 + $0x180] sm:$0xff] }
 0x1dc   : > { %1158 = vst [vmem:[#allocation3 + $0x4cc] sm:$0xf] %v1094_v35  ;;  %v1474_v40 = vpack.c.bf16 %v1410_v39, %v1410_v39  ;;  %v900_v39 = vpack.c.bf16 %v836_v34, %v836_v34 }
 0x1dd   : > { %1732 = vst [vmem:[#allocation3 + $0x490] sm:$0xf] %v1094_v35  ;;  %9290 = vmatpush.bf16.msra.mxu3 %v9439_v32  ;;  %v9233_v35 = vld [vmem:[%s12229_s3 + $0x138] sm:$0xff]  ;;  %v5128_v62 = vpop.f32.mrf.mxu2 }
 0x1de   : > { %773 = vst [vmem:[#allocation2 + $0x1d1] sm:$0xff] %v577_v37  ;;  %5581 = vmatpush.bf16.msrb.mxu1 %v9233_v35  ;;  %v584_v56 = vpop.f32.mrf.mxu0 }
 0x1df   : > { %1538 = vst [vmem:[#allocation3 + $0x444] sm:$0xf] %v1474_v40  ;;  %v1411_v47 = vld [vmem:[#allocation2 + $0x188] sm:$0xff]  ;;  %v585_v16 = vadd.f32 %v9783_v0, %v584_v56 }
 0x1e0   : > { %v1794_v48 = vld [vmem:[#allocation2 + $0x182] sm:$0xff]  ;;  %v1795_v50 = vld [vmem:[#allocation2 + $0x18a] sm:$0xff]  ;;  %2113 = vst [vmem:[#allocation3 + $0x408] sm:$0xf] %v1474_v40  ;;  %v1475_v52 = vpack.c.bf16 %v1411_v47, %v1411_v47  ;;  %v1029_v40 = vld [vmem:[#allocation2 + $0x1b9] sm:$0xff]  ;;  %v901_v47 = vpack.c.bf16 %v9440_v45, %v9440_v45 }
 0x1e1   : > { %v1858_v53 = vpack.c.bf16 %v1794_v48, %v1794_v48  ;;  %v1859_v55 = vpack.c.bf16 %v1795_v50, %v1795_v50  ;;  %1159 = vst [vmem:[#allocation3 + $0x4f0] sm:$0xf] %v1095_v43  ;;  %v4959_v37 = vpop.f32.mrf.mxu1  ;;  %v580_v48 = vadd.f32 %v9783_v0, %v579_v46  ;;  %v8916_v46 = vld [vmem:[#allocation3 + $0x54] sm:$0xf] }
 0x1e2   : > { %12250 = vst [vmem:[#allocation20_spill] sm:$0xff] %v9910_v63  ;;  %v838_v7 = vld [vmem:[#allocation2 + $0x1c8] sm:$0xff]  ;;  %v4960_v50 = vadd.f32 %v9743_v54, %v4959_v37  ;;  %v7483_v54 = vor.u32 %v8916_v46, %v7480_v1 }
 0x1e3   : > { %1539 = vst [vmem:[#allocation3 + $0x468] sm:$0xf] %v1475_v52  ;;  %v902_v18 = vpack.c.bf16 %v838_v7, %v838_v7  ;;  %v1096_v6 = vpack.c.bf16 %v580_v48, %v580_v48 }
 0x1e4   : > { %1922 = vst [vmem:[#allocation3 + $0x44c] sm:$0xf] %v1858_v53  ;;  %v9933_v7 = vadd.f32 %v5128_v62, %v4960_v50 }
 0x1e5   : > { %1923 = vst [vmem:[#allocation3 + $0x470] sm:$0xf] %v1859_v55  ;;  %v839_v22 = vld [vmem:[#allocation2 + $0x1d0] sm:$0xff] }
 0x1e6   : > { %2114 = vst [vmem:[#allocation3 + $0x42c] sm:$0xf] %v1475_v52  ;;  %v1222_v4 = vld [vmem:[#allocation2 + $0x1ca] sm:$0xff]  ;;  %v1223_v24 = vld [vmem:[#allocation2 + $0x1d2] sm:$0xff]  ;;  %v903_v25 = vpack.c.bf16 %v839_v22, %v839_v22  ;;  %v9939_v22 = vpop.f32.mrf.mxu2 }
 0x1e7   : > { %2497 = vst [vmem:[#allocation3 + $0x410] sm:$0xf] %v1858_v53  ;;  %v1286_v30 = vpack.c.bf16 %v1222_v4, %v1222_v4  ;;  %v1287_v33 = vpack.c.bf16 %v1223_v24, %v1223_v24  ;;  %v337_v52 = vld [vmem:[%s9521_s9 + $0x1b0] sm:$0xff]  ;;  %v338_v53 = vld [vmem:[%s9521_s9 + $0x1b8] sm:$0xff] }
 0x1e8   : > { %2498 = vst [vmem:[#allocation3 + $0x434] sm:$0xf] %v1859_v55  ;;  %v1093_v55 = vpack.c.bf16 %v1029_v40, %v1029_v40  ;;  %v374_v61 = vpack.c.bf16 %v338_v53, %v337_v52  ;;  %v8925_v53 = vld [vmem:[#allocation3 + $0x9c] sm:$0xf] }
 0x1e9   : > { %966 = vst [vmem:[#allocation3 + $0x4c8] sm:$0xf] %v902_v18 }
 0x1ea   : > { %1540 = vst [vmem:[#allocation3 + $0x48c] sm:$0xf] %v902_v18  ;;  %7427 = vmatmul.msk.bf16.gmra.mxu3 %vm384_vm1, %v374_v61  ;;  %5425 = vmatmul.bf16.gmra.mxu0 %v7483_v54  ;;  %v9937_v18 = vpop.f32.mrf.mxu1 }
 0x1eb   : > { %12251 = vst [vmem:[#allocation21_spill] sm:$0xff] %v9923_v9 }
 0x1ec   : > { %967 = vst [vmem:[#allocation3 + $0x4ec] sm:$0xf] %v903_v25 }
 0x1ed   : > { %1350 = vst [vmem:[#allocation3 + $0x4d0] sm:$0xf] %v1286_v30 }
 0x1ee   : > { %1351 = vst [vmem:[#allocation3 + $0x4f4] sm:$0xf] %v1287_v33 }
 0x1ef   : > { %1541 = vst [vmem:[#allocation3 + $0x4b0] sm:$0xf] %v903_v25  ;;  %v9941_v25 = vpack.c.bf16 %v585_v16, %v585_v16 }
 0x1f0   : > { %1733 = vst [vmem:[#allocation3 + $0x4b4] sm:$0xf] %v1095_v43  ;;  %v582_v43 = vadd.f32 %v9783_v0, %v581_v27  ;;  %v586_v27 = vpop.f32.mrf.mxu0  ;;  %v8046_v54 = vld [vmem:[#allocation3 + $0x4c8] sm:$0xf] }
 0x1f1   : > { %1924 = vst [vmem:[#allocation3 + $0x494] sm:$0xf] %v1286_v30 }
 0x1f2   : > { %1925 = vst [vmem:[#allocation3 + $0x4b8] sm:$0xf] %v1287_v33  ;;  %v1097_v14 = vpack.c.bf16 %v582_v43, %v582_v43  ;;  %v4964_v50 = vpop.f32.mrf.mxu1 }
 0x1f3   : > { %964 = vst [vmem:[#allocation3 + $0x480] sm:$0xf] %v900_v39 }
 0x1f4   : > { %965 = vst [vmem:[#allocation3 + $0x4a4] sm:$0xf] %v901_v47  ;;  %v5133_v47 = vpop.f32.mrf.mxu2 }
 0x1f5   : > { %1156 = vst [vmem:[#allocation3 + $0x484] sm:$0xf] %v1092_v51  ;;  %v9948_v51 = vld [vmem:[%s12230_s4] ss:$0 sm:$0xff] }
 0x1f6   : > { %1157 = vst [vmem:[#allocation3 + $0x4a8] sm:$0xf] %v1093_v55  ;;  %v4965_v52 = vadd.f32 %v9948_v51, %v4964_v50  ;;  %v9063_v55 = vld [vmem:[#allocation3 + $0x4e8] sm:$0xf0] }
 0x1f7   : > { %774 = vst [vmem:[#allocation2 + $0x1e1] sm:$0xff] %v580_v48  ;;  %v7516_v48 = vld [vmem:[#allocation3 + $0xbc] sm:$0xf0] }
 0x1f8   : > { %1160 = vst [vmem:[#allocation3 + $0x514] sm:$0xf] %v1096_v6  ;;  %v589_v56 = vpop.f32.mrf.mxu0  ;;  %v7519_v61 = vor.u32 %v8925_v53, %v7516_v48  ;;  %v9951_v1 = vadd.f32 %v5133_v47, %v4965_v52  ;;  %v8934_v47 = vld [vmem:[#allocation3 + $0xe4] sm:$0xf] }
 0x1f9   : > { %1734 = vst [vmem:[#allocation3 + $0x4d8] sm:$0xf] %v1096_v6 }
 0x1fa   : > { %v8010_v17 = vld [vmem:[#allocation3 + $0x480] sm:$0xf]  ;;  %2309 = vst [vmem:[#allocation3 + $0x49c] sm:$0xf] %v1096_v6  ;;  %5430 = vmatmul.bf16.gmra.mxu0 %v7519_v61 }
 0x1fb   : > { %12252 = vst [vmem:[#allocation22_spill] sm:$0xff] %v9937_v18  ;;  %v9054_v19 = vld [vmem:[#allocation3 + $0x4a0] sm:$0xf0] }
 0x1fc   : > { %775 = vst [vmem:[#allocation2 + $0x1e9] sm:$0xff] %v582_v43  ;;  %v8011_v4 = vor.u32 %v9054_v19, %v8010_v17  ;;  %v9050_v24 = vld [vmem:[#allocation3 + $0x484] sm:$0xf]  ;;  %v340_v43 = vld [vmem:[%s9521_s9 + $0x1c8] sm:$0xff] }
 0x1fd   : > { %12253 = vst [vmem:[#allocation23_spill] sm:$0xff] %v9939_v22  ;;  %v8012_v30 = vld [vmem:[#allocation3 + $0x4a4] sm:$0xf0]  ;;  %v339_v6 = vld [vmem:[%s9521_s9 + $0x1c0] sm:$0xff]  ;;  %v9059_v19 = vld [vmem:[#allocation3 + $0x4cc] sm:$0xf] }
 0x1fe   : > { %1161 = vst [vmem:[#allocation3 + $0x538] sm:$0xf] %v1097_v14  ;;  %4993 = vmatmul.bf16.gmra.mxu1 %v8011_v4  ;;  %v8015_v32 = vor.u32 %v9050_v24, %v8012_v30  ;;  %v840_v33 = vld [vmem:[#allocation2 + $0x1e0] sm:$0xff]  ;;  %v375_v46 = vpack.c.bf16 %v340_v43, %v339_v6  ;;  %v587_v4 = vadd.f32 %v9783_v0, %v586_v27  ;;  %v9957_v24 = vpop.f32.mrf.mxu2 }
 0x1ff   : > { %1735 = vst [vmem:[#allocation3 + $0x4fc] sm:$0xf] %v1097_v14  ;;  %v904_v34 = vpack.c.bf16 %v840_v33, %v840_v33 }
 0x200   : > { %2310 = vst [vmem:[#allocation3 + $0x4c0] sm:$0xf] %v1097_v14  ;;  %5162 = vmatmul.bf16.gmra.mxu2 %v8015_v32  ;;  %v8048_v14 = vld [vmem:[#allocation3 + $0x4ec] sm:$0xf0]  ;;  %7428 = vmatmul.msk.bf16.gmra.mxu3 %vm384_vm1, %v375_v46  ;;  %v9959_v32 = vpop.f32.mrf.mxu1  ;;  %v1099_v33 = vpack.c.bf16 %v587_v4, %v587_v4 }
 0x201   : > { %776 = vst [vmem:[#allocation2 + $0x1f9] sm:$0xff] %v585_v16  ;;  %v8047_v16 = vor.u32 %v9063_v55, %v8046_v54  ;;  %v8051_v30 = vor.u32 %v9059_v19, %v8048_v14  ;;  %v9068_v14 = vld [vmem:[#allocation3 + $0x514] sm:$0xf] }
 0x202   : > { %1162 = vst [vmem:[#allocation3 + $0x55c] sm:$0xf] %v9941_v25 }
 0x203   : > { %968 = vst [vmem:[#allocation3 + $0x510] sm:$0xf] %v904_v34  ;;  %v841_v35 = vld [vmem:[#allocation2 + $0x1e8] sm:$0xff] }
 0x204   : > { %1542 = vst [vmem:[#allocation3 + $0x4d4] sm:$0xf] %v904_v34  ;;  %v1224_v37 = vld [vmem:[#allocation2 + $0x1e2] sm:$0xff]  ;;  %v1225_v38 = vld [vmem:[#allocation2 + $0x1ea] sm:$0xff]  ;;  %v905_v39 = vpack.c.bf16 %v841_v35, %v841_v35  ;;  %v591_v35 = vpop.f32.mrf.mxu0 }
 0x205   : > { %2117 = vst [vmem:[#allocation3 + $0x498] sm:$0xf] %v904_v34  ;;  %v1288_v40 = vpack.c.bf16 %v1224_v37, %v1224_v37  ;;  %v1289_v45 = vpack.c.bf16 %v1225_v38, %v1225_v38  ;;  %v590_v34 = vadd.f32 %v9783_v0, %v589_v56  ;;  %v592_v37 = vadd.f32 %v9783_v0, %v591_v35  ;;  %v8084_v53 = vld [vmem:[#allocation3 + $0x534] sm:$0xf0] }
 0x206   : > { %1736 = vst [vmem:[#allocation3 + $0x520] sm:$0xf] %v9941_v25  ;;  %v5138_v38 = vpop.f32.mrf.mxu2 }
 0x207   : > { %969 = vst [vmem:[#allocation3 + $0x534] sm:$0xf] %v905_v39  ;;  %v1100_v27 = vpack.c.bf16 %v590_v34, %v590_v34  ;;  %v9965_v52 = vpack.c.bf16 %v592_v37, %v592_v37 }
 0x208   : > { %1352 = vst [vmem:[#allocation3 + $0x518] sm:$0xf] %v1288_v40  ;;  %v842_v62 = vld [vmem:[#allocation2 + $0x1f8] sm:$0xff] }
 0x209   : > { %1353 = vst [vmem:[#allocation3 + $0x53c] sm:$0xf] %v1289_v45  ;;  %v906_v17 = vpack.c.bf16 %v842_v62, %v842_v62 }
 0x20a   : > { %1543 = vst [vmem:[#allocation3 + $0x4f8] sm:$0xf] %v905_v39 }
 0x20b   : > { %1926 = vst [vmem:[#allocation3 + $0x4dc] sm:$0xf] %v1288_v40 }
 0x20c   : > { %1927 = vst [vmem:[#allocation3 + $0x500] sm:$0xf] %v1289_v45  ;;  %v594_v54 = vpop.f32.mrf.mxu0 }
 0x20d   : > { %2118 = vst [vmem:[#allocation3 + $0x4bc] sm:$0xf] %v905_v39  ;;  %v7552_v39 = vld [vmem:[#allocation3 + $0x104] sm:$0xf0] }
 0x20e   : > { %12254 = vst [vmem:[#allocation24_spill] sm:$0xff] %v9957_v24  ;;  %4998 = vmatmul.bf16.gmra.mxu1 %v8047_v16  ;;  %v7555_v48 = vor.u32 %v8934_v47, %v7552_v39  ;;  %v9072_v50 = vld [vmem:[#allocation3 + $0x530] sm:$0xf0]  ;;  %v9972_v19 = vpop.f32.mrf.mxu2  ;;  %v7588_v39 = vld [vmem:[#allocation3 + $0x14c] sm:$0xf0] }
 0x20f   : > { %2501 = vst [vmem:[#allocation3 + $0x4a0] sm:$0xf] %v1288_v40  ;;  %v4969_v40 = vpop.f32.mrf.mxu1  ;;  %v341_v16 = vld [vmem:[%s9521_s9 + $0x1d0] sm:$0xff] }
 0x210   : > { %12255 = vst [vmem:[#allocation25_spill] sm:$0xff] %v9959_v32  ;;  %5167 = vmatmul.bf16.gmra.mxu2 %v8051_v30  ;;  %5435 = vmatmul.bf16.gmra.mxu0 %v7555_v48 }
 0x211   : > { %2502 = vst [vmem:[#allocation3 + $0x4c4] sm:$0xf] %v1289_v45  ;;  %v4970_v45 = vadd.f32 %v9948_v51, %v4969_v40 }
 0x212   : > { %970 = vst [vmem:[#allocation3 + $0x558] sm:$0xf] %v906_v17 }
 0x213   : > { %1544 = vst [vmem:[#allocation3 + $0x51c] sm:$0xf] %v906_v17  ;;  %v9967_v0 = vadd.f32 %v5138_v38, %v4970_v45 }
 0x214   : > { %2119 = vst [vmem:[#allocation3 + $0x4e0] sm:$0xf] %v906_v17  ;;  %v342_v17 = vld [vmem:[%s9521_s9 + $0x1d8] sm:$0xff]  ;;  %v596_v45 = vpop.f32.mrf.mxu0 }
 0x215   : > { %2311 = vst [vmem:[#allocation3 + $0x4e4] sm:$0xf] %v9941_v25  ;;  %v8082_v25 = vld [vmem:[#allocation3 + $0x510] sm:$0xf]  ;;  %v376_v30 = vpack.c.bf16 %v342_v17, %v341_v16  ;;  %v9077_v16 = vld [vmem:[#allocation3 + $0x55c] sm:$0xf] }
 0x216   : > { %777 = vst [vmem:[#allocation2 + $0x201] sm:$0xff] %v587_v4  ;;  %v8083_v46 = vor.u32 %v9072_v50, %v8082_v25  ;;  %v8087_v4 = vor.u32 %v9068_v14, %v8084_v53  ;;  %v5143_v50 = vpop.f32.mrf.mxu2  ;;  %v8943_v25 = vld [vmem:[#allocation3 + $0x12c] sm:$0xf]  ;;  %v343_v17 = vld [vmem:[%s9521_s9 + $0x1e0] sm:$0xff] }
 0x217   : > { %1163 = vst [vmem:[#allocation3 + $0x580] sm:$0xf] %v1099_v33  ;;  %7429 = vmatmul.msk.bf16.gmra.mxu3 %vm384_vm1, %v376_v30 }
 0x218   : > { %1737 = vst [vmem:[#allocation3 + $0x544] sm:$0xf] %v1099_v33 }
 0x219   : > { %2312 = vst [vmem:[#allocation3 + $0x508] sm:$0xf] %v1099_v33  ;;  %v9974_v33 = vpop.f32.mrf.mxu1 }
 0x21a   : > { %778 = vst [vmem:[#allocation2 + $0x211] sm:$0xff] %v590_v34 }
 0x21b   : > { %1164 = vst [vmem:[#allocation3 + $0x5a4] sm:$0xf] %v1100_v27 }
 0x21c   : > { %1738 = vst [vmem:[#allocation3 + $0x568] sm:$0xf] %v1100_v27 }
 0x21d   : > { %v843_v55 = vld [vmem:[#allocation2 + $0x200] sm:$0xff]  ;;  %2313 = vst [vmem:[#allocation3 + $0x52c] sm:$0xf] %v1100_v27 }
 0x21e   : > { %v1226_v56 = vld [vmem:[#allocation2 + $0x1fa] sm:$0xff]  ;;  %v1227_v61 = vld [vmem:[#allocation2 + $0x202] sm:$0xff]  ;;  %v907_v62 = vpack.c.bf16 %v843_v55, %v843_v55  ;;  %779 = vst [vmem:[#allocation2 + $0x219] sm:$0xff] %v592_v37  ;;  %5003 = vmatmul.bf16.gmra.mxu1 %v8083_v46  ;;  %v9232_v46 = vld [vmem:[%s12229_s3 + $0x130] sm:$0xff] }
 0x21f   : > { %v1290_v6 = vpack.c.bf16 %v1226_v56, %v1226_v56  ;;  %v1291_v43 = vpack.c.bf16 %v1227_v61, %v1227_v61  ;;  %1165 = vst [vmem:[#allocation3 + $0x5c8] sm:$0xf] %v9965_v52  ;;  %v7591_v56 = vor.u32 %v8943_v25, %v7588_v39  ;;  %5582 = vmatpush.bf16.msrb.mxu1 %v9232_v46  ;;  %v9995_v39 = vpop.f32.mrf.mxu2 }
 0x220   : > { %12256 = vst [vmem:[#allocation26_spill] sm:$0xff] %v9972_v19  ;;  %5172 = vmatmul.bf16.gmra.mxu2 %v8087_v4  ;;  %v344_v4 = vld [vmem:[%s9521_s9 + $0x1e8] sm:$0xff] }
 0x221   : > { %971 = vst [vmem:[#allocation3 + $0x57c] sm:$0xf] %v907_v62  ;;  %v844_v34 = vld [vmem:[#allocation2 + $0x210] sm:$0xff]  ;;  %v4974_v48 = vpop.f32.mrf.mxu1  ;;  %5440 = vmatmul.bf16.gmra.mxu0 %v7591_v56 }
 0x222   : > { %1354 = vst [vmem:[#allocation3 + $0x560] sm:$0xf] %v1290_v6  ;;  %v908_v35 = vpack.c.bf16 %v844_v34, %v844_v34  ;;  %v4975_v55 = vadd.f32 %v9948_v51, %v4974_v48  ;;  %v9989_v34 = vld [vmem:[%s12228_s2] ss:$0 sm:$0xff]  ;;  %v8952_v56 = vld [vmem:[#allocation3 + $0x174] sm:$0xf] }
 0x223   : > { %12257 = vst [vmem:[#allocation27_spill] sm:$0xff] %v9974_v33  ;;  %v7840_v33 = vld [vmem:[#allocation3 + $0x344] sm:$0xf0] }
 0x224   : > { %1355 = vst [vmem:[#allocation3 + $0x584] sm:$0xf] %v1291_v43 }
 0x225   : > { %1545 = vst [vmem:[#allocation3 + $0x540] sm:$0xf] %v907_v62  ;;  %v845_v27 = vld [vmem:[#allocation2 + $0x218] sm:$0xff] }
 0x226   : > { %1928 = vst [vmem:[#allocation3 + $0x524] sm:$0xf] %v1290_v6  ;;  %v1228_v37 = vld [vmem:[#allocation2 + $0x212] sm:$0xff]  ;;  %v1229_v38 = vld [vmem:[#allocation2 + $0x21a] sm:$0xff]  ;;  %v909_v40 = vpack.c.bf16 %v845_v27, %v845_v27  ;;  %v377_v27 = vpack.c.bf16 %v344_v4, %v343_v17 }
 0x227   : > { %1929 = vst [vmem:[#allocation3 + $0x548] sm:$0xf] %v1291_v43  ;;  %v1292_v47 = vpack.c.bf16 %v1228_v37, %v1228_v37  ;;  %v1293_v53 = vpack.c.bf16 %v1229_v38, %v1229_v38  ;;  %v599_v38 = vpop.f32.mrf.mxu0  ;;  %v5148_v46 = vpop.f32.mrf.mxu2 }
 0x228   : > { %2120 = vst [vmem:[#allocation3 + $0x504] sm:$0xf] %v907_v62  ;;  %v9081_v61 = vld [vmem:[#allocation3 + $0x578] sm:$0xf0]  ;;  %v8118_v62 = vld [vmem:[#allocation3 + $0x558] sm:$0xf]  ;;  %7430 = vmatmul.msk.bf16.gmra.mxu3 %vm384_vm1, %v377_v27 }
 0x229   : > { %2503 = vst [vmem:[#allocation3 + $0x4e8] sm:$0xf] %v1290_v6  ;;  %v9978_v6 = vadd.f32 %v5143_v50, %v4975_v55  ;;  %v8119_v14 = vor.u32 %v9081_v61, %v8118_v62  ;;  %v9992_v37 = vpop.f32.mrf.mxu1  ;;  %v597_v50 = vadd.f32 %v9989_v34, %v596_v45  ;;  %v600_v55 = vadd.f32 %v9989_v34, %v599_v38 }
 0x22a   : > { %2504 = vst [vmem:[#allocation3 + $0x50c] sm:$0xf] %v1291_v43  ;;  %v8120_v43 = vld [vmem:[#allocation3 + $0x57c] sm:$0xf0] }
 0x22b   : > { %972 = vst [vmem:[#allocation3 + $0x5a0] sm:$0xf] %v908_v35  ;;  %v8123_v30 = vor.u32 %v9077_v16, %v8120_v43  ;;  %v1103_v25 = vpack.c.bf16 %v597_v50, %v597_v50 }
 0x22c   : > { %1546 = vst [vmem:[#allocation3 + $0x564] sm:$0xf] %v908_v35 }
 0x22d   : > { %2121 = vst [vmem:[#allocation3 + $0x528] sm:$0xf] %v908_v35  ;;  %v595_v35 = vadd.f32 %v9989_v34, %v594_v54  ;;  %v7624_v54 = vld [vmem:[#allocation3 + $0x194] sm:$0xf0] }
 0x22e   : > { %973 = vst [vmem:[#allocation3 + $0x5c4] sm:$0xf] %v909_v40  ;;  %5008 = vmatmul.bf16.gmra.mxu1 %v8119_v14 }
 0x22f   : > { %1356 = vst [vmem:[#allocation3 + $0x5a8] sm:$0xf] %v1292_v47  ;;  %v1102_v48 = vpack.c.bf16 %v595_v35, %v595_v35  ;;  %v601_v43 = vpop.f32.mrf.mxu0 }
 0x230   : > { %1357 = vst [vmem:[#allocation3 + $0x5cc] sm:$0xf] %v1293_v53  ;;  %5177 = vmatmul.bf16.gmra.mxu2 %v8123_v30  ;;  %v9086_v30 = vld [vmem:[#allocation3 + $0x5a4] sm:$0xf] }
 0x231   : > { %1547 = vst [vmem:[#allocation3 + $0x588] sm:$0xf] %v909_v40  ;;  %v4979_v62 = vpop.f32.mrf.mxu1 }
 0x232   : > { %1739 = vst [vmem:[#allocation3 + $0x58c] sm:$0xf] %v9965_v52  ;;  %v4980_v45 = vadd.f32 %v9948_v51, %v4979_v62  ;;  %v7660_v62 = vld [vmem:[#allocation3 + $0x1dc] sm:$0xf0] }
 0x233   : > { %1930 = vst [vmem:[#allocation3 + $0x56c] sm:$0xf] %v1292_v47 }
 0x234   : > { %12258 = vst [vmem:[#allocation28_spill] sm:$0xff] %v9992_v37  ;;  %v10003_v17 = vadd.f32 %v5148_v46, %v4980_v45  ;;  %v9241_v45 = vld [vmem:[%s12229_s3 + $0x178] sm:$0xff] }
 0x235   : > { %1931 = vst [vmem:[#allocation3 + $0x590] sm:$0xf] %v1293_v53  ;;  %v9090_v61 = vld [vmem:[#allocation3 + $0x5c0] sm:$0xf0]  ;;  %5750 = vmatpush.bf16.msrb.mxu2 %v9241_v45 }
 0x236   : > { %2122 = vst [vmem:[#allocation3 + $0x54c] sm:$0xf] %v909_v40  ;;  %v7627_v40 = vor.u32 %v8952_v56, %v7624_v54 }
 0x237   : > { %12259 = vst [vmem:[#allocation29_spill] sm:$0xff] %v9995_v39  ;;  %v8997_v39 = vld [vmem:[#allocation3 + $0x2dc] sm:$0xf] }
 0x238   : > { %2314 = vst [vmem:[#allocation3 + $0x550] sm:$0xf] %v9965_v52  ;;  %v10000_v52 = vpack.c.bf16 %v600_v55, %v600_v55  ;;  %5445 = vmatmul.bf16.gmra.mxu0 %v7627_v40 }
 0x239   : > { %2505 = vst [vmem:[#allocation3 + $0x530] sm:$0xf] %v1292_v47  ;;  %v8154_v47 = vld [vmem:[#allocation3 + $0x5a0] sm:$0xf] }
 0x23a   : > { %2506 = vst [vmem:[#allocation3 + $0x554] sm:$0xf] %v1293_v53  ;;  %v8156_v53 = vld [vmem:[#allocation3 + $0x5c4] sm:$0xf0]  ;;  %v8155_v16 = vor.u32 %v9090_v61, %v8154_v47  ;;  %v10009_v61 = vpop.f32.mrf.mxu2  ;;  %v8961_v47 = vld [vmem:[#allocation3 + $0x1bc] sm:$0xf] }
 0x23b   : > { %780 = vst [vmem:[#allocation2 + $0x229] sm:$0xff] %v595_v35  ;;  %v8159_v35 = vor.u32 %v9086_v30, %v8156_v53  ;;  %v7663_v46 = vor.u32 %v8961_v47, %v7660_v62 }
 0x23c   : > { %1166 = vst [vmem:[#allocation3 + $0x5ec] sm:$0xf] %v1102_v48 }
 0x23d   : > { %1740 = vst [vmem:[#allocation3 + $0x5b0] sm:$0xf] %v1102_v48 }
 0x23e   : > { %2315 = vst [vmem:[#allocation3 + $0x574] sm:$0xf] %v1102_v48  ;;  %5013 = vmatmul.bf16.gmra.mxu1 %v8155_v16 }
 0x23f   : > { %781 = vst [vmem:[#allocation2 + $0x231] sm:$0xff] %v597_v50 }
 0x240   : > { %1167 = vst [vmem:[#allocation3 + $0x610] sm:$0xf] %v1103_v25  ;;  %5182 = vmatmul.bf16.gmra.mxu2 %v8159_v35  ;;  %v9240_v35 = vld [vmem:[%s12229_s3 + $0x170] sm:$0xff] }
 0x241   : > { %1741 = vst [vmem:[#allocation3 + $0x5d4] sm:$0xf] %v1103_v25  ;;  %5751 = vmatpush.bf16.msrb.mxu2 %v9240_v35 }
 0x242   : > { %v846_v14 = vld [vmem:[#allocation2 + $0x228] sm:$0xff]  ;;  %2316 = vst [vmem:[#allocation3 + $0x598] sm:$0xf] %v1103_v25  ;;  %v10007_v25 = vpop.f32.mrf.mxu1 }
 0x243   : > { %v910_v4 = vpack.c.bf16 %v846_v14, %v846_v14  ;;  %782 = vst [vmem:[#allocation2 + $0x241] sm:$0xff] %v600_v55  ;;  %v604_v55 = vpop.f32.mrf.mxu0  ;;  %v602_v14 = vadd.f32 %v9989_v34, %v601_v43 }
 0x244   : > { %1168 = vst [vmem:[#allocation3 + $0x634] sm:$0xf] %v10000_v52 }
 0x245   : > { %974 = vst [vmem:[#allocation3 + $0x5e8] sm:$0xf] %v910_v4 }
 0x246   : > { %1548 = vst [vmem:[#allocation3 + $0x5ac] sm:$0xf] %v910_v4  ;;  %v847_v27 = vld [vmem:[#allocation2 + $0x230] sm:$0xff] }
 0x247   : > { %v1230_v38 = vld [vmem:[#allocation2 + $0x22a] sm:$0xff]  ;;  %v1231_v48 = vld [vmem:[#allocation2 + $0x232] sm:$0xff]  ;;  %2123 = vst [vmem:[#allocation3 + $0x570] sm:$0xf] %v910_v4  ;;  %v911_v50 = vpack.c.bf16 %v847_v27, %v847_v27 }
 0x248   : > { %v1294_v54 = vpack.c.bf16 %v1230_v38, %v1230_v38  ;;  %v1295_v56 = vpack.c.bf16 %v1231_v48, %v1231_v48  ;;  %1742 = vst [vmem:[#allocation3 + $0x5f8] sm:$0xf] %v10000_v52  ;;  %v8192_v4 = vld [vmem:[#allocation3 + $0x60c] sm:$0xf0]  ;;  %5450 = vmatmul.bf16.gmra.mxu0 %v7663_v46  ;;  %v1105_v38 = vpack.c.bf16 %v602_v14, %v602_v14  ;;  %v9095_v48 = vld [vmem:[#allocation3 + $0x5ec] sm:$0xf] }
 0x249   : > { %975 = vst [vmem:[#allocation3 + $0x60c] sm:$0xf] %v911_v50  ;;  %v8195_v43 = vor.u32 %v9095_v48, %v8192_v4  ;;  %v7696_v46 = vld [vmem:[#allocation3 + $0x224] sm:$0xf0]  ;;  %v345_v4 = vld [vmem:[%s9521_s9 + $0x1f0] sm:$0xff] }
 0x24a   : > { %12260 = vst [vmem:[#allocation30_spill] sm:$0xff] %v10007_v25  ;;  %v848_v40 = vld [vmem:[#allocation2 + $0x240] sm:$0xff] }
 0x24b   : > { %1358 = vst [vmem:[#allocation3 + $0x5f0] sm:$0xf] %v1294_v54  ;;  %v912_v53 = vpack.c.bf16 %v848_v40, %v848_v40  ;;  %v4984_v40 = vpop.f32.mrf.mxu1 }
 0x24c   : > { %1359 = vst [vmem:[#allocation3 + $0x614] sm:$0xf] %v1295_v56  ;;  %v8190_v30 = vld [vmem:[#allocation3 + $0x5e8] sm:$0xf]  ;;  %v4985_v62 = vadd.f32 %v9948_v51, %v4984_v40 }
 0x24d   : > { %12261 = vst [vmem:[#allocation31_spill] sm:$0xff] %v10009_v61 }
 0x24e   : > { %1549 = vst [vmem:[#allocation3 + $0x5d0] sm:$0xf] %v911_v50 }
 0x24f   : > { %1932 = vst [vmem:[#allocation3 + $0x5b4] sm:$0xf] %v1294_v54 }
 0x250   : > { %1933 = vst [vmem:[#allocation3 + $0x5d8] sm:$0xf] %v1295_v56  ;;  %v9099_v16 = vld [vmem:[#allocation3 + $0x608] sm:$0xf0]  ;;  %5187 = vmatmul.bf16.gmra.mxu2 %v8195_v43 }
 0x251   : > { %2124 = vst [vmem:[#allocation3 + $0x594] sm:$0xf] %v911_v50  ;;  %v8191_v27 = vor.u32 %v9099_v16, %v8190_v30  ;;  %v605_v50 = vadd.f32 %v9989_v34, %v604_v55  ;;  %v9239_v55 = vld [vmem:[%s12229_s3 + $0x168] sm:$0xff]  ;;  %v346_v30 = vld [vmem:[%s9521_s9 + $0x1f8] sm:$0xff] }
 0x252   : > { %2507 = vst [vmem:[#allocation3 + $0x578] sm:$0xf] %v1294_v54  ;;  %v606_v54 = vpop.f32.mrf.mxu0  ;;  %5752 = vmatpush.bf16.msrb.mxu2 %v9239_v55  ;;  %v378_v35 = vpack.c.bf16 %v346_v30, %v345_v4  ;;  %v9237_v4 = vld [vmem:[%s12229_s3 + $0x158] sm:$0xff]  ;;  %v9104_v30 = vld [vmem:[#allocation3 + $0x634] sm:$0xf] }
 0x253   : > { %2508 = vst [vmem:[#allocation3 + $0x59c] sm:$0xf] %v1295_v56  ;;  %v5153_v56 = vpop.f32.mrf.mxu2  ;;  %5018 = vmatmul.bf16.gmra.mxu1 %v8191_v27  ;;  %v1106_v47 = vpack.c.bf16 %v605_v50, %v605_v50  ;;  %v10032_v16 = vpop.f32.mrf.mxu1  ;;  %v8970_v27 = vld [vmem:[#allocation3 + $0x204] sm:$0xf] }
 0x254   : > { %976 = vst [vmem:[#allocation3 + $0x630] sm:$0xf] %v912_v53  ;;  %v10021_v45 = vadd.f32 %v5153_v56, %v4985_v62  ;;  %7431 = vmatmul.msk.bf16.gmra.mxu3 %vm384_vm1, %v378_v35  ;;  %v9231_v56 = vld [vmem:[%s12229_s3 + $0x128] sm:$0xff] }
 0x255   : > { %1550 = vst [vmem:[#allocation3 + $0x5f4] sm:$0xf] %v912_v53  ;;  %5583 = vmatpush.bf16.msrb.mxu1 %v9231_v56  ;;  %v9236_v56 = vld [vmem:[%s12229_s3 + $0x150] sm:$0xff] }
 0x256   : > { %2125 = vst [vmem:[#allocation3 + $0x5b8] sm:$0xf] %v912_v53  ;;  %v607_v53 = vadd.f32 %v9989_v34, %v606_v54 }
 0x257   : > { %2317 = vst [vmem:[#allocation3 + $0x5bc] sm:$0xf] %v10000_v52  ;;  %v9238_v52 = vld [vmem:[%s12229_s3 + $0x160] sm:$0xff] }
 0x258   : > { %783 = vst [vmem:[#allocation2 + $0x249] sm:$0xff] %v602_v14  ;;  %v10030_v14 = vpack.c.bf16 %v607_v53, %v607_v53  ;;  %5753 = vmatpush.bf16.msrb.mxu2 %v9238_v52 }
 0x259   : > { %1169 = vst [vmem:[#allocation3 + $0x658] sm:$0xf] %v1105_v38 }
 0x25a   : > { %1743 = vst [vmem:[#allocation3 + $0x61c] sm:$0xf] %v1105_v38  ;;  %v609_v52 = vpop.f32.mrf.mxu0 }
 0x25b   : > { %2318 = vst [vmem:[#allocation3 + $0x5e0] sm:$0xf] %v1105_v38  ;;  %v10041_v55 = vpop.f32.mrf.mxu2 }
 0x25c   : > { %784 = vst [vmem:[#allocation2 + $0x259] sm:$0xff] %v605_v50  ;;  %v7699_v50 = vor.u32 %v8970_v27, %v7696_v46  ;;  %v4989_v27 = vpop.f32.mrf.mxu1  ;;  %5754 = vmatpush.bf16.msrb.mxu2 %v9237_v4 }
 0x25d   : > { %1170 = vst [vmem:[#allocation3 + $0x67c] sm:$0xf] %v1106_v47  ;;  %v4990_v61 = vadd.f32 %v9948_v51, %v4989_v27  ;;  %v7732_v27 = vld [vmem:[#allocation3 + $0x26c] sm:$0xf0] }
 0x25e   : > { %12262 = vst [vmem:[#allocation32_spill] sm:$0xff] %v10032_v16  ;;  %5455 = vmatmul.bf16.gmra.mxu0 %v7699_v50  ;;  %v8226_v50 = vld [vmem:[#allocation3 + $0x630] sm:$0xf] }
 0x25f   : > { %1744 = vst [vmem:[#allocation3 + $0x640] sm:$0xf] %v1106_v47  ;;  %v849_v48 = vld [vmem:[#allocation2 + $0x248] sm:$0xff] }
 0x260   : > { %v1232_v40 = vld [vmem:[#allocation2 + $0x242] sm:$0xff]  ;;  %v1233_v38 = vld [vmem:[#allocation2 + $0x24a] sm:$0xff]  ;;  %2319 = vst [vmem:[#allocation3 + $0x604] sm:$0xf] %v1106_v47  ;;  %v913_v43 = vpack.c.bf16 %v849_v48, %v849_v48  ;;  %v8228_v47 = vld [vmem:[#allocation3 + $0x654] sm:$0xf0]  ;;  %5755 = vmatpush.bf16.msrb.mxu2 %v9236_v56 }
 0x261   : > { %v1296_v54 = vpack.c.bf16 %v1232_v40, %v1232_v40  ;;  %v1297_v62 = vpack.c.bf16 %v1233_v38, %v1233_v38  ;;  %785 = vst [vmem:[#allocation2 + $0x261] sm:$0xff] %v607_v53  ;;  %v9230_v53 = vld [vmem:[%s12229_s3 + $0x120] sm:$0xff]  ;;  %v8231_v35 = vor.u32 %v9104_v30, %v8228_v47 }
 0x262   : > { %1171 = vst [vmem:[#allocation3 + $0x6a0] sm:$0xf] %v10030_v14  ;;  %5584 = vmatpush.bf16.msrb.mxu1 %v9230_v53 }
 0x263   : > { %977 = vst [vmem:[#allocation3 + $0x654] sm:$0xf] %v913_v43  ;;  %v850_v46 = vld [vmem:[#allocation2 + $0x258] sm:$0xff]  ;;  %5192 = vmatmul.bf16.gmra.mxu2 %v8231_v35  ;;  %v5158_v4 = vpop.f32.mrf.mxu2 }
 0x264   : > { %12263 = vst [vmem:[#allocation33_spill] sm:$0xff] %v10041_v55  ;;  %v914_v48 = vpack.c.bf16 %v850_v46, %v850_v46  ;;  %v9229_v46 = vld [vmem:[%s12229_s3 + $0x118] sm:$0xff]  ;;  %v10056_v25 = vadd.f32 %v5158_v4, %v4990_v61  ;;  %v610_v61 = vadd.f32 %v9989_v34, %v609_v52 }
 0x265   : > { %1360 = vst [vmem:[#allocation3 + $0x638] sm:$0xf] %v1296_v54 }
 0x266   : > { %1361 = vst [vmem:[#allocation3 + $0x65c] sm:$0xf] %v1297_v62  ;;  %5585 = vmatpush.bf16.msrb.mxu1 %v9229_v46  ;;  %v1108_v56 = vpack.c.bf16 %v610_v61, %v610_v61 }
 0x267   : > { %1551 = vst [vmem:[#allocation3 + $0x618] sm:$0xf] %v913_v43 }
 0x268   : > { %1934 = vst [vmem:[#allocation3 + $0x5fc] sm:$0xf] %v1296_v54  ;;  %v851_v40 = vld [vmem:[#allocation2 + $0x260] sm:$0xff] }
 0x269   : > { %1935 = vst [vmem:[#allocation3 + $0x620] sm:$0xf] %v1297_v62  ;;  %v1234_v38 = vld [vmem:[#allocation2 + $0x25a] sm:$0xff]  ;;  %v1235_v55 = vld [vmem:[#allocation2 + $0x262] sm:$0xff]  ;;  %v915_v47 = vpack.c.bf16 %v851_v40, %v851_v40 }
 0x26a   : > { %2126 = vst [vmem:[#allocation3 + $0x5dc] sm:$0xf] %v913_v43  ;;  %v9108_v16 = vld [vmem:[#allocation3 + $0x650] sm:$0xf0]  ;;  %v1298_v53 = vpack.c.bf16 %v1234_v38, %v1234_v38  ;;  %v1299_v43 = vpack.c.bf16 %v1235_v55, %v1235_v55  ;;  %v9234_v40 = vld [vmem:[%s12229_s3 + $0x140] sm:$0xff] }
 0x26b   : > { %2509 = vst [vmem:[#allocation3 + $0x5c0] sm:$0xf] %v1296_v54  ;;  %v8227_v30 = vor.u32 %v9108_v16, %v8226_v50  ;;  %v611_v54 = vpop.f32.mrf.mxu0  ;;  %v9235_v16 = vld [vmem:[%s12229_s3 + $0x148] sm:$0xff]  ;;  %v9228_v55 = vld [vmem:[%s12229_s3 + $0x110] sm:$0xff]  ;;  %v9113_v50 = vld [vmem:[#allocation3 + $0x67c] sm:$0xf] }
 0x26c   : > { %2510 = vst [vmem:[#allocation3 + $0x5e4] sm:$0xf] %v1297_v62  ;;  %v8979_v62 = vld [vmem:[#allocation3 + $0x24c] sm:$0xf]  ;;  %5756 = vmatpush.bf16.msrb.mxu2 %v9235_v16  ;;  %5586 = vmatpush.bf16.msrb.mxu1 %v9228_v55  ;;  %v8988_v55 = vld [vmem:[#allocation3 + $0x294] sm:$0xf] }
 0x26d   : > { %978 = vst [vmem:[#allocation3 + $0x678] sm:$0xf] %v914_v48  ;;  %5023 = vmatmul.bf16.gmra.mxu1 %v8227_v30  ;;  %v7735_v35 = vor.u32 %v8979_v62, %v7732_v27  ;;  %v612_v30 = vadd.f32 %v9989_v34, %v611_v54  ;;  %v9227_v27 = vld [vmem:[%s12229_s3 + $0x108] sm:$0xff]  ;;  %v10078_v54 = vpop.f32.mrf.mxu1 }
 0x26e   : > { %1552 = vst [vmem:[#allocation3 + $0x63c] sm:$0xf] %v914_v48 }
 0x26f   : > { %2127 = vst [vmem:[#allocation3 + $0x600] sm:$0xf] %v914_v48  ;;  %5460 = vmatmul.bf16.gmra.mxu0 %v7735_v35  ;;  %v8264_v48 = vld [vmem:[#allocation3 + $0x69c] sm:$0xf0] }
 0x270   : > { %979 = vst [vmem:[#allocation3 + $0x69c] sm:$0xf] %v915_v47  ;;  %5757 = vmatpush.bf16.msrb.mxu2 %v9234_v40  ;;  %v8267_v46 = vor.u32 %v9113_v50, %v8264_v48  ;;  %5587 = vmatpush.bf16.msrb.mxu1 %v9227_v27  ;;  %v8908_v27 = vld [vmem:[#allocation3 + $0x14] sm:$0xf] }
 0x271   : > { %1362 = vst [vmem:[#allocation3 + $0x680] sm:$0xf] %v1298_v53 }
 0x272   : > { %1363 = vst [vmem:[#allocation3 + $0x6a4] sm:$0xf] %v1299_v43 }
 0x273   : > { %1553 = vst [vmem:[#allocation3 + $0x660] sm:$0xf] %v915_v47  ;;  %v614_v4 = vpop.f32.mrf.mxu0  ;;  %5197 = vmatmul.bf16.gmra.mxu2 %v8267_v46 }
 0x274   : > { %1745 = vst [vmem:[#allocation3 + $0x664] sm:$0xf] %v10030_v14  ;;  %v8262_v52 = vld [vmem:[#allocation3 + $0x678] sm:$0xf] }
 0x275   : > { %1936 = vst [vmem:[#allocation3 + $0x644] sm:$0xf] %v1298_v53 }
 0x276   : > { %1937 = vst [vmem:[#allocation3 + $0x668] sm:$0xf] %v1299_v43 }
 0x277   : > { %2128 = vst [vmem:[#allocation3 + $0x624] sm:$0xf] %v915_v47  ;;  %v9117_v38 = vld [vmem:[#allocation3 + $0x698] sm:$0xf0]  ;;  %v1109_v47 = vpack.c.bf16 %v612_v30, %v612_v30 }
 0x278   : > { %2320 = vst [vmem:[#allocation3 + $0x628] sm:$0xf] %v10030_v14  ;;  %v8263_v16 = vor.u32 %v9117_v38, %v8262_v52  ;;  %v615_v14 = vadd.f32 %v9989_v34, %v614_v4  ;;  %v10080_v38 = vpop.f32.mrf.mxu2 }
 0x279   : > { %2511 = vst [vmem:[#allocation3 + $0x608] sm:$0xf] %v1298_v53  ;;  %v9226_v53 = vld [vmem:[%s12229_s3 + $0x100] sm:$0xff] }
 0x27a   : > { %2512 = vst [vmem:[#allocation3 + $0x62c] sm:$0xf] %v1299_v43  ;;  %5588 = vmatpush.bf16.msrb.mxu1 %v9226_v53  ;;  %v7768_v43 = vld [vmem:[#allocation3 + $0x2b4] sm:$0xf0]  ;;  %v1110_v62 = vpack.c.bf16 %v615_v14, %v615_v14  ;;  %v619_v53 = vpop.f32.mrf.mxu3 }
 0x27b   : > { %786 = vst [vmem:[#allocation2 + $0x271] sm:$0xff] %v610_v61  ;;  %v7771_v61 = vor.u32 %v8988_v55, %v7768_v43  ;;  %v616_v40 = vpop.f32.mrf.mxu0 }
 0x27c   : > { %1172 = vst [vmem:[#allocation3 + $0x6c4] sm:$0xf] %v1108_v56 }
 0x27d   : > { %1746 = vst [vmem:[#allocation3 + $0x688] sm:$0xf] %v1108_v56  ;;  %5028 = vmatmul.bf16.gmra.mxu1 %v8263_v16  ;;  %v7452_v16 = vld [vmem:[#allocation3 + $0x34] sm:$0xf0] }
 0x27e   : > { %2321 = vst [vmem:[#allocation3 + $0x64c] sm:$0xf] %v1108_v56  ;;  %v7455_v43 = vor.u32 %v8908_v27, %v7452_v16 }
 0x27f   : > { %12264 = vst [vmem:[#allocation34_spill] sm:$0xff] %v10078_v54  ;;  %5465 = vmatmul.bf16.gmra.mxu0 %v7771_v61 }
 0x280   : > { %787 = vst [vmem:[#allocation2 + $0x279] sm:$0xff] %v612_v30 }
 0x281   : > { %1173 = vst [vmem:[#allocation3 + $0x6e8] sm:$0xf] %v1109_v47 }
 0x282   : > { %1747 = vst [vmem:[#allocation3 + $0x6ac] sm:$0xf] %v1109_v47  ;;  %v852_v35 = vld [vmem:[#allocation2 + $0x270] sm:$0xff] }
 0x283   : > { %2322 = vst [vmem:[#allocation3 + $0x670] sm:$0xf] %v1109_v47  ;;  %v916_v48 = vpack.c.bf16 %v852_v35, %v852_v35  ;;  %v4994_v47 = vpop.f32.mrf.mxu1  ;;  %v7450_v35 = vld [vmem:[#allocation3 + $0x10] sm:$0xf]  ;;  %5758 = vmatmul.bf16.vlgmr.msrb.gmra.mxu2 %v7455_v43 }
 0x284   : > { %788 = vst [vmem:[#allocation2 + $0x289] sm:$0xff] %v615_v14  ;;  %v8912_v14 = vld [vmem:[#allocation3 + $0x30] sm:$0xf0] }
 0x285   : > { %1174 = vst [vmem:[#allocation3 + $0x70c] sm:$0xf] %v1110_v62  ;;  %v7451_v61 = vor.u32 %v8912_v14, %v7450_v35  ;;  %v4995_v14 = vadd.f32 %v9948_v51, %v4994_v47  ;;  %v8917_v47 = vld [vmem:[#allocation3 + $0x5c] sm:$0xf] }
 0x286   : > { %980 = vst [vmem:[#allocation3 + $0x6c0] sm:$0xf] %v916_v48 }
 0x287   : > { %12265 = vst [vmem:[#allocation35_spill] sm:$0xff] %v10080_v38  ;;  %v853_v50 = vld [vmem:[#allocation2 + $0x278] sm:$0xff]  ;;  %v7804_v38 = vld [vmem:[#allocation3 + $0x2fc] sm:$0xf0] }
 0x288   : > { %1554 = vst [vmem:[#allocation3 + $0x684] sm:$0xf] %v916_v48  ;;  %v1236_v56 = vld [vmem:[#allocation2 + $0x272] sm:$0xff]  ;;  %v1237_v30 = vld [vmem:[#allocation2 + $0x27a] sm:$0xff]  ;;  %v917_v46 = vpack.c.bf16 %v853_v50, %v853_v50  ;;  %v617_v50 = vadd.f32 %v9989_v34, %v616_v40  ;;  %v7807_v35 = vor.u32 %v8997_v39, %v7804_v38  ;;  %v621_v40 = vpop.f32.mrf.mxu3 }
 0x289   : > { %2129 = vst [vmem:[#allocation3 + $0x648] sm:$0xf] %v916_v48  ;;  %v1300_v52 = vpack.c.bf16 %v1236_v56, %v1236_v56  ;;  %v1301_v4 = vpack.c.bf16 %v1237_v30, %v1237_v30  ;;  %v10083_v56 = vpop.f32.mrf.mxu0  ;;  %v5163_v30 = vpop.f32.mrf.mxu2  ;;  %v8921_v38 = vld [vmem:[#allocation3 + $0x78] sm:$0xf0] }
 0x28a   : > { %1748 = vst [vmem:[#allocation3 + $0x6d0] sm:$0xf] %v1110_v62 }
 0x28b   : > { %981 = vst [vmem:[#allocation3 + $0x6e4] sm:$0xf] %v917_v46  ;;  %v854_v55 = vld [vmem:[#allocation2 + $0x288] sm:$0xff]  ;;  %v4996_v43 = vpop.f32.mrf.mxu1 }
 0x28c   : > { %1364 = vst [vmem:[#allocation3 + $0x6c8] sm:$0xf] %v1300_v52  ;;  %v918_v48 = vpack.c.bf16 %v854_v55, %v854_v55  ;;  %v1111_v55 = vpack.c.bf16 %v617_v50, %v617_v50 }
 0x28d   : > { %1365 = vst [vmem:[#allocation3 + $0x6ec] sm:$0xf] %v1301_v4  ;;  %5589 = vmatmul.bf16.vlgmr.msrb.gmra.mxu1 %v7451_v61  ;;  %v8298_v54 = vld [vmem:[#allocation3 + $0x6c0] sm:$0xf] }
 0x28e   : > { %1555 = vst [vmem:[#allocation3 + $0x6a8] sm:$0xf] %v917_v46 }
 0x28f   : > { %1938 = vst [vmem:[#allocation3 + $0x68c] sm:$0xf] %v1300_v52  ;;  %5470 = vmatmul.bf16.gmra.mxu0 %v7807_v35 }
 0x290   : > { %1939 = vst [vmem:[#allocation3 + $0x6b0] sm:$0xf] %v1301_v4 }
 0x291   : > { %2130 = vst [vmem:[#allocation3 + $0x66c] sm:$0xf] %v917_v46  ;;  %v620_v46 = vadd.f32 %v9989_v34, %v619_v53  ;;  %v5165_v61 = vpop.f32.mrf.mxu2  ;;  %v10090_v39 = vpop.f32.mrf.mxu0 }
 0x292   : > { %12266 = vst [vmem:[#allocation36_spill] sm:$0xff] %v10083_v56  ;;  %v9126_v27 = vld [vmem:[#allocation3 + $0x6e0] sm:$0xf0] }
 0x293   : > { %2513 = vst [vmem:[#allocation3 + $0x650] sm:$0xf] %v1300_v52  ;;  %v8299_v16 = vor.u32 %v9126_v27, %v8298_v54  ;;  %v10087_v52 = vadd.f32 %v5163_v30, %v4995_v14  ;;  %v1112_v54 = vpack.c.bf16 %v620_v46, %v620_v46  ;;  %v7488_v27 = vld [vmem:[#allocation3 + $0x7c] sm:$0xf0]  ;;  %v4999_v53 = vpop.f32.mrf.mxu1 }
 0x294   : > { %2514 = vst [vmem:[#allocation3 + $0x674] sm:$0xf] %v1301_v4  ;;  %v622_v4 = vadd.f32 %v9989_v34, %v621_v40  ;;  %v5000_v30 = vadd.f32 %v9948_v51, %v4999_v53 }
 0x295   : > { %982 = vst [vmem:[#allocation3 + $0x708] sm:$0xf] %v918_v48  ;;  %5033 = vmatmul.bf16.vlgmr.msrb.gmra.mxu3 %v8299_v16 }
 0x296   : > { %1556 = vst [vmem:[#allocation3 + $0x6cc] sm:$0xf] %v918_v48 }
 0x297   : > { %2131 = vst [vmem:[#allocation3 + $0x690] sm:$0xf] %v918_v48  ;;  %v7491_v48 = vor.u32 %v8917_v47, %v7488_v27  ;;  %v4997_v47 = vadd.f32 %v9948_v51, %v4996_v43 }
 0x298   : > { %2323 = vst [vmem:[#allocation3 + $0x694] sm:$0xf] %v1110_v62  ;;  %v10092_v62 = vpack.c.bf16 %v622_v4, %v622_v4 }
 0x299   : > { %789 = vst [vmem:[#allocation2 + $0x291] sm:$0xff] %v617_v50  ;;  %v7486_v50 = vld [vmem:[#allocation3 + $0x58] sm:$0xf]  ;;  %5763 = vmatmul.bf16.gmra.mxu2 %v7491_v48  ;;  %v5168_v27 = vpop.f32.mrf.mxu2 }
 0x29a   : > { %1175 = vst [vmem:[#allocation3 + $0x730] sm:$0xf] %v1111_v55  ;;  %v7487_v16 = vor.u32 %v8921_v38, %v7486_v50  ;;  %v10097_v53 = vadd.f32 %v5168_v27, %v5000_v30  ;;  %v9006_v38 = vld [vmem:[#allocation3 + $0x324] sm:$0xf]  ;;  %v10099_v50 = vadd.f32 %v5165_v61, %v4997_v47 }
 0x29b   : > { %1749 = vst [vmem:[#allocation3 + $0x6f4] sm:$0xf] %v1111_v55 }
 0x29c   : > { %2324 = vst [vmem:[#allocation3 + $0x6b8] sm:$0xf] %v1111_v55 }
 0x29d   : > { %12267 = vst [vmem:[#allocation37_spill] sm:$0xff] %v10090_v39  ;;  %5594 = vmatmul.bf16.gmra.mxu1 %v7487_v16  ;;  %v5001_v16 = vpop.f32.mrf.mxu1 }
 0x29e   : > { %790 = vst [vmem:[#allocation2 + $0x2a1] sm:$0xff] %v620_v46  ;;  %v624_v46 = vpop.f32.mrf.mxu3 }
 0x29f   : > { %1176 = vst [vmem:[#allocation3 + $0x754] sm:$0xf] %v1112_v54 }
 0x2a0   : > { %1750 = vst [vmem:[#allocation3 + $0x718] sm:$0xf] %v1112_v54  ;;  %v855_v14 = vld [vmem:[#allocation2 + $0x290] sm:$0xff] }
 0x2a1   : > { %v1238_v35 = vld [vmem:[#allocation2 + $0x28a] sm:$0xff]  ;;  %v1239_v40 = vld [vmem:[#allocation2 + $0x292] sm:$0xff]  ;;  %2325 = vst [vmem:[#allocation3 + $0x6dc] sm:$0xf] %v1112_v54  ;;  %v919_v55 = vpack.c.bf16 %v855_v14, %v855_v14  ;;  %v7843_v54 = vor.u32 %v9006_v38, %v7840_v33  ;;  %v5170_v24 = vpop.f32.mrf.mxu2 }
 0x2a2   : > { %v1302_v37 = vpack.c.bf16 %v1238_v35, %v1238_v35  ;;  %v1303_v19 = vpack.c.bf16 %v1239_v40, %v1239_v40  ;;  %791 = vst [vmem:[#allocation2 + $0x2a9] sm:$0xff] %v622_v4  ;;  %v10101_v4 = vpop.f32.mrf.mxu0  ;;  %v5002_v35 = vadd.f32 %v9948_v51, %v5001_v16  ;;  %v8926_v40 = vld [vmem:[#allocation3 + $0xa4] sm:$0xf]  ;;  %v7524_v33 = vld [vmem:[#allocation3 + $0xc4] sm:$0xf0] }
 0x2a3   : > { %1177 = vst [vmem:[#allocation3 + $0x778] sm:$0xf] %v10092_v62  ;;  %5475 = vmatmul.bf16.gmra.mxu0 %v7843_v54  ;;  %v8930_v54 = vld [vmem:[#allocation3 + $0xc0] sm:$0xf0]  ;;  %v7527_v22 = vor.u32 %v8926_v40, %v7524_v33  ;;  %v7522_v16 = vld [vmem:[#allocation3 + $0xa0] sm:$0xf] }
 0x2a4   : > { %1366 = vst [vmem:[#allocation3 + $0x710] sm:$0xf] %v1302_v37  ;;  %v10104_v38 = vadd.f32 %v5170_v24, %v5002_v35  ;;  %v8334_v24 = vld [vmem:[#allocation3 + $0x708] sm:$0xf] }
 0x2a5   : > { %1367 = vst [vmem:[#allocation3 + $0x734] sm:$0xf] %v1303_v19  ;;  %v856_v48 = vld [vmem:[#allocation2 + $0x2a0] sm:$0xff]  ;;  %v5004_v35 = vpop.f32.mrf.mxu1 }
 0x2a6   : > { %1557 = vst [vmem:[#allocation3 + $0x6f0] sm:$0xf] %v919_v55  ;;  %v920_v43 = vpack.c.bf16 %v856_v48, %v856_v48  ;;  %v626_v47 = vpop.f32.mrf.mxu3  ;;  %v5005_v33 = vadd.f32 %v9948_v51, %v5004_v35 }
 0x2a7   : > { %1940 = vst [vmem:[#allocation3 + $0x6d4] sm:$0xf] %v1302_v37 }
 0x2a8   : > { %12268 = vst [vmem:[#allocation38_spill] sm:$0xff] %v10101_v4 }
 0x2a9   : > { %1941 = vst [vmem:[#allocation3 + $0x6f8] sm:$0xf] %v1303_v19  ;;  %v1240_v14 = vld [vmem:[#allocation2 + $0x2a2] sm:$0xff]  ;;  %v1241_v30 = vld [vmem:[#allocation2 + $0x2aa] sm:$0xff]  ;;  %5768 = vmatmul.bf16.gmra.mxu2 %v7527_v22 }
 0x2aa   : > { %2132 = vst [vmem:[#allocation3 + $0x6b4] sm:$0xf] %v919_v55  ;;  %v857_v27 = vld [vmem:[#allocation2 + $0x2a8] sm:$0xff]  ;;  %v1304_v61 = vpack.c.bf16 %v1240_v14, %v1240_v14  ;;  %v1305_v32 = vpack.c.bf16 %v1241_v30, %v1241_v30  ;;  %v625_v30 = vadd.f32 %v9989_v34, %v624_v46 }
 0x2ab   : > { %2515 = vst [vmem:[#allocation3 + $0x698] sm:$0xf] %v1302_v37  ;;  %v921_v48 = vpack.c.bf16 %v857_v27, %v857_v27  ;;  %v7523_v37 = vor.u32 %v8930_v54, %v7522_v16  ;;  %v9015_v27 = vld [vmem:[#allocation3 + $0x36c] sm:$0xf] }
 0x2ac   : > { %2516 = vst [vmem:[#allocation3 + $0x6bc] sm:$0xf] %v1303_v19  ;;  %v10106_v19 = vpop.f32.mrf.mxu0  ;;  %v1114_v16 = vpack.c.bf16 %v625_v30, %v625_v30 }
 0x2ad   : > { %983 = vst [vmem:[#allocation3 + $0x72c] sm:$0xf] %v919_v55  ;;  %5599 = vmatmul.bf16.gmra.mxu1 %v7523_v37  ;;  %v7876_v55 = vld [vmem:[#allocation3 + $0x38c] sm:$0xf0]  ;;  %v627_v37 = vadd.f32 %v9989_v34, %v626_v47  ;;  %v5006_v47 = vpop.f32.mrf.mxu1 }
 0x2ae   : > { %984 = vst [vmem:[#allocation3 + $0x750] sm:$0xf] %v920_v43  ;;  %v629_v22 = vpop.f32.mrf.mxu3  ;;  %v7879_v54 = vor.u32 %v9015_v27, %v7876_v55 }
 0x2af   : > { %1558 = vst [vmem:[#allocation3 + $0x714] sm:$0xf] %v920_v43  ;;  %v1115_v18 = vpack.c.bf16 %v627_v37, %v627_v37  ;;  %v630_v51 = vadd.f32 %v9989_v34, %v629_v22 }
 0x2b0   : > { %2133 = vst [vmem:[#allocation3 + $0x6d8] sm:$0xf] %v920_v43  ;;  %v5173_v43 = vpop.f32.mrf.mxu2 }
 0x2b1   : > { %1368 = vst [vmem:[#allocation3 + $0x758] sm:$0xf] %v1304_v61  ;;  %v10113_v46 = vadd.f32 %v5173_v43, %v5005_v33 }
 0x2b2   : > { %1369 = vst [vmem:[#allocation3 + $0x77c] sm:$0xf] %v1305_v32 }
 0x2b3   : > { %12269 = vst [vmem:[#allocation39_spill] sm:$0xff] %v10106_v19  ;;  %5480 = vmatmul.bf16.gmra.mxu0 %v7879_v54 }
 0x2b4   : > { %1559 = vst [vmem:[#allocation3 + $0x738] sm:$0xf] %v921_v48  ;;  %v9135_v14 = vld [vmem:[#allocation3 + $0x728] sm:$0xf0] }
 0x2b5   : > { %1751 = vst [vmem:[#allocation3 + $0x73c] sm:$0xf] %v10092_v62  ;;  %v8335_v40 = vor.u32 %v9135_v14, %v8334_v24  ;;  %v10115_v24 = vpop.f32.mrf.mxu0  ;;  %v8935_v14 = vld [vmem:[#allocation3 + $0xec] sm:$0xf]  ;;  %v8370_v22 = vld [vmem:[#allocation3 + $0x750] sm:$0xf] }
 0x2b6   : > { %1942 = vst [vmem:[#allocation3 + $0x71c] sm:$0xf] %v1304_v61  ;;  %v631_v35 = vpop.f32.mrf.mxu3 }
 0x2b7   : > { %1943 = vst [vmem:[#allocation3 + $0x740] sm:$0xf] %v1305_v32  ;;  %5038 = vmatmul.bf16.gmra.mxu3 %v8335_v40  ;;  %v7560_v40 = vld [vmem:[#allocation3 + $0x10c] sm:$0xf0] }
 0x2b8   : > { %2134 = vst [vmem:[#allocation3 + $0x6fc] sm:$0xf] %v921_v48  ;;  %v5175_v55 = vpop.f32.mrf.mxu2 }
 0x2b9   : > { %2326 = vst [vmem:[#allocation3 + $0x700] sm:$0xf] %v10092_v62  ;;  %v8939_v62 = vld [vmem:[#allocation3 + $0x108] sm:$0xf0] }
 0x2ba   : > { %2517 = vst [vmem:[#allocation3 + $0x6e0] sm:$0xf] %v1304_v61  ;;  %v7563_v61 = vor.u32 %v8935_v14, %v7560_v40  ;;  %v7912_v14 = vld [vmem:[#allocation3 + $0x3d4] sm:$0xf0] }
 0x2bb   : > { %2518 = vst [vmem:[#allocation3 + $0x704] sm:$0xf] %v1305_v32  ;;  %v7558_v32 = vld [vmem:[#allocation3 + $0xe8] sm:$0xf] }
 0x2bc   : > { %985 = vst [vmem:[#allocation3 + $0x774] sm:$0xf] %v921_v48  ;;  %v10118_v48 = vpack.c.bf16 %v630_v51, %v630_v51  ;;  %v7559_v27 = vor.u32 %v8939_v62, %v7558_v32  ;;  %5773 = vmatmul.bf16.gmra.mxu2 %v7563_v61 }
 0x2bd   : > { %792 = vst [vmem:[#allocation2 + $0x2b9] sm:$0xff] %v625_v30  ;;  %v10123_v30 = vld [vmem:[%s12230_s4] ss:$0 sm:$0xff]  ;;  %v10129_v9 = vpop.f32.mrf.mxu0 }
 0x2be   : > { %12270 = vst [vmem:[#allocation40_spill] sm:$0xff] %v10115_v24  ;;  %v5007_v43 = vadd.f32 %v10123_v30, %v5006_v47  ;;  %5604 = vmatmul.bf16.gmra.mxu1 %v7559_v27  ;;  %v9024_v47 = vld [vmem:[#allocation3 + $0x3b4] sm:$0xf]  ;;  %v5009_v27 = vpop.f32.mrf.mxu1 }
 0x2bf   : > { %1178 = vst [vmem:[#allocation3 + $0x79c] sm:$0xf] %v1114_v16  ;;  %v7915_v63 = vor.u32 %v9024_v47, %v7912_v14 }
 0x2c0   : > { %1752 = vst [vmem:[#allocation3 + $0x760] sm:$0xf] %v1114_v16 }
 0x2c1   : > { %2327 = vst [vmem:[#allocation3 + $0x724] sm:$0xf] %v1114_v16  ;;  %v10126_v16 = vadd.f32 %v5175_v55, %v5007_v43 }
 0x2c2   : > { %793 = vst [vmem:[#allocation2 + $0x2c1] sm:$0xff] %v627_v37 }
 0x2c3   : > { %1179 = vst [vmem:[#allocation3 + $0x7c0] sm:$0xf] %v1115_v18  ;;  %v9144_v33 = vld [vmem:[#allocation3 + $0x770] sm:$0xf0]  ;;  %5485 = vmatmul.bf16.gmra.mxu0 %v7915_v63  ;;  %v632_v63 = vadd.f32 %v9989_v34, %v631_v35 }
 0x2c4   : > { %1753 = vst [vmem:[#allocation3 + $0x784] sm:$0xf] %v1115_v18  ;;  %v858_v54 = vld [vmem:[#allocation2 + $0x2b8] sm:$0xff]  ;;  %v8371_v40 = vor.u32 %v9144_v33, %v8370_v22  ;;  %v634_v22 = vpop.f32.mrf.mxu3  ;;  %v5010_v33 = vadd.f32 %v10123_v30, %v5009_v27 }
 0x2c5   : > { %2328 = vst [vmem:[#allocation3 + $0x748] sm:$0xf] %v1115_v18  ;;  %v922_v37 = vpack.c.bf16 %v858_v54, %v858_v54  ;;  %v8944_v54 = vld [vmem:[#allocation3 + $0x134] sm:$0xf]  ;;  %v1117_v12 = vpack.c.bf16 %v632_v63, %v632_v63 }
 0x2c6   : > { %794 = vst [vmem:[#allocation2 + $0x2d1] sm:$0xff] %v630_v51  ;;  %v5178_v51 = vpop.f32.mrf.mxu2  ;;  %v7599_v47 = vor.u32 %v8944_v54, %v7596_v15 }
 0x2c7   : > { %1180 = vst [vmem:[#allocation3 + $0x7e4] sm:$0xf] %v10118_v48  ;;  %5043 = vmatmul.bf16.gmra.mxu3 %v8371_v40  ;;  %v10133_v40 = vadd.f32 %v5178_v51, %v5010_v33  ;;  %v5011_v51 = vpop.f32.mrf.mxu1  ;;  %v7948_v33 = vld [vmem:[#allocation3 + $0x41c] sm:$0xf0] }
 0x2c8   : > { %986 = vst [vmem:[#allocation3 + $0x798] sm:$0xf] %v922_v37  ;;  %v5012_v35 = vadd.f32 %v10123_v30, %v5011_v51 }
 0x2c9   : > { %12271 = vst [vmem:[#allocation41_spill] sm:$0xff] %v10129_v9  ;;  %v859_v62 = vld [vmem:[#allocation2 + $0x2c0] sm:$0xff] }
 0x2ca   : > { %1560 = vst [vmem:[#allocation3 + $0x75c] sm:$0xf] %v922_v37  ;;  %v1242_v61 = vld [vmem:[#allocation2 + $0x2ba] sm:$0xff]  ;;  %v1243_v32 = vld [vmem:[#allocation2 + $0x2c2] sm:$0xff]  ;;  %v923_v18 = vpack.c.bf16 %v859_v62, %v859_v62  ;;  %v10136_v62 = vpop.f32.mrf.mxu0 }
 0x2cb   : > { %2135 = vst [vmem:[#allocation3 + $0x720] sm:$0xf] %v922_v37  ;;  %v1306_v55 = vpack.c.bf16 %v1242_v61, %v1242_v61  ;;  %v1307_v43 = vpack.c.bf16 %v1243_v32, %v1243_v32  ;;  %v8948_v37 = vld [vmem:[#allocation3 + $0x150] sm:$0xf0]  ;;  %v7594_v61 = vld [vmem:[#allocation3 + $0x130] sm:$0xf] }
 0x2cc   : > { %1754 = vst [vmem:[#allocation3 + $0x7a8] sm:$0xf] %v10118_v48  ;;  %v7595_v32 = vor.u32 %v8948_v37, %v7594_v61  ;;  %5778 = vmatmul.bf16.gmra.mxu2 %v7599_v47  ;;  %v636_v15 = vpop.f32.mrf.mxu3 }
 0x2cd   : > { %1370 = vst [vmem:[#allocation3 + $0x7a0] sm:$0xf] %v1306_v55  ;;  %v860_v31 = vld [vmem:[#allocation2 + $0x2d0] sm:$0xff]  ;;  %v637_v47 = vadd.f32 %v9989_v34, %v636_v15 }
 0x2ce   : > { %1371 = vst [vmem:[#allocation3 + $0x7c4] sm:$0xf] %v1307_v43  ;;  %v924_v14 = vpack.c.bf16 %v860_v31, %v860_v31  ;;  %v5180_v27 = vpop.f32.mrf.mxu2  ;;  %5609 = vmatmul.bf16.gmra.mxu1 %v7595_v32  ;;  %v635_v31 = vadd.f32 %v9989_v34, %v634_v22  ;;  %v8953_v32 = vld [vmem:[#allocation3 + $0x17c] sm:$0xf] }
 0x2cf   : > { %1561 = vst [vmem:[#allocation3 + $0x780] sm:$0xf] %v923_v18  ;;  %v10141_v54 = vadd.f32 %v5180_v27, %v5012_v35  ;;  %v7632_v27 = vld [vmem:[#allocation3 + $0x19c] sm:$0xf0]  ;;  %v8957_v34 = vld [vmem:[#allocation3 + $0x198] sm:$0xf0] }
 0x2d0   : > { %1944 = vst [vmem:[#allocation3 + $0x764] sm:$0xf] %v1306_v55  ;;  %v1118_v37 = vpack.c.bf16 %v635_v31, %v635_v31  ;;  %v7631_v42 = vor.u32 %v8957_v34, %v7630_v10 }
 0x2d1   : > { %1945 = vst [vmem:[#allocation3 + $0x788] sm:$0xf] %v1307_v43  ;;  %v9141_v39 = vld [vmem:[#allocation3 + $0x75c] sm:$0xf] }
 0x2d2   : > { %2136 = vst [vmem:[#allocation3 + $0x744] sm:$0xf] %v923_v18  ;;  %v10144_v61 = vpop.f32.mrf.mxu0 }
 0x2d3   : > { %2519 = vst [vmem:[#allocation3 + $0x728] sm:$0xf] %v1306_v55  ;;  %v9033_v55 = vld [vmem:[#allocation3 + $0x3fc] sm:$0xf] }
 0x2d4   : > { %12272 = vst [vmem:[#allocation42_spill] sm:$0xff] %v10136_v62 }
 0x2d5   : > { %2520 = vst [vmem:[#allocation3 + $0x74c] sm:$0xf] %v1307_v43  ;;  %v8406_v43 = vld [vmem:[#allocation3 + $0x798] sm:$0xf] }
 0x2d6   : > { %987 = vst [vmem:[#allocation3 + $0x7bc] sm:$0xf] %v923_v18  ;;  %v7951_v18 = vor.u32 %v9033_v55, %v7948_v33  ;;  %v5183_v33 = vpop.f32.mrf.mxu2 }
 0x2d7   : > { %988 = vst [vmem:[#allocation3 + $0x7e0] sm:$0xf] %v924_v14 }
 0x2d8   : > { %1562 = vst [vmem:[#allocation3 + $0x7a4] sm:$0xf] %v924_v14  ;;  %5490 = vmatmul.bf16.gmra.mxu0 %v7951_v18 }
 0x2d9   : > { %2137 = vst [vmem:[#allocation3 + $0x768] sm:$0xf] %v924_v14 }
 0x2da   : > { %2329 = vst [vmem:[#allocation3 + $0x76c] sm:$0xf] %v10118_v48  ;;  %v10146_v48 = vpack.c.bf16 %v637_v47, %v637_v47 }
 0x2db   : > { %795 = vst [vmem:[#allocation2 + $0x2d9] sm:$0xff] %v632_v63  ;;  %v5014_v63 = vpop.f32.mrf.mxu1 }
 0x2dc   : > { %1181 = vst [vmem:[#allocation3 + $0x808] sm:$0xf] %v1117_v12  ;;  %v5015_v51 = vadd.f32 %v10123_v30, %v5014_v63 }
 0x2dd   : > { %1755 = vst [vmem:[#allocation3 + $0x7cc] sm:$0xf] %v1117_v12  ;;  %v9153_v22 = vld [vmem:[#allocation3 + $0x7b8] sm:$0xf0] }
 0x2de   : > { %2330 = vst [vmem:[#allocation3 + $0x790] sm:$0xf] %v1117_v12  ;;  %v8407_v14 = vor.u32 %v9153_v22, %v8406_v43  ;;  %v639_v22 = vpop.f32.mrf.mxu3  ;;  %5614 = vmatmul.bf16.gmra.mxu1 %v7631_v42  ;;  %v5185_v10 = vpop.f32.mrf.mxu2 }
 0x2df   : > { %12273 = vst [vmem:[#allocation43_spill] sm:$0xff] %v10144_v61 }
 0x2e0   : > { %796 = vst [vmem:[#allocation2 + $0x2e9] sm:$0xff] %v635_v31  ;;  %5048 = vmatmul.bf16.gmra.mxu3 %v8407_v14  ;;  %v7635_v31 = vor.u32 %v8953_v32, %v7632_v27  ;;  %v10150_v14 = vadd.f32 %v5183_v33, %v5015_v51  ;;  %v9042_v33 = vld [vmem:[#allocation3 + $0x444] sm:$0xf] }
 0x2e1   : > { %1182 = vst [vmem:[#allocation3 + $0x82c] sm:$0xf] %v1118_v37 }
 0x2e2   : > { %1756 = vst [vmem:[#allocation3 + $0x7f0] sm:$0xf] %v1118_v37  ;;  %v861_v15 = vld [vmem:[#allocation2 + $0x2d8] sm:$0xff]  ;;  %5783 = vmatmul.bf16.gmra.mxu2 %v7635_v31 }
 0x2e3   : > { %v1244_v35 = vld [vmem:[#allocation2 + $0x2d2] sm:$0xff]  ;;  %v1245_v55 = vld [vmem:[#allocation2 + $0x2da] sm:$0xff]  ;;  %2331 = vst [vmem:[#allocation3 + $0x7b4] sm:$0xf] %v1118_v37  ;;  %v925_v12 = vpack.c.bf16 %v861_v15, %v861_v15  ;;  %v10152_v37 = vpop.f32.mrf.mxu0  ;;  %v7984_v15 = vld [vmem:[#allocation3 + $0x464] sm:$0xf0] }
 0x2e4   : > { %v1308_v43 = vpack.c.bf16 %v1244_v35, %v1244_v35  ;;  %v1309_v18 = vpack.c.bf16 %v1245_v55, %v1245_v55  ;;  %797 = vst [vmem:[#allocation2 + $0x2f1] sm:$0xff] %v637_v47  ;;  %v5016_v47 = vpop.f32.mrf.mxu1  ;;  %v7987_v34 = vor.u32 %v9042_v33, %v7984_v15 }
 0x2e5   : > { %1183 = vst [vmem:[#allocation3 + $0x850] sm:$0xf] %v10146_v48  ;;  %v5017_v51 = vadd.f32 %v10123_v30, %v5016_v47  ;;  %v7668_v47 = vld [vmem:[#allocation3 + $0x1e4] sm:$0xf0] }
 0x2e6   : > { %1372 = vst [vmem:[#allocation3 + $0x7e8] sm:$0xf] %v1308_v43  ;;  %v641_v3 = vpop.f32.mrf.mxu3 }
 0x2e7   : > { %1373 = vst [vmem:[#allocation3 + $0x80c] sm:$0xf] %v1309_v18  ;;  %v862_v63 = vld [vmem:[#allocation2 + $0x2e8] sm:$0xff]  ;;  %v10155_v31 = vadd.f32 %v5185_v10, %v5017_v51  ;;  %v7666_v51 = vld [vmem:[#allocation3 + $0x1c0] sm:$0xf] }
 0x2e8   : > { %1563 = vst [vmem:[#allocation3 + $0x7c8] sm:$0xf] %v925_v12  ;;  %v926_v32 = vpack.c.bf16 %v862_v63, %v862_v63  ;;  %5495 = vmatmul.bf16.gmra.mxu0 %v7987_v34  ;;  %v5188_v34 = vpop.f32.mrf.mxu2 }
 0x2e9   : > { %1946 = vst [vmem:[#allocation3 + $0x7ac] sm:$0xf] %v1308_v43 }
 0x2ea   : > { %12274 = vst [vmem:[#allocation44_spill] sm:$0xff] %v10152_v37  ;;  %v8962_v37 = vld [vmem:[#allocation3 + $0x1c4] sm:$0xf] }
 0x2eb   : > { %1947 = vst [vmem:[#allocation3 + $0x7d0] sm:$0xf] %v1309_v18  ;;  %v863_v27 = vld [vmem:[#allocation2 + $0x2f0] sm:$0xff]  ;;  %v10157_v2 = vpop.f32.mrf.mxu0  ;;  %v7671_v15 = vor.u32 %v8962_v37, %v7668_v47 }
 0x2ec   : > { %2138 = vst [vmem:[#allocation3 + $0x78c] sm:$0xf] %v925_v12  ;;  %v1246_v35 = vld [vmem:[#allocation2 + $0x2ea] sm:$0xff]  ;;  %v1247_v55 = vld [vmem:[#allocation2 + $0x2f2] sm:$0xff]  ;;  %v927_v42 = vpack.c.bf16 %v863_v27, %v863_v27  ;;  %v5019_v27 = vpop.f32.mrf.mxu1 }
 0x2ed   : > { %2521 = vst [vmem:[#allocation3 + $0x770] sm:$0xf] %v1308_v43  ;;  %v1310_v41 = vpack.c.bf16 %v1246_v35, %v1246_v35  ;;  %v1311_v63 = vpack.c.bf16 %v1247_v55, %v1247_v55  ;;  %v8442_v43 = vld [vmem:[#allocation3 + $0x7e0] sm:$0xf]  ;;  %v5020_v37 = vadd.f32 %v10123_v30, %v5019_v27  ;;  %v8020_v47 = vld [vmem:[#allocation3 + $0x4ac] sm:$0xf0] }
 0x2ee   : > { %2522 = vst [vmem:[#allocation3 + $0x794] sm:$0xf] %v1309_v18  ;;  %v8966_v18 = vld [vmem:[#allocation3 + $0x1e0] sm:$0xf0]  ;;  %v644_v55 = vpop.f32.mrf.mxu3 }
 0x2ef   : > { %989 = vst [vmem:[#allocation3 + $0x804] sm:$0xf] %v925_v12  ;;  %v7667_v10 = vor.u32 %v8966_v18, %v7666_v51 }
 0x2f0   : > { %990 = vst [vmem:[#allocation3 + $0x828] sm:$0xf] %v926_v32  ;;  %v5190_v27 = vpop.f32.mrf.mxu2 }
 0x2f1   : > { %1564 = vst [vmem:[#allocation3 + $0x7ec] sm:$0xf] %v926_v32  ;;  %5619 = vmatmul.bf16.gmra.mxu1 %v7667_v10 }
 0x2f2   : > { %2139 = vst [vmem:[#allocation3 + $0x7b0] sm:$0xf] %v926_v32  ;;  %v10163_v32 = vld [vmem:[%s12228_s2] ss:$0 sm:$0xff]  ;;  %5788 = vmatmul.bf16.gmra.mxu2 %v7671_v15 }
 0x2f3   : > { %991 = vst [vmem:[#allocation3 + $0x84c] sm:$0xf] %v927_v42  ;;  %v640_v33 = vadd.f32 %v10163_v32, %v639_v22  ;;  %v642_v61 = vadd.f32 %v10163_v32, %v641_v3  ;;  %v9051_v22 = vld [vmem:[#allocation3 + $0x48c] sm:$0xf]  ;;  %v10171_v15 = vpop.f32.mrf.mxu0 }
 0x2f4   : > { %1374 = vst [vmem:[#allocation3 + $0x830] sm:$0xf] %v1310_v41  ;;  %v8023_v18 = vor.u32 %v9051_v22, %v8020_v47  ;;  %v8971_v3 = vld [vmem:[#allocation3 + $0x20c] sm:$0xf]  ;;  %v7702_v22 = vld [vmem:[#allocation3 + $0x208] sm:$0xf] }
 0x2f5   : > { %12275 = vst [vmem:[#allocation45_spill] sm:$0xff] %v10157_v2  ;;  %v1120_v2 = vpack.c.bf16 %v640_v33, %v640_v33 }
 0x2f6   : > { %1375 = vst [vmem:[#allocation3 + $0x854] sm:$0xf] %v1311_v63  ;;  %v9162_v12 = vld [vmem:[#allocation3 + $0x800] sm:$0xf0] }
 0x2f7   : > { %1565 = vst [vmem:[#allocation3 + $0x810] sm:$0xf] %v927_v42  ;;  %v8443_v35 = vor.u32 %v9162_v12, %v8442_v43  ;;  %v10169_v43 = vadd.f32 %v5188_v34, %v5020_v37  ;;  %v1121_v12 = vpack.c.bf16 %v642_v61, %v642_v61  ;;  %v646_v34 = vpop.f32.mrf.mxu3 }
 0x2f8   : > { %1757 = vst [vmem:[#allocation3 + $0x814] sm:$0xf] %v10146_v48  ;;  %5500 = vmatmul.bf16.gmra.mxu0 %v8023_v18 }
 0x2f9   : > { %1948 = vst [vmem:[#allocation3 + $0x7f4] sm:$0xf] %v1310_v41  ;;  %5053 = vmatmul.bf16.gmra.mxu3 %v8443_v35  ;;  %v8478_v35 = vld [vmem:[#allocation3 + $0x828] sm:$0xf] }
 0x2fa   : > { %1949 = vst [vmem:[#allocation3 + $0x818] sm:$0xf] %v1311_v63  ;;  %v9171_v10 = vld [vmem:[#allocation3 + $0x848] sm:$0xf0] }
 0x2fb   : > { %2140 = vst [vmem:[#allocation3 + $0x7d4] sm:$0xf] %v927_v42  ;;  %v645_v42 = vadd.f32 %v10163_v32, %v644_v55  ;;  %v8479_v18 = vor.u32 %v9171_v10, %v8478_v35  ;;  %v9060_v35 = vld [vmem:[#allocation3 + $0x4d4] sm:$0xf] }
 0x2fc   : > { %2332 = vst [vmem:[#allocation3 + $0x7d8] sm:$0xf] %v10146_v48  ;;  %v5021_v48 = vpop.f32.mrf.mxu1 }
 0x2fd   : > { %2523 = vst [vmem:[#allocation3 + $0x7b8] sm:$0xf] %v1310_v41  ;;  %v7704_v41 = vld [vmem:[#allocation3 + $0x22c] sm:$0xf0]  ;;  %v5022_v51 = vadd.f32 %v10123_v30, %v5021_v48  ;;  %v5193_v48 = vpop.f32.mrf.mxu2 }
 0x2fe   : > { %2524 = vst [vmem:[#allocation3 + $0x7dc] sm:$0xf] %v1311_v63  ;;  %v10174_v63 = vpack.c.bf16 %v645_v42, %v645_v42  ;;  %v7707_v47 = vor.u32 %v8971_v3, %v7704_v41  ;;  %v8056_v41 = vld [vmem:[#allocation3 + $0x4f4] sm:$0xf0] }
 0x2ff   : > { %798 = vst [vmem:[#allocation2 + $0x301] sm:$0xff] %v640_v33  ;;  %v8975_v33 = vld [vmem:[#allocation3 + $0x228] sm:$0xf0]  ;;  %v10177_v55 = vadd.f32 %v5190_v27, %v5022_v51 }
 0x300   : > { %12276 = vst [vmem:[#allocation46_spill] sm:$0xff] %v10171_v15  ;;  %v7703_v15 = vor.u32 %v8975_v33, %v7702_v22  ;;  %v649_v33 = vpop.f32.mrf.mxu3  ;;  %v8980_v22 = vld [vmem:[#allocation3 + $0x254] sm:$0xf] }
 0x301   : > { %1184 = vst [vmem:[#allocation3 + $0x874] sm:$0xf] %v1120_v2 }
 0x302   : > { %1758 = vst [vmem:[#allocation3 + $0x838] sm:$0xf] %v1120_v2  ;;  %5793 = vmatmul.bf16.gmra.mxu2 %v7707_v47  ;;  %5624 = vmatmul.bf16.gmra.mxu1 %v7703_v15 }
 0x303   : > { %2333 = vst [vmem:[#allocation3 + $0x7fc] sm:$0xf] %v1120_v2 }
 0x304   : > { %799 = vst [vmem:[#allocation2 + $0x309] sm:$0xff] %v642_v61  ;;  %v10179_v61 = vpop.f32.mrf.mxu0  ;;  %v5024_v3 = vpop.f32.mrf.mxu1 }
 0x305   : > { %1185 = vst [vmem:[#allocation3 + $0x898] sm:$0xf] %v1121_v12  ;;  %v5025_v51 = vadd.f32 %v10123_v30, %v5024_v3  ;;  %v8984_v3 = vld [vmem:[#allocation3 + $0x270] sm:$0xf0] }
 0x306   : > { %1759 = vst [vmem:[#allocation3 + $0x85c] sm:$0xf] %v1121_v12  ;;  %v864_v37 = vld [vmem:[#allocation2 + $0x300] sm:$0xff] }
 0x307   : > { %2334 = vst [vmem:[#allocation3 + $0x820] sm:$0xf] %v1121_v12  ;;  %v928_v2 = vpack.c.bf16 %v864_v37, %v864_v37  ;;  %v10184_v10 = vadd.f32 %v5193_v48, %v5025_v51  ;;  %v8059_v37 = vor.u32 %v9060_v35, %v8056_v41 }
 0x308   : > { %800 = vst [vmem:[#allocation2 + $0x319] sm:$0xff] %v645_v42 }
 0x309   : > { %12277 = vst [vmem:[#allocation47_spill] sm:$0xff] %v10179_v61  ;;  %5058 = vmatmul.bf16.gmra.mxu3 %v8479_v18  ;;  %5505 = vmatmul.bf16.gmra.mxu0 %v8059_v37  ;;  %v7740_v18 = vld [vmem:[#allocation3 + $0x274] sm:$0xf0]  ;;  %v7738_v61 = vld [vmem:[#allocation3 + $0x250] sm:$0xf] }
 0x30a   : > { %1186 = vst [vmem:[#allocation3 + $0x8bc] sm:$0xf] %v10174_v63  ;;  %v7743_v37 = vor.u32 %v8980_v22, %v7740_v18  ;;  %v7739_v9 = vor.u32 %v8984_v3, %v7738_v61  ;;  %v8092_v18 = vld [vmem:[#allocation3 + $0x53c] sm:$0xf0] }
 0x30b   : > { %992 = vst [vmem:[#allocation3 + $0x870] sm:$0xf] %v928_v2  ;;  %v865_v28 = vld [vmem:[#allocation2 + $0x308] sm:$0xff] }
 0x30c   : > { %1566 = vst [vmem:[#allocation3 + $0x834] sm:$0xf] %v928_v2  ;;  %v1248_v62 = vld [vmem:[#allocation2 + $0x302] sm:$0xff]  ;;  %v1249_v23 = vld [vmem:[#allocation2 + $0x30a] sm:$0xff]  ;;  %v929_v12 = vpack.c.bf16 %v865_v28, %v865_v28  ;;  %v10186_v15 = vpop.f32.mrf.mxu0 }
 0x30d   : > { %2141 = vst [vmem:[#allocation3 + $0x7f8] sm:$0xf] %v928_v2  ;;  %v1312_v27 = vpack.c.bf16 %v1248_v62, %v1248_v62  ;;  %v1313_v42 = vpack.c.bf16 %v1249_v23, %v1249_v23  ;;  %v5195_v23 = vpop.f32.mrf.mxu2  ;;  %v647_v62 = vadd.f32 %v10163_v32, %v646_v34  ;;  %v5026_v2 = vpop.f32.mrf.mxu1  ;;  %v650_v34 = vadd.f32 %v10163_v32, %v649_v33 }
 0x30e   : > { %1760 = vst [vmem:[#allocation3 + $0x880] sm:$0xf] %v10174_v63  ;;  %v5027_v48 = vadd.f32 %v10123_v30, %v5026_v2 }
 0x30f   : > { %993 = vst [vmem:[#allocation3 + $0x894] sm:$0xf] %v929_v12  ;;  %v866_v47 = vld [vmem:[#allocation2 + $0x318] sm:$0xff]  ;;  %v1698_v2 = vpack.c.bf16 %v650_v34, %v650_v34 }
 0x310   : > { %1376 = vst [vmem:[#allocation3 + $0x878] sm:$0xf] %v1312_v27  ;;  %v930_v28 = vpack.c.bf16 %v866_v47, %v866_v47  ;;  %v10190_v35 = vadd.f32 %v5195_v23, %v5027_v48 }
 0x311   : > { %1377 = vst [vmem:[#allocation3 + $0x89c] sm:$0xf] %v1313_v42 }
 0x312   : > { %12278 = vst [vmem:[#allocation48_spill] sm:$0xff] %v10186_v15  ;;  %v8514_v41 = vld [vmem:[#allocation3 + $0x870] sm:$0xf]  ;;  %v1123_v15 = vpack.c.bf16 %v647_v62, %v647_v62  ;;  %5798 = vmatmul.bf16.gmra.mxu2 %v7743_v37  ;;  %5629 = vmatmul.bf16.gmra.mxu1 %v7739_v9 }
 0x313   : > { %1567 = vst [vmem:[#allocation3 + $0x858] sm:$0xf] %v929_v12 }
 0x314   : > { %1950 = vst [vmem:[#allocation3 + $0x83c] sm:$0xf] %v1312_v27  ;;  %v10192_v47 = vpop.f32.mrf.mxu0 }
 0x315   : > { %1951 = vst [vmem:[#allocation3 + $0x860] sm:$0xf] %v1313_v42  ;;  %v5029_v22 = vpop.f32.mrf.mxu1 }
 0x316   : > { %2142 = vst [vmem:[#allocation3 + $0x81c] sm:$0xf] %v929_v12  ;;  %v9180_v51 = vld [vmem:[#allocation3 + $0x890] sm:$0xf0]  ;;  %v651_v12 = vpop.f32.mrf.mxu3  ;;  %v5030_v33 = vadd.f32 %v10123_v30, %v5029_v22 }
 0x317   : > { %2525 = vst [vmem:[#allocation3 + $0x800] sm:$0xf] %v1312_v27  ;;  %v8515_v27 = vor.u32 %v9180_v51, %v8514_v41  ;;  %v652_v23 = vadd.f32 %v10163_v32, %v651_v12 }
 0x318   : > { %2526 = vst [vmem:[#allocation3 + $0x824] sm:$0xf] %v1313_v42  ;;  %v5198_v42 = vpop.f32.mrf.mxu2 }
 0x319   : > { %994 = vst [vmem:[#allocation3 + $0x8b8] sm:$0xf] %v930_v28  ;;  %5063 = vmatmul.bf16.gmra.mxu3 %v8515_v27  ;;  %v1699_v61 = vpack.c.bf16 %v652_v23, %v652_v23  ;;  %v10198_v48 = vadd.f32 %v5198_v42, %v5030_v33  ;;  %v8989_v27 = vld [vmem:[#allocation3 + $0x29c] sm:$0xf]  ;;  %v7776_v42 = vld [vmem:[#allocation3 + $0x2bc] sm:$0xf0] }
 0x31a   : > { %1568 = vst [vmem:[#allocation3 + $0x87c] sm:$0xf] %v930_v28 }
 0x31b   : > { %12279 = vst [vmem:[#allocation49_spill] sm:$0xff] %v10192_v47  ;;  %v9087_v47 = vld [vmem:[#allocation3 + $0x5ac] sm:$0xf] }
 0x31c   : > { %2143 = vst [vmem:[#allocation3 + $0x840] sm:$0xf] %v930_v28  ;;  %v9069_v28 = vld [vmem:[#allocation3 + $0x51c] sm:$0xf]  ;;  %v10203_v9 = vpop.f32.mrf.mxu0 }
 0x31d   : > { %2335 = vst [vmem:[#allocation3 + $0x844] sm:$0xf] %v10174_v63  ;;  %v9217_v63 = vld [vmem:[%s12229_s3 + $0xb8] sm:$0xff]  ;;  %v5031_v12 = vpop.f32.mrf.mxu1 }
 0x31e   : > { %801 = vst [vmem:[#allocation2 + $0x321] sm:$0xff] %v647_v62  ;;  %v8095_v62 = vor.u32 %v9069_v28, %v8092_v18  ;;  %5243 = vmatpush.bf16.msrb.mxu3 %v9217_v63  ;;  %v5032_v22 = vadd.f32 %v10123_v30, %v5031_v12  ;;  %v7779_v28 = vor.u32 %v8989_v27, %v7776_v42  ;;  %v7774_v63 = vld [vmem:[#allocation3 + $0x298] sm:$0xf] }
 0x31f   : > { %1187 = vst [vmem:[#allocation3 + $0x8e0] sm:$0xf] %v1123_v15 }
 0x320   : > { %1761 = vst [vmem:[#allocation3 + $0x8a4] sm:$0xf] %v1123_v15  ;;  %5510 = vmatmul.bf16.gmra.mxu0 %v8095_v62 }
 0x321   : > { %2336 = vst [vmem:[#allocation3 + $0x868] sm:$0xf] %v1123_v15  ;;  %v5200_v15 = vpop.f32.mrf.mxu2 }
 0x322   : > { %802 = vst [vmem:[#allocation2 + $0x331] sm:$0xff] %v650_v34  ;;  %v10206_v33 = vadd.f32 %v5200_v15, %v5032_v22  ;;  %5803 = vmatmul.bf16.gmra.mxu2 %v7779_v28  ;;  %v8128_v22 = vld [vmem:[#allocation3 + $0x584] sm:$0xf0]  ;;  %v10214_v28 = vpop.f32.mrf.mxu3 }
 0x323   : > { %1762 = vst [vmem:[#allocation3 + $0x8c8] sm:$0xf] %v1698_v2 }
 0x324   : > { %12280 = vst [vmem:[#allocation50_spill] sm:$0xff] %v10203_v9 }
 0x325   : > { %2337 = vst [vmem:[#allocation3 + $0x88c] sm:$0xf] %v1698_v2  ;;  %v867_v32 = vld [vmem:[#allocation2 + $0x320] sm:$0xff]  ;;  %v8993_v2 = vld [vmem:[#allocation3 + $0x2b8] sm:$0xf0]  ;;  %v10212_v42 = vpop.f32.mrf.mxu1 }
 0x326   : > { %v1250_v3 = vld [vmem:[#allocation2 + $0x31a] sm:$0xff]  ;;  %v1251_v41 = vld [vmem:[#allocation2 + $0x322] sm:$0xff]  ;;  %803 = vst [vmem:[#allocation2 + $0x339] sm:$0xff] %v652_v23  ;;  %v931_v51 = vpack.c.bf16 %v867_v32, %v867_v32  ;;  %v10208_v23 = vpop.f32.mrf.mxu0 }
 0x327   : > { %v1314_v37 = vpack.c.bf16 %v1250_v3, %v1250_v3  ;;  %v1315_v34 = vpack.c.bf16 %v1251_v41, %v1251_v41  ;;  %1763 = vst [vmem:[#allocation3 + $0x8ec] sm:$0xf] %v1699_v61  ;;  %v8550_v3 = vld [vmem:[#allocation3 + $0x8b8] sm:$0xf] }
 0x328   : > { %2338 = vst [vmem:[#allocation3 + $0x8b0] sm:$0xf] %v1699_v61  ;;  %v7775_v61 = vor.u32 %v8993_v2, %v7774_v63 }
 0x329   : > { %995 = vst [vmem:[#allocation3 + $0x8dc] sm:$0xf] %v931_v51  ;;  %v1442_v18 = vld [vmem:[#allocation2 + $0x330] sm:$0xff]  ;;  %v10210_v30 = vpop.f32.mrf.mxu2 }
 0x32a   : > { %1378 = vst [vmem:[#allocation3 + $0x8c0] sm:$0xf] %v1314_v37  ;;  %v1506_v32 = vpack.c.bf16 %v1442_v18, %v1442_v18  ;;  %5634 = vmatmul.bf16.gmra.mxu1 %v7775_v61  ;;  %v9078_v18 = vld [vmem:[#allocation3 + $0x564] sm:$0xf] }
 0x32b   : > { %1379 = vst [vmem:[#allocation3 + $0x8e4] sm:$0xf] %v1315_v34  ;;  %v8998_v61 = vld [vmem:[#allocation3 + $0x2e4] sm:$0xf] }
 0x32c   : > { %1569 = vst [vmem:[#allocation3 + $0x8a0] sm:$0xf] %v931_v51 }
 0x32d   : > { %12281 = vst [vmem:[#allocation51_spill] sm:$0xff] %v10208_v23  ;;  %v1443_v62 = vld [vmem:[#allocation2 + $0x338] sm:$0xff] }
 0x32e   : > { %1952 = vst [vmem:[#allocation3 + $0x884] sm:$0xf] %v1314_v37  ;;  %v1826_v41 = vld [vmem:[#allocation2 + $0x332] sm:$0xff]  ;;  %v1827_v12 = vld [vmem:[#allocation2 + $0x33a] sm:$0xff]  ;;  %v1507_v27 = vpack.c.bf16 %v1443_v62, %v1443_v62  ;;  %v10219_v63 = vpop.f32.mrf.mxu0  ;;  %v10223_v62 = vpop.f32.mrf.mxu1 }
 0x32f   : > { %1953 = vst [vmem:[#allocation3 + $0x8a8] sm:$0xf] %v1315_v34  ;;  %v1890_v9 = vpack.c.bf16 %v1826_v41, %v1826_v41  ;;  %v1891_v2 = vpack.c.bf16 %v1827_v12, %v1827_v12  ;;  %v10227_v12 = vpop.f32.mrf.mxu3 }
 0x330   : > { %12282 = vst [vmem:[#allocation52_spill] sm:$0xff] %v10210_v30  ;;  %v9189_v15 = vld [vmem:[#allocation3 + $0x8d8] sm:$0xf0] }
 0x331   : > { %2144 = vst [vmem:[#allocation3 + $0x864] sm:$0xf] %v931_v51  ;;  %v8551_v23 = vor.u32 %v9189_v15, %v8550_v3  ;;  %v9216_v51 = vld [vmem:[%s12229_s3 + $0xb0] sm:$0xff]  ;;  %v7810_v15 = vld [vmem:[#allocation3 + $0x2e0] sm:$0xf] }
 0x332   : > { %2527 = vst [vmem:[#allocation3 + $0x848] sm:$0xf] %v1314_v37  ;;  %v8131_v37 = vor.u32 %v9078_v18, %v8128_v22  ;;  %5244 = vmatpush.bf16.msrb.mxu3 %v9216_v51  ;;  %v8300_v18 = vld [vmem:[#allocation3 + $0x6e4] sm:$0xf0] }
 0x333   : > { %12283 = vst [vmem:[#allocation53_spill] sm:$0xff] %v10212_v42  ;;  %5068 = vmatmul.bf16.gmra.mxu3 %v8551_v23  ;;  %v7812_v23 = vld [vmem:[#allocation3 + $0x304] sm:$0xf0]  ;;  %v8380_v42 = vld [vmem:[#allocation3 + $0x77c] sm:$0xf0] }
 0x334   : > { %2528 = vst [vmem:[#allocation3 + $0x86c] sm:$0xf] %v1315_v34  ;;  %5515 = vmatmul.bf16.gmra.mxu0 %v8131_v37  ;;  %v10221_v34 = vpop.f32.mrf.mxu2  ;;  %v7815_v3 = vor.u32 %v8998_v61, %v7812_v23  ;;  %v8164_v37 = vld [vmem:[#allocation3 + $0x5cc] sm:$0xf0] }
 0x335   : > { %1570 = vst [vmem:[#allocation3 + $0x8c4] sm:$0xf] %v1506_v32  ;;  %v8167_v61 = vor.u32 %v9087_v47, %v8164_v37  ;;  %v8336_v47 = vld [vmem:[#allocation3 + $0x72c] sm:$0xf0] }
 0x336   : > { %2145 = vst [vmem:[#allocation3 + $0x888] sm:$0xf] %v1506_v32  ;;  %v9002_v32 = vld [vmem:[#allocation3 + $0x300] sm:$0xf0]  ;;  %v10225_v41 = vpop.f32.mrf.mxu0  ;;  %5808 = vmatmul.bf16.gmra.mxu2 %v7815_v3 }
 0x337   : > { %1571 = vst [vmem:[#allocation3 + $0x8e8] sm:$0xf] %v1507_v27  ;;  %v7811_v22 = vor.u32 %v9002_v32, %v7810_v15 }
 0x338   : > { %12284 = vst [vmem:[#allocation54_spill] sm:$0xff] %v10219_v63 }
 0x339   : > { %1954 = vst [vmem:[#allocation3 + $0x8cc] sm:$0xf] %v1890_v9 }
 0x33a   : > { %1955 = vst [vmem:[#allocation3 + $0x8f0] sm:$0xf] %v1891_v2  ;;  %5639 = vmatmul.bf16.gmra.mxu1 %v7811_v22  ;;  %v10238_v32 = vpop.f32.mrf.mxu3  ;;  %v9007_v22 = vld [vmem:[#allocation3 + $0x32c] sm:$0xf] }
 0x33b   : > { %12285 = vst [vmem:[#allocation55_spill] sm:$0xff] %v10221_v34 }
 0x33c   : > { %2146 = vst [vmem:[#allocation3 + $0x8ac] sm:$0xf] %v1507_v27  ;;  %v10229_v51 = vpop.f32.mrf.mxu2  ;;  %v9122_v27 = vld [vmem:[#allocation3 + $0x6c4] sm:$0xf] }
 0x33d   : > { %2529 = vst [vmem:[#allocation3 + $0x890] sm:$0xf] %v1890_v9  ;;  %v10231_v9 = vpop.f32.mrf.mxu1  ;;  %v8303_v63 = vor.u32 %v9122_v27, %v8300_v18  ;;  %v9011_v18 = vld [vmem:[#allocation3 + $0x348] sm:$0xf0] }
 0x33e   : > { %12286 = vst [vmem:[#allocation56_spill] sm:$0xff] %v10223_v62  ;;  %v10236_v23 = vpop.f32.mrf.mxu0  ;;  %v7847_v24 = vor.u32 %v9011_v18, %v7846_v58 }
 0x33f   : > { %2530 = vst [vmem:[#allocation3 + $0x8b4] sm:$0xf] %v1891_v2  ;;  %v9215_v2 = vld [vmem:[%s12229_s3 + $0xa8] sm:$0xff] }
 0x340   : > { %12287 = vst [vmem:[#allocation57_spill] sm:$0xff] %v10225_v41  ;;  %5245 = vmatpush.bf16.msrb.mxu3 %v9215_v2  ;;  %v7848_v41 = vld [vmem:[#allocation3 + $0x34c] sm:$0xf0]  ;;  %v9131_v2 = vld [vmem:[#allocation3 + $0x70c] sm:$0xf] }
 0x341   : > { %12288 = vst [vmem:[#allocation58_spill] sm:$0xff] %v10229_v51  ;;  %v7851_v27 = vor.u32 %v9007_v22, %v7848_v41  ;;  %v8339_v57 = vor.u32 %v9131_v2, %v8336_v47  ;;  %v9214_v41 = vld [vmem:[%s12229_s3 + $0xa0] sm:$0xff]  ;;  %v9020_v47 = vld [vmem:[#allocation3 + $0x390] sm:$0xf0] }
 0x342   : > { %12289 = vst [vmem:[#allocation59_spill] sm:$0xff] %v10231_v9 }
 0x343   : > { %5202 = vmatmul.bf16.vlgmr.msra.gmra.mxu3 %v8303_v63  ;;  %12290 = vst [vmem:[#allocation60_spill] sm:$0xff] %v10236_v23 }
 0x344   : > { %5520 = vmatmul.bf16.gmra.mxu0 %v8167_v61  ;;  %v10240_v3 = vpop.f32.mrf.mxu2  ;;  %v10248_v61 = vpop.f32.mrf.mxu3  ;;  %5246 = vmatpush.bf16.msrb.mxu3 %v9214_v41 }
 0x345   : > { %12291 = vst [vmem:[#allocation61_spill] sm:$0xff] %v10240_v3  ;;  %v10242_v15 = vpop.f32.mrf.mxu1  ;;  %v8200_v3 = vld [vmem:[#allocation3 + $0x614] sm:$0xf0] }
 0x346   : > { %12292 = vst [vmem:[#allocation62_spill] sm:$0xff] %v10242_v15  ;;  %v10244_v63 = vpop.f32.mrf.mxu0  ;;  %5813 = vmatmul.bf16.gmra.mxu2 %v7851_v27  ;;  %v9096_v15 = vld [vmem:[#allocation3 + $0x5f4] sm:$0xf] }
 0x347   : > { %12293 = vst [vmem:[#allocation63_spill] sm:$0xff] %v10244_v63  ;;  %v8203_v22 = vor.u32 %v9096_v15, %v8200_v3  ;;  %v9016_v27 = vld [vmem:[#allocation3 + $0x374] sm:$0xf]  ;;  %v7884_v63 = vld [vmem:[#allocation3 + $0x394] sm:$0xf0] }
 0x348   : > { %12295 = vst [vmem:[#allocation65_spill] sm:$0xff] %v10248_v61  ;;  %v7887_v2 = vor.u32 %v9016_v27, %v7884_v63  ;;  %v9140_v3 = vld [vmem:[#allocation3 + $0x754] sm:$0xf]  ;;  %v8372_v15 = vld [vmem:[#allocation3 + $0x774] sm:$0xf0] }
 0x349   : > { %v9213_v63 = vld [vmem:[%s12229_s3 + $0x98] sm:$0xff] }
 0x34a   : > { %5644 = vmatmul.bf16.gmra.mxu1 %v7847_v24  ;;  %5247 = vmatpush.bf16.msrb.mxu3 %v9213_v63 }
 0x34c   : > { %v10246_v37 = vpop.f32.mrf.mxu2 }
 0x34d   : > { %12294 = vst [vmem:[#allocation64_spill] sm:$0xff] %v10246_v37  ;;  %v10250_v23 = vpop.f32.mrf.mxu1  ;;  %v10261_v37 = vpop.f32.mrf.mxu3 }
 0x34e   : > { %12296 = vst [vmem:[#allocation66_spill] sm:$0xff] %v10250_v23  ;;  %v10255_v58 = vpop.f32.mrf.mxu0  ;;  %v7882_v23 = vld [vmem:[#allocation3 + $0x370] sm:$0xf] }
 0x34f   : > { %12297 = vst [vmem:[#allocation67_spill] sm:$0xff] %v10255_v58  ;;  %v7883_v51 = vor.u32 %v9020_v47, %v7882_v23 }
 0x353   : > { %5207 = vmatmul.bf16.gmra.mxu3 %v8339_v57 }
 0x354   : > { %5525 = vmatmul.bf16.gmra.mxu0 %v8203_v22  ;;  %v10257_v18 = vpop.f32.mrf.mxu2  ;;  %v8236_v22 = vld [vmem:[#allocation3 + $0x65c] sm:$0xf0] }
 0x355   : > { %12298 = vst [vmem:[#allocation68_spill] sm:$0xff] %v10257_v18  ;;  %v10259_v24 = vpop.f32.mrf.mxu1  ;;  %v8375_v18 = vor.u32 %v9140_v3, %v8372_v15  ;;  %v9029_v3 = vld [vmem:[#allocation3 + $0x3d8] sm:$0xf0] }
 0x356   : > { %12299 = vst [vmem:[#allocation69_spill] sm:$0xff] %v10259_v24  ;;  %v10263_v57 = vpop.f32.mrf.mxu0  ;;  %5818 = vmatmul.bf16.gmra.mxu2 %v7887_v2  ;;  %v9105_v24 = vld [vmem:[#allocation3 + $0x63c] sm:$0xf] }
 0x357   : > { %12300 = vst [vmem:[#allocation70_spill] sm:$0xff] %v10263_v57  ;;  %v8239_v27 = vor.u32 %v9105_v24, %v8236_v22  ;;  %v10272_v57 = vpop.f32.mrf.mxu3  ;;  %v9025_v2 = vld [vmem:[#allocation3 + $0x3bc] sm:$0xf]  ;;  %v8408_v22 = vld [vmem:[#allocation3 + $0x7bc] sm:$0xf0] }
 0x358   : > { %12303 = vst [vmem:[#allocation73_spill] sm:$0xff] %v10272_v57  ;;  %v9149_v24 = vld [vmem:[#allocation3 + $0x79c] sm:$0xf] }
 0x35a   : > { %5649 = vmatmul.bf16.gmra.mxu1 %v7883_v51 }
 0x35c   : > { %v10265_v58 = vpop.f32.mrf.mxu2 }
 0x35d   : > { %12301 = vst [vmem:[#allocation71_spill] sm:$0xff] %v10265_v58  ;;  %v10267_v41 = vpop.f32.mrf.mxu1  ;;  %v7920_v58 = vld [vmem:[#allocation3 + $0x3dc] sm:$0xf0] }
 0x35e   : > { %12302 = vst [vmem:[#allocation72_spill] sm:$0xff] %v10267_v41  ;;  %v10274_v23 = vpop.f32.mrf.mxu0  ;;  %v7923_v15 = vor.u32 %v9025_v2, %v7920_v58  ;;  %v7918_v41 = vld [vmem:[#allocation3 + $0x3b8] sm:$0xf]  ;;  %v9212_v58 = vld [vmem:[%s12229_s3 + $0x90] sm:$0xff] }
 0x35f   : > { %12304 = vst [vmem:[#allocation74_spill] sm:$0xff] %v10274_v23  ;;  %v7919_v19 = vor.u32 %v9029_v3, %v7918_v41  ;;  %5248 = vmatpush.bf16.msrb.mxu3 %v9212_v58 }
 0x363   : > { %5212 = vmatmul.bf16.gmra.mxu3 %v8375_v18  ;;  %v10282_v9 = vpop.f32.mrf.mxu3 }
 0x364   : > { %5530 = vmatmul.bf16.gmra.mxu0 %v8239_v27  ;;  %v10276_v47 = vpop.f32.mrf.mxu2  ;;  %v8272_v27 = vld [vmem:[#allocation3 + $0x6a4] sm:$0xf0] }
 0x365   : > { %12305 = vst [vmem:[#allocation75_spill] sm:$0xff] %v10276_v47  ;;  %v10278_v51 = vpop.f32.mrf.mxu1  ;;  %v8411_v47 = vor.u32 %v9149_v24, %v8408_v22  ;;  %v9038_v24 = vld [vmem:[#allocation3 + $0x420] sm:$0xf0] }
 0x366   : > { %12306 = vst [vmem:[#allocation76_spill] sm:$0xff] %v10278_v51  ;;  %v10280_v18 = vpop.f32.mrf.mxu0  ;;  %5823 = vmatmul.bf16.gmra.mxu2 %v7923_v15  ;;  %v9114_v51 = vld [vmem:[#allocation3 + $0x684] sm:$0xf] }
 0x367   : > { %12307 = vst [vmem:[#allocation77_spill] sm:$0xff] %v10280_v18  ;;  %v8275_v2 = vor.u32 %v9114_v51, %v8272_v27  ;;  %v9034_v18 = vld [vmem:[#allocation3 + $0x404] sm:$0xf]  ;;  %v8444_v27 = vld [vmem:[#allocation3 + $0x804] sm:$0xf0] }
 0x368   : > { %v9158_v51 = vld [vmem:[#allocation3 + $0x7e4] sm:$0xf] }
 0x36a   : > { %5654 = vmatmul.bf16.gmra.mxu1 %v7919_v19 }
 0x36b   : > { %v10295_v15 = vpop.f32.mrf.mxu3 }
 0x36c   : > { %v10284_v23 = vpop.f32.mrf.mxu2 }
 0x36d   : > { %12308 = vst [vmem:[#allocation78_spill] sm:$0xff] %v10284_v23  ;;  %v10286_v63 = vpop.f32.mrf.mxu1  ;;  %v7956_v23 = vld [vmem:[#allocation3 + $0x424] sm:$0xf0] }
 0x36e   : > { %12309 = vst [vmem:[#allocation79_spill] sm:$0xff] %v10286_v63  ;;  %v10291_v41 = vpop.f32.mrf.mxu0  ;;  %v7959_v22 = vor.u32 %v9034_v18, %v7956_v23  ;;  %v7954_v63 = vld [vmem:[#allocation3 + $0x400] sm:$0xf]  ;;  %v9211_v23 = vld [vmem:[%s12229_s3 + $0x88] sm:$0xff] }
 0x36f   : > { %12310 = vst [vmem:[#allocation80_spill] sm:$0xff] %v10291_v41  ;;  %v7955_v29 = vor.u32 %v9038_v24, %v7954_v63  ;;  %5249 = vmatpush.bf16.msrb.mxu3 %v9211_v23 }
 0x373   : > { %5217 = vmatmul.bf16.gmra.mxu3 %v8411_v47 }
 0x374   : > { %5535 = vmatmul.bf16.gmra.mxu0 %v8275_v2  ;;  %v10293_v3 = vpop.f32.mrf.mxu2  ;;  %v8308_v2 = vld [vmem:[#allocation3 + $0x6ec] sm:$0xf0] }
 0x375   : > { %12311 = vst [vmem:[#allocation81_spill] sm:$0xff] %v10293_v3  ;;  %v10297_v19 = vpop.f32.mrf.mxu1  ;;  %v8447_v3 = vor.u32 %v9158_v51, %v8444_v27  ;;  %v9047_v27 = vld [vmem:[#allocation3 + $0x468] sm:$0xf0] }
 0x376   : > { %12312 = vst [vmem:[#allocation82_spill] sm:$0xff] %v10297_v19  ;;  %v10299_v47 = vpop.f32.mrf.mxu0  ;;  %5828 = vmatmul.bf16.gmra.mxu2 %v7959_v22  ;;  %v9123_v19 = vld [vmem:[#allocation3 + $0x6cc] sm:$0xf] }
 0x377   : > { %12313 = vst [vmem:[#allocation83_spill] sm:$0xff] %v10299_v47  ;;  %v8311_v18 = vor.u32 %v9123_v19, %v8308_v2  ;;  %v9043_v22 = vld [vmem:[#allocation3 + $0x44c] sm:$0xf]  ;;  %v7992_v47 = vld [vmem:[#allocation3 + $0x46c] sm:$0xf0] }
 0x378   : > { %v9167_v19 = vld [vmem:[#allocation3 + $0x82c] sm:$0xf]  ;;  %v8480_v2 = vld [vmem:[#allocation3 + $0x84c] sm:$0xf0] }
 0x37a   : > { %5659 = vmatmul.bf16.gmra.mxu1 %v7955_v29 }
 0x37c   : > { %v10301_v41 = vpop.f32.mrf.mxu2  ;;  %v10305_v34 = vpop.f32.mrf.mxu3 }
 0x37d   : > { %12314 = vst [vmem:[#allocation84_spill] sm:$0xff] %v10301_v41  ;;  %v10303_v58 = vpop.f32.mrf.mxu1  ;;  %v7995_v41 = vor.u32 %v9043_v22, %v7992_v47  ;;  %v9210_v47 = vld [vmem:[%s12229_s3 + $0x80] sm:$0xff] }
 0x37e   : > { %12315 = vst [vmem:[#allocation85_spill] sm:$0xff] %v10303_v58  ;;  %v10310_v63 = vpop.f32.mrf.mxu0  ;;  %v7990_v58 = vld [vmem:[#allocation3 + $0x448] sm:$0xf]  ;;  %5250 = vmatpush.bf16.msrb.mxu3 %v9210_v47 }
 0x37f   : > { %12316 = vst [vmem:[#allocation86_spill] sm:$0xff] %v10310_v63  ;;  %v7991_v4 = vor.u32 %v9047_v27, %v7990_v58  ;;  %v9052_v27 = vld [vmem:[#allocation3 + $0x494] sm:$0xf]  ;;  %v1188_v47 = vld [vmem:[#allocation2 + $0x2] sm:$0xff] }
 0x383   : > { %5222 = vmatmul.bf16.gmra.mxu3 %v8447_v3 }
 0x384   : > { %5540 = vmatmul.bf16.gmra.mxu0 %v8311_v18  ;;  %v10312_v24 = vpop.f32.mrf.mxu2  ;;  %v10316_v51 = vpop.f32.mrf.mxu3  ;;  %v9132_v18 = vld [vmem:[#allocation3 + $0x714] sm:$0xf] }
 0x385   : > { %12317 = vst [vmem:[#allocation87_spill] sm:$0xff] %v10312_v24  ;;  %v10314_v29 = vpop.f32.mrf.mxu1  ;;  %v8344_v24 = vld [vmem:[#allocation3 + $0x734] sm:$0xf0] }
 0x386   : > { %12318 = vst [vmem:[#allocation88_spill] sm:$0xff] %v10314_v29  ;;  %v10318_v3 = vpop.f32.mrf.mxu0  ;;  %5833 = vmatmul.bf16.gmra.mxu2 %v7995_v41  ;;  %v8483_v29 = vor.u32 %v9167_v19, %v8480_v2  ;;  %v8347_v22 = vor.u32 %v9132_v18, %v8344_v24  ;;  %v9056_v19 = vld [vmem:[#allocation3 + $0x4b0] sm:$0xf0]  ;;  %v8516_v18 = vld [vmem:[#allocation3 + $0x894] sm:$0xf0] }
 0x387   : > { %12319 = vst [vmem:[#allocation89_spill] sm:$0xff] %v10318_v3  ;;  %v8028_v3 = vld [vmem:[#allocation3 + $0x4b4] sm:$0xf0]  ;;  %v9176_v24 = vld [vmem:[#allocation3 + $0x874] sm:$0xf] }
 0x388   : > { %v8031_v2 = vor.u32 %v9052_v27, %v8028_v3  ;;  %v8519_v8 = vor.u32 %v9176_v24, %v8516_v18  ;;  %v8383_v27 = vor.u32 %v9141_v39, %v8380_v42  ;;  %v8064_v24 = vld [vmem:[#allocation3 + $0x4fc] sm:$0xf0]  ;;  %v9065_v39 = vld [vmem:[#allocation3 + $0x4f8] sm:$0xf0] }
 0x38a   : > { %5664 = vmatmul.bf16.gmra.mxu1 %v7991_v4 }
 0x38c   : > { %v10320_v63 = vpop.f32.mrf.mxu2  ;;  %v10324_v26 = vpop.f32.mrf.mxu3 }
 0x38d   : > { %12320 = vst [vmem:[#allocation90_spill] sm:$0xff] %v10320_v63  ;;  %v10322_v23 = vpop.f32.mrf.mxu1 }
 0x38e   : > { %12321 = vst [vmem:[#allocation91_spill] sm:$0xff] %v10322_v23  ;;  %v10329_v58 = vpop.f32.mrf.mxu0  ;;  %v8026_v23 = vld [vmem:[#allocation3 + $0x490] sm:$0xf] }
 0x38f   : > { %12322 = vst [vmem:[#allocation92_spill] sm:$0xff] %v10329_v58  ;;  %v8027_v62 = vor.u32 %v9056_v19, %v8026_v23  ;;  %v9249_v23 = vld [vmem:[%s12229_s3 + $0x1b8] sm:$0xff] }
 0x390   : > { %5919 = vmatpush.bf16.msra.mxu3 %v9249_v23 }
 0x393   : > { %5227 = vmatmul.bf16.gmra.mxu3 %v8483_v29 }
 0x394   : > { %5545 = vmatmul.bf16.gmra.mxu0 %v8347_v22  ;;  %v10331_v41 = vpop.f32.mrf.mxu2  ;;  %v10335_v63 = vpop.f32.mrf.mxu3  ;;  %v1189_v22 = vld [vmem:[#allocation2 + $0xa] sm:$0xff] }
 0x395   : > { %12323 = vst [vmem:[#allocation93_spill] sm:$0xff] %v10331_v41  ;;  %v10333_v4 = vpop.f32.mrf.mxu1  ;;  %v1253_v30 = vpack.c.bf16 %v1189_v22, %v1189_v22  ;;  %v8062_v22 = vld [vmem:[#allocation3 + $0x4d8] sm:$0xf] }
 0x396   : > { %12324 = vst [vmem:[#allocation94_spill] sm:$0xff] %v10333_v4  ;;  %v10337_v29 = vpop.f32.mrf.mxu0  ;;  %5838 = vmatmul.bf16.gmra.mxu2 %v8031_v2  ;;  %v1252_v4 = vpack.c.bf16 %v1188_v47, %v1188_v47  ;;  %v9257_v2 = vld [vmem:[%s12229_s3 + $0x1f8] sm:$0xff]  ;;  %v8063_v23 = vor.u32 %v9065_v39, %v8062_v22  ;;  %v8100_v22 = vld [vmem:[#allocation3 + $0x544] sm:$0xf0] }
 0x397   : > { %12325 = vst [vmem:[#allocation95_spill] sm:$0xff] %v10337_v29  ;;  %6088 = vmatpush.bf16.msra.mxu0 %v9257_v2 }
 0x398   : > { %1316 = vst [vmem:[#allocation3 + $0x8] sm:$0xf] %v1252_v4  ;;  %v9061_v4 = vld [vmem:[#allocation3 + $0x4dc] sm:$0xf] }
 0x399   : > { %1317 = vst [vmem:[#allocation3 + $0x2c] sm:$0xf] %v1253_v30  ;;  %v8067_v42 = vor.u32 %v9061_v4, %v8064_v24 }
 0x39a   : > { %5669 = vmatmul.bf16.gmra.mxu1 %v8027_v62 }
 0x39c   : > { %v10339_v58 = vpop.f32.mrf.mxu2  ;;  %v10343_v3 = vpop.f32.mrf.mxu3 }
 0x39d   : > { %12326 = vst [vmem:[#allocation96_spill] sm:$0xff] %v10339_v58  ;;  %v10341_v41 = vpop.f32.mrf.mxu1  ;;  %v8416_v58 = vld [vmem:[#allocation3 + $0x7c4] sm:$0xf0] }
 0x39e   : > { %12327 = vst [vmem:[#allocation97_spill] sm:$0xff] %v10341_v41  ;;  %v10348_v19 = vpop.f32.mrf.mxu0 }
 0x39f   : > { %12328 = vst [vmem:[#allocation98_spill] sm:$0xff] %v10348_v19  ;;  %v8552_v19 = vld [vmem:[#allocation3 + $0x8dc] sm:$0xf0]  ;;  %v7442_v41 = vld [vmem:[#allocation3 + $0x8] sm:$0xf] }
 0x3a3   : > { %5232 = vmatmul.bf16.gmra.mxu3 %v8519_v8  ;;  %v9265_v8 = vld [vmem:[%s12229_s3 + $0x238] sm:$0xff] }
 0x3a4   : > { %5550 = vmatmul.bf16.gmra.mxu0 %v8383_v27  ;;  %v10350_v62 = vpop.f32.mrf.mxu2  ;;  %6257 = vmatpush.bf16.msra.mxu1 %v9265_v8  ;;  %v10360_v18 = vpop.f32.mrf.mxu3  ;;  %v9185_v27 = vld [vmem:[#allocation3 + $0x8bc] sm:$0xf] }
 0x3a5   : > { %12329 = vst [vmem:[#allocation99_spill] sm:$0xff] %v10350_v62  ;;  %v10358_v30 = vpop.f32.mrf.mxu1  ;;  %v8555_v2 = vor.u32 %v9185_v27, %v8552_v19  ;;  %v8098_v19 = vld [vmem:[#allocation3 + $0x520] sm:$0xf] }
 0x3a6   : > { %12330 = vst [vmem:[#allocation100_spill] sm:$0xff] %v10358_v30  ;;  %v10362_v47 = vpop.f32.mrf.mxu0  ;;  %5843 = vmatmul.bf16.gmra.mxu2 %v8067_v42  ;;  %v9150_v30 = vld [vmem:[#allocation3 + $0x7a4] sm:$0xf] }
 0x3a7   : > { %12331 = vst [vmem:[#allocation101_spill] sm:$0xff] %v10362_v47  ;;  %v8419_v8 = vor.u32 %v9150_v30, %v8416_v58  ;;  %v9070_v42 = vld [vmem:[#allocation3 + $0x524] sm:$0xf] }
 0x3aa   : > { %5674 = vmatmul.bf16.gmra.mxu1 %v8063_v23  ;;  %v8103_v23 = vor.u32 %v9070_v42, %v8100_v22  ;;  %v10389_v22 = vld [vmem:[%s12230_s4] ss:$0 sm:$0xff] }
 0x3ac   : > { %v10364_v29 = vpop.f32.mrf.mxu2 }
 0x3ad   : > { %12332 = vst [vmem:[#allocation102_spill] sm:$0xff] %v10364_v29  ;;  %v10366_v62 = vpop.f32.mrf.mxu1  ;;  %v9074_v29 = vld [vmem:[#allocation3 + $0x540] sm:$0xf0] }
 0x3ae   : > { %12333 = vst [vmem:[#allocation103_spill] sm:$0xff] %v10366_v62  ;;  %v10368_v4 = vpop.f32.mrf.mxu0  ;;  %v8911_v62 = vld [vmem:[#allocation3 + $0x28] sm:$0xf0]  ;;  %v8099_v27 = vor.u32 %v9074_v29, %v8098_v19  ;;  %v5035_v29 = vadd.f32 %v10389_v22, %v10214_v28  ;;  %v7478_v28 = vld [vmem:[#allocation3 + $0x50] sm:$0xf] }
 0x3af   : > { %12334 = vst [vmem:[#allocation104_spill] sm:$0xff] %v10368_v4  ;;  %v9159_v4 = vld [vmem:[#allocation3 + $0x7ec] sm:$0xf] }
 0x3b3   : > { %5237 = vmatmul.bf16.gmra.mxu3 %v8555_v2  ;;  %v7443_v2 = vor.u32 %v8911_v62, %v7442_v41 }
 0x3b4   : > { %5555 = vmatmul.bf16.gmra.mxu0 %v8419_v8  ;;  %v10372_v47 = vpop.f32.mrf.mxu2 }
 0x3b5   : > { %12335 = vst [vmem:[#allocation105_spill] sm:$0xff] %v10372_v47  ;;  %v10374_v39 = vpop.f32.mrf.mxu1  ;;  %v8452_v47 = vld [vmem:[#allocation3 + $0x80c] sm:$0xf0] }
 0x3b6   : > { %v10370_v24 = vpop.f32.mrf.mxu3  ;;  %12336 = vst [vmem:[#allocation106_spill] sm:$0xff] %v10374_v39  ;;  %v10376_v56 = vpop.f32.mrf.mxu0  ;;  %5848 = vmatmul.bf16.gmra.mxu2 %v8103_v23  ;;  %v8455_v39 = vor.u32 %v9159_v4, %v8452_v47  ;;  %v8136_v47 = vld [vmem:[#allocation3 + $0x58c] sm:$0xf0]  ;;  %v9083_v4 = vld [vmem:[#allocation3 + $0x588] sm:$0xf0] }
 0x3b7   : > { %12337 = vst [vmem:[#allocation107_spill] sm:$0xff] %v10376_v56  ;;  %v8134_v56 = vld [vmem:[#allocation3 + $0x568] sm:$0xf] }
 0x3ba   : > { %5679 = vmatmul.bf16.gmra.mxu1 %v8099_v27  ;;  %v9079_v27 = vld [vmem:[#allocation3 + $0x56c] sm:$0xf] }
 0x3bc   : > { %v10380_v30 = vpop.f32.mrf.mxu2 }
 0x3bd   : > { %12338 = vst [vmem:[#allocation108_spill] sm:$0xff] %v10380_v30  ;;  %v10382_v8 = vpop.f32.mrf.mxu1  ;;  %v8135_v30 = vor.u32 %v9083_v4, %v8134_v56  ;;  %v5040_v56 = vadd.f32 %v10389_v22, %v10238_v32  ;;  %v7514_v32 = vld [vmem:[#allocation3 + $0x98] sm:$0xf] }
 0x3be   : > { %v10378_v58 = vpop.f32.mrf.mxu3  ;;  %12339 = vst [vmem:[#allocation109_spill] sm:$0xff] %v10382_v8  ;;  %v10384_v42 = vpop.f32.mrf.mxu0 }
 0x3bf   : > { %12340 = vst [vmem:[#allocation110_spill] sm:$0xff] %v10384_v42 }
 0x3c3   : > { %5251 = vmatmul.bf16.vlgmr.msrb.gmra.mxu3 %v7443_v2  ;;  %v8139_v2 = vor.u32 %v9079_v27, %v8136_v47 }
 0x3c4   : > { %5560 = vmatmul.bf16.gmra.mxu0 %v8455_v39  ;;  %v10393_v41 = vpop.f32.mrf.mxu2  ;;  %v8920_v39 = vld [vmem:[#allocation3 + $0x70] sm:$0xf0] }
 0x3c5   : > { %12341 = vst [vmem:[#allocation111_spill] sm:$0xff] %v10393_v41  ;;  %v10397_v19 = vpop.f32.mrf.mxu1  ;;  %v8488_v41 = vld [vmem:[#allocation3 + $0x854] sm:$0xf0] }
 0x3c6   : > { %v5203_v23 = vpop.f32.mrf.mxu3  ;;  %12342 = vst [vmem:[#allocation112_spill] sm:$0xff] %v10397_v19  ;;  %v10399_v42 = vpop.f32.mrf.mxu0  ;;  %5853 = vmatmul.bf16.gmra.mxu2 %v8139_v2  ;;  %v7479_v19 = vor.u32 %v8920_v39, %v7478_v28 }
 0x3c7   : > { %v10395_v62 = vadd.f32 %v5203_v23, %v5035_v29  ;;  %12343 = vst [vmem:[#allocation113_spill] sm:$0xff] %v10399_v42  ;;  %v9168_v23 = vld [vmem:[#allocation3 + $0x834] sm:$0xf] }
 0x3c8   : > { %v8491_v57 = vor.u32 %v9168_v23, %v8488_v41  ;;  %v9088_v42 = vld [vmem:[#allocation3 + $0x5b4] sm:$0xf]  ;;  %v8170_v41 = vld [vmem:[#allocation3 + $0x5b0] sm:$0xf] }
 0x3ca   : > { %5684 = vmatmul.bf16.gmra.mxu1 %v8135_v30  ;;  %v8172_v30 = vld [vmem:[#allocation3 + $0x5d4] sm:$0xf0] }
 0x3cb   : > { %v8175_v61 = vor.u32 %v9088_v42, %v8172_v30  ;;  %v9248_v42 = vld [vmem:[%s12229_s3 + $0x1b0] sm:$0xff] }
 0x3cc   : > { %v10403_v59 = vpop.f32.mrf.mxu2  ;;  %5920 = vmatpush.bf16.msra.mxu3 %v9248_v42 }
 0x3cd   : > { %12344 = vst [vmem:[#allocation114_spill] sm:$0xff] %v10403_v59  ;;  %v10405_v29 = vpop.f32.mrf.mxu1 }
 0x3ce   : > { %v10401_v8 = vpop.f32.mrf.mxu3  ;;  %12345 = vst [vmem:[#allocation115_spill] sm:$0xff] %v10405_v29  ;;  %v10407_v27 = vpop.f32.mrf.mxu0  ;;  %v9092_v29 = vld [vmem:[#allocation3 + $0x5d0] sm:$0xf0] }
 0x3cf   : > { %12346 = vst [vmem:[#allocation116_spill] sm:$0xff] %v10407_v27 }
 0x3d3   : > { %5256 = vmatmul.bf16.gmra.mxu3 %v7479_v19  ;;  %v8171_v19 = vor.u32 %v9092_v29, %v8170_v41 }
 0x3d4   : > { %5565 = vmatmul.bf16.gmra.mxu0 %v8491_v57  ;;  %v10415_v59 = vpop.f32.mrf.mxu2  ;;  %v8929_v57 = vld [vmem:[#allocation3 + $0xb8] sm:$0xf0] }
 0x3d5   : > { %v10413_v2 = vpop.f32.mrf.mxu1  ;;  %12348 = vst [vmem:[#allocation118_spill] sm:$0xff] %v10415_v59  ;;  %v7515_v27 = vor.u32 %v8929_v57, %v7514_v32  ;;  %v9264_v32 = vld [vmem:[%s12229_s3 + $0x230] sm:$0xff] }
 0x3d6   : > { %v5208_v47 = vpop.f32.mrf.mxu3  ;;  %12347 = vst [vmem:[#allocation117_spill] sm:$0xff] %v10413_v2  ;;  %v10417_v28 = vpop.f32.mrf.mxu0  ;;  %5858 = vmatmul.bf16.gmra.mxu2 %v8175_v61  ;;  %v5045_v61 = vadd.f32 %v10389_v22, %v10261_v37  ;;  %6258 = vmatpush.bf16.msra.mxu1 %v9264_v32  ;;  %v9101_v37 = vld [vmem:[#allocation3 + $0x618] sm:$0xf0] }
 0x3d7   : > { %v10411_v4 = vadd.f32 %v5208_v47, %v5040_v56  ;;  %12349 = vst [vmem:[#allocation119_spill] sm:$0xff] %v10417_v28  ;;  %v9177_v56 = vld [vmem:[#allocation3 + $0x87c] sm:$0xf]  ;;  %v8524_v47 = vld [vmem:[#allocation3 + $0x89c] sm:$0xf0] }
 0x3d8   : > { %v8527_v30 = vor.u32 %v9177_v56, %v8524_v47  ;;  %v9097_v56 = vld [vmem:[#allocation3 + $0x5fc] sm:$0xf]  ;;  %v8208_v47 = vld [vmem:[#allocation3 + $0x61c] sm:$0xf0] }
 0x3d9   : > { %v8211_v42 = vor.u32 %v9097_v56, %v8208_v47  ;;  %v5050_v47 = vadd.f32 %v10389_v22, %v10282_v9 }
 0x3da   : > { %5689 = vmatmul.bf16.gmra.mxu1 %v8171_v19 }
 0x3dc   : > { %v10423_v2 = vpop.f32.mrf.mxu2 }
 0x3dd   : > { %v10421_v23 = vpop.f32.mrf.mxu1  ;;  %12351 = vst [vmem:[#allocation121_spill] sm:$0xff] %v10423_v2  ;;  %v7550_v2 = vld [vmem:[#allocation3 + $0xe0] sm:$0xf] }
 0x3de   : > { %v10419_v39 = vpop.f32.mrf.mxu3  ;;  %12350 = vst [vmem:[#allocation120_spill] sm:$0xff] %v10421_v23  ;;  %v10428_v29 = vpop.f32.mrf.mxu0  ;;  %v8938_v23 = vld [vmem:[#allocation3 + $0x100] sm:$0xf0] }
 0x3df   : > { %12352 = vst [vmem:[#allocation122_spill] sm:$0xff] %v10428_v29 }
 0x3e3   : > { %5261 = vmatmul.bf16.gmra.mxu3 %v7515_v27  ;;  %v9256_v27 = vld [vmem:[%s12229_s3 + $0x1f0] sm:$0xff] }
 0x3e4   : > { %5570 = vmatmul.bf16.gmra.mxu0 %v8527_v30 }
 0x3e5   : > { %v10440_v57 = vpop.f32.mrf.mxu1  ;;  %6089 = vmatpush.bf16.msra.mxu0 %v9256_v27  ;;  %v7551_v27 = vor.u32 %v8938_v23, %v7550_v2  ;;  %v8242_v23 = vld [vmem:[#allocation3 + $0x640] sm:$0xf] }
 0x3e6   : > { %v5213_v41 = vpop.f32.mrf.mxu3  ;;  %12354 = vst [vmem:[#allocation124_spill] sm:$0xff] %v10440_v57  ;;  %v10442_v30 = vpop.f32.mrf.mxu0  ;;  %5863 = vmatmul.bf16.gmra.mxu2 %v8211_v42  ;;  %v9186_v57 = vld [vmem:[#allocation3 + $0x8c4] sm:$0xf] }
 0x3e7   : > { %v10432_v19 = vadd.f32 %v5213_v41, %v5045_v61  ;;  %12355 = vst [vmem:[#allocation125_spill] sm:$0xff] %v10442_v30  ;;  %v8206_v61 = vld [vmem:[#allocation3 + $0x5f8] sm:$0xf]  ;;  %v10444_v41 = vpop.f32.mrf.mxu2 }
 0x3e8   : > { %12356 = vst [vmem:[#allocation126_spill] sm:$0xff] %v10444_v41  ;;  %v8207_v29 = vor.u32 %v9101_v37, %v8206_v61  ;;  %v9110_v41 = vld [vmem:[#allocation3 + $0x660] sm:$0xf0] }
 0x3e9   : > { %12353 = vst [vmem:[#allocation123_spill] sm:$0xff] %v10432_v19  ;;  %v8560_v19 = vld [vmem:[#allocation3 + $0x8e4] sm:$0xf0] }
 0x3ea   : > { %5694 = vmatmul.bf16.gmra.mxu1 %v8207_v29  ;;  %v8563_v32 = vor.u32 %v9186_v57, %v8560_v19  ;;  %v9106_v29 = vld [vmem:[#allocation3 + $0x644] sm:$0xf]  ;;  %v5052_v19 = vadd.f32 %v10389_v22, %v10295_v15  ;;  %v8243_v57 = vor.u32 %v9110_v41, %v8242_v23  ;;  %v9115_v23 = vld [vmem:[#allocation3 + $0x68c] sm:$0xf] }
 0x3ed   : > { %v10448_v59 = vpop.f32.mrf.mxu1 }
 0x3ee   : > { %v10446_v28 = vpop.f32.mrf.mxu3  ;;  %12358 = vst [vmem:[#allocation128_spill] sm:$0xff] %v10448_v59  ;;  %v10450_v56 = vpop.f32.mrf.mxu0  ;;  %v8244_v59 = vld [vmem:[#allocation3 + $0x664] sm:$0xf0] }
 0x3ef   : > { %12357 = vst [vmem:[#allocation127_spill] sm:$0xff] %v10446_v28  ;;  %v10456_v61 = vpop.f32.mrf.mxu2  ;;  %v8247_v28 = vor.u32 %v9106_v29, %v8244_v59  ;;  %v5055_v29 = vadd.f32 %v10389_v22, %v10305_v34 }
 0x3f0   : > { %12359 = vst [vmem:[#allocation129_spill] sm:$0xff] %v10450_v56 }
 0x3f1   : > { %12360 = vst [vmem:[#allocation130_spill] sm:$0xff] %v10456_v61 }
 0x3f3   : > { %5266 = vmatmul.bf16.gmra.mxu3 %v7551_v27  ;;  %v7586_v27 = vld [vmem:[#allocation3 + $0x128] sm:$0xf] }
 0x3f4   : > { %5575 = vmatmul.bf16.gmra.mxu0 %v8563_v32  ;;  %v8947_v32 = vld [vmem:[#allocation3 + $0x148] sm:$0xf0] }
 0x3f5   : > { %v10458_v30 = vpop.f32.mrf.mxu1  ;;  %v7587_v56 = vor.u32 %v8947_v32, %v7586_v27  ;;  %v8278_v32 = vld [vmem:[#allocation3 + $0x688] sm:$0xf] }
 0x3f6   : > { %v5218_v37 = vpop.f32.mrf.mxu3  ;;  %12361 = vst [vmem:[#allocation131_spill] sm:$0xff] %v10458_v30  ;;  %v10460_v2 = vpop.f32.mrf.mxu0  ;;  %5868 = vmatmul.bf16.gmra.mxu2 %v8247_v28 }
 0x3f7   : > { %v10454_v42 = vadd.f32 %v5218_v37, %v5050_v47  ;;  %12362 = vst [vmem:[#allocation132_spill] sm:$0xff] %v10460_v2  ;;  %v10468_v30 = vpop.f32.mrf.mxu2 }
 0x3f8   : > { %12364 = vst [vmem:[#allocation134_spill] sm:$0xff] %v10468_v30 }
 0x3fa   : > { %5699 = vmatmul.bf16.gmra.mxu1 %v8243_v57 }
 0x3fd   : > { %v10466_v37 = vpop.f32.mrf.mxu1 }
 0x3fe   : > { %v5220_v9 = vpop.f32.mrf.mxu3  ;;  %12363 = vst [vmem:[#allocation133_spill] sm:$0xff] %v10466_v37  ;;  %v10470_v59 = vpop.f32.mrf.mxu0  ;;  %v7622_v37 = vld [vmem:[#allocation3 + $0x170] sm:$0xf] }
 0x3ff   : > { %v10464_v47 = vadd.f32 %v5220_v9, %v5052_v19  ;;  %12365 = vst [vmem:[#allocation135_spill] sm:$0xff] %v10470_v59  ;;  %v8280_v19 = vld [vmem:[#allocation3 + $0x6ac] sm:$0xf0]  ;;  %v9119_v9 = vld [vmem:[#allocation3 + $0x6a8] sm:$0xf0]  ;;  %v10478_v57 = vpop.f32.mrf.mxu2 }
 0x400   : > { %12367 = vst [vmem:[#allocation137_spill] sm:$0xff] %v10478_v57  ;;  %v8283_v2 = vor.u32 %v9115_v23, %v8280_v19  ;;  %v8279_v59 = vor.u32 %v9119_v9, %v8278_v32  ;;  %v5060_v19 = vadd.f32 %v10389_v22, %v10324_v26  ;;  %v9128_v26 = vld [vmem:[#allocation3 + $0x6f0] sm:$0xf0] }
 0x403   : > { %5271 = vmatmul.bf16.gmra.mxu3 %v7587_v56  ;;  %v5057_v56 = vadd.f32 %v10389_v22, %v10316_v51  ;;  %v9254_v51 = vld [vmem:[%s12229_s3 + $0x1e0] sm:$0xff] }
 0x405   : > { %v10476_v28 = vpop.f32.mrf.mxu1 }
 0x406   : > { %v5223_v15 = vpop.f32.mrf.mxu3  ;;  %12366 = vst [vmem:[#allocation136_spill] sm:$0xff] %v10476_v28  ;;  %v10480_v27 = vpop.f32.mrf.mxu0  ;;  %5873 = vmatmul.bf16.gmra.mxu2 %v8283_v2  ;;  %v9255_v28 = vld [vmem:[%s12229_s3 + $0x1e8] sm:$0xff] }
 0x407   : > { %v10474_v41 = vadd.f32 %v5223_v15, %v5055_v29  ;;  %12368 = vst [vmem:[#allocation138_spill] sm:$0xff] %v10480_v27  ;;  %v8956_v29 = vld [vmem:[#allocation3 + $0x190] sm:$0xf0]  ;;  %6090 = vmatpush.bf16.msra.mxu0 %v9255_v28  ;;  %v10498_v9 = vpop.f32.mrf.mxu2 }
 0x408   : > { %v7623_v23 = vor.u32 %v8956_v29, %v7622_v37  ;;  %12371 = vst [vmem:[#allocation141_spill] sm:$0xff] %v10498_v9  ;;  %v9253_v37 = vld [vmem:[%s12229_s3 + $0x1d8] sm:$0xff]  ;;  %v9124_v28 = vld [vmem:[#allocation3 + $0x6d4] sm:$0xf] }
 0x409   : > { %v9252_v29 = vld [vmem:[%s12229_s3 + $0x1d0] sm:$0xff] }
 0x40a   : > { %5704 = vmatmul.bf16.gmra.mxu1 %v8279_v59 }
 0x40b   : > { %6091 = vmatpush.bf16.msra.mxu0 %v9254_v51  ;;  %v8314_v51 = vld [vmem:[#allocation3 + $0x6d0] sm:$0xf] }
 0x40d   : > { %v10489_v57 = vpop.f32.mrf.mxu1 }
 0x40e   : > { %v5225_v34 = vpop.f32.mrf.mxu3  ;;  %12369 = vst [vmem:[#allocation139_spill] sm:$0xff] %v10489_v57  ;;  %v10494_v2 = vpop.f32.mrf.mxu0  ;;  %v8965_v57 = vld [vmem:[#allocation3 + $0x1d8] sm:$0xf0] }
 0x40f   : > { %v10484_v15 = vadd.f32 %v5225_v34, %v5057_v56  ;;  %12370 = vst [vmem:[#allocation140_spill] sm:$0xff] %v10494_v2  ;;  %v8316_v34 = vld [vmem:[#allocation3 + $0x6f4] sm:$0xf0]  ;;  %6092 = vmatpush.bf16.msra.mxu0 %v9253_v37  ;;  %v10516_v37 = vpop.f32.mrf.mxu2 }
 0x410   : > { %12374 = vst [vmem:[#allocation144_spill] sm:$0xff] %v10516_v37  ;;  %v8350_v37 = vld [vmem:[#allocation3 + $0x718] sm:$0xf] }
 0x413   : > { %5276 = vmatmul.bf16.gmra.mxu3 %v7623_v23  ;;  %v8319_v23 = vor.u32 %v9124_v28, %v8316_v34  ;;  %6093 = vmatpush.bf16.msra.mxu0 %v9252_v29  ;;  %v9251_v28 = vld [vmem:[%s12229_s3 + $0x1c8] sm:$0xff]  ;;  %v7460_v29 = vld [vmem:[#allocation3 + $0x3c] sm:$0xf0] }
 0x415   : > { %v10505_v59 = vpop.f32.mrf.mxu1 }
 0x416   : > { %v5228_v32 = vpop.f32.mrf.mxu3  ;;  %12372 = vst [vmem:[#allocation142_spill] sm:$0xff] %v10505_v59  ;;  %v10510_v2 = vpop.f32.mrf.mxu0  ;;  %5878 = vmatmul.bf16.gmra.mxu2 %v8319_v23  ;;  %v7658_v59 = vld [vmem:[#allocation3 + $0x1b8] sm:$0xf]  ;;  %v5065_v23 = vadd.f32 %v10389_v22, %v10343_v3  ;;  %v9137_v3 = vld [vmem:[#allocation3 + $0x738] sm:$0xf0] }
 0x417   : > { %v10500_v56 = vadd.f32 %v5228_v32, %v5060_v19  ;;  %12373 = vst [vmem:[#allocation143_spill] sm:$0xff] %v10510_v2  ;;  %v5062_v19 = vadd.f32 %v10389_v22, %v10335_v63  ;;  %v8315_v32 = vor.u32 %v9128_v26, %v8314_v51  ;;  %v7659_v2 = vor.u32 %v8965_v57, %v7658_v59  ;;  %v9247_v63 = vld [vmem:[%s12229_s3 + $0x1a8] sm:$0xff]  ;;  %v8909_v51 = vld [vmem:[#allocation3 + $0x1c] sm:$0xf] }
 0x418   : > { %6094 = vmatpush.bf16.msra.mxu0 %v9251_v28  ;;  %5921 = vmatpush.bf16.msra.mxu3 %v9247_v63  ;;  %v7463_v59 = vor.u32 %v8909_v51, %v7460_v29  ;;  %v8352_v28 = vld [vmem:[#allocation3 + $0x73c] sm:$0xf0]  ;;  %v5067_v29 = vadd.f32 %v10389_v22, %v10360_v18  ;;  %v5070_v18 = vadd.f32 %v10389_v22, %v10370_v24 }
 0x41a   : > { %5709 = vmatmul.bf16.gmra.mxu1 %v8315_v32  ;;  %v9133_v32 = vld [vmem:[#allocation3 + $0x71c] sm:$0xf] }
 0x41b   : > { %v8355_v63 = vor.u32 %v9133_v32, %v8352_v28 }
 0x41d   : > { %v10521_v34 = vpop.f32.mrf.mxu1 }
 0x41e   : > { %v5230_v27 = vpop.f32.mrf.mxu3  ;;  %12375 = vst [vmem:[#allocation145_spill] sm:$0xff] %v10521_v34  ;;  %v10529_v26 = vpop.f32.mrf.mxu0 }
 0x41f   : > { %v10514_v9 = vadd.f32 %v5230_v27, %v5062_v19  ;;  %v9250_v27 = vld [vmem:[%s12229_s3 + $0x1c0] sm:$0xff]  ;;  %12376 = vst [vmem:[#allocation146_spill] sm:$0xff] %v10529_v26  ;;  %v10537_v34 = vpop.f32.mrf.mxu2  ;;  %v9263_v26 = vld [vmem:[%s12229_s3 + $0x228] sm:$0xff] }
 0x420   : > { %6095 = vmatpush.bf16.msra.mxu0 %v9250_v27  ;;  %12378 = vst [vmem:[#allocation148_spill] sm:$0xff] %v10537_v34  ;;  %6259 = vmatpush.bf16.msra.mxu1 %v9263_v26  ;;  %v7496_v26 = vld [vmem:[#allocation3 + $0x84] sm:$0xf0] }
 0x423   : > { %5281 = vmatmul.bf16.gmra.mxu3 %v7659_v2  ;;  %6096 = vmatmul.bf16.vlgmr.msra.gmra.mxu0 %v7463_v59  ;;  %v8974_v59 = vld [vmem:[#allocation3 + $0x220] sm:$0xf0] }
 0x425   : > { %v10535_v19 = vpop.f32.mrf.mxu1 }
 0x426   : > { %v5233_v57 = vpop.f32.mrf.mxu3  ;;  %12377 = vst [vmem:[#allocation147_spill] sm:$0xff] %v10535_v19  ;;  %v10542_v27 = vpop.f32.mrf.mxu0  ;;  %5883 = vmatmul.bf16.gmra.mxu2 %v8355_v63 }
 0x427   : > { %v10533_v2 = vadd.f32 %v5233_v57, %v5065_v23  ;;  %12379 = vst [vmem:[#allocation149_spill] sm:$0xff] %v10542_v27  ;;  %v8351_v23 = vor.u32 %v9137_v3, %v8350_v37  ;;  %v7694_v57 = vld [vmem:[#allocation3 + $0x200] sm:$0xf]  ;;  %v10550_v61 = vpop.f32.mrf.mxu2  ;;  %v8918_v37 = vld [vmem:[#allocation3 + $0x64] sm:$0xf] }
 0x428   : > { %v7695_v30 = vor.u32 %v8974_v59, %v7694_v57  ;;  %12381 = vst [vmem:[#allocation151_spill] sm:$0xff] %v10550_v61  ;;  %v7499_v3 = vor.u32 %v8918_v37, %v7496_v26  ;;  %v8386_v57 = vld [vmem:[#allocation3 + $0x760] sm:$0xf]  ;;  %v8983_v37 = vld [vmem:[#allocation3 + $0x268] sm:$0xf0] }
 0x42a   : > { %5714 = vmatmul.bf16.gmra.mxu1 %v8351_v23  ;;  %v9142_v23 = vld [vmem:[#allocation3 + $0x764] sm:$0xf] }
 0x42d   : > { %v10548_v34 = vpop.f32.mrf.mxu1 }
 0x42e   : > { %v5235_v51 = vpop.f32.mrf.mxu3  ;;  %12380 = vst [vmem:[#allocation150_spill] sm:$0xff] %v10548_v34  ;;  %v10552_v32 = vpop.f32.mrf.mxu0 }
 0x42f   : > { %v10546_v19 = vadd.f32 %v5235_v51, %v5067_v29  ;;  %12382 = vst [vmem:[#allocation152_spill] sm:$0xff] %v10552_v32  ;;  %v8388_v51 = vld [vmem:[#allocation3 + $0x784] sm:$0xf0]  ;;  %v5072_v32 = vadd.f32 %v10389_v22, %v10378_v58  ;;  %v10564_v34 = vpop.f32.mrf.mxu2 }
 0x430   : > { %v8391_v59 = vor.u32 %v9142_v23, %v8388_v51  ;;  %12385 = vst [vmem:[#allocation155_spill] sm:$0xff] %v10564_v34  ;;  %v7532_v23 = vld [vmem:[#allocation3 + $0xcc] sm:$0xf0]  ;;  %v7640_v34 = vld [vmem:[#allocation3 + $0x1a4] sm:$0xf0] }
 0x433   : > { %5286 = vmatmul.bf16.gmra.mxu3 %v7695_v30  ;;  %6101 = vmatmul.bf16.gmra.mxu0 %v7499_v3  ;;  %v9146_v30 = vld [vmem:[#allocation3 + $0x780] sm:$0xf0] }
 0x434   : > { %v8387_v24 = vor.u32 %v9146_v30, %v8386_v57 }
 0x435   : > { %v10558_v29 = vpop.f32.mrf.mxu1 }
 0x436   : > { %v5238_v28 = vpop.f32.mrf.mxu3  ;;  %12383 = vst [vmem:[#allocation153_spill] sm:$0xff] %v10558_v29  ;;  %v10560_v27 = vpop.f32.mrf.mxu0  ;;  %5888 = vmatmul.bf16.gmra.mxu2 %v8391_v59  ;;  %v8424_v59 = vld [vmem:[#allocation3 + $0x7cc] sm:$0xf0] }
 0x437   : > { %v10556_v63 = vadd.f32 %v5238_v28, %v5070_v18  ;;  %12384 = vst [vmem:[#allocation154_spill] sm:$0xff] %v10560_v27  ;;  %v7730_v18 = vld [vmem:[#allocation3 + $0x248] sm:$0xf]  ;;  %v8927_v27 = vld [vmem:[#allocation3 + $0xac] sm:$0xf]  ;;  %v10575_v57 = vpop.f32.mrf.mxu2 }
 0x438   : > { %v7731_v29 = vor.u32 %v8983_v37, %v7730_v18  ;;  %v7535_v58 = vor.u32 %v8927_v27, %v7532_v23  ;;  %12388 = vst [vmem:[#allocation158_spill] sm:$0xff] %v10575_v57  ;;  %v7766_v27 = vld [vmem:[#allocation3 + $0x290] sm:$0xf]  ;;  %v8992_v23 = vld [vmem:[#allocation3 + $0x2b0] sm:$0xf0] }
 0x43a   : > { %5719 = vmatmul.bf16.gmra.mxu1 %v8387_v24  ;;  %v8422_v24 = vld [vmem:[#allocation3 + $0x7a8] sm:$0xf] }
 0x43d   : > { %v10568_v3 = vpop.f32.mrf.mxu1 }
 0x43e   : > { %v5240_v26 = vpop.f32.mrf.mxu3  ;;  %12386 = vst [vmem:[#allocation156_spill] sm:$0xff] %v10568_v3  ;;  %v10570_v51 = vpop.f32.mrf.mxu0  ;;  %v9164_v3 = vld [vmem:[#allocation3 + $0x810] sm:$0xf0] }
 0x43f   : > { %v10566_v28 = vadd.f32 %v5240_v26, %v5072_v32  ;;  %12387 = vst [vmem:[#allocation157_spill] sm:$0xff] %v10570_v51  ;;  %v9151_v32 = vld [vmem:[#allocation3 + $0x7ac] sm:$0xf] }
 0x440   : > { %v9155_v26 = vld [vmem:[#allocation3 + $0x7c8] sm:$0xf0]  ;;  %v8427_v18 = vor.u32 %v9151_v32, %v8424_v59  ;;  %v7568_v32 = vld [vmem:[#allocation3 + $0x114] sm:$0xf0] }
 0x441   : > { %v8423_v37 = vor.u32 %v9155_v26, %v8422_v24  ;;  %v8936_v24 = vld [vmem:[#allocation3 + $0xf4] sm:$0xf] }
 0x443   : > { %5291 = vmatmul.bf16.gmra.mxu3 %v7731_v29  ;;  %6106 = vmatmul.bf16.gmra.mxu0 %v7535_v58  ;;  %v9273_v58 = vld [vmem:[%s12231_s5 + $0x38] sm:$0xff] }
 0x444   : > { %7102 = vmatpush.bf16.msra.mxu2 %v9273_v58 }
 0x445   : > { %v10577_v30 = vpop.f32.mrf.mxu1 }
 0x446   : > { %v5252_v61 = vpop.f32.mrf.mxu3  ;;  %12389 = vst [vmem:[#allocation159_spill] sm:$0xff] %v10577_v30  ;;  %v10579_v29 = vpop.f32.mrf.mxu0  ;;  %5893 = vmatmul.bf16.gmra.mxu2 %v8427_v18  ;;  %v7767_v30 = vor.u32 %v8992_v23, %v7766_v27  ;;  %v7571_v18 = vor.u32 %v8936_v24, %v7568_v32  ;;  %v8460_v27 = vld [vmem:[#allocation3 + $0x814] sm:$0xf0]  ;;  %v8458_v23 = vld [vmem:[#allocation3 + $0x7f0] sm:$0xf] }
 0x447   : > { %v10573_v22 = vadd.f32 %v5252_v61, %v9750_v5  ;;  %12390 = vst [vmem:[#allocation160_spill] sm:$0xff] %v10579_v29  ;;  %v10585_v61 = vpop.f32.mrf.mxu2  ;;  %v8459_v57 = vor.u32 %v9164_v3, %v8458_v23  ;;  %v7802_v32 = vld [vmem:[#allocation3 + $0x2d8] sm:$0xf]  ;;  %v9001_v24 = vld [vmem:[#allocation3 + $0x2f8] sm:$0xf0] }
 0x448   : > { %12392 = vst [vmem:[#allocation162_spill] sm:$0xff] %v10585_v61  ;;  %v8945_v3 = vld [vmem:[#allocation3 + $0x13c] sm:$0xf] }
 0x44a   : > { %5724 = vmatmul.bf16.gmra.mxu1 %v8423_v37 }
 0x44d   : > { %v10583_v5 = vpop.f32.mrf.mxu1 }
 0x44e   : > { %v10581_v51 = vpop.f32.mrf.mxu3  ;;  %12391 = vst [vmem:[#allocation161_spill] sm:$0xff] %v10583_v5  ;;  %v10590_v59 = vpop.f32.mrf.mxu0  ;;  %v9160_v5 = vld [vmem:[#allocation3 + $0x7f4] sm:$0xf] }
 0x44f   : > { %12393 = vst [vmem:[#allocation163_spill] sm:$0xff] %v10590_v59  ;;  %v10597_v61 = vpop.f32.mrf.mxu2 }
 0x450   : > { %12395 = vst [vmem:[#allocation165_spill] sm:$0xff] %v10597_v61 }
 0x453   : > { %5296 = vmatmul.bf16.gmra.mxu3 %v7767_v30  ;;  %6111 = vmatmul.bf16.gmra.mxu0 %v7571_v18  ;;  %v8463_v30 = vor.u32 %v9160_v5, %v8460_v27  ;;  %v9246_v18 = vld [vmem:[%s12229_s3 + $0x1a0] sm:$0xff] }
 0x454   : > { %5922 = vmatpush.bf16.msra.mxu3 %v9246_v18 }
 0x455   : > { %v10595_v37 = vpop.f32.mrf.mxu1 }
 0x456   : > { %v5257_v26 = vpop.f32.mrf.mxu3  ;;  %12394 = vst [vmem:[#allocation164_spill] sm:$0xff] %v10595_v37  ;;  %v10599_v58 = vpop.f32.mrf.mxu0  ;;  %5898 = vmatmul.bf16.gmra.mxu2 %v8463_v30  ;;  %v7604_v37 = vld [vmem:[#allocation3 + $0x15c] sm:$0xf0] }
 0x457   : > { %v10593_v29 = vadd.f32 %v5257_v26, %v9757_v21  ;;  %12396 = vst [vmem:[#allocation166_spill] sm:$0xff] %v10599_v58  ;;  %v7803_v26 = vor.u32 %v9001_v24, %v7802_v32  ;;  %v10610_v5 = vpop.f32.mrf.mxu2  ;;  %v7607_v23 = vor.u32 %v8945_v3, %v7604_v37  ;;  %v9169_v32 = vld [vmem:[#allocation3 + $0x83c] sm:$0xf]  ;;  %v8496_v24 = vld [vmem:[#allocation3 + $0x85c] sm:$0xf0] }
 0x458   : > { %12399 = vst [vmem:[#allocation169_spill] sm:$0xff] %v10610_v5  ;;  %v8494_v58 = vld [vmem:[#allocation3 + $0x838] sm:$0xf]  ;;  %v9010_v3 = vld [vmem:[#allocation3 + $0x340] sm:$0xf0] }
 0x45a   : > { %5729 = vmatmul.bf16.gmra.mxu1 %v8459_v57 }
 0x45d   : > { %v10603_v21 = vpop.f32.mrf.mxu1 }
 0x45e   : > { %v10601_v59 = vpop.f32.mrf.mxu3  ;;  %12397 = vst [vmem:[#allocation167_spill] sm:$0xff] %v10603_v21  ;;  %v10608_v61 = vpop.f32.mrf.mxu0  ;;  %v8499_v21 = vor.u32 %v9169_v32, %v8496_v24 }
 0x45f   : > { %12398 = vst [vmem:[#allocation168_spill] sm:$0xff] %v10608_v61  ;;  %v9173_v61 = vld [vmem:[#allocation3 + $0x858] sm:$0xf0] }
 0x460   : > { %v8495_v5 = vor.u32 %v9173_v61, %v8494_v58 }
 0x463   : > { %5301 = vmatmul.bf16.gmra.mxu3 %v7803_v26  ;;  %6116 = vmatmul.bf16.gmra.mxu0 %v7607_v23  ;;  %v9262_v26 = vld [vmem:[%s12229_s3 + $0x220] sm:$0xff] }
 0x464   : > { %6260 = vmatpush.bf16.msra.mxu1 %v9262_v26  ;;  %v8954_v26 = vld [vmem:[#allocation3 + $0x184] sm:$0xf] }
 0x465   : > { %v10615_v57 = vpop.f32.mrf.mxu1  ;;  %v7643_v24 = vor.u32 %v8954_v26, %v7640_v34  ;;  %v7874_v34 = vld [vmem:[#allocation3 + $0x368] sm:$0xf]  ;;  %v9019_v26 = vld [vmem:[#allocation3 + $0x388] sm:$0xf0] }
 0x466   : > { %v5262_v27 = vpop.f32.mrf.mxu3  ;;  %12401 = vst [vmem:[#allocation171_spill] sm:$0xff] %v10615_v57  ;;  %v10620_v18 = vpop.f32.mrf.mxu0  ;;  %5903 = vmatmul.bf16.gmra.mxu2 %v8499_v21  ;;  %v9178_v21 = vld [vmem:[#allocation3 + $0x884] sm:$0xf] }
 0x467   : > { %v10613_v30 = vadd.f32 %v5262_v27, %v9771_v44  ;;  %12402 = vst [vmem:[#allocation172_spill] sm:$0xff] %v10620_v18  ;;  %v7838_v44 = vld [vmem:[#allocation3 + $0x320] sm:$0xf]  ;;  %v10624_v27 = vpop.f32.mrf.mxu2  ;;  %v8532_v18 = vld [vmem:[#allocation3 + $0x8a4] sm:$0xf0] }
 0x468   : > { %12403 = vst [vmem:[#allocation173_spill] sm:$0xff] %v10624_v27  ;;  %v7839_v57 = vor.u32 %v9010_v3, %v7838_v44  ;;  %v8535_v44 = vor.u32 %v9178_v21, %v8532_v18 }
 0x469   : > { %12400 = vst [vmem:[#allocation170_spill] sm:$0xff] %v10613_v30 }
 0x46a   : > { %5734 = vmatmul.bf16.gmra.mxu1 %v8495_v5  ;;  %v8530_v5 = vld [vmem:[#allocation3 + $0x880] sm:$0xf] }
 0x46d   : > { %v10626_v23 = vpop.f32.mrf.mxu1 }
 0x46e   : > { %v10622_v37 = vpop.f32.mrf.mxu3  ;;  %12404 = vst [vmem:[#allocation174_spill] sm:$0xff] %v10626_v23  ;;  %v10628_v30 = vpop.f32.mrf.mxu0  ;;  %v9182_v23 = vld [vmem:[#allocation3 + $0x8a0] sm:$0xf0] }
 0x46f   : > { %12405 = vst [vmem:[#allocation175_spill] sm:$0xff] %v10628_v30  ;;  %v10635_v27 = vpop.f32.mrf.mxu2  ;;  %v8531_v3 = vor.u32 %v9182_v23, %v8530_v5 }
 0x470   : > { %12408 = vst [vmem:[#allocation178_spill] sm:$0xff] %v10635_v27 }
 0x473   : > { %5306 = vmatmul.bf16.gmra.mxu3 %v7839_v57  ;;  %6121 = vmatmul.bf16.gmra.mxu0 %v7643_v24 }
 0x475   : > { %v10633_v58 = vpop.f32.mrf.mxu1 }
 0x476   : > { %v5267_v32 = vpop.f32.mrf.mxu3  ;;  %12407 = vst [vmem:[#allocation177_spill] sm:$0xff] %v10633_v58  ;;  %v10637_v57 = vpop.f32.mrf.mxu0  ;;  %5908 = vmatmul.bf16.gmra.mxu2 %v8535_v44  ;;  %v7676_v58 = vld [vmem:[#allocation3 + $0x1ec] sm:$0xf0]  ;;  %v9187_v44 = vld [vmem:[#allocation3 + $0x8cc] sm:$0xf] }
 0x477   : > { %v10631_v61 = vadd.f32 %v5267_v32, %v9788_v11  ;;  %12409 = vst [vmem:[#allocation179_spill] sm:$0xff] %v10637_v57  ;;  %v7875_v32 = vor.u32 %v9019_v26, %v7874_v34  ;;  %v10643_v24 = vpop.f32.mrf.mxu2  ;;  %v8566_v57 = vld [vmem:[#allocation3 + $0x8c8] sm:$0xf] }
 0x478   : > { %12411 = vst [vmem:[#allocation181_spill] sm:$0xff] %v10643_v24 }
 0x479   : > { %12406 = vst [vmem:[#allocation176_spill] sm:$0xff] %v10631_v61  ;;  %v8963_v61 = vld [vmem:[#allocation3 + $0x1cc] sm:$0xf] }
 0x47a   : > { %5739 = vmatmul.bf16.gmra.mxu1 %v8531_v3  ;;  %v7679_v21 = vor.u32 %v8963_v61, %v7676_v58  ;;  %v8568_v3 = vld [vmem:[#allocation3 + $0x8ec] sm:$0xf0]  ;;  %v9028_v58 = vld [vmem:[#allocation3 + $0x3d0] sm:$0xf0] }
 0x47b   : > { %v8571_v34 = vor.u32 %v9187_v44, %v8568_v3  ;;  %v7910_v61 = vld [vmem:[#allocation3 + $0x3b0] sm:$0xf]  ;;  %v9261_v44 = vld [vmem:[%s12229_s3 + $0x218] sm:$0xff]  ;;  %v8972_v3 = vld [vmem:[#allocation3 + $0x214] sm:$0xf] }
 0x47c   : > { %6261 = vmatpush.bf16.msra.mxu1 %v9261_v44 }
 0x47d   : > { %v10641_v11 = vpop.f32.mrf.mxu1 }
 0x47e   : > { %v10639_v30 = vpop.f32.mrf.mxu3  ;;  %12410 = vst [vmem:[#allocation180_spill] sm:$0xff] %v10641_v11  ;;  %v10645_v27 = vpop.f32.mrf.mxu0  ;;  %v9191_v11 = vld [vmem:[#allocation3 + $0x8e8] sm:$0xf0] }
 0x47f   : > { %12412 = vst [vmem:[#allocation182_spill] sm:$0xff] %v10645_v27  ;;  %v8567_v24 = vor.u32 %v9191_v11, %v8566_v57  ;;  %v7712_v57 = vld [vmem:[#allocation3 + $0x234] sm:$0xf0] }
 0x483   : > { %5311 = vmatmul.bf16.gmra.mxu3 %v7875_v32  ;;  %6126 = vmatmul.bf16.gmra.mxu0 %v7679_v21  ;;  %v10654_v32 = vpop.f32.mrf.mxu2  ;;  %v9272_v21 = vld [vmem:[%s12231_s5 + $0x30] sm:$0xff] }
 0x484   : > { %12416 = vst [vmem:[#allocation186_spill] sm:$0xff] %v10654_v32  ;;  %7103 = vmatpush.bf16.msra.mxu2 %v9272_v21 }
 0x485   : > { %v10650_v5 = vpop.f32.mrf.mxu1 }
 0x486   : > { %v5272_v18 = vpop.f32.mrf.mxu3  ;;  %12414 = vst [vmem:[#allocation184_spill] sm:$0xff] %v10650_v5  ;;  %v10652_v26 = vpop.f32.mrf.mxu0  ;;  %5913 = vmatmul.bf16.gmra.mxu2 %v8571_v34 }
 0x487   : > { %v10648_v23 = vadd.f32 %v5272_v18, %v9804_v49  ;;  %12415 = vst [vmem:[#allocation185_spill] sm:$0xff] %v10652_v26  ;;  %v7911_v18 = vor.u32 %v9028_v58, %v7910_v61  ;;  %v9260_v58 = vld [vmem:[%s12229_s3 + $0x210] sm:$0xff] }
 0x488   : > { %6262 = vmatpush.bf16.msra.mxu1 %v9260_v58  ;;  %v9258_v58 = vld [vmem:[%s12229_s3 + $0x200] sm:$0xff] }
 0x489   : > { %12413 = vst [vmem:[#allocation183_spill] sm:$0xff] %v10648_v23 }
 0x48a   : > { %5744 = vmatmul.bf16.gmra.mxu1 %v8567_v24  ;;  %v7715_v24 = vor.u32 %v8972_v3, %v7712_v57  ;;  %v7946_v57 = vld [vmem:[#allocation3 + $0x3f8] sm:$0xf]  ;;  %v9037_v3 = vld [vmem:[#allocation3 + $0x418] sm:$0xf0] }
 0x48d   : > { %v10658_v49 = vpop.f32.mrf.mxu1 }
 0x48e   : > { %v10656_v27 = vpop.f32.mrf.mxu3  ;;  %12418 = vst [vmem:[#allocation188_spill] sm:$0xff] %v10658_v49  ;;  %v10666_v11 = vpop.f32.mrf.mxu0  ;;  %v1221_v49 = vld [vmem:[#allocation2 + $0x1ba] sm:$0xff] }
 0x48f   : > { %12417 = vst [vmem:[#allocation187_spill] sm:$0xff] %v10656_v27  ;;  %v1285_v32 = vpack.c.bf16 %v1221_v49, %v1221_v49  ;;  %v7982_v27 = vld [vmem:[#allocation3 + $0x440] sm:$0xf] }
 0x490   : > { %12419 = vst [vmem:[#allocation189_spill] sm:$0xff] %v10666_v11  ;;  %v7947_v11 = vor.u32 %v9037_v3, %v7946_v57  ;;  %v8981_v57 = vld [vmem:[#allocation3 + $0x25c] sm:$0xf] }
 0x491   : > { %1349 = vst [vmem:[#allocation3 + $0x4ac] sm:$0xf] %v1285_v32 }
 0x493   : > { %5316 = vmatmul.bf16.gmra.mxu3 %v7911_v18  ;;  %6131 = vmatmul.bf16.gmra.mxu0 %v7715_v24  ;;  %v9259_v18 = vld [vmem:[%s12229_s3 + $0x208] sm:$0xff]  ;;  %v8914_v24 = vld [vmem:[#allocation3 + $0x40] sm:$0xf0] }
 0x494   : > { %6263 = vmatpush.bf16.msra.mxu1 %v9259_v18  ;;  %v7748_v18 = vld [vmem:[#allocation3 + $0x27c] sm:$0xf0] }
 0x495   : > { %v10671_v61 = vpop.f32.mrf.mxu1 }
 0x496   : > { %v5277_v34 = vpop.f32.mrf.mxu3  ;;  %12421 = vst [vmem:[#allocation191_spill] sm:$0xff] %v10671_v61  ;;  %v10679_v21 = vpop.f32.mrf.mxu0  ;;  %v1220_v61 = vld [vmem:[#allocation2 + $0x1b2] sm:$0xff] }
 0x497   : > { %v10669_v26 = vadd.f32 %v5277_v34, %v9820_v20  ;;  %12422 = vst [vmem:[#allocation192_spill] sm:$0xff] %v10679_v21  ;;  %v7466_v34 = vld [vmem:[#allocation3 + $0x20] sm:$0xf]  ;;  %v1284_v5 = vpack.c.bf16 %v1220_v61, %v1220_v61  ;;  %v9245_v21 = vld [vmem:[%s12229_s3 + $0x198] sm:$0xff] }
 0x498   : > { %6264 = vmatpush.bf16.msra.mxu1 %v9258_v58  ;;  %5923 = vmatpush.bf16.msra.mxu3 %v9245_v21  ;;  %v7502_v21 = vld [vmem:[#allocation3 + $0x68] sm:$0xf] }
 0x499   : > { %12420 = vst [vmem:[#allocation190_spill] sm:$0xff] %v10669_v26  ;;  %v7751_v26 = vor.u32 %v8981_v57, %v7748_v18  ;;  %v8990_v18 = vld [vmem:[#allocation3 + $0x2a4] sm:$0xf] }
 0x49a   : > { %1348 = vst [vmem:[#allocation3 + $0x488] sm:$0xf] %v1284_v5 }
 0x49d   : > { %v10683_v20 = vpop.f32.mrf.mxu1 }
 0x49e   : > { %v10681_v44 = vpop.f32.mrf.mxu3  ;;  %12424 = vst [vmem:[#allocation194_spill] sm:$0xff] %v10683_v20  ;;  %v7467_v20 = vor.u32 %v8914_v24, %v7466_v34  ;;  %v8923_v34 = vld [vmem:[#allocation3 + $0x88] sm:$0xf0] }
 0x49f   : > { %12423 = vst [vmem:[#allocation193_spill] sm:$0xff] %v10681_v44  ;;  %v10691_v44 = vpop.f32.mrf.mxu0 }
 0x4a0   : > { %12425 = vst [vmem:[#allocation195_spill] sm:$0xff] %v10691_v44  ;;  %6265 = vmatmul.bf16.vlgmr.msra.gmra.mxu1 %v7467_v20  ;;  %v9046_v44 = vld [vmem:[#allocation3 + $0x460] sm:$0xf0]  ;;  %v7784_v20 = vld [vmem:[#allocation3 + $0x2c4] sm:$0xf0] }
 0x4a1   : > { %v7983_v32 = vor.u32 %v9046_v44, %v7982_v27 }
 0x4a3   : > { %5321 = vmatmul.bf16.gmra.mxu3 %v7947_v11  ;;  %6136 = vmatmul.bf16.gmra.mxu0 %v7751_v26  ;;  %v7787_v26 = vor.u32 %v8990_v18, %v7784_v20  ;;  %v8999_v18 = vld [vmem:[#allocation3 + $0x2ec] sm:$0xf] }
 0x4a5   : > { %v10696_v49 = vpop.f32.mrf.mxu1 }
 0x4a6   : > { %v5282_v3 = vpop.f32.mrf.mxu3  ;;  %12427 = vst [vmem:[#allocation197_spill] sm:$0xff] %v10696_v49  ;;  %v8018_v49 = vld [vmem:[#allocation3 + $0x488] sm:$0xf] }
 0x4a7   : > { %v10694_v61 = vadd.f32 %v5282_v3, %v9832_v60  ;;  %v10698_v11 = vpop.f32.mrf.mxu0  ;;  %v7503_v60 = vor.u32 %v8923_v34, %v7502_v21  ;;  %v7538_v21 = vld [vmem:[#allocation3 + $0xb0] sm:$0xf]  ;;  %v8932_v34 = vld [vmem:[#allocation3 + $0xd0] sm:$0xf0] }
 0x4a8   : > { %12428 = vst [vmem:[#allocation198_spill] sm:$0xff] %v10698_v11 }
 0x4a9   : > { %12426 = vst [vmem:[#allocation196_spill] sm:$0xff] %v10694_v61 }
 0x4ad   : > { %v10702_v5 = vpop.f32.mrf.mxu1 }
 0x4ae   : > { %v10700_v58 = vpop.f32.mrf.mxu3  ;;  %12430 = vst [vmem:[#allocation200_spill] sm:$0xff] %v10702_v5  ;;  %v9055_v5 = vld [vmem:[#allocation3 + $0x4a8] sm:$0xf0] }
 0x4af   : > { %12429 = vst [vmem:[#allocation199_spill] sm:$0xff] %v10700_v58  ;;  %v10704_v24 = vpop.f32.mrf.mxu0 }
 0x4b0   : > { %6270 = vmatmul.bf16.gmra.mxu1 %v7503_v60  ;;  %v7820_v60 = vld [vmem:[#allocation3 + $0x30c] sm:$0xf0] }
 0x4b3   : > { %5326 = vmatmul.bf16.gmra.mxu3 %v7983_v32  ;;  %6141 = vmatmul.bf16.gmra.mxu0 %v7787_v26  ;;  %v8019_v32 = vor.u32 %v9055_v5, %v8018_v49  ;;  %v7823_v26 = vor.u32 %v8999_v18, %v7820_v60  ;;  %v8941_v60 = vld [vmem:[#allocation3 + $0x118] sm:$0xf0] }
 0x4b5   : > { %v10709_v11 = vpop.f32.mrf.mxu1 }
 0x4b6   : > { %v5287_v57 = vpop.f32.mrf.mxu3  ;;  %12432 = vst [vmem:[#allocation202_spill] sm:$0xff] %v10709_v11 }
 0x4b7   : > { %v10707_v3 = vadd.f32 %v5287_v57, %v9860_v36  ;;  %v10711_v27 = vpop.f32.mrf.mxu0  ;;  %v7539_v36 = vor.u32 %v8932_v34, %v7538_v21  ;;  %v9271_v21 = vld [vmem:[%s12231_s5 + $0x28] sm:$0xff]  ;;  %v7574_v34 = vld [vmem:[#allocation3 + $0xf8] sm:$0xf] }
 0x4b8   : > { %7104 = vmatpush.bf16.msra.mxu2 %v9271_v21  ;;  %v7575_v18 = vor.u32 %v8941_v60, %v7574_v34  ;;  %v9073_v21 = vld [vmem:[#allocation3 + $0x538] sm:$0xf0]  ;;  %v7610_v34 = vld [vmem:[#allocation3 + $0x140] sm:$0xf]  ;;  %v8950_v60 = vld [vmem:[#allocation3 + $0x160] sm:$0xf0] }
 0x4b9   : > { %12431 = vst [vmem:[#allocation201_spill] sm:$0xff] %v10707_v3 }
 0x4bd   : > { %v10715_v58 = vpop.f32.mrf.mxu1 }
 0x4be   : > { %v10713_v44 = vpop.f32.mrf.mxu3  ;;  %12434 = vst [vmem:[#allocation204_spill] sm:$0xff] %v10715_v58  ;;  %v8054_v58 = vld [vmem:[#allocation3 + $0x4d0] sm:$0xf] }
 0x4bf   : > { %12433 = vst [vmem:[#allocation203_spill] sm:$0xff] %v10713_v44  ;;  %v10717_v20 = vpop.f32.mrf.mxu0 }
 0x4c0   : > { %6275 = vmatmul.bf16.gmra.mxu1 %v7539_v36 }
 0x4c3   : > { %5331 = vmatmul.bf16.gmra.mxu3 %v8019_v32  ;;  %6146 = vmatmul.bf16.gmra.mxu0 %v7823_v26  ;;  %v9064_v32 = vld [vmem:[#allocation3 + $0x4f0] sm:$0xf0] }
 0x4c4   : > { %v8055_v61 = vor.u32 %v9064_v32, %v8054_v58 }
 0x4c5   : > { %v10722_v3 = vpop.f32.mrf.mxu1 }
 0x4c6   : > { %v5292_v57 = vpop.f32.mrf.mxu3  ;;  %12436 = vst [vmem:[#allocation206_spill] sm:$0xff] %v10722_v3 }
 0x4c7   : > { %v10720_v11 = vadd.f32 %v5292_v57, %v9914_v13  ;;  %v10724_v49 = vpop.f32.mrf.mxu0  ;;  %v7856_v13 = vld [vmem:[#allocation3 + $0x354] sm:$0xf0]  ;;  %v9008_v57 = vld [vmem:[#allocation3 + $0x334] sm:$0xf] }
 0x4c8   : > { %v7859_v3 = vor.u32 %v9008_v57, %v7856_v13  ;;  %v7892_v13 = vld [vmem:[#allocation3 + $0x39c] sm:$0xf0]  ;;  %v9017_v57 = vld [vmem:[#allocation3 + $0x37c] sm:$0xf] }
 0x4c9   : > { %12435 = vst [vmem:[#allocation205_spill] sm:$0xff] %v10720_v11 }
 0x4cd   : > { %v10728_v44 = vpop.f32.mrf.mxu1 }
 0x4ce   : > { %v10726_v5 = vpop.f32.mrf.mxu3  ;;  %12438 = vst [vmem:[#allocation208_spill] sm:$0xff] %v10728_v44 }
 0x4cf   : > { %12437 = vst [vmem:[#allocation207_spill] sm:$0xff] %v10726_v5  ;;  %v10733_v36 = vpop.f32.mrf.mxu0 }
 0x4d0   : > { %6280 = vmatmul.bf16.gmra.mxu1 %v7575_v18 }
 0x4d3   : > { %5336 = vmatmul.bf16.gmra.mxu3 %v8055_v61  ;;  %6151 = vmatmul.bf16.gmra.mxu0 %v7859_v3  ;;  %v8090_v61 = vld [vmem:[#allocation3 + $0x518] sm:$0xf]  ;;  %v7611_v3 = vor.u32 %v8950_v60, %v7610_v34  ;;  %v7646_v60 = vld [vmem:[#allocation3 + $0x188] sm:$0xf] }
 0x4d4   : > { %v8091_v23 = vor.u32 %v9073_v21, %v8090_v61 }
 0x4d5   : > { %v10738_v58 = vpop.f32.mrf.mxu1 }
 0x4d6   : > { %v5297_v26 = vpop.f32.mrf.mxu3  ;;  %12440 = vst [vmem:[#allocation210_spill] sm:$0xff] %v10738_v58  ;;  %v7895_v58 = vor.u32 %v9017_v57, %v7892_v13 }
 0x4d7   : > { %v10736_v5 = vadd.f32 %v5297_v26, %v9933_v7  ;;  %v10740_v32 = vpop.f32.mrf.mxu0  ;;  %v9244_v7 = vld [vmem:[%s12229_s3 + $0x190] sm:$0xff] }
 0x4d8   : > { %12441 = vst [vmem:[#allocation211_spill] sm:$0xff] %v10740_v32  ;;  %5924 = vmatpush.bf16.msra.mxu3 %v9244_v7  ;;  %v8959_v7 = vld [vmem:[#allocation3 + $0x1a8] sm:$0xf0] }
 0x4d9   : > { %12439 = vst [vmem:[#allocation209_spill] sm:$0xff] %v10736_v5  ;;  %v9082_v5 = vld [vmem:[#allocation3 + $0x580] sm:$0xf0]  ;;  %v7647_v13 = vor.u32 %v8959_v7, %v7646_v60  ;;  %v7682_v7 = vld [vmem:[#allocation3 + $0x1d0] sm:$0xf] }
 0x4dd   : > { %v10744_v11 = vpop.f32.mrf.mxu1 }
 0x4de   : > { %v10742_v44 = vpop.f32.mrf.mxu3  ;;  %12443 = vst [vmem:[#allocation213_spill] sm:$0xff] %v10744_v11  ;;  %v8126_v11 = vld [vmem:[#allocation3 + $0x560] sm:$0xf] }
 0x4df   : > { %12442 = vst [vmem:[#allocation212_spill] sm:$0xff] %v10742_v44  ;;  %v10749_v18 = vpop.f32.mrf.mxu0  ;;  %v8127_v34 = vor.u32 %v9082_v5, %v8126_v11  ;;  %v8162_v11 = vld [vmem:[#allocation3 + $0x5a8] sm:$0xf]  ;;  %v9091_v5 = vld [vmem:[#allocation3 + $0x5c8] sm:$0xf0] }
 0x4e0   : > { %6285 = vmatmul.bf16.gmra.mxu1 %v7611_v3  ;;  %v7928_v3 = vld [vmem:[#allocation3 + $0x3e4] sm:$0xf0]  ;;  %v8163_v60 = vor.u32 %v9091_v5, %v8162_v11  ;;  %v8198_v11 = vld [vmem:[#allocation3 + $0x5f0] sm:$0xf]  ;;  %v9100_v5 = vld [vmem:[#allocation3 + $0x610] sm:$0xf0] }
 0x4e3   : > { %5341 = vmatmul.bf16.gmra.mxu3 %v8091_v23  ;;  %6156 = vmatmul.bf16.gmra.mxu0 %v7895_v58 }
 0x4e5   : > { %v10754_v61 = vpop.f32.mrf.mxu1 }
 0x4e6   : > { %v5302_v26 = vpop.f32.mrf.mxu3  ;;  %12445 = vst [vmem:[#allocation215_spill] sm:$0xff] %v10754_v61 }
 0x4e7   : > { %v10752_v44 = vadd.f32 %v5302_v26, %v9951_v1  ;;  %v10756_v23 = vpop.f32.mrf.mxu0  ;;  %v9026_v1 = vld [vmem:[#allocation3 + $0x3c4] sm:$0xf] }
 0x4e8   : > { %v7931_v58 = vor.u32 %v9026_v1, %v7928_v3  ;;  %v9035_v1 = vld [vmem:[#allocation3 + $0x40c] sm:$0xf] }
 0x4e9   : > { %12444 = vst [vmem:[#allocation214_spill] sm:$0xff] %v10752_v44 }
 0x4ed   : > { %v10760_v32 = vpop.f32.mrf.mxu1 }
 0x4ee   : > { %v10758_v21 = vpop.f32.mrf.mxu3  ;;  %12447 = vst [vmem:[#allocation217_spill] sm:$0xff] %v10760_v32 }
 0x4ef   : > { %12446 = vst [vmem:[#allocation216_spill] sm:$0xff] %v10758_v21  ;;  %v10762_v57 = vpop.f32.mrf.mxu0 }
 0x4f0   : > { %12448 = vst [vmem:[#allocation218_spill] sm:$0xff] %v10762_v57  ;;  %6290 = vmatmul.bf16.gmra.mxu1 %v7647_v13  ;;  %v8968_v57 = vld [vmem:[#allocation3 + $0x1f0] sm:$0xf0]  ;;  %v7964_v13 = vld [vmem:[#allocation3 + $0x42c] sm:$0xf0] }
 0x4f1   : > { %v7683_v3 = vor.u32 %v8968_v57, %v7682_v7  ;;  %v9270_v57 = vld [vmem:[%s12231_s5 + $0x20] sm:$0xff]  ;;  %v7718_v7 = vld [vmem:[#allocation3 + $0x218] sm:$0xf] }
 0x4f2   : > { %7105 = vmatpush.bf16.msra.mxu2 %v9270_v57  ;;  %v9109_v57 = vld [vmem:[#allocation3 + $0x658] sm:$0xf0] }
 0x4f3   : > { %5346 = vmatmul.bf16.gmra.mxu3 %v8127_v34  ;;  %6161 = vmatmul.bf16.gmra.mxu0 %v7931_v58 }
 0x4f5   : > { %v10767_v21 = vpop.f32.mrf.mxu1 }
 0x4f6   : > { %v5307_v26 = vpop.f32.mrf.mxu3  ;;  %12450 = vst [vmem:[#allocation220_spill] sm:$0xff] %v10767_v21 }
 0x4f7   : > { %v10765_v61 = vadd.f32 %v5307_v26, %v9967_v0  ;;  %v10771_v32 = vpop.f32.mrf.mxu0  ;;  %v7967_v26 = vor.u32 %v9035_v1, %v7964_v13  ;;  %v8977_v13 = vld [vmem:[#allocation3 + $0x238] sm:$0xf0] }
 0x4f9   : > { %12449 = vst [vmem:[#allocation219_spill] sm:$0xff] %v10765_v61 }
 0x4fd   : > { %v10773_v34 = vpop.f32.mrf.mxu1 }
 0x4fe   : > { %v10769_v44 = vpop.f32.mrf.mxu3  ;;  %12452 = vst [vmem:[#allocation222_spill] sm:$0xff] %v10773_v34 }
 0x4ff   : > { %12451 = vst [vmem:[#allocation221_spill] sm:$0xff] %v10769_v44  ;;  %v10780_v44 = vpop.f32.mrf.mxu0 }
 0x500   : > { %6295 = vmatmul.bf16.gmra.mxu1 %v7683_v3  ;;  %12455 = vst [vmem:[#allocation225_spill] sm:$0xff] %v10780_v44  ;;  %v7719_v3 = vor.u32 %v8977_v13, %v7718_v7 }
 0x503   : > { %5351 = vmatmul.bf16.gmra.mxu3 %v8163_v60  ;;  %6166 = vmatmul.bf16.gmra.mxu0 %v7967_v26  ;;  %v8199_v60 = vor.u32 %v9100_v5, %v8198_v11  ;;  %v2180_v11 = vld [vmem:[#allocation2 + $0x1a1] sm:$0xff] }
 0x505   : > { %v10778_v21 = vpop.f32.mrf.mxu1 }
 0x506   : > { %v5312_v0 = vpop.f32.mrf.mxu3  ;;  %12454 = vst [vmem:[#allocation224_spill] sm:$0xff] %v10778_v21  ;;  %v2244_v21 = vpack.c.bf16 %v2180_v11, %v2180_v11 }
 0x507   : > { %v10776_v58 = vadd.f32 %v5312_v0, %v9978_v6  ;;  %v10789_v6 = vpop.f32.mrf.mxu0 }
 0x508   : > { %12458 = vst [vmem:[#allocation228_spill] sm:$0xff] %v10789_v6 }
 0x509   : > { %12453 = vst [vmem:[#allocation223_spill] sm:$0xff] %v10776_v58  ;;  %v8234_v58 = vld [vmem:[#allocation3 + $0x638] sm:$0xf] }
 0x50a   : > { %2308 = vst [vmem:[#allocation3 + $0x478] sm:$0xf] %v2244_v21  ;;  %v8235_v13 = vor.u32 %v9109_v57, %v8234_v58 }
 0x50d   : > { %v10784_v34 = vpop.f32.mrf.mxu1 }
 0x50e   : > { %v10782_v61 = vpop.f32.mrf.mxu3  ;;  %12457 = vst [vmem:[#allocation227_spill] sm:$0xff] %v10784_v34  ;;  %v2179_v34 = vld [vmem:[#allocation2 + $0x199] sm:$0xff] }
 0x50f   : > { %12456 = vst [vmem:[#allocation226_spill] sm:$0xff] %v10782_v61  ;;  %v2243_v5 = vpack.c.bf16 %v2179_v34, %v2179_v34  ;;  %v10796_v61 = vpop.f32.mrf.mxu0  ;;  %v9243_v34 = vld [vmem:[%s12229_s3 + $0x188] sm:$0xff] }
 0x510   : > { %6300 = vmatmul.bf16.gmra.mxu1 %v7719_v3  ;;  %12461 = vst [vmem:[#allocation231_spill] sm:$0xff] %v10796_v61  ;;  %v7754_v3 = vld [vmem:[#allocation3 + $0x260] sm:$0xf]  ;;  %5925 = vmatpush.bf16.msra.mxu3 %v9243_v34 }
 0x511   : > { %2307 = vst [vmem:[#allocation3 + $0x454] sm:$0xf] %v2243_v5  ;;  %v8000_v11 = vld [vmem:[#allocation3 + $0x474] sm:$0xf0]  ;;  %v8036_v34 = vld [vmem:[#allocation3 + $0x4bc] sm:$0xf0] }
 0x513   : > { %5356 = vmatmul.bf16.gmra.mxu3 %v8199_v60 }
 0x515   : > { %v10794_v26 = vpop.f32.mrf.mxu1 }
 0x516   : > { %v5317_v1 = vpop.f32.mrf.mxu3  ;;  %12460 = vst [vmem:[#allocation230_spill] sm:$0xff] %v10794_v26 }
 0x517   : > { %v10792_v0 = vadd.f32 %v5317_v1, %v10003_v17  ;;  %v8986_v17 = vld [vmem:[#allocation3 + $0x280] sm:$0xf0] }
 0x518   : > { %v9044_v1 = vld [vmem:[#allocation3 + $0x454] sm:$0xf]  ;;  %v7755_v5 = vor.u32 %v8986_v17, %v7754_v3  ;;  %v7790_v17 = vld [vmem:[#allocation3 + $0x2a8] sm:$0xf] }
 0x519   : > { %12459 = vst [vmem:[#allocation229_spill] sm:$0xff] %v10792_v0  ;;  %v8003_v26 = vor.u32 %v9044_v1, %v8000_v11  ;;  %v10808_v0 = vpop.f32.mrf.mxu0  ;;  %v8995_v1 = vld [vmem:[#allocation3 + $0x2c8] sm:$0xf0] }
 0x51a   : > { %12465 = vst [vmem:[#allocation235_spill] sm:$0xff] %v10808_v0  ;;  %v7791_v11 = vor.u32 %v8995_v1, %v7790_v17  ;;  %v7826_v0 = vld [vmem:[#allocation3 + $0x2f0] sm:$0xf]  ;;  %v9004_v17 = vld [vmem:[#allocation3 + $0x310] sm:$0xf0] }
 0x51b   : > { %6171 = vmatmul.bf16.gmra.mxu0 %v8003_v26  ;;  %v8072_v1 = vld [vmem:[#allocation3 + $0x504] sm:$0xf0] }
 0x51d   : > { %v10800_v7 = vpop.f32.mrf.mxu1 }
 0x51e   : > { %v10798_v60 = vpop.f32.mrf.mxu3  ;;  %12463 = vst [vmem:[#allocation233_spill] sm:$0xff] %v10800_v7  ;;  %v9118_v7 = vld [vmem:[#allocation3 + $0x6a0] sm:$0xf0] }
 0x51f   : > { %12462 = vst [vmem:[#allocation232_spill] sm:$0xff] %v10798_v60 }
 0x520   : > { %6305 = vmatmul.bf16.gmra.mxu1 %v7755_v5 }
 0x521   : > { %v10816_v3 = vpop.f32.mrf.mxu0 }
 0x522   : > { %12468 = vst [vmem:[#allocation238_spill] sm:$0xff] %v10816_v3 }
 0x523   : > { %5361 = vmatmul.bf16.gmra.mxu3 %v8235_v13  ;;  %v8270_v13 = vld [vmem:[#allocation3 + $0x680] sm:$0xf] }
 0x524   : > { %v8271_v6 = vor.u32 %v9118_v7, %v8270_v13  ;;  %v8306_v13 = vld [vmem:[#allocation3 + $0x6c8] sm:$0xf] }
 0x525   : > { %v10810_v58 = vpop.f32.mrf.mxu1 }
 0x526   : > { %v5322_v21 = vpop.f32.mrf.mxu3  ;;  %12466 = vst [vmem:[#allocation236_spill] sm:$0xff] %v10810_v58 }
 0x527   : > { %v10806_v60 = vadd.f32 %v5322_v21, %v10021_v45  ;;  %v9053_v45 = vld [vmem:[#allocation3 + $0x49c] sm:$0xf] }
 0x528   : > { %v8039_v5 = vor.u32 %v9053_v45, %v8036_v34  ;;  %v9062_v34 = vld [vmem:[#allocation3 + $0x4e4] sm:$0xf]  ;;  %v7827_v45 = vor.u32 %v9004_v17, %v7826_v0 }
 0x529   : > { %12464 = vst [vmem:[#allocation234_spill] sm:$0xff] %v10806_v60  ;;  %v9127_v60 = vld [vmem:[#allocation3 + $0x6e8] sm:$0xf0] }
 0x52b   : > { %6176 = vmatmul.bf16.gmra.mxu0 %v8039_v5 }
 0x52d   : > { %v10814_v61 = vpop.f32.mrf.mxu1 }
 0x52e   : > { %v10812_v57 = vpop.f32.mrf.mxu3 }
 0x52f   : > { %12467 = vst [vmem:[#allocation237_spill] sm:$0xff] %v10812_v57  ;;  %v10823_v57 = vpop.f32.mrf.mxu0 }
 0x530   : > { %6310 = vmatmul.bf16.gmra.mxu1 %v7791_v11  ;;  %12470 = vst [vmem:[#allocation240_spill] sm:$0xff] %v10823_v57  ;;  %v8075_v11 = vor.u32 %v9062_v34, %v8072_v1  ;;  %v8342_v57 = vld [vmem:[#allocation3 + $0x710] sm:$0xf]  ;;  %v9269_v1 = vld [vmem:[%s12231_s5 + $0x18] sm:$0xff] }
 0x531   : > { %v9013_v34 = vld [vmem:[#allocation3 + $0x358] sm:$0xf0]  ;;  %7106 = vmatpush.bf16.msra.mxu2 %v9269_v1 }
 0x533   : > { %5366 = vmatmul.bf16.gmra.mxu3 %v8271_v6  ;;  %v8307_v6 = vor.u32 %v9127_v60, %v8306_v13  ;;  %v9136_v60 = vld [vmem:[#allocation3 + $0x730] sm:$0xf0] }
 0x534   : > { %v8343_v17 = vor.u32 %v9136_v60, %v8342_v57 }
 0x535   : > { %v10821_v58 = vpop.f32.mrf.mxu1 }
 0x536   : > { %v5327_v21 = vpop.f32.mrf.mxu3 }
 0x537   : > { %v10819_v26 = vadd.f32 %v5327_v21, %v10056_v25  ;;  %v10829_v25 = vpop.f32.mrf.mxu0 }
 0x538   : > { %12472 = vst [vmem:[#allocation242_spill] sm:$0xff] %v10829_v25 }
 0x539   : > { %12469 = vst [vmem:[#allocation239_spill] sm:$0xff] %v10819_v26 }
 0x53b   : > { %6181 = vmatmul.bf16.gmra.mxu0 %v8075_v11  ;;  %v9071_v11 = vld [vmem:[#allocation3 + $0x52c] sm:$0xf] }
 0x53d   : > { %v10827_v3 = vpop.f32.mrf.mxu1 }
 0x53e   : > { %v10825_v7 = vpop.f32.mrf.mxu3 }
 0x53f   : > { %12471 = vst [vmem:[#allocation241_spill] sm:$0xff] %v10825_v7  ;;  %v10836_v13 = vpop.f32.mrf.mxu0 }
 0x540   : > { %6315 = vmatmul.bf16.gmra.mxu1 %v7827_v45  ;;  %12474 = vst [vmem:[#allocation244_spill] sm:$0xff] %v10836_v13  ;;  %v8108_v45 = vld [vmem:[#allocation3 + $0x54c] sm:$0xf0]  ;;  %v9145_v13 = vld [vmem:[#allocation3 + $0x778] sm:$0xf0] }
 0x543   : > { %5371 = vmatmul.bf16.gmra.mxu3 %v8307_v6 }
 0x545   : > { %v10834_v7 = vpop.f32.mrf.mxu1 }
 0x546   : > { %v5332_v5 = vpop.f32.mrf.mxu3 }
 0x547   : > { %v10832_v21 = vadd.f32 %v5332_v5, %v10087_v52  ;;  %v7862_v52 = vld [vmem:[#allocation3 + $0x338] sm:$0xf]  ;;  %v10851_v57 = vpop.f32.mrf.mxu0 }
 0x548   : > { %v7863_v5 = vor.u32 %v9013_v34, %v7862_v52  ;;  %12477 = vst [vmem:[#allocation247_spill] sm:$0xff] %v10851_v57  ;;  %v7898_v52 = vld [vmem:[#allocation3 + $0x380] sm:$0xf]  ;;  %v9022_v34 = vld [vmem:[#allocation3 + $0x3a0] sm:$0xf0] }
 0x549   : > { %12473 = vst [vmem:[#allocation243_spill] sm:$0xff] %v10832_v21  ;;  %v8111_v21 = vor.u32 %v9071_v11, %v8108_v45  ;;  %v8144_v45 = vld [vmem:[#allocation3 + $0x594] sm:$0xf0] }
 0x54b   : > { %6186 = vmatmul.bf16.gmra.mxu0 %v8111_v21  ;;  %v7899_v21 = vor.u32 %v9022_v34, %v7898_v52  ;;  %v7934_v34 = vld [vmem:[#allocation3 + $0x3c8] sm:$0xf] }
 0x54d   : > { %v10841_v0 = vpop.f32.mrf.mxu1 }
 0x54e   : > { %v5334_v26 = vpop.f32.mrf.mxu3 }
 0x54f   : > { %v10839_v6 = vadd.f32 %v5334_v26, %v10099_v50  ;;  %v10858_v11 = vpop.f32.mrf.mxu0 }
 0x550   : > { %6320 = vmatmul.bf16.gmra.mxu1 %v7863_v5  ;;  %12479 = vst [vmem:[#allocation249_spill] sm:$0xff] %v10858_v11 }
 0x551   : > { %12475 = vst [vmem:[#allocation245_spill] sm:$0xff] %v10839_v6  ;;  %v8378_v6 = vld [vmem:[#allocation3 + $0x758] sm:$0xf] }
 0x552   : > { %v8379_v1 = vor.u32 %v9145_v13, %v8378_v6 }
 0x553   : > { %5376 = vmatmul.bf16.gmra.mxu3 %v8343_v17 }
 0x555   : > { %v10849_v26 = vpop.f32.mrf.mxu1 }
 0x556   : > { %v5337_v25 = vpop.f32.mrf.mxu3 }
 0x557   : > { %v10847_v50 = vadd.f32 %v5337_v25, %v10097_v53  ;;  %v9242_v53 = vld [vmem:[%s12229_s3 + $0x180] sm:$0xff]  ;;  %v9080_v25 = vld [vmem:[#allocation3 + $0x574] sm:$0xf]  ;;  %v10868_v6 = vpop.f32.mrf.mxu0 }
 0x558   : > { %v8147_v5 = vor.u32 %v9080_v25, %v8144_v45  ;;  %5926 = vmatpush.bf16.msra.mxu3 %v9242_v53  ;;  %12481 = vst [vmem:[#allocation251_spill] sm:$0xff] %v10868_v6  ;;  %v9031_v45 = vld [vmem:[#allocation3 + $0x3e8] sm:$0xf0]  ;;  %v8180_v53 = vld [vmem:[#allocation3 + $0x5dc] sm:$0xf0] }
 0x559   : > { %12476 = vst [vmem:[#allocation246_spill] sm:$0xff] %v10847_v50 }
 0x55b   : > { %6191 = vmatmul.bf16.gmra.mxu0 %v8147_v5 }
 0x55d   : > { %v10856_v17 = vpop.f32.mrf.mxu1 }
 0x55e   : > { %v5339_v60 = vpop.f32.mrf.mxu3 }
 0x55f   : > { %v10854_v44 = vadd.f32 %v5339_v60, %v10104_v38  ;;  %v10875_v5 = vpop.f32.mrf.mxu0 }
 0x560   : > { %6325 = vmatmul.bf16.gmra.mxu1 %v7899_v21  ;;  %12483 = vst [vmem:[#allocation253_spill] sm:$0xff] %v10875_v5 }
 0x561   : > { %12478 = vst [vmem:[#allocation248_spill] sm:$0xff] %v10854_v44  ;;  %v9154_v44 = vld [vmem:[#allocation3 + $0x7c0] sm:$0xf0] }
 0x563   : > { %5381 = vmatmul.bf16.gmra.mxu3 %v8379_v1  ;;  %v8414_v1 = vld [vmem:[#allocation3 + $0x7a0] sm:$0xf] }
 0x564   : > { %v8415_v52 = vor.u32 %v9154_v44, %v8414_v1  ;;  %v9163_v44 = vld [vmem:[#allocation3 + $0x808] sm:$0xf0] }
 0x565   : > { %v10866_v13 = vpop.f32.mrf.mxu1 }
 0x566   : > { %v5342_v50 = vpop.f32.mrf.mxu3 }
 0x567   : > { %v10864_v38 = vadd.f32 %v5342_v50, %v10113_v46  ;;  %v9089_v46 = vld [vmem:[#allocation3 + $0x5bc] sm:$0xf]  ;;  %v7935_v50 = vor.u32 %v9031_v45, %v7934_v34  ;;  %v7970_v45 = vld [vmem:[#allocation3 + $0x410] sm:$0xf] }
 0x568   : > { %v8183_v25 = vor.u32 %v9089_v46, %v8180_v53  ;;  %v9040_v53 = vld [vmem:[#allocation3 + $0x430] sm:$0xf0]  ;;  %v8216_v46 = vld [vmem:[#allocation3 + $0x624] sm:$0xf0] }
 0x569   : > { %12480 = vst [vmem:[#allocation250_spill] sm:$0xff] %v10864_v38 }
 0x56b   : > { %6196 = vmatmul.bf16.gmra.mxu0 %v8183_v25 }
 0x56d   : > { %v10873_v57 = vpop.f32.mrf.mxu1 }
 0x56e   : > { %v5344_v60 = vpop.f32.mrf.mxu3 }
 0x56f   : > { %v10871_v11 = vadd.f32 %v5344_v60, %v10126_v16 }
 0x570   : > { %6330 = vmatmul.bf16.gmra.mxu1 %v7935_v50 }
 0x571   : > { %12482 = vst [vmem:[#allocation252_spill] sm:$0xff] %v10871_v11  ;;  %v8450_v11 = vld [vmem:[#allocation3 + $0x7e8] sm:$0xf] }
 0x572   : > { %v8451_v34 = vor.u32 %v9163_v44, %v8450_v11  ;;  %v8486_v44 = vld [vmem:[#allocation3 + $0x830] sm:$0xf] }
 0x573   : > { %5386 = vmatmul.bf16.gmra.mxu3 %v8415_v52  ;;  %v10885_v52 = vpop.f32.mrf.mxu0 }
 0x574   : > { %12486 = vst [vmem:[#allocation256_spill] sm:$0xff] %v10885_v52 }
 0x575   : > { %v10880_v16 = vpop.f32.mrf.mxu1 }
 0x576   : > { %v5347_v21 = vpop.f32.mrf.mxu3 }
 0x577   : > { %v10878_v38 = vadd.f32 %v5347_v21, %v10133_v40  ;;  %v9098_v40 = vld [vmem:[#allocation3 + $0x604] sm:$0xf]  ;;  %v7971_v21 = vor.u32 %v9040_v53, %v7970_v45  ;;  %v9268_v45 = vld [vmem:[%s12231_s5 + $0x10] sm:$0xff] }
 0x578   : > { %v8219_v25 = vor.u32 %v9098_v40, %v8216_v46  ;;  %v8252_v53 = vld [vmem:[#allocation3 + $0x66c] sm:$0xf0]  ;;  %7107 = vmatpush.bf16.msra.mxu2 %v9268_v45  ;;  %v9107_v46 = vld [vmem:[#allocation3 + $0x64c] sm:$0xf]  ;;  %v9181_v45 = vld [vmem:[#allocation3 + $0x898] sm:$0xf0] }
 0x579   : > { %12484 = vst [vmem:[#allocation254_spill] sm:$0xff] %v10878_v38 }
 0x57b   : > { %6201 = vmatmul.bf16.gmra.mxu0 %v8219_v25 }
 0x57d   : > { %v10887_v50 = vpop.f32.mrf.mxu1 }
 0x57e   : > { %v5349_v60 = vpop.f32.mrf.mxu3 }
 0x57f   : > { %v10883_v1 = vadd.f32 %v5349_v60, %v10141_v54  ;;  %v10892_v54 = vpop.f32.mrf.mxu0 }
 0x580   : > { %6335 = vmatmul.bf16.gmra.mxu1 %v7971_v21  ;;  %12488 = vst [vmem:[#allocation258_spill] sm:$0xff] %v10892_v54 }
 0x581   : > { %12485 = vst [vmem:[#allocation255_spill] sm:$0xff] %v10883_v1  ;;  %v9172_v1 = vld [vmem:[#allocation3 + $0x850] sm:$0xf0] }
 0x582   : > { %v8487_v52 = vor.u32 %v9172_v1, %v8486_v44  ;;  %v8522_v44 = vld [vmem:[#allocation3 + $0x878] sm:$0xf] }
 0x583   : > { %5391 = vmatmul.bf16.gmra.mxu3 %v8451_v34 }
 0x585   : > { %v10894_v60 = vpop.f32.mrf.mxu1 }
 0x586   : > { %v5352_v38 = vpop.f32.mrf.mxu3 }
 0x587   : > { %v10890_v5 = vadd.f32 %v5352_v38, %v10150_v14  ;;  %v2371_v14 = vld [vmem:[#allocation2 + $0x19a] sm:$0xff]  ;;  %v2372_v38 = vld [vmem:[#allocation2 + $0x1a2] sm:$0xff]  ;;  %v10902_v25 = vpop.f32.mrf.mxu0 }
 0x588   : > { %v2435_v40 = vpack.c.bf16 %v2371_v14, %v2371_v14  ;;  %v2436_v21 = vpack.c.bf16 %v2372_v38, %v2372_v38  ;;  %12490 = vst [vmem:[#allocation260_spill] sm:$0xff] %v10902_v25  ;;  %v8523_v38 = vor.u32 %v9181_v45, %v8522_v44  ;;  %v9190_v44 = vld [vmem:[#allocation3 + $0x8e0] sm:$0xf0]  ;;  %v9067_v25 = vld [vmem:[#allocation3 + $0x508] sm:$0xf0] }
 0x589   : > { %12487 = vst [vmem:[#allocation257_spill] sm:$0xff] %v10890_v5  ;;  %v8255_v5 = vor.u32 %v9107_v46, %v8252_v53 }
 0x58a   : > { %2499 = vst [vmem:[#allocation3 + $0x458] sm:$0xf] %v2435_v40 }
 0x58b   : > { %6206 = vmatmul.bf16.gmra.mxu0 %v8255_v5  ;;  %2500 = vst [vmem:[#allocation3 + $0x47c] sm:$0xf] %v2436_v21 }
 0x58d   : > { %v10907_v1 = vpop.f32.mrf.mxu1 }
 0x58e   : > { %v5354_v11 = vpop.f32.mrf.mxu3 }
 0x58f   : > { %v10897_v34 = vadd.f32 %v5354_v11, %v10155_v31  ;;  %v10909_v6 = vpop.f32.mrf.mxu0 }
 0x590   : > { %12492 = vst [vmem:[#allocation262_spill] sm:$0xff] %v10909_v6 }
 0x591   : > { %12489 = vst [vmem:[#allocation259_spill] sm:$0xff] %v10897_v34  ;;  %v8006_v11 = vld [vmem:[#allocation3 + $0x458] sm:$0xf] }
 0x592   : > { %v9049_v34 = vld [vmem:[#allocation3 + $0x478] sm:$0xf0] }
 0x593   : > { %5396 = vmatmul.bf16.gmra.mxu3 %v8487_v52  ;;  %v8007_v53 = vor.u32 %v9049_v34, %v8006_v11  ;;  %v8558_v11 = vld [vmem:[#allocation3 + $0x8c0] sm:$0xf] }
 0x595   : > { %v10914_v46 = vpop.f32.mrf.mxu1  ;;  %6340 = vmatmul.bf16.gmra.mxu1 %v8007_v53 }
 0x596   : > { %v5357_v54 = vpop.f32.mrf.mxu3 }
 0x597   : > { %v10905_v31 = vadd.f32 %v5357_v54, %v10169_v43  ;;  %v8288_v43 = vld [vmem:[#allocation3 + $0x6b4] sm:$0xf0]  ;;  %v9116_v54 = vld [vmem:[#allocation3 + $0x694] sm:$0xf] }
 0x598   : > { %v8291_v5 = vor.u32 %v9116_v54, %v8288_v43  ;;  %v9125_v43 = vld [vmem:[#allocation3 + $0x6dc] sm:$0xf]  ;;  %v8324_v54 = vld [vmem:[#allocation3 + $0x6fc] sm:$0xf0] }
 0x599   : > { %12491 = vst [vmem:[#allocation261_spill] sm:$0xff] %v10905_v31  ;;  %v10919_v31 = vpop.f32.mrf.mxu0 }
 0x59a   : > { %12495 = vst [vmem:[#allocation265_spill] sm:$0xff] %v10919_v31  ;;  %v8078_v31 = vld [vmem:[#allocation3 + $0x4e8] sm:$0xf] }
 0x59b   : > { %6211 = vmatmul.bf16.gmra.mxu0 %v8291_v5 }
 0x59d   : > { %v10921_v6 = vpop.f32.mrf.mxu1 }
 0x59e   : > { %v5359_v52 = vpop.f32.mrf.mxu3 }
 0x59f   : > { %v10912_v14 = vadd.f32 %v5359_v52, %v10177_v55  ;;  %v8042_v55 = vld [vmem:[#allocation3 + $0x4a0] sm:$0xf]  ;;  %v9058_v52 = vld [vmem:[#allocation3 + $0x4c0] sm:$0xf0] }
 0x5a0   : > { %v8043_v53 = vor.u32 %v9058_v52, %v8042_v55  ;;  %v8913_v52 = vld [vmem:[#allocation3 + $0x38] sm:$0xf0] }
 0x5a1   : > { %12493 = vst [vmem:[#allocation263_spill] sm:$0xff] %v10912_v14 }
 0x5a3   : > { %5401 = vmatmul.bf16.gmra.mxu3 %v8523_v38  ;;  %v8559_v38 = vor.u32 %v9190_v44, %v8558_v11  ;;  %v8079_v44 = vor.u32 %v9067_v25, %v8078_v31  ;;  %v8114_v31 = vld [vmem:[#allocation3 + $0x530] sm:$0xf] }
 0x5a5   : > { %6345 = vmatmul.bf16.gmra.mxu1 %v8043_v53  ;;  %v10928_v5 = vpop.f32.mrf.mxu1  ;;  %v7458_v53 = vld [vmem:[#allocation3 + $0x18] sm:$0xf] }
 0x5a6   : > { %v5362_v40 = vpop.f32.mrf.mxu3 }
 0x5a7   : > { %v10917_v21 = vadd.f32 %v5362_v40, %v10184_v10  ;;  %v10926_v10 = vpop.f32.mrf.mxu0  ;;  %v8327_v40 = vor.u32 %v9125_v43, %v8324_v54  ;;  %v9134_v43 = vld [vmem:[#allocation3 + $0x724] sm:$0xf]  ;;  %v8360_v54 = vld [vmem:[#allocation3 + $0x744] sm:$0xf0] }
 0x5a8   : > { %12497 = vst [vmem:[#allocation267_spill] sm:$0xff] %v10926_v10 }
 0x5a9   : > { %12494 = vst [vmem:[#allocation264_spill] sm:$0xff] %v10917_v21 }
 0x5ab   : > { %6216 = vmatmul.bf16.gmra.mxu0 %v8327_v40 }
 0x5ad   : > { %v10938_v11 = vpop.f32.mrf.mxu1 }
 0x5ae   : > { %v5364_v34 = vpop.f32.mrf.mxu3 }
 0x5af   : > { %v10924_v45 = vadd.f32 %v5364_v34, %v10190_v35  ;;  %v10933_v35 = vpop.f32.mrf.mxu0 }
 0x5b0   : > { %12499 = vst [vmem:[#allocation269_spill] sm:$0xff] %v10933_v35  ;;  %v12512_v35 = vld [vmem:[#allocation73_spill] sm:$0xff] }
 0x5b1   : > { %12496 = vst [vmem:[#allocation266_spill] sm:$0xff] %v10924_v45 }
 0x5b3   : > { %5406 = vmatmul.bf16.gmra.mxu3 %v8559_v38  ;;  %v7459_v38 = vor.u32 %v8913_v52, %v7458_v53  ;;  %v8922_v53 = vld [vmem:[#allocation3 + $0x80] sm:$0xf0] }
 0x5b5   : > { %6350 = vmatmul.bf16.gmra.mxu1 %v8079_v44  ;;  %v10945_v45 = vpop.f32.mrf.mxu1 }
 0x5b6   : > { %v5367_v21 = vpop.f32.mrf.mxu3 }
 0x5b7   : > { %v10931_v14 = vadd.f32 %v5367_v21, %v10198_v48  ;;  %v8363_v48 = vor.u32 %v9134_v43, %v8360_v54  ;;  %v10940_v40 = vpop.f32.mrf.mxu0  ;;  %v7494_v43 = vld [vmem:[#allocation3 + $0x60] sm:$0xf] }
 0x5b8   : > { %12501 = vst [vmem:[#allocation271_spill] sm:$0xff] %v10940_v40 }
 0x5b9   : > { %12498 = vst [vmem:[#allocation268_spill] sm:$0xff] %v10931_v14 }
 0x5bb   : > { %6221 = vmatmul.bf16.gmra.mxu0 %v8363_v48  ;;  %v7495_v48 = vor.u32 %v8922_v53, %v7494_v43  ;;  %v8150_v53 = vld [vmem:[#allocation3 + $0x578] sm:$0xf] }
 0x5be   : > { %v5369_v55 = vpop.f32.mrf.mxu3 }
 0x5bf   : > { %v10936_v34 = vadd.f32 %v5369_v55, %v10206_v33  ;;  %v10950_v33 = vld [vmem:[%s12230_s4] ss:$0 sm:$0xff]  ;;  %v9076_v55 = vld [vmem:[#allocation3 + $0x550] sm:$0xf0]  ;;  %v10957_v54 = vpop.f32.mrf.mxu0 }
 0x5c0   : > { %v5037_v25 = vadd.f32 %v10950_v33, %v10227_v12  ;;  %12504 = vst [vmem:[#allocation274_spill] sm:$0xff] %v10957_v54  ;;  %v8396_v12 = vld [vmem:[#allocation3 + $0x78c] sm:$0xf0] }
 0x5c1   : > { %12500 = vst [vmem:[#allocation270_spill] sm:$0xff] %v10936_v34  ;;  %v10962_v34 = vpop.f32.mrf.mxu1 }
 0x5c2   : > { %v5206_v52 = vadd.f32 %v10401_v8, %v5037_v25 }
 0x5c3   : > { %5927 = vmatmul.bf16.vlgmr.msra.gmra.mxu3 %v7459_v38 }
 0x5c6   : > { %v5372_v21 = vpop.f32.mrf.mxu3 }
 0x5c7   : > { %v10943_v14 = vadd.f32 %v5372_v21, %v10395_v62  ;;  %v8115_v62 = vor.u32 %v9076_v55, %v8114_v31  ;;  %v9267_v21 = vld [vmem:[%s12231_s5 + $0x8] sm:$0xff] }
 0x5c8   : > { %7108 = vmatpush.bf16.msra.mxu2 %v9267_v21  ;;  %v12506_v31 = vld [vmem:[#allocation65_spill] sm:$0xff] }
 0x5c9   : > { %12502 = vst [vmem:[#allocation272_spill] sm:$0xff] %v10943_v14  ;;  %6355 = vmatmul.bf16.gmra.mxu1 %v8115_v62  ;;  %v9143_v14 = vld [vmem:[#allocation3 + $0x76c] sm:$0xf]  ;;  %v5042_v55 = vadd.f32 %v10950_v33, %v12506_v31  ;;  %v9085_v62 = vld [vmem:[#allocation3 + $0x598] sm:$0xf0] }
 0x5ca   : > { %v8399_v8 = vor.u32 %v9143_v14, %v8396_v12  ;;  %v8151_v14 = vor.u32 %v9085_v62, %v8150_v53  ;;  %v7530_v12 = vld [vmem:[#allocation3 + $0xa8] sm:$0xf]  ;;  %v8186_v53 = vld [vmem:[#allocation3 + $0x5c0] sm:$0xf]  ;;  %v9094_v62 = vld [vmem:[#allocation3 + $0x5e0] sm:$0xf0] }
 0x5cb   : > { %v5211_v43 = vadd.f32 %v10419_v39, %v5042_v55  ;;  %v12510_v39 = vld [vmem:[#allocation123_spill] sm:$0xff] }
 0x5cc   : > { %6226 = vmatmul.bf16.gmra.mxu0 %v8399_v8  ;;  %v9152_v8 = vld [vmem:[#allocation3 + $0x7b4] sm:$0xf] }
 0x5ce   : > { %v5374_v44 = vpop.f32.mrf.mxu3 }
 0x5cf   : > { %v10955_v38 = vadd.f32 %v5374_v44, %v5206_v52  ;;  %v10969_v44 = vpop.f32.mrf.mxu0 }
 0x5d0   : > { %12507 = vst [vmem:[#allocation65_spill] sm:$0xff] %v10969_v44 }
 0x5d1   : > { %12503 = vst [vmem:[#allocation273_spill] sm:$0xff] %v10955_v38  ;;  %v10972_v38 = vpop.f32.mrf.mxu1 }
 0x5d3   : > { %5932 = vmatmul.bf16.gmra.mxu3 %v7495_v48  ;;  %v8931_v48 = vld [vmem:[#allocation3 + $0xc8] sm:$0xf0] }
 0x5d6   : > { %v5377_v25 = vpop.f32.mrf.mxu3 }
 0x5d7   : > { %v10965_v52 = vadd.f32 %v5377_v25, %v10411_v4  ;;  %v7531_v4 = vor.u32 %v8931_v48, %v7530_v12  ;;  %v8432_v25 = vld [vmem:[#allocation3 + $0x7d4] sm:$0xf0]  ;;  %v10976_v31 = vpop.f32.mrf.mxu0  ;;  %v8940_v12 = vld [vmem:[#allocation3 + $0x110] sm:$0xf0] }
 0x5d8   : > { %12509 = vst [vmem:[#allocation277_spill] sm:$0xff] %v10976_v31 }
 0x5d9   : > { %12505 = vst [vmem:[#allocation275_spill] sm:$0xff] %v10965_v52  ;;  %6360 = vmatmul.bf16.gmra.mxu1 %v8151_v14  ;;  %v8435_v52 = vor.u32 %v9152_v8, %v8432_v25  ;;  %v10978_v40 = vpop.f32.mrf.mxu1  ;;  %v8187_v8 = vor.u32 %v9094_v62, %v8186_v53  ;;  %v7566_v25 = vld [vmem:[#allocation3 + $0xf0] sm:$0xf]  ;;  %v9103_v53 = vld [vmem:[#allocation3 + $0x628] sm:$0xf0] }
 0x5dc   : > { %6231 = vmatmul.bf16.gmra.mxu0 %v8435_v52  ;;  %v9161_v52 = vld [vmem:[#allocation3 + $0x7fc] sm:$0xf] }
 0x5de   : > { %v5379_v54 = vpop.f32.mrf.mxu3 }
 0x5df   : > { %v10974_v21 = vadd.f32 %v5379_v54, %v5211_v43  ;;  %v5047_v54 = vadd.f32 %v10950_v33, %v12512_v35  ;;  %v12513_v43 = vld [vmem:[#allocation127_spill] sm:$0xff] }
 0x5e1   : > { %12508 = vst [vmem:[#allocation276_spill] sm:$0xff] %v10974_v21  ;;  %v5216_v48 = vadd.f32 %v12513_v43, %v5047_v54  ;;  %v10990_v31 = vpop.f32.mrf.mxu1 }
 0x5e3   : > { %5937 = vmatmul.bf16.gmra.mxu3 %v7531_v4  ;;  %v10986_v4 = vpop.f32.mrf.mxu0 }
 0x5e4   : > { %12514 = vst [vmem:[#allocation73_spill] sm:$0xff] %v10986_v4  ;;  %v12543_v4 = vld [vmem:[#allocation52_spill] sm:$0xff] }
 0x5e6   : > { %v5382_v44 = vpop.f32.mrf.mxu3 }
 0x5e7   : > { %v10981_v55 = vadd.f32 %v5382_v44, %v12510_v39  ;;  %v7567_v44 = vor.u32 %v8940_v12, %v7566_v25  ;;  %v8468_v39 = vld [vmem:[#allocation3 + $0x81c] sm:$0xf0]  ;;  %v7602_v25 = vld [vmem:[#allocation3 + $0x138] sm:$0xf] }
 0x5e8   : > { %v8471_v35 = vor.u32 %v9161_v52, %v8468_v39  ;;  %v9170_v52 = vld [vmem:[#allocation3 + $0x844] sm:$0xf]  ;;  %v8504_v39 = vld [vmem:[#allocation3 + $0x864] sm:$0xf0] }
 0x5e9   : > { %12511 = vst [vmem:[#allocation123_spill] sm:$0xff] %v10981_v55  ;;  %6365 = vmatmul.bf16.gmra.mxu1 %v8187_v8  ;;  %v10997_v43 = vpop.f32.mrf.mxu1 }
 0x5eb   : > { %v10995_v54 = vpop.f32.mrf.mxu0 }
 0x5ec   : > { %6236 = vmatmul.bf16.gmra.mxu0 %v8471_v35  ;;  %12517 = vst [vmem:[#allocation279_spill] sm:$0xff] %v10995_v54 }
 0x5ee   : > { %v5384_v14 = vpop.f32.mrf.mxu3 }
 0x5ef   : > { %v10988_v21 = vadd.f32 %v5384_v14, %v5216_v48  ;;  %v8222_v48 = vld [vmem:[#allocation3 + $0x608] sm:$0xf]  ;;  %v8949_v14 = vld [vmem:[#allocation3 + $0x158] sm:$0xf0] }
 0x5f0   : > { %v8223_v8 = vor.u32 %v9103_v53, %v8222_v48  ;;  %v9112_v48 = vld [vmem:[#allocation3 + $0x670] sm:$0xf0] }
 0x5f1   : > { %12515 = vst [vmem:[#allocation127_spill] sm:$0xff] %v10988_v21  ;;  %v11006_v35 = vpop.f32.mrf.mxu1 }
 0x5f3   : > { %5942 = vmatmul.bf16.gmra.mxu3 %v7567_v44  ;;  %v7603_v44 = vor.u32 %v8949_v14, %v7602_v25 }
 0x5f6   : > { %v5387_v55 = vpop.f32.mrf.mxu3 }
 0x5f7   : > { %v10993_v10 = vadd.f32 %v5387_v55, %v10454_v42  ;;  %v11002_v42 = vpop.f32.mrf.mxu2  ;;  %v11004_v55 = vpop.f32.mrf.mxu0 }
 0x5f8   : > { %12519 = vst [vmem:[#allocation281_spill] sm:$0xff] %v11002_v42 }
 0x5f9   : > { %12516 = vst [vmem:[#allocation278_spill] sm:$0xff] %v10993_v10  ;;  %6370 = vmatmul.bf16.gmra.mxu1 %v8223_v8  ;;  %v8507_v10 = vor.u32 %v9170_v52, %v8504_v39  ;;  %v8958_v8 = vld [vmem:[#allocation3 + $0x1a0] sm:$0xf0]  ;;  %v11015_v25 = vpop.f32.mrf.mxu1  ;;  %v7638_v52 = vld [vmem:[#allocation3 + $0x180] sm:$0xf] }
 0x5fa   : > { %12520 = vst [vmem:[#allocation282_spill] sm:$0xff] %v11004_v55  ;;  %v7639_v39 = vor.u32 %v8958_v8, %v7638_v52  ;;  %v8967_v8 = vld [vmem:[#allocation3 + $0x1e8] sm:$0xf0] }
 0x5fc   : > { %6241 = vmatmul.bf16.gmra.mxu0 %v8507_v10  ;;  %v9179_v10 = vld [vmem:[#allocation3 + $0x88c] sm:$0xf] }
 0x5fe   : > { %v5389_v62 = vpop.f32.mrf.mxu3 }
 0x5ff   : > { %v11000_v12 = vadd.f32 %v5389_v62, %v10464_v47  ;;  %v8258_v47 = vld [vmem:[#allocation3 + $0x650] sm:$0xf]  ;;  %v11011_v53 = vpop.f32.mrf.mxu2  ;;  %v11013_v62 = vpop.f32.mrf.mxu0 }
 0x600   : > { %12522 = vst [vmem:[#allocation284_spill] sm:$0xff] %v11011_v53 }
 0x601   : > { %12518 = vst [vmem:[#allocation280_spill] sm:$0xff] %v11000_v12  ;;  %v8259_v12 = vor.u32 %v9112_v48, %v8258_v47  ;;  %v11030_v47 = vpop.f32.mrf.mxu1  ;;  %v9121_v48 = vld [vmem:[#allocation3 + $0x6b8] sm:$0xf0] }
 0x602   : > { %12523 = vst [vmem:[#allocation285_spill] sm:$0xff] %v11013_v62 }
 0x603   : > { %5947 = vmatmul.bf16.gmra.mxu3 %v7603_v44 }
 0x606   : > { %v5392_v21 = vpop.f32.mrf.mxu3 }
 0x607   : > { %v11009_v54 = vadd.f32 %v5392_v21, %v10474_v41  ;;  %v9266_v41 = vld [vmem:[%s12231_s5] sm:$0xff]  ;;  %v8540_v21 = vld [vmem:[#allocation3 + $0x8ac] sm:$0xf0]  ;;  %v11023_v42 = vpop.f32.mrf.mxu2  ;;  %v11025_v62 = vpop.f32.mrf.mxu0 }
 0x608   : > { %7109 = vmatpush.bf16.msra.mxu2 %v9266_v41  ;;  %12525 = vst [vmem:[#allocation287_spill] sm:$0xff] %v11023_v42  ;;  %v7674_v41 = vld [vmem:[#allocation3 + $0x1c8] sm:$0xf]  ;;  %v9130_v42 = vld [vmem:[#allocation3 + $0x700] sm:$0xf0] }
 0x609   : > { %12521 = vst [vmem:[#allocation283_spill] sm:$0xff] %v11009_v54  ;;  %6375 = vmatmul.bf16.gmra.mxu1 %v8259_v12  ;;  %v8543_v54 = vor.u32 %v9179_v10, %v8540_v21  ;;  %v8294_v12 = vld [vmem:[#allocation3 + $0x698] sm:$0xf]  ;;  %v7675_v21 = vor.u32 %v8967_v8, %v7674_v41  ;;  %v7710_v8 = vld [vmem:[#allocation3 + $0x210] sm:$0xf] }
 0x60a   : > { %12526 = vst [vmem:[#allocation288_spill] sm:$0xff] %v11025_v62 }
 0x60c   : > { %6246 = vmatmul.bf16.gmra.mxu0 %v8543_v54 }
 0x60e   : > { %v5394_v14 = vpop.f32.mrf.mxu3 }
 0x60f   : > { %v11018_v44 = vadd.f32 %v5394_v14, %v10484_v15  ;;  %v11035_v10 = vpop.f32.mrf.mxu2 }
 0x610   : > { %12529 = vst [vmem:[#allocation291_spill] sm:$0xff] %v11035_v10  ;;  %v9139_v10 = vld [vmem:[#allocation3 + $0x748] sm:$0xf0] }
 0x611   : > { %12524 = vst [vmem:[#allocation286_spill] sm:$0xff] %v11018_v44  ;;  %v11037_v44 = vpop.f32.mrf.mxu1 }
 0x613   : > { %5952 = vmatmul.bf16.gmra.mxu3 %v7639_v39  ;;  %v8295_v39 = vor.u32 %v9121_v48, %v8294_v12  ;;  %v8976_v12 = vld [vmem:[#allocation3 + $0x230] sm:$0xf0] }
 0x616   : > { %v5397_v53 = vpop.f32.mrf.mxu3 }
 0x617   : > { %v11028_v15 = vadd.f32 %v5397_v53, %v10500_v56  ;;  %v11042_v53 = vpop.f32.mrf.mxu2 }
 0x618   : > { %12531 = vst [vmem:[#allocation293_spill] sm:$0xff] %v11042_v53  ;;  %v8366_v53 = vld [vmem:[#allocation3 + $0x728] sm:$0xf] }
 0x619   : > { %12527 = vst [vmem:[#allocation289_spill] sm:$0xff] %v11028_v15  ;;  %6380 = vmatmul.bf16.gmra.mxu1 %v8295_v39  ;;  %v8330_v15 = vld [vmem:[#allocation3 + $0x6e0] sm:$0xf]  ;;  %v11044_v62 = vpop.f32.mrf.mxu1  ;;  %v7711_v39 = vor.u32 %v8976_v12, %v7710_v8  ;;  %v12538_v12 = vld [vmem:[#allocation5_spill] sm:$0xff] }
 0x61e   : > { %v5399_v14 = vpop.f32.mrf.mxu3 }
 0x61f   : > { %v11033_v52 = vadd.f32 %v5399_v14, %v10514_v9  ;;  %v8331_v14 = vor.u32 %v9130_v42, %v8330_v15  ;;  %v11049_v41 = vpop.f32.mrf.mxu2 }
 0x620   : > { %12533 = vst [vmem:[#allocation295_spill] sm:$0xff] %v11049_v41  ;;  %v12541_v41 = vld [vmem:[#allocation53_spill] sm:$0xff] }
 0x621   : > { %12528 = vst [vmem:[#allocation290_spill] sm:$0xff] %v11033_v52 }
 0x623   : > { %5957 = vmatmul.bf16.gmra.mxu3 %v7675_v21  ;;  %v11051_v21 = vpop.f32.mrf.mxu1 }
 0x624   : > { %12534 = vst [vmem:[#allocation296_spill] sm:$0xff] %v11051_v21 }
 0x626   : > { %v5402_v56 = vpop.f32.mrf.mxu3 }
 0x627   : > { %v11040_v54 = vadd.f32 %v5402_v56, %v10533_v2  ;;  %v11061_v8 = vpop.f32.mrf.mxu2 }
 0x629   : > { %12530 = vst [vmem:[#allocation292_spill] sm:$0xff] %v11040_v54  ;;  %6385 = vmatmul.bf16.gmra.mxu1 %v8331_v14  ;;  %v12536_v54 = vld [vmem:[#allocation4_spill] sm:$0xff] }
 0x62a   : > { %v4917_v52 = vadd.f32 %v10950_v33, %v12536_v54  ;;  %12539 = vst [vmem:[#allocation4_spill] sm:$0xff] %v11061_v8 }
 0x62c   : > { %v5086_v14 = vadd.f32 %v12538_v12, %v4917_v52 }
 0x62e   : > { %v5404_v9 = vpop.f32.mrf.mxu3 }
 0x62f   : > { %v11047_v48 = vadd.f32 %v5404_v9, %v10546_v19  ;;  %v12537_v19 = vld [vmem:[#allocation36_spill] sm:$0xff]  ;;  %v8985_v9 = vld [vmem:[#allocation3 + $0x278] sm:$0xf0]  ;;  %v11072_v21 = vpop.f32.mrf.mxu2 }
 0x630   : > { %v5422_v42 = vadd.f32 %v12537_v19, %v10573_v22  ;;  %v12542_v22 = vld [vmem:[#allocation37_spill] sm:$0xff]  ;;  %12544 = vst [vmem:[#allocation5_spill] sm:$0xff] %v11072_v21 }
 0x631   : > { %12532 = vst [vmem:[#allocation294_spill] sm:$0xff] %v11047_v48  ;;  %v8367_v48 = vor.u32 %v9139_v10, %v8366_v53  ;;  %v12545_v10 = vld [vmem:[#allocation56_spill] sm:$0xff] }
 0x632   : > { %v5591_v55 = vadd.f32 %v12541_v41, %v5422_v42  ;;  %v8402_v41 = vld [vmem:[#allocation3 + $0x770] sm:$0xf]  ;;  %v9148_v42 = vld [vmem:[#allocation3 + $0x790] sm:$0xf0] }
 0x633   : > { %5962 = vmatmul.bf16.gmra.mxu3 %v7711_v39 }
 0x634   : > { %v5760_v52 = vadd.f32 %v12543_v4, %v5591_v55  ;;  %v12547_v4 = vld [vmem:[#allocation38_spill] sm:$0xff] }
 0x635   : > { %v5427_v55 = vadd.f32 %v12547_v4, %v10593_v29  ;;  %v12550_v4 = vld [vmem:[#allocation59_spill] sm:$0xff] }
 0x636   : > { %v5407_v2 = vpop.f32.mrf.mxu3 }
 0x637   : > { %v11054_v56 = vadd.f32 %v5407_v2, %v10556_v63  ;;  %v7746_v63 = vld [vmem:[#allocation3 + $0x258] sm:$0xf]  ;;  %v5255_v2 = vadd.f32 %v10581_v51, %v5086_v14  ;;  %v12546_v51 = vld [vmem:[#allocation6_spill] sm:$0xff]  ;;  %v11093_v21 = vpop.f32.mrf.mxu2 }
 0x638   : > { %v7747_v54 = vor.u32 %v8985_v9, %v7746_v63  ;;  %v12548_v63 = vld [vmem:[#allocation55_spill] sm:$0xff] }
 0x639   : > { %12535 = vst [vmem:[#allocation297_spill] sm:$0xff] %v11054_v56  ;;  %v11067_v56 = vpop.f32.mrf.mxu1  ;;  %6390 = vmatmul.bf16.gmra.mxu1 %v8367_v48  ;;  %v5424_v19 = vadd.f32 %v12542_v22, %v5255_v2 }
 0x63b   : > { %v5593_v53 = vadd.f32 %v12545_v10, %v5424_v19 }
 0x63e   : > { %v5409_v15 = vpop.f32.mrf.mxu3 }
 0x63f   : > { %v11064_v39 = vadd.f32 %v5409_v15, %v10566_v28  ;;  %v4922_v15 = vadd.f32 %v10950_v33, %v12546_v51 }
 0x641   : > { %12540 = vst [vmem:[#allocation36_spill] sm:$0xff] %v11064_v39  ;;  %v11078_v9 = vpop.f32.mrf.mxu1  ;;  %v5596_v39 = vadd.f32 %v12550_v4, %v5427_v55 }
 0x643   : > { %5967 = vmatmul.bf16.gmra.mxu3 %v7747_v54  ;;  %v12549_v54 = vld [vmem:[#allocation7_spill] sm:$0xff] }
 0x644   : > { %v5091_v22 = vadd.f32 %v12549_v54, %v4922_v15 }
 0x646   : > { %v5928_v12 = vpop.f32.mrf.mxu3  ;;  %v5260_v10 = vadd.f32 %v10601_v59, %v5091_v22  ;;  %v12553_v22 = vld [vmem:[#allocation62_spill] sm:$0xff] }
 0x647   : > { %v5929_v8 = vadd.f32 %v5928_v12, %v5760_v52  ;;  %v7782_v12 = vld [vmem:[#allocation3 + $0x2a0] sm:$0xf] }
 0x649   : > { %v6098_v28 = vadd.f32 %v10704_v24, %v5929_v8  ;;  %v5762_v24 = vadd.f32 %v12548_v63, %v5593_v53  ;;  %v8994_v8 = vld [vmem:[#allocation3 + $0x2c0] sm:$0xf0] }
 0x64b   : > { %v11081_v48 = vadd.f32 %v10814_v61, %v6098_v28  ;;  %v8403_v61 = vor.u32 %v9148_v42, %v8402_v41  ;;  %v7783_v28 = vor.u32 %v8994_v8, %v7782_v12  ;;  %v11100_v41 = vpop.f32.mrf.mxu1 }
 0x64d   : > { %v6426_v14 = vmul.f32 %v11081_v48, %v11081_v48  ;;  %6395 = vmatmul.bf16.gmra.mxu1 %v8403_v61 }
 0x64e   : > { %v5930_v2 = vpop.f32.mrf.mxu3 }
 0x64f   : > { %v6490_v19 = vmul.f32 %v6426_v14, %v11081_v48  ;;  %v5931_v52 = vadd.f32 %v5930_v2, %v5762_v24  ;;  %v12551_v14 = vld [vmem:[#allocation39_spill] sm:$0xff] }
 0x650   : > { %v5429_v63 = vadd.f32 %v12551_v14, %v5260_v10  ;;  %v8438_v10 = vld [vmem:[#allocation3 + $0x7b8] sm:$0xf] }
 0x651   : > { %v6554_v51 = vmul.f32 0.044715, %v6490_v19  ;;  %v6100_v29 = vadd.f32 %v10711_v27, %v5931_v52  ;;  %v12552_v27 = vld [vmem:[#allocation58_spill] sm:$0xff]  ;;  %v12554_v52 = vld [vmem:[#allocation8_spill] sm:$0xff] }
 0x652   : > { %v5765_v24 = vadd.f32 %v12552_v27, %v5596_v39  ;;  %v5598_v19 = vadd.f32 %v12553_v22, %v5429_v63  ;;  %v4927_v12 = vadd.f32 %v10950_v33, %v12554_v52  ;;  %v9157_v39 = vld [vmem:[#allocation3 + $0x7d8] sm:$0xf0]  ;;  %v12557_v63 = vld [vmem:[#allocation61_spill] sm:$0xff] }
 0x653   : > { %v6618_v53 = vadd.f32 %v6554_v51, %v11081_v48  ;;  %v11097_v15 = vadd.f32 %v10821_v58, %v6100_v29  ;;  %5972 = vmatmul.bf16.gmra.mxu3 %v7783_v28  ;;  %v12555_v51 = vld [vmem:[#allocation170_spill] sm:$0xff]  ;;  %v12556_v29 = vld [vmem:[#allocation40_spill] sm:$0xff]  ;;  %v12558_v27 = vld [vmem:[#allocation9_spill] sm:$0xff]  ;;  %v8439_v22 = vor.u32 %v9157_v39, %v8438_v10 }
 0x654   : > { %v5432_v4 = vadd.f32 %v12556_v29, %v12555_v51 }
 0x655   : > { %v6682_v42 = vmul.f32 0.7978846, %v6618_v53  ;;  %v6427_v59 = vmul.f32 %v11097_v15, %v11097_v15  ;;  %v11116_v53 = vpop.f32.mrf.mxu2 }
 0x656   : > { %v5933_v55 = vpop.f32.mrf.mxu3 }
 0x657   : > { %v6491_v8 = vmul.f32 %v6427_v59, %v11097_v15  ;;  %v5934_v2 = vadd.f32 %v5933_v55, %v5765_v24  ;;  %9303 = vtanh.f32 %v6682_v42  ;;  %v5767_v42 = vadd.f32 %v12557_v63, %v5598_v19  ;;  %v9003_v59 = vld [vmem:[#allocation3 + $0x308] sm:$0xf0]  ;;  %v12559_v19 = vld [vmem:[#allocation66_spill] sm:$0xff] }
 0x658   : > { %v5096_v24 = vadd.f32 %v12558_v27, %v4927_v12  ;;  %v5601_v63 = vadd.f32 %v12559_v19, %v5432_v4 }
 0x659   : > { %v6555_v54 = vmul.f32 0.044715, %v6491_v8  ;;  %v6103_v58 = vadd.f32 %v10717_v20, %v5934_v2 }
 0x65b   : > { %v6619_v61 = vadd.f32 %v6555_v54, %v11097_v15  ;;  %v11112_v28 = vadd.f32 %v10827_v3, %v6103_v58  ;;  %v11122_v3 = vpop.f32.mrf.mxu1  ;;  %v7818_v58 = vld [vmem:[#allocation3 + $0x2e8] sm:$0xf] }
 0x65c   : > { %v7819_v52 = vor.u32 %v9003_v59, %v7818_v58 }
 0x65d   : > { %v6683_v14 = vmul.f32 0.7978846, %v6619_v61  ;;  %v6428_v20 = vmul.f32 %v11112_v28, %v11112_v28  ;;  %v9304_v8 = vpop.eup %9303  ;;  %v5265_v61 = vadd.f32 %v10622_v37, %v5096_v24  ;;  %6400 = vmatmul.bf16.gmra.mxu1 %v8439_v22  ;;  %v12561_v37 = vld [vmem:[#allocation64_spill] sm:$0xff] }
 0x65e   : > { %v5935_v55 = vpop.f32.mrf.mxu3  ;;  %v6810_v12 = vadd.f32 1.0, %v9304_v8  ;;  %v5770_v39 = vadd.f32 %v12561_v37, %v5601_v63  ;;  %v9166_v37 = vld [vmem:[#allocation3 + $0x820] sm:$0xf0] }
 0x65f   : > { %9305 = vtanh.f32 %v6683_v14  ;;  %v6492_v2 = vmul.f32 %v6428_v20, %v11112_v28  ;;  %v5936_v54 = vadd.f32 %v5935_v55, %v5767_v42  ;;  %v12560_v42 = vld [vmem:[#allocation41_spill] sm:$0xff] }
 0x660   : > { %v5434_v55 = vadd.f32 %v12560_v42, %v5265_v61 }
 0x661   : > { %v6556_v51 = vmul.f32 0.044715, %v6492_v2  ;;  %v6105_v29 = vadd.f32 %v10724_v49, %v5936_v54  ;;  %v6874_v49 = vmul.f32 0.5, %v6810_v12  ;;  %v11136_v2 = vpop.f32.mrf.mxu2 }
 0x663   : > { %v11129_v27 = vadd.f32 %v10834_v7, %v6105_v29  ;;  %5977 = vmatmul.bf16.gmra.mxu3 %v7819_v52  ;;  %v6620_v14 = vadd.f32 %v6556_v51, %v11112_v28  ;;  %v11139_v58 = vpop.f32.mrf.mxu1  ;;  %v12562_v52 = vld [vmem:[#allocation69_spill] sm:$0xff]  ;;  %v12563_v29 = vld [vmem:[#allocation10_spill] sm:$0xff]  ;;  %v6938_v63 = vmul.f32 %v6874_v49, %v11081_v48  ;;  %v12567_v49 = vld [vmem:[#allocation11_spill] sm:$0xff] }
 0x664   : > { %v5603_v61 = vadd.f32 %v12562_v52, %v5434_v55  ;;  %v4932_v19 = vadd.f32 %v10950_v33, %v12563_v29  ;;  %v7854_v52 = vld [vmem:[#allocation3 + $0x330] sm:$0xf] }
 0x665   : > { %v9306_v20 = vpop.eup %9305  ;;  %v6429_v10 = vmul.f32 %v11129_v27, %v11129_v27  ;;  %v6684_v59 = vmul.f32 0.7978846, %v6620_v14 }
 0x666   : > { %v6811_v24 = vadd.f32 1.0, %v9306_v20  ;;  %v5938_v4 = vpop.f32.mrf.mxu3 }
 0x667   : > { %v5939_v8 = vadd.f32 %v5938_v4, %v5770_v39  ;;  %v6493_v7 = vmul.f32 %v6429_v10, %v11129_v27  ;;  %9307 = vtanh.f32 %v6684_v59  ;;  %v8474_v10 = vld [vmem:[#allocation3 + $0x800] sm:$0xf]  ;;  %v12565_v39 = vld [vmem:[#allocation42_spill] sm:$0xff] }
 0x668   : > { %v6875_v54 = vmul.f32 0.5, %v6811_v24  ;;  %v12566_v24 = vld [vmem:[#allocation68_spill] sm:$0xff] }
 0x669   : > { %v6108_v22 = vadd.f32 %v10733_v36, %v5939_v8  ;;  %v6557_v51 = vmul.f32 0.044715, %v6493_v7  ;;  %v12564_v36 = vld [vmem:[#allocation176_spill] sm:$0xff]  ;;  %v5772_v4 = vadd.f32 %v12566_v24, %v5603_v61  ;;  %v9012_v8 = vld [vmem:[#allocation3 + $0x350] sm:$0xf0]  ;;  %v12568_v61 = vld [vmem:[#allocation211_spill] sm:$0xff] }
 0x66a   : > { %v6939_v12 = vmul.f32 %v6875_v54, %v11097_v15  ;;  %v5437_v55 = vadd.f32 %v12565_v39, %v12564_v36  ;;  %v5101_v15 = vadd.f32 %v12567_v49, %v4932_v19  ;;  %v7855_v29 = vor.u32 %v9012_v8, %v7854_v52 }
 0x66b   : > { %v11148_v14 = vadd.f32 %v10841_v0, %v6108_v22  ;;  %v6621_v20 = vadd.f32 %v6557_v51, %v11129_v27  ;;  %v8475_v51 = vor.u32 %v9166_v37, %v8474_v10 }
 0x66c   : > { %v7002_v42 = vpack.c.bf16 %v6939_v12, %v6938_v63  ;;  %v5270_v63 = vadd.f32 %v10639_v30, %v5101_v15  ;;  %v11159_v12 = vpop.f32.mrf.mxu2 }
 0x66d   : > { %v6430_v59 = vmul.f32 %v11148_v14, %v11148_v14  ;;  %v6685_v48 = vmul.f32 0.7978846, %v6621_v20  ;;  %v9308_v0 = vpop.eup %9307  ;;  %v12569_v20 = vld [vmem:[#allocation72_spill] sm:$0xff]  ;;  %6405 = vmatmul.bf16.gmra.mxu1 %v8475_v51 }
 0x66e   : > { %v5940_v7 = vpop.f32.mrf.mxu3  ;;  %7110 = vmatmul.bf16.vlgmr.msra.gmra.mxu2 %v7002_v42  ;;  %v5606_v24 = vadd.f32 %v12569_v20, %v5437_v55  ;;  %v6812_v19 = vadd.f32 1.0, %v9308_v0  ;;  %v11163_v42 = vpop.f32.mrf.mxu1  ;;  %v12572_v51 = vld [vmem:[#allocation76_spill] sm:$0xff] }
 0x66f   : > { %v6494_v54 = vmul.f32 %v6430_v59, %v11148_v14  ;;  %v5941_v22 = vadd.f32 %v5940_v7, %v5772_v4  ;;  %9309 = vtanh.f32 %v6685_v48  ;;  %v12570_v4 = vld [vmem:[#allocation43_spill] sm:$0xff] }
 0x670   : > { %v5439_v30 = vadd.f32 %v12570_v4, %v5270_v63  ;;  %v12571_v48 = vld [vmem:[#allocation71_spill] sm:$0xff]  ;;  %v6876_v0 = vmul.f32 0.5, %v6812_v19  ;;  %v12573_v63 = vld [vmem:[#allocation12_spill] sm:$0xff]  ;;  %v9175_v4 = vld [vmem:[#allocation3 + $0x868] sm:$0xf0] }
 0x671   : > { %v6558_v36 = vmul.f32 0.044715, %v6494_v54  ;;  %v6110_v39 = vadd.f32 %v12568_v61, %v5941_v22  ;;  %v5775_v49 = vadd.f32 %v12571_v48, %v5606_v24  ;;  %v4937_v61 = vadd.f32 %v10950_v33, %v12573_v63 }
 0x673   : > { %v11166_v59 = vadd.f32 %v10849_v26, %v6110_v39  ;;  %5982 = vmatmul.bf16.gmra.mxu3 %v7855_v29  ;;  %v6622_v10 = vadd.f32 %v6558_v36, %v11148_v14  ;;  %v5608_v29 = vadd.f32 %v12572_v51, %v5439_v30  ;;  %v6940_v39 = vmul.f32 %v6876_v0, %v11112_v28  ;;  %v12574_v30 = vld [vmem:[#allocation183_spill] sm:$0xff]  ;;  %v12577_v0 = vld [vmem:[#allocation13_spill] sm:$0xff] }
 0x674   : > { %v11180_v24 = vpop.f32.mrf.mxu2  ;;  %v7890_v51 = vld [vmem:[#allocation3 + $0x378] sm:$0xf] }
 0x675   : > { %v9310_v37 = vpop.eup %9309  ;;  %v6431_v8 = vmul.f32 %v11166_v59, %v11166_v59  ;;  %v6686_v15 = vmul.f32 0.7978846, %v6622_v10 }
 0x676   : > { %v5943_v55 = vpop.f32.mrf.mxu3  ;;  %v6813_v7 = vadd.f32 1.0, %v9310_v37 }
 0x677   : > { %v5944_v54 = vadd.f32 %v5943_v55, %v5775_v49  ;;  %v6495_v22 = vmul.f32 %v6431_v8, %v11166_v59  ;;  %9311 = vtanh.f32 %v6686_v15  ;;  %v12575_v8 = vld [vmem:[#allocation44_spill] sm:$0xff]  ;;  %v11188_v49 = vpop.f32.mrf.mxu1  ;;  %v12576_v15 = vld [vmem:[#allocation75_spill] sm:$0xff] }
 0x678   : > { %v6877_v26 = vmul.f32 0.5, %v6813_v7  ;;  %v5442_v48 = vadd.f32 %v12575_v8, %v12574_v30  ;;  %v9021_v55 = vld [vmem:[#allocation3 + $0x398] sm:$0xf0] }
 0x679   : > { %v6113_v52 = vadd.f32 %v10749_v18, %v5944_v54  ;;  %v6559_v36 = vmul.f32 0.044715, %v6495_v22  ;;  %v8510_v18 = vld [vmem:[#allocation3 + $0x848] sm:$0xf]  ;;  %v7891_v63 = vor.u32 %v9021_v55, %v7890_v51  ;;  %v12581_v55 = vld [vmem:[#allocation78_spill] sm:$0xff] }
 0x67a   : > { %v6941_v20 = vmul.f32 %v6877_v26, %v11129_v27  ;;  %v5777_v27 = vadd.f32 %v12576_v15, %v5608_v29  ;;  %v12579_v29 = vld [vmem:[#allocation79_spill] sm:$0xff]  ;;  %v12582_v51 = vld [vmem:[#allocation218_spill] sm:$0xff] }
 0x67b   : > { %v11183_v19 = vadd.f32 %v10856_v17, %v6113_v52  ;;  %v6623_v10 = vadd.f32 %v6559_v36, %v11166_v59  ;;  %v5106_v17 = vadd.f32 %v12577_v0, %v4937_v61  ;;  %v8511_v36 = vor.u32 %v9175_v4, %v8510_v18 }
 0x67c   : > { %v7003_v37 = vpack.c.bf16 %v6941_v20, %v6940_v39  ;;  %v12578_v39 = vld [vmem:[#allocation187_spill] sm:$0xff]  ;;  %v5611_v15 = vadd.f32 %v12579_v29, %v5442_v48  ;;  %v11203_v18 = vpop.f32.mrf.mxu2 }
 0x67d   : > { %v6432_v28 = vmul.f32 %v11183_v19, %v11183_v19  ;;  %v6687_v7 = vmul.f32 0.7978846, %v6623_v10  ;;  %v9312_v22 = vpop.eup %9311  ;;  %v5275_v20 = vadd.f32 %v12578_v39, %v5106_v17  ;;  %6410 = vmatmul.bf16.gmra.mxu1 %v8511_v36 }
 0x67e   : > { %v5945_v54 = vpop.f32.mrf.mxu3  ;;  %7115 = vmatmul.bf16.gmra.mxu2 %v7003_v37  ;;  %v6814_v10 = vadd.f32 1.0, %v9312_v22 }
 0x67f   : > { %v6496_v26 = vmul.f32 %v6432_v28, %v11183_v19  ;;  %v5946_v52 = vadd.f32 %v5945_v54, %v5777_v27  ;;  %9313 = vtanh.f32 %v6687_v7  ;;  %v12580_v27 = vld [vmem:[#allocation45_spill] sm:$0xff]  ;;  %v11208_v22 = vpop.f32.mrf.mxu1 }
 0x680   : > { %v5444_v7 = vadd.f32 %v12580_v27, %v5275_v20  ;;  %v6878_v54 = vmul.f32 0.5, %v6814_v10  ;;  %v12586_v27 = vld [vmem:[#allocation46_spill] sm:$0xff] }
 0x681   : > { %v6560_v30 = vmul.f32 0.044715, %v6496_v26  ;;  %v6115_v8 = vadd.f32 %v10756_v23, %v5946_v52  ;;  %v5780_v23 = vadd.f32 %v12581_v55, %v5611_v15 }
 0x682   : > { %v6942_v29 = vmul.f32 %v6878_v54, %v11148_v14  ;;  %v12588_v14 = vld [vmem:[#allocation15_spill] sm:$0xff] }
 0x683   : > { %v11199_v61 = vadd.f32 %v10866_v13, %v6115_v8  ;;  %5987 = vmatmul.bf16.gmra.mxu3 %v7891_v63  ;;  %v6624_v37 = vadd.f32 %v6560_v30, %v11183_v19  ;;  %v12583_v63 = vld [vmem:[#allocation82_spill] sm:$0xff] }
 0x684   : > { %v5613_v39 = vadd.f32 %v12583_v63, %v5444_v7  ;;  %v12584_v30 = vld [vmem:[#allocation14_spill] sm:$0xff] }
 0x685   : > { %v9314_v28 = vpop.eup %9313  ;;  %v6433_v4 = vmul.f32 %v11199_v61, %v11199_v61  ;;  %v6688_v0 = vmul.f32 0.7978846, %v6624_v37  ;;  %v4942_v8 = vadd.f32 %v10950_v33, %v12584_v30  ;;  %v9184_v7 = vld [vmem:[#allocation3 + $0x8b0] sm:$0xf0]  ;;  %v12589_v30 = vld [vmem:[#allocation85_spill] sm:$0xff] }
 0x686   : > { %v5948_v48 = vpop.f32.mrf.mxu3  ;;  %v6815_v17 = vadd.f32 1.0, %v9314_v28  ;;  %v12585_v28 = vld [vmem:[#allocation190_spill] sm:$0xff] }
 0x687   : > { %v5949_v13 = vadd.f32 %v5948_v48, %v5780_v23  ;;  %v6497_v26 = vmul.f32 %v6433_v4, %v11199_v61  ;;  %9315 = vtanh.f32 %v6688_v0  ;;  %v5447_v4 = vadd.f32 %v12586_v27, %v12585_v28  ;;  %v8546_v23 = vld [vmem:[#allocation3 + $0x890] sm:$0xf]  ;;  %v12587_v48 = vld [vmem:[#allocation81_spill] sm:$0xff] }
 0x688   : > { %v6879_v52 = vmul.f32 0.5, %v6815_v17  ;;  %v5782_v17 = vadd.f32 %v12587_v48, %v5613_v39  ;;  %v5111_v54 = vadd.f32 %v12588_v14, %v4942_v8  ;;  %v8547_v63 = vor.u32 %v9184_v7, %v8546_v23  ;;  %v11232_v39 = vpop.f32.mrf.mxu1  ;;  %v12591_v23 = vld [vmem:[#allocation84_spill] sm:$0xff] }
 0x689   : > { %v6118_v36 = vadd.f32 %v12582_v51, %v5949_v13  ;;  %v6561_v20 = vmul.f32 0.044715, %v6497_v26 }
 0x68a   : > { %v6943_v15 = vmul.f32 %v6879_v52, %v11166_v59  ;;  %v11227_v52 = vpop.f32.mrf.mxu2 }
 0x68b   : > { %v11218_v10 = vadd.f32 %v10873_v57, %v6118_v36  ;;  %v6625_v37 = vadd.f32 %v6561_v20, %v11199_v61  ;;  %v9030_v57 = vld [vmem:[#allocation3 + $0x3e0] sm:$0xf0]  ;;  %v7926_v20 = vld [vmem:[#allocation3 + $0x3c0] sm:$0xf] }
 0x68c   : > { %v7004_v55 = vpack.c.bf16 %v6943_v15, %v6942_v29  ;;  %v5616_v29 = vadd.f32 %v12589_v30, %v5447_v4  ;;  %v12590_v15 = vld [vmem:[#allocation193_spill] sm:$0xff]  ;;  %v7927_v27 = vor.u32 %v9030_v57, %v7926_v20  ;;  %v12592_v4 = vld [vmem:[#allocation47_spill] sm:$0xff] }
 0x68d   : > { %v6434_v0 = vmul.f32 %v11218_v10, %v11218_v10  ;;  %v6689_v13 = vmul.f32 0.7978846, %v6625_v37  ;;  %v9316_v26 = vpop.eup %9315  ;;  %v5280_v28 = vadd.f32 %v12590_v15, %v5111_v54  ;;  %6415 = vmatmul.bf16.gmra.mxu1 %v8547_v63  ;;  %v12593_v15 = vld [vmem:[#allocation225_spill] sm:$0xff] }
 0x68e   : > { %v5950_v59 = vpop.f32.mrf.mxu3  ;;  %7120 = vmatmul.bf16.gmra.mxu2 %v7004_v55  ;;  %v6816_v55 = vadd.f32 1.0, %v9316_v26  ;;  %v5785_v7 = vadd.f32 %v12591_v23, %v5616_v29 }
 0x68f   : > { %v6498_v51 = vmul.f32 %v6434_v0, %v11218_v10  ;;  %v5951_v36 = vadd.f32 %v5950_v59, %v5782_v17  ;;  %9317 = vtanh.f32 %v6689_v13  ;;  %v5449_v13 = vadd.f32 %v12592_v4, %v5280_v28  ;;  %v1987_v59 = vld [vmem:[#allocation2 + $0x198] sm:$0xff] }
 0x691   : > { %v6562_v37 = vmul.f32 0.044715, %v6498_v51  ;;  %v6120_v8 = vadd.f32 %v10771_v32, %v5951_v36  ;;  %v9447_v32 = vld [vmem:[#allocation2 + $0x8] sm:$0xff]  ;;  %v6880_v36 = vmul.f32 0.5, %v6816_v55  ;;  %v12595_v55 = vld [vmem:[#allocation16_spill] sm:$0xff] }
 0x692   : > { %v2052_v57 = vpack.c.bf16 %v9447_v32, %v9447_v32  ;;  %v11244_v29 = vpop.f32.mrf.mxu2  ;;  %v12597_v32 = vld [vmem:[#allocation48_spill] sm:$0xff] }
 0x693   : > { %v11236_v48 = vadd.f32 %v10880_v16, %v6120_v8  ;;  %5992 = vmatmul.bf16.gmra.mxu3 %v7927_v27  ;;  %v6626_v0 = vadd.f32 %v6562_v37, %v11218_v10  ;;  %v2051_v16 = vpack.c.bf16 %v1987_v59, %v1987_v59  ;;  %v12594_v37 = vld [vmem:[#allocation88_spill] sm:$0xff] }
 0x694   : > { %2116 = vst [vmem:[#allocation3 + $0x474] sm:$0xf] %v2052_v57  ;;  %v5618_v8 = vadd.f32 %v12594_v37, %v5449_v13  ;;  %v12596_v59 = vld [vmem:[#allocation196_spill] sm:$0xff] }
 0x695   : > { %v9318_v17 = vpop.eup %9317  ;;  %v6435_v14 = vmul.f32 %v11236_v48, %v11236_v48  ;;  %v6690_v54 = vmul.f32 0.7978846, %v6626_v0  ;;  %2115 = vst [vmem:[#allocation3 + $0x450] sm:$0xf] %v2051_v16  ;;  %v6944_v0 = vmul.f32 %v6880_v36, %v11183_v19  ;;  %v5452_v57 = vadd.f32 %v12597_v32, %v12596_v59  ;;  %v9039_v19 = vld [vmem:[#allocation3 + $0x428] sm:$0xf0] }
 0x696   : > { %v5953_v51 = vpop.f32.mrf.mxu3  ;;  %v6817_v26 = vadd.f32 1.0, %v9318_v17  ;;  %v12599_v16 = vld [vmem:[#allocation17_spill] sm:$0xff] }
 0x697   : > { %v5954_v63 = vadd.f32 %v5953_v51, %v5785_v7  ;;  %v6499_v20 = vmul.f32 %v6435_v14, %v11236_v48  ;;  %9319 = vtanh.f32 %v6690_v54  ;;  %v4947_v7 = vadd.f32 %v10950_v33, %v12595_v55  ;;  %v12598_v54 = vld [vmem:[#allocation87_spill] sm:$0xff] }
 0x698   : > { %v6881_v30 = vmul.f32 0.5, %v6817_v26  ;;  %v5787_v51 = vadd.f32 %v12598_v54, %v5618_v8  ;;  %v12602_v55 = vld [vmem:[#allocation91_spill] sm:$0xff] }
 0x699   : > { %v6123_v28 = vadd.f32 %v12593_v15, %v5954_v63  ;;  %v6563_v27 = vmul.f32 0.044715, %v6499_v20  ;;  %v5116_v63 = vadd.f32 %v12599_v16, %v4947_v7  ;;  %v5621_v8 = vadd.f32 %v12602_v55, %v5452_v57 }
 0x69a   : > { %v6945_v23 = vmul.f32 %v6881_v30, %v11199_v61  ;;  %v7962_v30 = vld [vmem:[#allocation3 + $0x408] sm:$0xf] }
 0x69b   : > { %v11253_v17 = vadd.f32 %v10887_v50, %v6123_v28  ;;  %v6627_v4 = vadd.f32 %v6563_v27, %v11236_v48  ;;  %v7963_v15 = vor.u32 %v9039_v19, %v7962_v30  ;;  %v12600_v28 = vld [vmem:[#allocation199_spill] sm:$0xff]  ;;  %v12604_v19 = vld [vmem:[#allocation90_spill] sm:$0xff] }
 0x69c   : > { %v7005_v14 = vpack.c.bf16 %v6945_v23, %v6944_v0  ;;  %v5285_v37 = vadd.f32 %v12600_v28, %v5116_v63  ;;  %v12601_v0 = vld [vmem:[#allocation228_spill] sm:$0xff] }
 0x69d   : > { %v6436_v13 = vmul.f32 %v11253_v17, %v11253_v17  ;;  %v6691_v26 = vmul.f32 0.7978846, %v6627_v4  ;;  %v9320_v36 = vpop.eup %9319  ;;  %v11266_v4 = vpop.f32.mrf.mxu2 }
 0x69e   : > { %v5955_v61 = vpop.f32.mrf.mxu3  ;;  %7125 = vmatmul.bf16.gmra.mxu2 %v7005_v14  ;;  %v6818_v59 = vadd.f32 1.0, %v9320_v36 }
 0x69f   : > { %v6500_v50 = vmul.f32 %v6436_v13, %v11253_v17  ;;  %v5956_v20 = vadd.f32 %v5955_v61, %v5787_v51  ;;  %9321 = vtanh.f32 %v6691_v26  ;;  %v12603_v13 = vld [vmem:[#allocation49_spill] sm:$0xff]  ;;  %v5790_v26 = vadd.f32 %v12604_v19, %v5621_v8  ;;  %v12609_v19 = vld [vmem:[#allocation50_spill] sm:$0xff] }
 0x6a0   : > { %v5454_v54 = vadd.f32 %v12603_v13, %v5285_v37  ;;  %v6882_v36 = vmul.f32 0.5, %v6818_v59  ;;  %v12607_v37 = vld [vmem:[#allocation18_spill] sm:$0xff] }
 0x6a1   : > { %v6564_v27 = vmul.f32 0.044715, %v6500_v50  ;;  %v6125_v23 = vadd.f32 %v12601_v0, %v5956_v20  ;;  %v12605_v20 = vld [vmem:[#allocation231_spill] sm:$0xff]  ;;  %v4952_v0 = vadd.f32 %v10950_v33, %v12607_v37  ;;  %v9048_v13 = vld [vmem:[#allocation3 + $0x470] sm:$0xf0] }
 0x6a2   : > { %v12613_v37 = vld [vmem:[#allocation235_spill] sm:$0xff] }
 0x6a3   : > { %v11269_v14 = vadd.f32 %v10894_v60, %v6125_v23  ;;  %5997 = vmatmul.bf16.gmra.mxu3 %v7963_v15  ;;  %v6628_v7 = vadd.f32 %v6564_v27, %v11253_v17  ;;  %v12606_v15 = vld [vmem:[#allocation94_spill] sm:$0xff]  ;;  %v6946_v23 = vmul.f32 %v6882_v36, %v11218_v10 }
 0x6a4   : > { %v5623_v28 = vadd.f32 %v12606_v15, %v5454_v54 }
 0x6a5   : > { %v9322_v32 = vpop.eup %9321  ;;  %v6437_v51 = vmul.f32 %v11269_v14, %v11269_v14  ;;  %v6692_v61 = vmul.f32 0.7978846, %v6628_v7 }
 0x6a6   : > { %v5958_v16 = vpop.f32.mrf.mxu3  ;;  %v6819_v57 = vadd.f32 1.0, %v9322_v32  ;;  %v7998_v32 = vld [vmem:[#allocation3 + $0x450] sm:$0xf] }
 0x6a7   : > { %v5959_v63 = vadd.f32 %v5958_v16, %v5790_v26  ;;  %v6501_v50 = vmul.f32 %v6437_v51, %v11269_v14  ;;  %9323 = vtanh.f32 %v6692_v61  ;;  %v12608_v51 = vld [vmem:[#allocation201_spill] sm:$0xff]  ;;  %v11289_v26 = vpop.f32.mrf.mxu2 }
 0x6a8   : > { %v6883_v60 = vmul.f32 0.5, %v6819_v57  ;;  %v5457_v54 = vadd.f32 %v12609_v19, %v12608_v51  ;;  %v12610_v16 = vld [vmem:[#allocation93_spill] sm:$0xff] }
 0x6a9   : > { %v6128_v30 = vadd.f32 %v12605_v20, %v5959_v63  ;;  %v6565_v27 = vmul.f32 0.044715, %v6501_v50  ;;  %v5792_v10 = vadd.f32 %v12610_v16, %v5623_v28  ;;  %v7999_v20 = vor.u32 %v9048_v13, %v7998_v32  ;;  %v12616_v13 = vld [vmem:[#allocation96_spill] sm:$0xff] }
 0x6aa   : > { %v6947_v55 = vmul.f32 %v6883_v60, %v11236_v48  ;;  %v12611_v48 = vld [vmem:[#allocation19_spill] sm:$0xff] }
 0x6ab   : > { %v11284_v8 = vadd.f32 %v10907_v1, %v6128_v30  ;;  %v6629_v59 = vadd.f32 %v6565_v27, %v11269_v14  ;;  %v5121_v36 = vadd.f32 %v12611_v48, %v4952_v0  ;;  %v12612_v30 = vld [vmem:[#allocation203_spill] sm:$0xff] }
 0x6ac   : > { %v7006_v7 = vpack.c.bf16 %v6947_v55, %v6946_v23  ;;  %v12614_v55 = vld [vmem:[#allocation97_spill] sm:$0xff] }
 0x6ad   : > { %v6438_v61 = vmul.f32 %v11284_v8, %v11284_v8  ;;  %v6693_v57 = vmul.f32 0.7978846, %v6629_v59  ;;  %v9324_v63 = vpop.eup %9323  ;;  %v5290_v15 = vadd.f32 %v12612_v30, %v5121_v36  ;;  %v5626_v51 = vadd.f32 %v12614_v55, %v5457_v54 }
 0x6ae   : > { %v5960_v1 = vpop.f32.mrf.mxu3  ;;  %7130 = vmatmul.bf16.gmra.mxu2 %v7006_v7  ;;  %v6820_v19 = vadd.f32 1.0, %v9324_v63  ;;  %v12615_v7 = vld [vmem:[#allocation51_spill] sm:$0xff] }
 0x6af   : > { %v6502_v50 = vmul.f32 %v6438_v61, %v11284_v8  ;;  %v5961_v60 = vadd.f32 %v5960_v1, %v5792_v10  ;;  %9325 = vtanh.f32 %v6693_v57  ;;  %v5459_v61 = vadd.f32 %v12615_v7, %v5290_v15  ;;  %v11307_v54 = vpop.f32.mrf.mxu2  ;;  %v12621_v7 = vld [vmem:[#allocation54_spill] sm:$0xff] }
 0x6b0   : > { %v5795_v16 = vadd.f32 %v12616_v13, %v5626_v51  ;;  %v6884_v36 = vmul.f32 0.5, %v6820_v19  ;;  %v12622_v13 = vld [vmem:[#allocation99_spill] sm:$0xff] }
 0x6b1   : > { %v6566_v27 = vmul.f32 0.044715, %v6502_v50  ;;  %v6130_v23 = vadd.f32 %v12613_v37, %v5961_v60  ;;  %v12617_v50 = vld [vmem:[#allocation238_spill] sm:$0xff] }
 0x6b3   : > { %v11300_v28 = vadd.f32 %v10914_v46, %v6130_v23  ;;  %6002 = vmatmul.bf16.gmra.mxu3 %v7999_v20  ;;  %v6630_v0 = vadd.f32 %v6566_v27, %v11284_v8  ;;  %v12618_v20 = vld [vmem:[#allocation100_spill] sm:$0xff]  ;;  %v6948_v27 = vmul.f32 %v6884_v36, %v11253_v17  ;;  %v9057_v17 = vld [vmem:[#allocation3 + $0x4b8] sm:$0xf0] }
 0x6b4   : > { %v5628_v30 = vadd.f32 %v12618_v20, %v5459_v61  ;;  %v12619_v23 = vld [vmem:[#allocation20_spill] sm:$0xff] }
 0x6b5   : > { %v9326_v59 = vpop.eup %9325  ;;  %v6439_v32 = vmul.f32 %v11300_v28, %v11300_v28  ;;  %v6694_v10 = vmul.f32 0.7978846, %v6630_v0  ;;  %v4957_v55 = vadd.f32 %v10950_v33, %v12619_v23  ;;  %v12623_v33 = vld [vmem:[#allocation21_spill] sm:$0xff] }
 0x6b6   : > { %v5963_v57 = vpop.f32.mrf.mxu3  ;;  %v6821_v48 = vadd.f32 1.0, %v9326_v59  ;;  %v12620_v59 = vld [vmem:[#allocation205_spill] sm:$0xff] }
 0x6b7   : > { %v5964_v1 = vadd.f32 %v5963_v57, %v5795_v16  ;;  %v6503_v46 = vmul.f32 %v6439_v32, %v11300_v28  ;;  %9327 = vtanh.f32 %v6694_v10  ;;  %v5462_v32 = vadd.f32 %v12621_v7, %v12620_v59  ;;  %v12627_v59 = vld [vmem:[#allocation57_spill] sm:$0xff] }
 0x6b8   : > { %v6885_v63 = vmul.f32 0.5, %v6821_v48  ;;  %v5797_v16 = vadd.f32 %v12622_v13, %v5628_v30  ;;  %v5126_v48 = vadd.f32 %v12623_v33, %v4957_v55  ;;  %v12628_v13 = vld [vmem:[#allocation102_spill] sm:$0xff] }
 0x6b9   : > { %v6133_v60 = vadd.f32 %v12617_v50, %v5964_v1  ;;  %v6567_v15 = vmul.f32 0.044715, %v6503_v46  ;;  %v8034_v1 = vld [vmem:[#allocation3 + $0x498] sm:$0xf] }
 0x6ba   : > { %v6949_v37 = vmul.f32 %v6885_v63, %v11269_v14  ;;  %v8035_v46 = vor.u32 %v9057_v17, %v8034_v1  ;;  %v12624_v63 = vld [vmem:[#allocation207_spill] sm:$0xff] }
 0x6bb   : > { %v11317_v51 = vadd.f32 %v10921_v6, %v6133_v60  ;;  %v6631_v19 = vadd.f32 %v6567_v15, %v11300_v28  ;;  %v5295_v50 = vadd.f32 %v12624_v63, %v5126_v48  ;;  %v11328_v60 = vpop.f32.mrf.mxu2  ;;  %v12625_v15 = vld [vmem:[#allocation240_spill] sm:$0xff]  ;;  %v12629_v48 = vld [vmem:[#allocation242_spill] sm:$0xff] }
 0x6bc   : > { %v7007_v0 = vpack.c.bf16 %v6949_v37, %v6948_v27  ;;  %v12626_v27 = vld [vmem:[#allocation103_spill] sm:$0xff] }
 0x6bd   : > { %v6440_v61 = vmul.f32 %v11317_v51, %v11317_v51  ;;  %v6695_v10 = vmul.f32 0.7978846, %v6631_v19  ;;  %v9328_v57 = vpop.eup %9327  ;;  %v5631_v37 = vadd.f32 %v12626_v27, %v5462_v32  ;;  %v5464_v7 = vadd.f32 %v12627_v59, %v5295_v50 }
 0x6be   : > { %v5965_v14 = vpop.f32.mrf.mxu3  ;;  %7135 = vmatmul.bf16.gmra.mxu2 %v7007_v0  ;;  %v6822_v23 = vadd.f32 1.0, %v9328_v57 }
 0x6bf   : > { %v6504_v6 = vmul.f32 %v6440_v61, %v11317_v51  ;;  %v5966_v36 = vadd.f32 %v5965_v14, %v5797_v16  ;;  %9329 = vtanh.f32 %v6695_v10  ;;  %v5800_v16 = vadd.f32 %v12628_v13, %v5631_v37  ;;  %v9066_v13 = vld [vmem:[#allocation3 + $0x500] sm:$0xf0] }
 0x6c0   : > { %v6886_v33 = vmul.f32 0.5, %v6822_v23 }
 0x6c1   : > { %v6568_v20 = vmul.f32 0.044715, %v6504_v6  ;;  %v6135_v30 = vadd.f32 %v12625_v15, %v5966_v36  ;;  %v12630_v36 = vld [vmem:[#allocation106_spill] sm:$0xff] }
 0x6c2   : > { %v5633_v1 = vadd.f32 %v12630_v36, %v5464_v7  ;;  %v6950_v63 = vmul.f32 %v6886_v33, %v11284_v8  ;;  %v12631_v15 = vld [vmem:[#allocation22_spill] sm:$0xff]  ;;  %v12633_v8 = vld [vmem:[#allocation60_spill] sm:$0xff]  ;;  %v12634_v7 = vld [vmem:[#allocation105_spill] sm:$0xff] }
 0x6c3   : > { %v11333_v19 = vadd.f32 %v10928_v5, %v6135_v30  ;;  %6007 = vmatmul.bf16.gmra.mxu3 %v8035_v46  ;;  %v6632_v55 = vadd.f32 %v6568_v20, %v11317_v51  ;;  %v11348_v20 = vld [vmem:[%s12230_s4] ss:$0 sm:$0xff]  ;;  %v11352_v27 = vpop.f32.mrf.mxu2 }
 0x6c4   : > { %v4962_v30 = vadd.f32 %v11348_v20, %v12631_v15 }
 0x6c5   : > { %v9330_v0 = vpop.eup %9329  ;;  %v6441_v61 = vmul.f32 %v11333_v19, %v11333_v19  ;;  %v6696_v17 = vmul.f32 0.7978846, %v6632_v55 }
 0x6c6   : > { %v5968_v10 = vpop.f32.mrf.mxu3  ;;  %v6823_v14 = vadd.f32 1.0, %v9330_v0  ;;  %v12632_v0 = vld [vmem:[#allocation209_spill] sm:$0xff] }
 0x6c7   : > { %v5969_v32 = vadd.f32 %v5968_v10, %v5800_v16  ;;  %v6505_v57 = vmul.f32 %v6441_v61, %v11333_v19  ;;  %9331 = vtanh.f32 %v6696_v17  ;;  %v5467_v59 = vadd.f32 %v12633_v8, %v12632_v0  ;;  %v12639_v0 = vld [vmem:[#allocation63_spill] sm:$0xff] }
 0x6c8   : > { %v6887_v5 = vmul.f32 0.5, %v6823_v14  ;;  %v5802_v61 = vadd.f32 %v12634_v7, %v5633_v1  ;;  %v12635_v14 = vld [vmem:[#allocation23_spill] sm:$0xff] }
 0x6c9   : > { %v6138_v6 = vadd.f32 %v12629_v48, %v5969_v32  ;;  %v6569_v46 = vmul.f32 0.044715, %v6505_v57  ;;  %v5131_v33 = vadd.f32 %v12635_v14, %v4962_v30  ;;  %v8070_v57 = vld [vmem:[#allocation3 + $0x4e0] sm:$0xf] }
 0x6ca   : > { %v6951_v50 = vmul.f32 %v6887_v5, %v11300_v28  ;;  %v8071_v5 = vor.u32 %v9066_v13, %v8070_v57  ;;  %v12636_v48 = vld [vmem:[#allocation212_spill] sm:$0xff] }
 0x6cb   : > { %v11355_v37 = vadd.f32 %v10938_v11, %v6138_v6  ;;  %v6633_v23 = vadd.f32 %v6569_v46, %v11333_v19  ;;  %v5300_v6 = vadd.f32 %v12636_v48, %v5131_v33  ;;  %v12637_v46 = vld [vmem:[#allocation244_spill] sm:$0xff] }
 0x6cc   : > { %v7008_v55 = vpack.c.bf16 %v6951_v50, %v6950_v63  ;;  %v12638_v50 = vld [vmem:[#allocation109_spill] sm:$0xff]  ;;  %v12642_v57 = vld [vmem:[#allocation112_spill] sm:$0xff] }
 0x6cd   : > { %v6442_v28 = vmul.f32 %v11355_v37, %v11355_v37  ;;  %v6697_v16 = vmul.f32 0.7978846, %v6633_v23  ;;  %v9332_v10 = vpop.eup %9331  ;;  %v5636_v1 = vadd.f32 %v12638_v50, %v5467_v59  ;;  %v5469_v8 = vadd.f32 %v12639_v0, %v5300_v6 }
 0x6ce   : > { %v5970_v17 = vpop.f32.mrf.mxu3  ;;  %7140 = vmatmul.bf16.gmra.mxu2 %v7008_v55  ;;  %v6824_v15 = vadd.f32 1.0, %v9332_v10 }
 0x6cf   : > { %v6506_v11 = vmul.f32 %v6442_v28, %v11355_v37  ;;  %v5971_v32 = vadd.f32 %v5970_v17, %v5802_v61  ;;  %9333 = vtanh.f32 %v6697_v16  ;;  %v11373_v28 = vpop.f32.mrf.mxu2  ;;  %v12640_v61 = vld [vmem:[#allocation108_spill] sm:$0xff] }
 0x6d0   : > { %v5805_v13 = vadd.f32 %v12640_v61, %v5636_v1  ;;  %v6888_v10 = vmul.f32 0.5, %v6824_v15 }
 0x6d1   : > { %v6570_v36 = vmul.f32 0.044715, %v6506_v11  ;;  %v6140_v63 = vadd.f32 %v12637_v46, %v5971_v32  ;;  %v12641_v11 = vld [vmem:[#allocation247_spill] sm:$0xff]  ;;  %v12643_v46 = vld [vmem:[#allocation25_spill] sm:$0xff] }
 0x6d2   : > { %v6952_v6 = vmul.f32 %v6888_v10, %v11317_v51  ;;  %v9075_v51 = vld [vmem:[#allocation3 + $0x548] sm:$0xf0] }
 0x6d3   : > { %v11369_v23 = vadd.f32 %v10945_v45, %v6140_v63  ;;  %6012 = vmatmul.bf16.gmra.mxu3 %v8071_v5  ;;  %v6634_v30 = vadd.f32 %v6570_v36, %v11355_v37  ;;  %v5638_v5 = vadd.f32 %v12642_v57, %v5469_v8  ;;  %v4967_v63 = vadd.f32 %v11348_v20, %v12643_v46 }
 0x6d5   : > { %v9334_v55 = vpop.eup %9333  ;;  %v6443_v7 = vmul.f32 %v11369_v23, %v11369_v23  ;;  %v6698_v16 = vmul.f32 0.7978846, %v6634_v30  ;;  %v12644_v30 = vld [vmem:[#allocation214_spill] sm:$0xff] }
 0x6d6   : > { %v5973_v17 = vpop.f32.mrf.mxu3  ;;  %v6825_v59 = vadd.f32 1.0, %v9334_v55  ;;  %v12645_v55 = vld [vmem:[#allocation67_spill] sm:$0xff] }
 0x6d7   : > { %v5974_v14 = vadd.f32 %v5973_v17, %v5805_v13  ;;  %v6507_v45 = vmul.f32 %v6443_v7, %v11369_v23  ;;  %9335 = vtanh.f32 %v6698_v16  ;;  %v5472_v0 = vadd.f32 %v12645_v55, %v12644_v30  ;;  %v12646_v7 = vld [vmem:[#allocation111_spill] sm:$0xff]  ;;  %v12647_v17 = vld [vmem:[#allocation24_spill] sm:$0xff]  ;;  %v12651_v30 = vld [vmem:[#allocation70_spill] sm:$0xff] }
 0x6d8   : > { %v6889_v33 = vmul.f32 0.5, %v6825_v59  ;;  %v5807_v61 = vadd.f32 %v12646_v7, %v5638_v5  ;;  %v5136_v59 = vadd.f32 %v12647_v17, %v4967_v63  ;;  %v12652_v7 = vld [vmem:[#allocation114_spill] sm:$0xff] }
 0x6d9   : > { %v6143_v32 = vadd.f32 %v12641_v11, %v5974_v14  ;;  %v6571_v48 = vmul.f32 0.044715, %v6507_v45  ;;  %v8106_v45 = vld [vmem:[#allocation3 + $0x528] sm:$0xf]  ;;  %v12648_v11 = vld [vmem:[#allocation216_spill] sm:$0xff] }
 0x6da   : > { %v6953_v36 = vmul.f32 %v6889_v33, %v11333_v19  ;;  %v8107_v33 = vor.u32 %v9075_v51, %v8106_v45  ;;  %v12654_v45 = vld [vmem:[#allocation117_spill] sm:$0xff] }
 0x6db   : > { %v11386_v50 = vadd.f32 %v10962_v34, %v6143_v32  ;;  %v6635_v1 = vadd.f32 %v6571_v48, %v11369_v23  ;;  %v11395_v34 = vpop.f32.mrf.mxu2  ;;  %v5305_v32 = vadd.f32 %v12648_v11, %v5136_v59  ;;  %v12649_v48 = vld [vmem:[#allocation249_spill] sm:$0xff] }
 0x6dc   : > { %v7009_v15 = vpack.c.bf16 %v6953_v36, %v6952_v6  ;;  %v12650_v6 = vld [vmem:[#allocation115_spill] sm:$0xff] }
 0x6dd   : > { %v6444_v8 = vmul.f32 %v11386_v50, %v11386_v50  ;;  %v6699_v13 = vmul.f32 0.7978846, %v6635_v1  ;;  %v9336_v16 = vpop.eup %9335  ;;  %v5641_v36 = vadd.f32 %v12650_v6, %v5472_v0  ;;  %v5474_v55 = vadd.f32 %v12651_v30, %v5305_v32 }
 0x6de   : > { %v5975_v19 = vpop.f32.mrf.mxu3  ;;  %7145 = vmatmul.bf16.gmra.mxu2 %v7009_v15  ;;  %v6826_v46 = vadd.f32 1.0, %v9336_v16 }
 0x6df   : > { %v6508_v10 = vmul.f32 %v6444_v8, %v11386_v50  ;;  %v5976_v14 = vadd.f32 %v5975_v19, %v5807_v61  ;;  %9337 = vtanh.f32 %v6699_v13  ;;  %v5810_v61 = vadd.f32 %v12652_v7, %v5641_v36 }
 0x6e0   : > { %v6890_v17 = vmul.f32 0.5, %v6826_v46 }
 0x6e1   : > { %v6572_v57 = vmul.f32 0.044715, %v6508_v10  ;;  %v6145_v5 = vadd.f32 %v12649_v48, %v5976_v14  ;;  %v12653_v10 = vld [vmem:[#allocation251_spill] sm:$0xff] }
 0x6e2   : > { %v6954_v32 = vmul.f32 %v6890_v17, %v11355_v37  ;;  %v12655_v48 = vld [vmem:[#allocation27_spill] sm:$0xff]  ;;  %v9084_v37 = vld [vmem:[#allocation3 + $0x590] sm:$0xf0] }
 0x6e3   : > { %v11402_v1 = vadd.f32 %v10972_v38, %v6145_v5  ;;  %6017 = vmatmul.bf16.gmra.mxu3 %v8107_v33  ;;  %v6636_v63 = vadd.f32 %v6572_v57, %v11386_v50  ;;  %v11410_v59 = vpop.f32.mrf.mxu2  ;;  %v5643_v33 = vadd.f32 %v12654_v45, %v5474_v55  ;;  %v4972_v5 = vadd.f32 %v11348_v20, %v12655_v48 }
 0x6e5   : > { %v9338_v15 = vpop.eup %9337  ;;  %v6445_v8 = vmul.f32 %v11402_v1, %v11402_v1  ;;  %v6700_v51 = vmul.f32 0.7978846, %v6636_v63  ;;  %v12656_v63 = vld [vmem:[#allocation219_spill] sm:$0xff] }
 0x6e6   : > { %v5978_v13 = vpop.f32.mrf.mxu3  ;;  %v6827_v19 = vadd.f32 1.0, %v9338_v15  ;;  %v12657_v15 = vld [vmem:[#allocation74_spill] sm:$0xff] }
 0x6e7   : > { %v5979_v0 = vadd.f32 %v5978_v13, %v5810_v61  ;;  %v6509_v16 = vmul.f32 %v6445_v8, %v11402_v1  ;;  %9339 = vtanh.f32 %v6700_v51  ;;  %v5477_v30 = vadd.f32 %v12657_v15, %v12656_v63  ;;  %v12658_v8 = vld [vmem:[#allocation118_spill] sm:$0xff] }
 0x6e8   : > { %v6891_v38 = vmul.f32 0.5, %v6827_v19  ;;  %v5812_v7 = vadd.f32 %v12658_v8, %v5643_v33  ;;  %v12659_v13 = vld [vmem:[#allocation26_spill] sm:$0xff]  ;;  %v12661_v33 = vld [vmem:[#allocation253_spill] sm:$0xff] }
 0x6e9   : > { %v6148_v14 = vadd.f32 %v12653_v10, %v5979_v0  ;;  %v6573_v11 = vmul.f32 0.044715, %v6509_v16  ;;  %v5141_v19 = vadd.f32 %v12659_v13, %v4972_v5  ;;  %v8142_v16 = vld [vmem:[#allocation3 + $0x570] sm:$0xf]  ;;  %v12660_v10 = vld [vmem:[#allocation221_spill] sm:$0xff] }
 0x6ea   : > { %v6955_v57 = vmul.f32 %v6891_v38, %v11369_v23  ;;  %v8143_v38 = vor.u32 %v9084_v37, %v8142_v16  ;;  %v12664_v37 = vld [vmem:[#allocation121_spill] sm:$0xff] }
 0x6eb   : > { %v11419_v6 = vadd.f32 %v10978_v40, %v6148_v14  ;;  %v6637_v36 = vadd.f32 %v6573_v11, %v11402_v1  ;;  %v11430_v40 = vld [vmem:[%s12232_s6] ss:$0 sm:$0xff]  ;;  %v5310_v14 = vadd.f32 %v12660_v10, %v5141_v19 }
 0x6ec   : > { %v7010_v46 = vpack.c.bf16 %v6955_v57, %v6954_v32  ;;  %v12662_v57 = vld [vmem:[#allocation120_spill] sm:$0xff] }
 0x6ed   : > { %v6446_v55 = vmul.f32 %v11419_v6, %v11419_v6  ;;  %v6701_v23 = vmul.f32 0.7978846, %v6637_v36  ;;  %v9340_v51 = vpop.eup %9339  ;;  %v5646_v48 = vadd.f32 %v12662_v57, %v5477_v30  ;;  %v12666_v10 = vld [vmem:[#allocation124_spill] sm:$0xff] }
 0x6ee   : > { %v5980_v61 = vpop.f32.mrf.mxu3  ;;  %7150 = vmatmul.bf16.gmra.mxu2 %v7010_v46  ;;  %v6828_v36 = vadd.f32 1.0, %v9340_v51  ;;  %v12667_v57 = vld [vmem:[#allocation28_spill] sm:$0xff] }
 0x6ef   : > { %v6510_v17 = vmul.f32 %v6446_v55, %v11419_v6  ;;  %v5981_v0 = vadd.f32 %v5980_v61, %v5812_v7  ;;  %9341 = vtanh.f32 %v6701_v23  ;;  %v12663_v55 = vld [vmem:[#allocation77_spill] sm:$0xff]  ;;  %v5815_v23 = vadd.f32 %v12664_v37, %v5646_v48 }
 0x6f0   : > { %v5479_v8 = vadd.f32 %v12663_v55, %v5310_v14  ;;  %v6892_v51 = vmul.f32 0.5, %v6828_v36  ;;  %v4977_v48 = vadd.f32 %v11348_v20, %v12667_v57  ;;  %v12669_v55 = vld [vmem:[#allocation80_spill] sm:$0xff] }
 0x6f1   : > { %v6574_v45 = vmul.f32 0.044715, %v6510_v17  ;;  %v6150_v11 = vadd.f32 %v12661_v33, %v5981_v0  ;;  %v7111_v32 = vpop.f32.mrf.mxu2  ;;  %v12665_v0 = vld [vmem:[#allocation256_spill] sm:$0xff] }
 0x6f2   : > { %v7112_v5 = vadd.f32 %v11430_v40, %v7111_v32 }
 0x6f3   : > { %v11446_v46 = vadd.f32 %v10990_v31, %v6150_v11  ;;  %6022 = vmatmul.bf16.gmra.mxu3 %v8143_v38  ;;  %v6638_v63 = vadd.f32 %v6574_v45, %v11419_v6  ;;  %v5648_v45 = vadd.f32 %v12666_v10, %v5479_v8  ;;  %v6956_v11 = vmul.f32 %v6892_v51, %v11386_v50  ;;  %v12670_v50 = vld [vmem:[#allocation126_spill] sm:$0xff] }
 0x6f4   : > { %7271 = vst.msk [vmem:[%s11441_s14] sm:$0xff] %vm384_vm1, %v7112_v5  ;;  %v12673_v10 = vld [vmem:[#allocation258_spill] sm:$0xff] }
 0x6f5   : > { %v9342_v15 = vpop.eup %9341  ;;  %v6447_v7 = vmul.f32 %v11446_v46, %v11446_v46  ;;  %v6702_v30 = vmul.f32 0.7978846, %v6638_v63  ;;  %v5817_v37 = vadd.f32 %v12670_v50, %v5648_v45  ;;  %v12676_v50 = vld [vmem:[#allocation130_spill] sm:$0xff] }
 0x6f6   : > { %v5983_v61 = vpop.f32.mrf.mxu3  ;;  %v6829_v13 = vadd.f32 1.0, %v9342_v15  ;;  %v12668_v15 = vld [vmem:[#allocation223_spill] sm:$0xff] }
 0x6f7   : > { %v5984_v31 = vadd.f32 %v5983_v61, %v5815_v23  ;;  %v6511_v19 = vmul.f32 %v6447_v7, %v11446_v46  ;;  %9343 = vtanh.f32 %v6702_v30  ;;  %v5482_v8 = vadd.f32 %v12669_v55, %v12668_v15  ;;  %v12675_v15 = vld [vmem:[#allocation83_spill] sm:$0xff] }
 0x6f8   : > { %v6893_v17 = vmul.f32 0.5, %v6829_v13 }
 0x6f9   : > { %v6153_v16 = vadd.f32 %v12665_v0, %v5984_v31  ;;  %v7113_v38 = vpop.f32.mrf.mxu2  ;;  %v6575_v14 = vmul.f32 0.044715, %v6511_v19  ;;  %v8178_v19 = vld [vmem:[#allocation3 + $0x5b8] sm:$0xf]  ;;  %v12672_v0 = vld [vmem:[#allocation226_spill] sm:$0xff] }
 0x6fa   : > { %v7114_v33 = vadd.f32 %v11430_v40, %v7113_v38  ;;  %v6957_v32 = vmul.f32 %v6893_v17, %v11402_v1  ;;  %v9093_v1 = vld [vmem:[#allocation3 + $0x5d8] sm:$0xf0] }
 0x6fb   : > { %v11464_v5 = vadd.f32 %v10997_v43, %v6153_v16  ;;  %v6639_v36 = vadd.f32 %v6575_v14, %v11446_v46  ;;  %v12671_v43 = vld [vmem:[#allocation29_spill] sm:$0xff]  ;;  %v8179_v17 = vor.u32 %v9093_v1, %v8178_v19  ;;  %v12678_v19 = vld [vmem:[#allocation131_spill] sm:$0xff] }
 0x6fc   : > { %7272 = vst.msk [vmem:[%s11441_s14 + $0x8] sm:$0xff] %vm384_vm1, %v7114_v33  ;;  %v7011_v63 = vpack.c.bf16 %v6957_v32, %v6956_v11  ;;  %v5146_v13 = vadd.f32 %v12671_v43, %v4977_v48  ;;  %v12674_v33 = vld [vmem:[#allocation128_spill] sm:$0xff] }
 0x6fd   : > { %v6448_v7 = vmul.f32 %v11464_v5, %v11464_v5  ;;  %v6703_v23 = vmul.f32 0.7978846, %v6639_v36  ;;  %v9344_v61 = vpop.eup %9343  ;;  %v5651_v11 = vadd.f32 %v12674_v33, %v5482_v8 }
 0x6fe   : > { %v5985_v30 = vpop.f32.mrf.mxu3  ;;  %7155 = vmatmul.bf16.gmra.mxu2 %v7011_v63  ;;  %v5315_v16 = vadd.f32 %v12672_v0, %v5146_v13  ;;  %v6830_v57 = vadd.f32 1.0, %v9344_v61  ;;  %v12677_v13 = vld [vmem:[#allocation260_spill] sm:$0xff] }
 0x6ff   : > { %v6512_v51 = vmul.f32 %v6448_v7, %v11464_v5  ;;  %v5986_v31 = vadd.f32 %v5985_v30, %v5817_v37  ;;  %9345 = vtanh.f32 %v6703_v23  ;;  %v5820_v37 = vadd.f32 %v12676_v50, %v5651_v11 }
 0x700   : > { %v5484_v55 = vadd.f32 %v12675_v15, %v5315_v16  ;;  %v6894_v30 = vmul.f32 0.5, %v6830_v57  ;;  %v12680_v57 = vld [vmem:[#allocation229_spill] sm:$0xff] }
 0x701   : > { %v6576_v38 = vmul.f32 0.044715, %v6512_v51  ;;  %v6155_v14 = vadd.f32 %v12673_v10, %v5986_v31  ;;  %v7116_v45 = vpop.f32.mrf.mxu2 }
 0x702   : > { %v7117_v32 = vadd.f32 %v11430_v40, %v7116_v45 }
 0x703   : > { %v11481_v48 = vadd.f32 %v11006_v35, %v6155_v14  ;;  %6027 = vmatmul.bf16.gmra.mxu3 %v8179_v17  ;;  %v6640_v36 = vadd.f32 %v6576_v38, %v11464_v5  ;;  %v5653_v17 = vadd.f32 %v12678_v19, %v5484_v55  ;;  %v6958_v38 = vmul.f32 %v6894_v30, %v11419_v6  ;;  %v12679_v14 = vld [vmem:[#allocation30_spill] sm:$0xff]  ;;  %v8214_v30 = vld [vmem:[#allocation3 + $0x600] sm:$0xf] }
 0x704   : > { %7273 = vst.msk [vmem:[%s11441_s14 + $0x10] sm:$0xff] %vm384_vm1, %v7117_v32  ;;  %v4982_v45 = vadd.f32 %v11348_v20, %v12679_v14  ;;  %v12682_v6 = vld [vmem:[#allocation134_spill] sm:$0xff] }
 0x705   : > { %v9346_v63 = vpop.eup %9345  ;;  %v6449_v7 = vmul.f32 %v11481_v48, %v11481_v48  ;;  %v6704_v8 = vmul.f32 0.7978846, %v6640_v36  ;;  %v12681_v36 = vld [vmem:[#allocation86_spill] sm:$0xff]  ;;  %v5822_v55 = vadd.f32 %v12682_v6, %v5653_v17  ;;  %v12686_v17 = vld [vmem:[#allocation133_spill] sm:$0xff] }
 0x706   : > { %v5988_v1 = vpop.f32.mrf.mxu3  ;;  %v6831_v23 = vadd.f32 1.0, %v9346_v63  ;;  %v5487_v63 = vadd.f32 %v12681_v36, %v12680_v57  ;;  %v12688_v36 = vld [vmem:[#allocation137_spill] sm:$0xff] }
 0x707   : > { %v5989_v35 = vadd.f32 %v5988_v1, %v5820_v37  ;;  %v6513_v61 = vmul.f32 %v6449_v7, %v11481_v48  ;;  %9347 = vtanh.f32 %v6704_v8 }
 0x708   : > { %v6895_v43 = vmul.f32 0.5, %v6831_v23 }
 0x709   : > { %v6158_v51 = vadd.f32 %v12677_v13, %v5989_v35  ;;  %v7118_v31 = vpop.f32.mrf.mxu2  ;;  %v6577_v0 = vmul.f32 0.044715, %v6513_v61  ;;  %v12684_v61 = vld [vmem:[#allocation232_spill] sm:$0xff] }
 0x70a   : > { %v7119_v16 = vadd.f32 %v11430_v40, %v7118_v31  ;;  %v6959_v10 = vmul.f32 %v6895_v43, %v11446_v46  ;;  %v9102_v46 = vld [vmem:[#allocation3 + $0x620] sm:$0xf0] }
 0x70b   : > { %v11499_v33 = vadd.f32 %v11015_v25, %v6158_v51  ;;  %v6641_v11 = vadd.f32 %v6577_v0, %v11481_v48  ;;  %v12683_v25 = vld [vmem:[#allocation31_spill] sm:$0xff]  ;;  %v8215_v35 = vor.u32 %v9102_v46, %v8214_v30  ;;  %v12685_v51 = vld [vmem:[#allocation262_spill] sm:$0xff]  ;;  %v5656_v0 = vadd.f32 %v12686_v17, %v5487_v63 }
 0x70c   : > { %7274 = vst.msk [vmem:[%s11441_s14 + $0x18] sm:$0xff] %vm384_vm1, %v7119_v16  ;;  %v7012_v32 = vpack.c.bf16 %v6959_v10, %v6958_v38  ;;  %v5151_v8 = vadd.f32 %v12683_v25, %v4982_v45 }
 0x70d   : > { %v6450_v15 = vmul.f32 %v11499_v33, %v11499_v33  ;;  %v6705_v7 = vmul.f32 0.7978846, %v6641_v11  ;;  %v9348_v37 = vpop.eup %9347  ;;  %v12687_v11 = vld [vmem:[#allocation89_spill] sm:$0xff] }
 0x70e   : > { %v5990_v50 = vpop.f32.mrf.mxu3  ;;  %7160 = vmatmul.bf16.gmra.mxu2 %v7012_v32  ;;  %v5320_v43 = vadd.f32 %v12684_v61, %v5151_v8  ;;  %v6832_v38 = vadd.f32 1.0, %v9348_v37  ;;  %v12689_v37 = vld [vmem:[#allocation265_spill] sm:$0xff] }
 0x70f   : > { %v6514_v1 = vmul.f32 %v6450_v15, %v11499_v33  ;;  %v5991_v23 = vadd.f32 %v5990_v50, %v5822_v55  ;;  %9349 = vtanh.f32 %v6705_v7  ;;  %v5825_v15 = vadd.f32 %v12688_v36, %v5656_v0  ;;  %v12692_v0 = vld [vmem:[#allocation234_spill] sm:$0xff] }
 0x710   : > { %v5489_v32 = vadd.f32 %v12687_v11, %v5320_v43  ;;  %v6896_v46 = vmul.f32 0.5, %v6832_v38 }
 0x711   : > { %v6578_v13 = vmul.f32 0.044715, %v6514_v1  ;;  %v6160_v31 = vadd.f32 %v12685_v51, %v5991_v23  ;;  %v7121_v19 = vpop.f32.mrf.mxu2  ;;  %v12690_v1 = vld [vmem:[#allocation136_spill] sm:$0xff] }
 0x712   : > { %v7122_v16 = vadd.f32 %v11430_v40, %v7121_v19  ;;  %v5658_v23 = vadd.f32 %v12690_v1, %v5489_v32  ;;  %v6960_v61 = vmul.f32 %v6896_v46, %v11464_v5  ;;  %v12694_v5 = vld [vmem:[#allocation141_spill] sm:$0xff] }
 0x713   : > { %v11516_v10 = vadd.f32 %v11030_v47, %v6160_v31  ;;  %6032 = vmatmul.bf16.gmra.mxu3 %v8215_v35  ;;  %v6642_v14 = vadd.f32 %v6578_v13, %v11499_v33  ;;  %v12691_v13 = vld [vmem:[#allocation32_spill] sm:$0xff]  ;;  %v12696_v46 = vld [vmem:[#allocation237_spill] sm:$0xff] }
 0x714   : > { %7275 = vst.msk [vmem:[%s11441_s14 + $0x20] sm:$0xff] %vm384_vm1, %v7122_v16  ;;  %v4987_v51 = vadd.f32 %v11348_v20, %v12691_v13  ;;  %v12693_v16 = vld [vmem:[#allocation92_spill] sm:$0xff]  ;;  %v12699_v13 = vld [vmem:[#allocation95_spill] sm:$0xff] }
 0x715   : > { %v9350_v45 = vpop.eup %9349  ;;  %v6451_v57 = vmul.f32 %v11516_v10, %v11516_v10  ;;  %v6706_v63 = vmul.f32 0.7978846, %v6642_v14  ;;  %v5492_v38 = vadd.f32 %v12693_v16, %v12692_v0 }
 0x716   : > { %v5993_v6 = vpop.f32.mrf.mxu3  ;;  %v6833_v55 = vadd.f32 1.0, %v9350_v45  ;;  %v5827_v45 = vadd.f32 %v12694_v5, %v5658_v23 }
 0x717   : > { %v5994_v47 = vadd.f32 %v5993_v6, %v5825_v15  ;;  %v6515_v7 = vmul.f32 %v6451_v57, %v11516_v10  ;;  %9351 = vtanh.f32 %v6706_v63  ;;  %v8250_v6 = vld [vmem:[#allocation3 + $0x648] sm:$0xf] }
 0x718   : > { %v6897_v50 = vmul.f32 0.5, %v6833_v55 }
 0x719   : > { %v6163_v25 = vadd.f32 %v12689_v37, %v5994_v47  ;;  %v7123_v8 = vpop.f32.mrf.mxu2  ;;  %v6579_v30 = vmul.f32 0.044715, %v6515_v7 }
 0x71a   : > { %v7124_v35 = vadd.f32 %v11430_v40, %v7123_v8  ;;  %v6961_v43 = vmul.f32 %v6897_v50, %v11481_v48  ;;  %v9111_v48 = vld [vmem:[#allocation3 + $0x668] sm:$0xf0]  ;;  %v12697_v50 = vld [vmem:[#allocation267_spill] sm:$0xff] }
 0x71b   : > { %v11534_v31 = vadd.f32 %v11037_v44, %v6163_v25  ;;  %v6643_v19 = vadd.f32 %v6579_v30, %v11516_v10  ;;  %v12695_v44 = vld [vmem:[#allocation33_spill] sm:$0xff]  ;;  %v8251_v55 = vor.u32 %v9111_v48, %v8250_v6  ;;  %v12698_v8 = vld [vmem:[#allocation139_spill] sm:$0xff] }
 0x71c   : > { %7276 = vst.msk [vmem:[%s11441_s14 + $0x28] sm:$0xff] %vm384_vm1, %v7124_v35  ;;  %v7013_v17 = vpack.c.bf16 %v6961_v43, %v6960_v61  ;;  %v5156_v36 = vadd.f32 %v12695_v44, %v4987_v51  ;;  %v5661_v1 = vadd.f32 %v12698_v8, %v5492_v38  ;;  %v12702_v44 = vld [vmem:[#allocation142_spill] sm:$0xff]  ;;  %v12705_v8 = vld [vmem:[#allocation239_spill] sm:$0xff] }
 0x71d   : > { %v6452_v14 = vmul.f32 %v11534_v31, %v11534_v31  ;;  %v6707_v11 = vmul.f32 0.7978846, %v6643_v19  ;;  %v9352_v57 = vpop.eup %9351 }
 0x71e   : > { %v5995_v32 = vpop.f32.mrf.mxu3  ;;  %7165 = vmatmul.bf16.gmra.mxu2 %v7013_v17  ;;  %v5325_v47 = vadd.f32 %v12696_v46, %v5156_v36  ;;  %v6834_v30 = vadd.f32 1.0, %v9352_v57  ;;  %v12700_v17 = vld [vmem:[#allocation144_spill] sm:$0xff]  ;;  %v12703_v46 = vld [vmem:[#allocation34_spill] sm:$0xff] }
 0x71f   : > { %v6516_v15 = vmul.f32 %v6452_v14, %v11534_v31  ;;  %v5996_v63 = vadd.f32 %v5995_v32, %v5827_v45  ;;  %9353 = vtanh.f32 %v6707_v11  ;;  %v5830_v0 = vadd.f32 %v12700_v17, %v5661_v1  ;;  %v12701_v11 = vld [vmem:[#allocation269_spill] sm:$0xff]  ;;  %v12706_v1 = vld [vmem:[#allocation98_spill] sm:$0xff] }
 0x720   : > { %v5494_v51 = vadd.f32 %v12699_v13, %v5325_v47  ;;  %v6898_v5 = vmul.f32 0.5, %v6834_v30  ;;  %v4992_v47 = vadd.f32 %v11348_v20, %v12703_v46 }
 0x721   : > { %v6580_v7 = vmul.f32 0.044715, %v6516_v15  ;;  %v6165_v37 = vadd.f32 %v12697_v50, %v5996_v63  ;;  %v7126_v25 = vpop.f32.mrf.mxu2 }
 0x722   : > { %v7127_v23 = vadd.f32 %v11430_v40, %v7126_v25  ;;  %v5663_v36 = vadd.f32 %v12702_v44, %v5494_v51  ;;  %v6962_v6 = vmul.f32 %v6898_v5, %v11499_v33  ;;  %v12707_v33 = vld [vmem:[#allocation148_spill] sm:$0xff]  ;;  %v12708_v51 = vld [vmem:[#allocation35_spill] sm:$0xff] }
 0x723   : > { %v11551_v35 = vadd.f32 %v11044_v62, %v6165_v37  ;;  %6037 = vmatmul.bf16.gmra.mxu3 %v8251_v55  ;;  %v6644_v61 = vadd.f32 %v6580_v7, %v11534_v31  ;;  %v12704_v7 = vld [vmem:[#allocation296_spill] sm:$0xff] }
 0x724   : > { %7277 = vst.msk [vmem:[%s11441_s14 + $0x30] sm:$0xff] %vm384_vm1, %v7127_v23  ;;  %v5497_v23 = vadd.f32 %v12706_v1, %v12705_v8 }
 0x725   : > { %v9354_v43 = vpop.eup %9353  ;;  %v6453_v19 = vmul.f32 %v11551_v35, %v11551_v35  ;;  %v6708_v16 = vmul.f32 0.7978846, %v6644_v61  ;;  %v5832_v61 = vadd.f32 %v12707_v33, %v5663_v36 }
 0x726   : > { %v5998_v38 = vpop.f32.mrf.mxu3  ;;  %v6835_v14 = vadd.f32 1.0, %v9354_v43 }
 0x727   : > { %v5999_v62 = vadd.f32 %v5998_v38, %v5830_v0  ;;  %v6517_v45 = vmul.f32 %v6453_v19, %v11551_v35  ;;  %9355 = vtanh.f32 %v6708_v16  ;;  %v5161_v19 = vadd.f32 %v12708_v51, %v4992_v47  ;;  %v8286_v16 = vld [vmem:[#allocation3 + $0x690] sm:$0xf] }
 0x728   : > { %v6899_v48 = vmul.f32 0.5, %v6835_v14  ;;  %v12709_v14 = vld [vmem:[#allocation241_spill] sm:$0xff] }
 0x729   : > { %v6168_v32 = vadd.f32 %v12701_v11, %v5999_v62  ;;  %v7128_v57 = vpop.f32.mrf.mxu2  ;;  %v6581_v15 = vmul.f32 0.044715, %v6517_v45  ;;  %v5330_v5 = vadd.f32 %v12709_v14, %v5161_v19  ;;  %v12710_v45 = vld [vmem:[#allocation271_spill] sm:$0xff] }
 0x72a   : > { %v7129_v63 = vadd.f32 %v11430_v40, %v7128_v57  ;;  %v6963_v55 = vmul.f32 %v6899_v48, %v11516_v10  ;;  %v9120_v10 = vld [vmem:[#allocation3 + $0x6b0] sm:$0xf0] }
 0x72b   : > { %v11569_v50 = vadd.f32 %v12704_v7, %v6168_v32  ;;  %v6645_v37 = vadd.f32 %v6581_v15, %v11551_v35  ;;  %v8287_v38 = vor.u32 %v9120_v10, %v8286_v16  ;;  %v12711_v32 = vld [vmem:[#allocation145_spill] sm:$0xff]  ;;  %v12713_v7 = vld [vmem:[#allocation151_spill] sm:$0xff] }
 0x72c   : > { %7278 = vst.msk [vmem:[%s11441_s14 + $0x38] sm:$0xff] %vm384_vm1, %v7129_v63  ;;  %v7014_v25 = vpack.c.bf16 %v6963_v55, %v6962_v6  ;;  %v5666_v57 = vadd.f32 %v12711_v32, %v5497_v23  ;;  %v12712_v55 = vld [vmem:[#allocation101_spill] sm:$0xff] }
 0x72d   : > { %v6454_v30 = vmul.f32 %v11569_v50, %v11569_v50  ;;  %v6709_v43 = vmul.f32 0.7978846, %v6645_v37  ;;  %v9356_v20 = vpop.eup %9355  ;;  %v5499_v46 = vadd.f32 %v12712_v55, %v5330_v5  ;;  %v12716_v5 = vld [vmem:[#allocation243_spill] sm:$0xff]  ;;  %v12719_v55 = vld [vmem:[#allocation65_spill] sm:$0xff] }
 0x72e   : > { %v6000_v13 = vpop.f32.mrf.mxu3  ;;  %7170 = vmatmul.bf16.gmra.mxu2 %v7014_v25  ;;  %v6836_v36 = vadd.f32 1.0, %v9356_v20  ;;  %v5835_v37 = vadd.f32 %v12713_v7, %v5666_v57 }
 0x72f   : > { %v6518_v17 = vmul.f32 %v6454_v30, %v11569_v50  ;;  %v6001_v0 = vadd.f32 %v6000_v13, %v5832_v61  ;;  %9357 = vtanh.f32 %v6709_v43  ;;  %v12714_v61 = vld [vmem:[#allocation274_spill] sm:$0xff]  ;;  %v12715_v13 = vld [vmem:[#allocation147_spill] sm:$0xff] }
 0x730   : > { %v6900_v23 = vmul.f32 0.5, %v6836_v36  ;;  %v5668_v20 = vadd.f32 %v12715_v13, %v5499_v46  ;;  %v12723_v13 = vld [vmem:[#allocation158_spill] sm:$0xff] }
 0x731   : > { %v6582_v62 = vmul.f32 0.044715, %v6518_v17  ;;  %v6170_v48 = vadd.f32 %v12710_v45, %v6001_v0  ;;  %v7131_v11 = vpop.f32.mrf.mxu2 }
 0x732   : > { %v7132_v44 = vadd.f32 %v11430_v40, %v7131_v11  ;;  %v6964_v17 = vmul.f32 %v6900_v23, %v11534_v31  ;;  %v12718_v11 = vld [vmem:[#allocation155_spill] sm:$0xff] }
 0x733   : > { %v11586_v15 = vadd.f32 %v11067_v56, %v6170_v48  ;;  %6042 = vmatmul.bf16.gmra.mxu3 %v8287_v38  ;;  %v6646_v63 = vadd.f32 %v6582_v62, %v11569_v50  ;;  %v12717_v62 = vld [vmem:[#allocation104_spill] sm:$0xff]  ;;  %v5837_v32 = vadd.f32 %v12718_v11, %v5668_v20  ;;  %v12725_v11 = vld [vmem:[#allocation153_spill] sm:$0xff] }
 0x734   : > { %7279 = vst.msk [vmem:[%s11441_s14 + $0x40] sm:$0xff] %vm384_vm1, %v7132_v44  ;;  %v5502_v45 = vadd.f32 %v12717_v62, %v12716_v5  ;;  %v12724_v62 = vld [vmem:[#allocation277_spill] sm:$0xff] }
 0x735   : > { %v9358_v6 = vpop.eup %9357  ;;  %v6455_v47 = vmul.f32 %v11586_v15, %v11586_v15  ;;  %v6710_v25 = vmul.f32 0.7978846, %v6646_v63 }
 0x736   : > { %v6003_v8 = vpop.f32.mrf.mxu3  ;;  %v6837_v1 = vadd.f32 1.0, %v9358_v6 }
 0x737   : > { %v6004_v56 = vadd.f32 %v6003_v8, %v5835_v37  ;;  %v6519_v30 = vmul.f32 %v6455_v47, %v11586_v15  ;;  %9359 = vtanh.f32 %v6710_v25  ;;  %v12720_v37 = vld [vmem:[#allocation150_spill] sm:$0xff] }
 0x738   : > { %v6901_v33 = vmul.f32 0.5, %v6837_v1  ;;  %v5671_v25 = vadd.f32 %v12720_v37, %v5502_v45  ;;  %v12728_v37 = vld [vmem:[#allocation162_spill] sm:$0xff] }
 0x739   : > { %v6173_v10 = vadd.f32 %v12714_v61, %v6004_v56  ;;  %v7133_v43 = vpop.f32.mrf.mxu2  ;;  %v6583_v51 = vmul.f32 0.044715, %v6519_v30  ;;  %v12722_v61 = vld [vmem:[#allocation107_spill] sm:$0xff] }
 0x73a   : > { %v7134_v19 = vadd.f32 %v11430_v40, %v7133_v43  ;;  %v6965_v0 = vmul.f32 %v6901_v33, %v11551_v35  ;;  %v8322_v35 = vld [vmem:[#allocation3 + $0x6d8] sm:$0xf]  ;;  %v12721_v33 = vld [vmem:[#allocation245_spill] sm:$0xff]  ;;  %v5840_v20 = vadd.f32 %v12723_v13, %v5671_v25 }
 0x73b   : > { %v11602_v16 = vadd.f32 %v11078_v9, %v6173_v10  ;;  %v6647_v38 = vadd.f32 %v6583_v51, %v11586_v15  ;;  %v9129_v9 = vld [vmem:[#allocation3 + $0x6f8] sm:$0xf0]  ;;  %v5504_v10 = vadd.f32 %v12722_v61, %v12721_v33  ;;  %v12729_v61 = vld [vmem:[#allocation73_spill] sm:$0xff] }
 0x73c   : > { %7280 = vst.msk [vmem:[%s11441_s14 + $0x48] sm:$0xff] %vm384_vm1, %v7134_v19  ;;  %v7015_v14 = vpack.c.bf16 %v6965_v0, %v6964_v17  ;;  %v8323_v7 = vor.u32 %v9129_v9, %v8322_v35 }
 0x73d   : > { %v6456_v48 = vmul.f32 %v11602_v16, %v11602_v16  ;;  %v6711_v57 = vmul.f32 0.7978846, %v6647_v38  ;;  %v9360_v44 = vpop.eup %9359 }
 0x73e   : > { %v6005_v31 = vpop.f32.mrf.mxu3  ;;  %7175 = vmatmul.bf16.gmra.mxu2 %v7015_v14  ;;  %v6838_v1 = vadd.f32 1.0, %v9360_v44  ;;  %v11628_v14 = vpop.f32.mrf.mxu0 }
 0x73f   : > { %v6520_v36 = vmul.f32 %v6456_v48, %v11602_v16  ;;  %v6006_v63 = vadd.f32 %v6005_v31, %v5837_v32  ;;  %9361 = vtanh.f32 %v6711_v57  ;;  %v5673_v32 = vadd.f32 %v12725_v11, %v5504_v10  ;;  %v11632_v31 = vpop.f32.mrf.mxu1 }
 0x740   : > { %v6902_v0 = vmul.f32 0.5, %v6838_v1  ;;  %v9138_v1 = vld [vmem:[#allocation3 + $0x740] sm:$0xf0] }
 0x741   : > { %v6584_v6 = vmul.f32 0.044715, %v6520_v36  ;;  %v6175_v46 = vadd.f32 %v12719_v55, %v6006_v63  ;;  %v7136_v47 = vpop.f32.mrf.mxu2  ;;  %v12726_v55 = vld [vmem:[#allocation246_spill] sm:$0xff]  ;;  %v5842_v25 = vadd.f32 %v12728_v37, %v5673_v32 }
 0x742   : > { %v7137_v8 = vadd.f32 %v11430_v40, %v7136_v47  ;;  %v6966_v9 = vmul.f32 %v6902_v0, %v11569_v50 }
 0x743   : > { %v11617_v23 = vadd.f32 %v11100_v41, %v6175_v46  ;;  %6047 = vmatmul.bf16.gmra.mxu3 %v8323_v7  ;;  %v6648_v56 = vadd.f32 %v6584_v6, %v11602_v16  ;;  %v12727_v46 = vld [vmem:[#allocation110_spill] sm:$0xff] }
 0x744   : > { %7281 = vst.msk [vmem:[%s11441_s14 + $0x50] sm:$0xff] %vm384_vm1, %v7137_v8  ;;  %v5507_v47 = vadd.f32 %v12727_v46, %v12726_v55 }
 0x745   : > { %v9362_v30 = vpop.eup %9361  ;;  %v6457_v43 = vmul.f32 %v11617_v23, %v11617_v23  ;;  %v6712_v51 = vmul.f32 0.7978846, %v6648_v56 }
 0x746   : > { %v6008_v19 = vpop.f32.mrf.mxu3  ;;  %v6839_v17 = vadd.f32 1.0, %v9362_v30 }
 0x747   : > { %v6009_v41 = vadd.f32 %v6008_v19, %v5840_v20  ;;  %v6521_v38 = vmul.f32 %v6457_v43, %v11617_v23  ;;  %9363 = vtanh.f32 %v6712_v51  ;;  %v12730_v20 = vld [vmem:[#allocation156_spill] sm:$0xff]  ;;  %v11651_v19 = vpop.f32.mrf.mxu0 }
 0x748   : > { %v6903_v5 = vmul.f32 0.5, %v6839_v17  ;;  %v5676_v51 = vadd.f32 %v12730_v20, %v5507_v47  ;;  %v12734_v47 = vld [vmem:[#allocation279_spill] sm:$0xff] }
 0x749   : > { %v6178_v45 = vadd.f32 %v12724_v62, %v6009_v41  ;;  %v7138_v48 = vpop.f32.mrf.mxu2  ;;  %v6585_v57 = vmul.f32 0.044715, %v6521_v38 }
 0x74a   : > { %v7139_v35 = vadd.f32 %v11430_v40, %v7138_v48  ;;  %v6967_v44 = vmul.f32 %v6903_v5, %v11586_v15  ;;  %v8358_v15 = vld [vmem:[#allocation3 + $0x720] sm:$0xf]  ;;  %v11658_v5 = vpop.f32.mrf.mxu1  ;;  %v12732_v48 = vld [vmem:[#allocation113_spill] sm:$0xff] }
 0x74b   : > { %v11638_v36 = vadd.f32 %v11122_v3, %v6178_v45  ;;  %v6649_v63 = vadd.f32 %v6585_v57, %v11617_v23  ;;  %v8359_v13 = vor.u32 %v9138_v1, %v8358_v15  ;;  %v12731_v45 = vld [vmem:[#allocation248_spill] sm:$0xff]  ;;  %v12733_v57 = vld [vmem:[#allocation165_spill] sm:$0xff] }
 0x74c   : > { %7282 = vst.msk [vmem:[%s11441_s14 + $0x58] sm:$0xff] %vm384_vm1, %v7139_v35  ;;  %v7016_v6 = vpack.c.bf16 %v6967_v44, %v6966_v9  ;;  %v5509_v11 = vadd.f32 %v12732_v48, %v12731_v45  ;;  %v5845_v35 = vadd.f32 %v12733_v57, %v5676_v51  ;;  %v12738_v51 = vld [vmem:[#allocation169_spill] sm:$0xff] }
 0x74d   : > { %v6458_v7 = vmul.f32 %v11638_v36, %v11638_v36  ;;  %v6713_v8 = vmul.f32 0.7978846, %v6649_v63  ;;  %v9364_v3 = vpop.eup %9363 }
 0x74e   : > { %v6010_v50 = vpop.f32.mrf.mxu3  ;;  %7180 = vmatmul.bf16.gmra.mxu2 %v7016_v6  ;;  %v6840_v0 = vadd.f32 1.0, %v9364_v3 }
 0x74f   : > { %v6522_v56 = vmul.f32 %v6458_v7, %v11638_v36  ;;  %v6011_v30 = vadd.f32 %v6010_v50, %v5842_v25  ;;  %9365 = vtanh.f32 %v6713_v8  ;;  %v12735_v25 = vld [vmem:[#allocation159_spill] sm:$0xff] }
 0x750   : > { %v6904_v63 = vmul.f32 0.5, %v6840_v0  ;;  %v5678_v8 = vadd.f32 %v12735_v25, %v5509_v11  ;;  %v8394_v0 = vld [vmem:[#allocation3 + $0x768] sm:$0xf] }
 0x751   : > { %v6586_v33 = vmul.f32 0.044715, %v6522_v56  ;;  %v6180_v10 = vadd.f32 %v12729_v61, %v6011_v30  ;;  %v7141_v43 = vpop.f32.mrf.mxu2 }
 0x752   : > { %v7142_v17 = vadd.f32 %v11430_v40, %v7141_v43  ;;  %v6968_v1 = vmul.f32 %v6904_v63, %v11602_v16  ;;  %v12737_v43 = vld [vmem:[#allocation116_spill] sm:$0xff]  ;;  %v5847_v16 = vadd.f32 %v12738_v51, %v5678_v8  ;;  %v12744_v51 = vld [vmem:[#allocation285_spill] sm:$0xff] }
 0x753   : > { %v11655_v41 = vadd.f32 %v11139_v58, %v6180_v10  ;;  %6052 = vmatmul.bf16.gmra.mxu3 %v8359_v13  ;;  %v6650_v38 = vadd.f32 %v6586_v33, %v11638_v36  ;;  %v11677_v33 = vpop.f32.mrf.mxu0  ;;  %v12736_v10 = vld [vmem:[#allocation250_spill] sm:$0xff] }
 0x754   : > { %7283 = vst.msk [vmem:[%s11441_s14 + $0x60] sm:$0xff] %vm384_vm1, %v7142_v17  ;;  %v5512_v13 = vadd.f32 %v12737_v43, %v12736_v10 }
 0x755   : > { %v9366_v62 = vpop.eup %9365  ;;  %v6459_v32 = vmul.f32 %v11655_v41, %v11655_v41  ;;  %v6714_v9 = vmul.f32 0.7978846, %v6650_v38  ;;  %v9147_v38 = vld [vmem:[#allocation3 + $0x788] sm:$0xf0] }
 0x756   : > { %v6013_v44 = vpop.f32.mrf.mxu3  ;;  %v6841_v58 = vadd.f32 1.0, %v9366_v62 }
 0x757   : > { %v6014_v6 = vadd.f32 %v6013_v44, %v5845_v35  ;;  %v6523_v55 = vmul.f32 %v6459_v32, %v11655_v41  ;;  %9367 = vtanh.f32 %v6714_v9  ;;  %v12739_v32 = vld [vmem:[#allocation282_spill] sm:$0xff]  ;;  %v8395_v9 = vor.u32 %v9147_v38, %v8394_v0  ;;  %v12740_v44 = vld [vmem:[#allocation161_spill] sm:$0xff] }
 0x758   : > { %v6905_v46 = vmul.f32 0.5, %v6841_v58  ;;  %v5681_v58 = vadd.f32 %v12740_v44, %v5512_v13 }
 0x759   : > { %v6183_v7 = vadd.f32 %v12734_v47, %v6014_v6  ;;  %v7143_v37 = vpop.f32.mrf.mxu2  ;;  %v6587_v50 = vmul.f32 0.044715, %v6523_v55 }
 0x75a   : > { %v7144_v15 = vadd.f32 %v11430_v40, %v7143_v37  ;;  %v6969_v3 = vmul.f32 %v6905_v46, %v11617_v23  ;;  %v11686_v23 = vpop.f32.mrf.mxu1  ;;  %v12742_v37 = vld [vmem:[#allocation119_spill] sm:$0xff] }
 0x75b   : > { %v11674_v56 = vadd.f32 %v11163_v42, %v6183_v7  ;;  %v6651_v30 = vadd.f32 %v6587_v50, %v11655_v41  ;;  %v12741_v7 = vld [vmem:[#allocation252_spill] sm:$0xff]  ;;  %v12743_v50 = vld [vmem:[#allocation173_spill] sm:$0xff] }
 0x75c   : > { %7284 = vst.msk [vmem:[%s11441_s14 + $0x68] sm:$0xff] %vm384_vm1, %v7144_v15  ;;  %v7017_v61 = vpack.c.bf16 %v6969_v3, %v6968_v1  ;;  %v5514_v25 = vadd.f32 %v12742_v37, %v12741_v7  ;;  %v5850_v15 = vadd.f32 %v12743_v50, %v5681_v58  ;;  %v11703_v3 = vpop.f32.mrf.mxu0  ;;  %v12749_v50 = vld [vmem:[#allocation288_spill] sm:$0xff] }
 0x75d   : > { %v6460_v20 = vmul.f32 %v11674_v56, %v11674_v56  ;;  %v6715_v17 = vmul.f32 0.7978846, %v6651_v30  ;;  %v9368_v62 = vpop.eup %9367 }
 0x75e   : > { %v6015_v42 = vpop.f32.mrf.mxu3  ;;  %7185 = vmatmul.bf16.gmra.mxu2 %v7017_v61  ;;  %v6842_v6 = vadd.f32 1.0, %v9368_v62 }
 0x75f   : > { %v6524_v45 = vmul.f32 %v6460_v20, %v11674_v56  ;;  %v6016_v48 = vadd.f32 %v6015_v42, %v5847_v16  ;;  %9369 = vtanh.f32 %v6715_v17  ;;  %v12745_v42 = vld [vmem:[#allocation164_spill] sm:$0xff] }
 0x760   : > { %v6906_v61 = vmul.f32 0.5, %v6842_v6  ;;  %v5683_v0 = vadd.f32 %v12745_v42, %v5514_v25  ;;  %v12751_v42 = vld [vmem:[#allocation255_spill] sm:$0xff] }
 0x761   : > { %v6588_v11 = vmul.f32 0.044715, %v6524_v45  ;;  %v6185_v57 = vadd.f32 %v12739_v32, %v6016_v48  ;;  %v7146_v35 = vpop.f32.mrf.mxu2 }
 0x762   : > { %v7147_v63 = vadd.f32 %v11430_v40, %v7146_v35  ;;  %v11706_v13 = vpop.f32.mrf.mxu1  ;;  %v6970_v45 = vmul.f32 %v6906_v61, %v11638_v36  ;;  %v12746_v35 = vld [vmem:[#allocation254_spill] sm:$0xff] }
 0x763   : > { %v11693_v55 = vadd.f32 %v11188_v49, %v6185_v57  ;;  %6057 = vmatmul.bf16.gmra.mxu3 %v8395_v9  ;;  %v6652_v46 = vadd.f32 %v6588_v11, %v11674_v56  ;;  %v12747_v9 = vld [vmem:[#allocation122_spill] sm:$0xff] }
 0x764   : > { %7285 = vst.msk [vmem:[%s11441_s14 + $0x70] sm:$0xff] %vm384_vm1, %v7147_v63  ;;  %v5517_v44 = vadd.f32 %v12747_v9, %v12746_v35  ;;  %v12748_v63 = vld [vmem:[#allocation178_spill] sm:$0xff]  ;;  %v11725_v25 = vpop.f32.mrf.mxu0 }
 0x765   : > { %v9370_v47 = vpop.eup %9369  ;;  %v6461_v8 = vmul.f32 %v11693_v55, %v11693_v55  ;;  %v6716_v1 = vmul.f32 0.7978846, %v6652_v46  ;;  %v5852_v6 = vadd.f32 %v12748_v63, %v5683_v0  ;;  %v12752_v0 = vld [vmem:[#allocation125_spill] sm:$0xff] }
 0x766   : > { %v6018_v30 = vpop.f32.mrf.mxu3  ;;  %v6843_v49 = vadd.f32 1.0, %v9370_v47  ;;  %v9156_v47 = vld [vmem:[#allocation3 + $0x7d0] sm:$0xf0] }
 0x767   : > { %v6019_v10 = vadd.f32 %v6018_v30, %v5850_v15  ;;  %v6525_v43 = vmul.f32 %v6461_v8, %v11693_v55  ;;  %9371 = vtanh.f32 %v6716_v1 }
 0x768   : > { %v6907_v20 = vmul.f32 0.5, %v6843_v49  ;;  %v12750_v49 = vld [vmem:[#allocation167_spill] sm:$0xff] }
 0x769   : > { %v6188_v16 = vadd.f32 %v12744_v51, %v6019_v10  ;;  %v7148_v17 = vpop.f32.mrf.mxu2  ;;  %v6589_v38 = vmul.f32 0.044715, %v6525_v43  ;;  %v5686_v61 = vadd.f32 %v12750_v49, %v5517_v44 }
 0x76a   : > { %v7149_v62 = vadd.f32 %v11430_v40, %v7148_v17  ;;  %v6971_v48 = vmul.f32 %v6907_v20, %v11655_v41  ;;  %v8430_v41 = vld [vmem:[#allocation3 + $0x7b0] sm:$0xf]  ;;  %v11729_v10 = vpop.f32.mrf.mxu1 }
 0x76b   : > { %v11714_v11 = vadd.f32 %v11208_v22, %v6188_v16  ;;  %v6653_v32 = vadd.f32 %v6589_v38, %v11693_v55  ;;  %v8431_v30 = vor.u32 %v9156_v47, %v8430_v41  ;;  %v5519_v38 = vadd.f32 %v12752_v0, %v12751_v42 }
 0x76c   : > { %7286 = vst.msk [vmem:[%s11441_s14 + $0x78] sm:$0xff] %vm384_vm1, %v7149_v62  ;;  %v7018_v57 = vpack.c.bf16 %v6971_v48, %v6970_v45  ;;  %v12753_v45 = vld [vmem:[#allocation181_spill] sm:$0xff]  ;;  %v11746_v47 = vpop.f32.mrf.mxu0 }
 0x76d   : > { %v6462_v58 = vmul.f32 %v11714_v11, %v11714_v11  ;;  %v6717_v46 = vmul.f32 0.7978846, %v6653_v32  ;;  %v9372_v22 = vpop.eup %9371  ;;  %v5855_v48 = vadd.f32 %v12753_v45, %v5686_v61 }
 0x76e   : > { %v6020_v36 = vpop.f32.mrf.mxu3  ;;  %7190 = vmatmul.bf16.gmra.mxu2 %v7018_v57  ;;  %v6844_v20 = vadd.f32 1.0, %v9372_v22 }
 0x76f   : > { %v6526_v7 = vmul.f32 %v6462_v58, %v11714_v11  ;;  %v6021_v37 = vadd.f32 %v6020_v36, %v5852_v6  ;;  %9373 = vtanh.f32 %v6717_v46  ;;  %v12754_v46 = vld [vmem:[#allocation171_spill] sm:$0xff] }
 0x770   : > { %v6908_v9 = vmul.f32 0.5, %v6844_v20  ;;  %v5688_v36 = vadd.f32 %v12754_v46, %v5519_v38 }
 0x771   : > { %v6590_v8 = vmul.f32 0.044715, %v6526_v7  ;;  %v6190_v15 = vadd.f32 %v12749_v50, %v6021_v37  ;;  %v7151_v1 = vpop.f32.mrf.mxu2 }
 0x772   : > { %v7152_v43 = vadd.f32 %v11430_v40, %v7151_v1  ;;  %v6972_v7 = vmul.f32 %v6908_v9, %v11674_v56  ;;  %v12755_v1 = vld [vmem:[#allocation257_spill] sm:$0xff] }
 0x773   : > { %v11733_v51 = vadd.f32 %v11232_v39, %v6190_v15  ;;  %6062 = vmatmul.bf16.gmra.mxu3 %v8431_v30  ;;  %v6654_v16 = vadd.f32 %v6590_v8, %v11714_v11  ;;  %v11755_v15 = vpop.f32.mrf.mxu1  ;;  %v12756_v30 = vld [vmem:[#allocation129_spill] sm:$0xff] }
 0x774   : > { %7287 = vst.msk [vmem:[%s11441_s14 + $0x80] sm:$0xff] %vm384_vm1, %v7152_v43  ;;  %v5522_v49 = vadd.f32 %v12756_v30, %v12755_v1  ;;  %v12757_v43 = vld [vmem:[#allocation186_spill] sm:$0xff] }
 0x775   : > { %v9374_v17 = vpop.eup %9373  ;;  %v6463_v62 = vmul.f32 %v11733_v51, %v11733_v51  ;;  %v6718_v32 = vmul.f32 0.7978846, %v6654_v16  ;;  %v5857_v56 = vadd.f32 %v12757_v43, %v5688_v36  ;;  %v9165_v16 = vld [vmem:[#allocation3 + $0x818] sm:$0xf0] }
 0x776   : > { %v6023_v57 = vpop.f32.mrf.mxu3  ;;  %v6845_v35 = vadd.f32 1.0, %v9374_v17 }
 0x777   : > { %v6024_v39 = vadd.f32 %v6023_v57, %v5855_v48  ;;  %v6527_v44 = vmul.f32 %v6463_v62, %v11733_v51  ;;  %9375 = vtanh.f32 %v6718_v32  ;;  %v12758_v32 = vld [vmem:[#allocation174_spill] sm:$0xff] }
 0x778   : > { %v6909_v58 = vmul.f32 0.5, %v6845_v35  ;;  %v5691_v57 = vadd.f32 %v12758_v32, %v5522_v49  ;;  %v12765_v32 = vld [vmem:[#allocation284_spill] sm:$0xff] }
 0x779   : > { %v6193_v63 = vadd.f32 %v11628_v14, %v6024_v39  ;;  %v7153_v6 = vpop.f32.mrf.mxu2  ;;  %v6591_v41 = vmul.f32 0.044715, %v6527_v44 }
 0x77a   : > { %v7154_v22 = vadd.f32 %v11430_v40, %v7153_v6  ;;  %v6973_v37 = vmul.f32 %v6909_v58, %v11693_v55  ;;  %v11772_v58 = vpop.f32.mrf.mxu0  ;;  %v12759_v6 = vld [vmem:[#allocation259_spill] sm:$0xff] }
 0x77b   : > { %v11752_v8 = vadd.f32 %v11632_v31, %v6193_v63  ;;  %v6655_v50 = vadd.f32 %v6591_v41, %v11733_v51  ;;  %v8466_v31 = vld [vmem:[#allocation3 + $0x7f8] sm:$0xf]  ;;  %v12761_v41 = vld [vmem:[#allocation281_spill] sm:$0xff] }
 0x77c   : > { %7288 = vst.msk [vmem:[%s11441_s14 + $0x88] sm:$0xff] %vm384_vm1, %v7154_v22  ;;  %v7019_v14 = vpack.c.bf16 %v6973_v37, %v6972_v7  ;;  %v8467_v48 = vor.u32 %v9165_v16, %v8466_v31  ;;  %v5860_v22 = vadd.f32 %v12761_v41, %v5691_v57  ;;  %v11781_v37 = vpop.f32.mrf.mxu1 }
 0x77d   : > { %v6464_v61 = vmul.f32 %v11752_v8, %v11752_v8  ;;  %v6719_v20 = vmul.f32 0.7978846, %v6655_v50  ;;  %v9376_v17 = vpop.eup %9375 }
 0x77e   : > { %v6025_v55 = vpop.f32.mrf.mxu3  ;;  %7195 = vmatmul.bf16.gmra.mxu2 %v7019_v14  ;;  %v6846_v9 = vadd.f32 1.0, %v9376_v17 }
 0x77f   : > { %v6528_v42 = vmul.f32 %v6464_v61, %v11752_v8  ;;  %v6026_v0 = vadd.f32 %v6025_v55, %v5857_v56  ;;  %9377 = vtanh.f32 %v6719_v20  ;;  %v12762_v56 = vld [vmem:[#allocation177_spill] sm:$0xff] }
 0x780   : > { %v6910_v14 = vmul.f32 0.5, %v6846_v9  ;;  %v9174_v9 = vld [vmem:[#allocation3 + $0x860] sm:$0xf0] }
 0x781   : > { %v6592_v38 = vmul.f32 0.044715, %v6528_v42  ;;  %v6195_v62 = vadd.f32 %v11651_v19, %v6026_v0  ;;  %v7156_v45 = vpop.f32.mrf.mxu2  ;;  %v12760_v19 = vld [vmem:[#allocation132_spill] sm:$0xff] }
 0x782   : > { %v7157_v35 = vadd.f32 %v11430_v40, %v7156_v45  ;;  %v5524_v46 = vadd.f32 %v12760_v19, %v12759_v6  ;;  %v6974_v16 = vmul.f32 %v6910_v14, %v11714_v11  ;;  %v11800_v11 = vpop.f32.mrf.mxu0 }
 0x783   : > { %v11769_v39 = vadd.f32 %v11658_v5, %v6195_v62  ;;  %6067 = vmatmul.bf16.gmra.mxu3 %v8467_v48  ;;  %v6656_v44 = vadd.f32 %v6592_v38, %v11752_v8  ;;  %v12764_v62 = vld [vmem:[#allocation135_spill] sm:$0xff] }
 0x784   : > { %7289 = vst.msk [vmem:[%s11441_s14 + $0x90] sm:$0xff] %vm384_vm1, %v7157_v35  ;;  %v5693_v20 = vadd.f32 %v12762_v56, %v5524_v46  ;;  %v11803_v19 = vpop.f32.mrf.mxu1 }
 0x785   : > { %v9378_v63 = vpop.eup %9377  ;;  %v6465_v36 = vmul.f32 %v11769_v39, %v11769_v39  ;;  %v6720_v7 = vmul.f32 0.7978846, %v6656_v44 }
 0x786   : > { %v6028_v5 = vpop.f32.mrf.mxu3  ;;  %v6847_v50 = vadd.f32 1.0, %v9378_v63  ;;  %v5862_v57 = vadd.f32 %v12765_v32, %v5693_v20  ;;  %v12769_v20 = vld [vmem:[#allocation287_spill] sm:$0xff]  ;;  %v12770_v32 = vld [vmem:[#allocation184_spill] sm:$0xff] }
 0x787   : > { %v6029_v1 = vadd.f32 %v6028_v5, %v5860_v22  ;;  %v6529_v30 = vmul.f32 %v6465_v36, %v11769_v39  ;;  %9379 = vtanh.f32 %v6720_v7  ;;  %v12766_v7 = vld [vmem:[#allocation180_spill] sm:$0xff] }
 0x788   : > { %v6911_v49 = vmul.f32 0.5, %v6847_v50 }
 0x789   : > { %v6198_v61 = vadd.f32 %v11677_v33, %v6029_v1  ;;  %v7158_v43 = vpop.f32.mrf.mxu2  ;;  %v6593_v55 = vmul.f32 0.044715, %v6529_v30  ;;  %v12763_v33 = vld [vmem:[#allocation261_spill] sm:$0xff] }
 0x78a   : > { %v7159_v31 = vadd.f32 %v11430_v40, %v7158_v43  ;;  %v6975_v17 = vmul.f32 %v6911_v49, %v11733_v51  ;;  %v5527_v45 = vadd.f32 %v12764_v62, %v12763_v33  ;;  %v12767_v49 = vld [vmem:[#allocation263_spill] sm:$0xff] }
 0x78b   : > { %v11790_v42 = vadd.f32 %v11686_v23, %v6198_v61  ;;  %v6657_v0 = vadd.f32 %v6593_v55, %v11769_v39  ;;  %v8502_v23 = vld [vmem:[#allocation3 + $0x840] sm:$0xf]  ;;  %v12768_v61 = vld [vmem:[#allocation138_spill] sm:$0xff] }
 0x78c   : > { %7290 = vst.msk [vmem:[%s11441_s14 + $0x98] sm:$0xff] %vm384_vm1, %v7159_v31  ;;  %v7020_v38 = vpack.c.bf16 %v6975_v17, %v6974_v16  ;;  %v8503_v22 = vor.u32 %v9174_v9, %v8502_v23  ;;  %v5696_v5 = vadd.f32 %v12766_v7, %v5527_v45  ;;  %v5529_v43 = vadd.f32 %v12768_v61, %v12767_v49  ;;  %v11829_v7 = vld [vmem:[%s12232_s6] ss:$0 sm:$0xff] }
 0x78d   : > { %v6466_v48 = vmul.f32 %v11790_v42, %v11790_v42  ;;  %v6721_v35 = vmul.f32 0.7978846, %v6657_v0  ;;  %v9380_v44 = vpop.eup %9379  ;;  %v2211_v0 = vld [vmem:[#allocation2 + $0x349] sm:$0xff] }
 0x78e   : > { %v6030_v51 = vpop.f32.mrf.mxu3  ;;  %7200 = vmatmul.bf16.gmra.mxu2 %v7020_v38  ;;  %v6848_v14 = vadd.f32 1.0, %v9380_v44  ;;  %v5865_v55 = vadd.f32 %v12769_v20, %v5696_v5  ;;  %v2212_v38 = vld [vmem:[#allocation2 + $0x351] sm:$0xff]  ;;  %v2275_v9 = vpack.c.bf16 %v2211_v0, %v2211_v0 }
 0x78f   : > { %v6530_v63 = vmul.f32 %v6466_v48, %v11790_v42  ;;  %v6031_v6 = vadd.f32 %v6030_v51, %v5862_v57  ;;  %9381 = vtanh.f32 %v6721_v35  ;;  %v11820_v48 = vpop.f32.mrf.mxu0  ;;  %v5698_v57 = vadd.f32 %v12770_v32, %v5529_v43  ;;  %v9449_v51 = vld [vmem:[#allocation2 + $0x8] sm:$0xff]  ;;  %v12771_v43 = vld [vmem:[#allocation264_spill] sm:$0xff] }
 0x790   : > { %v6912_v17 = vmul.f32 0.5, %v6848_v14  ;;  %v2084_v23 = vpack.c.bf16 %v9449_v51, %v9449_v51  ;;  %v2403_v44 = vld [vmem:[#allocation2 + $0x34a] sm:$0xff]  ;;  %2339 = vst [vmem:[#allocation3 + $0x8d4] sm:$0xf] %v2275_v9 }
 0x791   : > { %v6594_v46 = vmul.f32 0.044715, %v6530_v63  ;;  %v6200_v36 = vadd.f32 %v11703_v3, %v6031_v6  ;;  %v7161_v41 = vpop.f32.mrf.mxu2  ;;  %v2404_v63 = vld [vmem:[#allocation2 + $0x352] sm:$0xff] }
 0x792   : > { %v7162_v50 = vadd.f32 %v11430_v40, %v7161_v41  ;;  %v2276_v41 = vpack.c.bf16 %v2212_v38, %v2212_v38  ;;  %2148 = vst [vmem:[#allocation3 + $0x8f4] sm:$0xf] %v2084_v23  ;;  %v2468_v61 = vpack.c.bf16 %v2404_v63, %v2404_v63  ;;  %v12774_v38 = vld [vmem:[#allocation188_spill] sm:$0xff] }
 0x793   : > { %v11809_v1 = vadd.f32 %v11706_v13, %v6200_v36  ;;  %6072 = vmatmul.bf16.gmra.mxu3 %v8503_v22  ;;  %v6658_v30 = vadd.f32 %v6594_v46, %v11790_v42  ;;  %v2019_v13 = vld [vmem:[#allocation2 + $0x348] sm:$0xff]  ;;  %v11824_v22 = vpop.f32.mrf.mxu1 }
 0x794   : > { %7291 = vst.msk [vmem:[%s11441_s14 + $0xa0] sm:$0xff] %vm384_vm1, %v7162_v50  ;;  %v2083_v45 = vpack.c.bf16 %v2019_v13, %v2019_v13  ;;  %v6976_v50 = vmul.f32 %v6912_v17, %v11752_v8 }
 0x795   : > { %v9382_v56 = vpop.eup %9381  ;;  %v6467_v3 = vmul.f32 %v11809_v1, %v11809_v1  ;;  %v6722_v31 = vmul.f32 0.7978846, %v6658_v30  ;;  %2340 = vst [vmem:[#allocation3 + $0x8f8] sm:$0xf] %v2276_v41 }
 0x796   : > { %v6033_v40 = vpop.f32.mrf.mxu3  ;;  %v6849_v16 = vadd.f32 1.0, %v9382_v56  ;;  %2147 = vst [vmem:[#allocation3 + $0x8d0] sm:$0xf] %v2083_v45  ;;  %v12772_v56 = vld [vmem:[#allocation140_spill] sm:$0xff] }
 0x797   : > { %v6531_v33 = vmul.f32 %v6467_v3, %v11809_v1  ;;  %v6034_v62 = vadd.f32 %v6033_v40, %v5865_v55  ;;  %9383 = vtanh.f32 %v6722_v31  ;;  %v5532_v3 = vadd.f32 %v12772_v56, %v12771_v43  ;;  %v12773_v55 = vld [vmem:[#allocation291_spill] sm:$0xff]  ;;  %2532 = vst [vmem:[#allocation3 + $0x8fc] sm:$0xf] %v2468_v61  ;;  %v9188_v9 = vld [vmem:[#allocation3 + $0x8d4] sm:$0xf] }
 0x798   : > { %v6913_v35 = vmul.f32 0.5, %v6849_v16  ;;  %v9183_v16 = vld [vmem:[#allocation3 + $0x8a8] sm:$0xf0] }
 0x799   : > { %v6595_v6 = vmul.f32 0.044715, %v6531_v33  ;;  %v6203_v46 = vadd.f32 %v11725_v25, %v6034_v62  ;;  %v7163_v36 = vpop.f32.mrf.mxu2  ;;  %v2467_v25 = vpack.c.bf16 %v2403_v44, %v2403_v44  ;;  %v5701_v33 = vadd.f32 %v12774_v38, %v5532_v3 }
 0x79a   : > { %v7164_v5 = vadd.f32 %v11829_v7, %v7163_v36  ;;  %v6977_v14 = vmul.f32 %v6913_v35, %v11769_v39  ;;  %v5867_v39 = vadd.f32 %v12773_v55, %v5698_v57  ;;  %v11848_v35 = vpop.f32.mrf.mxu0 }
 0x79b   : > { %v11835_v30 = vadd.f32 %v11729_v10, %v6203_v46  ;;  %v6659_v49 = vadd.f32 %v6595_v6, %v11809_v1  ;;  %v8538_v10 = vld [vmem:[#allocation3 + $0x888] sm:$0xf]  ;;  %2531 = vst [vmem:[#allocation3 + $0x8d8] sm:$0xf] %v2467_v25  ;;  %v11855_v6 = vpop.f32.mrf.mxu1 }
 0x79c   : > { %7292 = vst.msk [vmem:[%s11441_s14 + $0xa8] sm:$0xff] %vm384_vm1, %v7164_v5  ;;  %v7021_v20 = vpack.c.bf16 %v6977_v14, %v6976_v50  ;;  %v8539_v57 = vor.u32 %v9183_v16, %v8538_v10  ;;  %v12775_v46 = vld [vmem:[#allocation293_spill] sm:$0xff]  ;;  %v8576_v36 = vld [vmem:[#allocation3 + $0x8f4] sm:$0xf0]  ;;  %v12776_v5 = vld [vmem:[#allocation266_spill] sm:$0xff] }
 0x79d   : > { %v6468_v8 = vmul.f32 %v11835_v30, %v11835_v30  ;;  %v6723_v31 = vmul.f32 0.7978846, %v6659_v49  ;;  %v9384_v17 = vpop.eup %9383  ;;  %v12777_v50 = vld [vmem:[#allocation143_spill] sm:$0xff]  ;;  %v8579_v49 = vor.u32 %v9188_v9, %v8576_v36  ;;  %v12780_v9 = vld [vmem:[#allocation146_spill] sm:$0xff] }
 0x79e   : > { %v6035_v40 = vpop.f32.mrf.mxu3  ;;  %7205 = vmatmul.bf16.gmra.mxu2 %v7021_v20  ;;  %v6850_v23 = vadd.f32 1.0, %v9384_v17  ;;  %v5534_v14 = vadd.f32 %v12777_v50, %v12776_v5  ;;  %v9193_v20 = vld [vmem:[#allocation3 + $0x8f8] sm:$0xf0] }
 0x79f   : > { %v6532_v13 = vmul.f32 %v6468_v8, %v11835_v30  ;;  %v6036_v0 = vadd.f32 %v6035_v40, %v5867_v39  ;;  %9385 = vtanh.f32 %v6723_v31  ;;  %6251 = vmatmul.bf16.gmra.mxu0 %v8579_v49  ;;  %v12778_v17 = vld [vmem:[#allocation191_spill] sm:$0xff] }
 0x7a0   : > { %v6914_v3 = vmul.f32 0.5, %v6850_v23  ;;  %v12779_v23 = vld [vmem:[#allocation268_spill] sm:$0xff] }
 0x7a1   : > { %v6596_v62 = vmul.f32 0.044715, %v6532_v13  ;;  %v6205_v45 = vadd.f32 %v11746_v47, %v6036_v0  ;;  %v7166_v32 = vpop.f32.mrf.mxu2  ;;  %v5870_v47 = vadd.f32 %v12775_v46, %v5701_v33  ;;  %v5703_v13 = vadd.f32 %v12778_v17, %v5534_v14  ;;  %v12781_v46 = vld [vmem:[#allocation295_spill] sm:$0xff] }
 0x7a2   : > { %v7167_v51 = vadd.f32 %v11829_v7, %v7166_v32  ;;  %v6978_v38 = vmul.f32 %v6914_v3, %v11790_v42  ;;  %v11874_v32 = vpop.f32.mrf.mxu0 }
 0x7a3   : > { %v11852_v44 = vadd.f32 %v11755_v15, %v6205_v45  ;;  %6077 = vmatmul.bf16.gmra.mxu3 %v8539_v57  ;;  %v6660_v63 = vadd.f32 %v6596_v62, %v11835_v30  ;;  %v8582_v15 = vld [vmem:[#allocation3 + $0x8d8] sm:$0xf]  ;;  %v8574_v57 = vld [vmem:[#allocation3 + $0x8d0] sm:$0xf] }
 0x7a4   : > { %7293 = vst.msk [vmem:[%s11441_s14 + $0xb0] sm:$0xff] %vm384_vm1, %v7167_v51  ;;  %v8583_v39 = vor.u32 %v9193_v20, %v8582_v15  ;;  %v9192_v51 = vld [vmem:[#allocation3 + $0x8f0] sm:$0xf0] }
 0x7a5   : > { %v9386_v41 = vpop.eup %9385  ;;  %v6469_v25 = vmul.f32 %v11852_v44, %v11852_v44  ;;  %v6724_v61 = vmul.f32 0.7978846, %v6660_v63  ;;  %v5537_v63 = vadd.f32 %v12780_v9, %v12779_v23  ;;  %v8575_v14 = vor.u32 %v9192_v51, %v8574_v57 }
 0x7a6   : > { %v6038_v43 = vpop.f32.mrf.mxu3  ;;  %v6851_v56 = vadd.f32 1.0, %v9386_v41  ;;  %6420 = vmatmul.bf16.gmra.mxu1 %v8583_v39  ;;  %v12783_v39 = vld [vmem:[#allocation270_spill] sm:$0xff] }
 0x7a7   : > { %v6533_v8 = vmul.f32 %v6469_v25, %v11852_v44  ;;  %v6039_v55 = vadd.f32 %v6038_v43, %v5870_v47  ;;  %9387 = vtanh.f32 %v6724_v61  ;;  %v12782_v61 = vld [vmem:[#allocation194_spill] sm:$0xff] }
 0x7a8   : > { %v6915_v31 = vmul.f32 0.5, %v6851_v56  ;;  %v5706_v43 = vadd.f32 %v12782_v61, %v5537_v63  ;;  %v12786_v63 = vld [vmem:[#allocation197_spill] sm:$0xff] }
 0x7a9   : > { %v6597_v40 = vmul.f32 0.044715, %v6533_v8  ;;  %v6208_v10 = vadd.f32 %v11772_v58, %v6039_v55  ;;  %v7168_v16 = vpop.f32.mrf.mxu2 }
 0x7aa   : > { %v7169_v0 = vadd.f32 %v11829_v7, %v7168_v16  ;;  %v6979_v33 = vmul.f32 %v6915_v31, %v11809_v1  ;;  %v5872_v1 = vadd.f32 %v12781_v46, %v5703_v13  ;;  %v12784_v31 = vld [vmem:[#allocation149_spill] sm:$0xff]  ;;  %v11900_v13 = vpop.f32.mrf.mxu0 }
 0x7ab   : > { %v11871_v62 = vadd.f32 %v11781_v37, %v6208_v10  ;;  %v6661_v45 = vadd.f32 %v6597_v40, %v11852_v44  ;;  %v11883_v37 = vpop.f32.mrf.mxu1  ;;  %v5539_v40 = vadd.f32 %v12784_v31, %v12783_v39  ;;  %v12785_v10 = vld [vmem:[#allocation4_spill] sm:$0xff] }
 0x7ac   : > { %7294 = vst.msk [vmem:[%s11441_s14 + $0xb8] sm:$0xff] %vm384_vm1, %v7169_v0  ;;  %v7022_v58 = vpack.c.bf16 %v6979_v33, %v6978_v38  ;;  %v5875_v16 = vadd.f32 %v12785_v10, %v5706_v43  ;;  %v12790_v39 = vld [vmem:[#allocation200_spill] sm:$0xff] }
 0x7ad   : > { %v6470_v42 = vmul.f32 %v11871_v62, %v11871_v62  ;;  %v6725_v47 = vmul.f32 0.7978846, %v6661_v45  ;;  %v9388_v41 = vpop.eup %9387 }
 0x7ae   : > { %v6040_v36 = vpop.f32.mrf.mxu3  ;;  %7210 = vmatmul.bf16.gmra.mxu2 %v7022_v58  ;;  %v6852_v3 = vadd.f32 1.0, %v9388_v41 }
 0x7af   : > { %v6534_v5 = vmul.f32 %v6470_v42, %v11871_v62  ;;  %v6041_v50 = vadd.f32 %v6040_v36, %v5872_v1  ;;  %9389 = vtanh.f32 %v6725_v47  ;;  %v5708_v42 = vadd.f32 %v12786_v63, %v5539_v40 }
 0x7b0   : > { %v6916_v38 = vmul.f32 0.5, %v6852_v3 }
 0x7b1   : > { %v6598_v25 = vmul.f32 0.044715, %v6534_v5  ;;  %v6210_v49 = vadd.f32 %v11800_v11, %v6041_v50  ;;  %v7171_v15 = vpop.f32.mrf.mxu2  ;;  %v12787_v50 = vld [vmem:[#allocation272_spill] sm:$0xff] }
 0x7b2   : > { %v7172_v56 = vadd.f32 %v11829_v7, %v7171_v15  ;;  %v6980_v1 = vmul.f32 %v6916_v38, %v11835_v30  ;;  %v12792_v38 = vld [vmem:[#allocation154_spill] sm:$0xff] }
 0x7b3   : > { %v11890_v20 = vadd.f32 %v11803_v19, %v6210_v49  ;;  %6082 = vmatmul.bf16.gmra.mxu3 %v8575_v14  ;;  %v6662_v8 = vadd.f32 %v6598_v25, %v11871_v62  ;;  %v11903_v58 = vpop.f32.mrf.mxu1  ;;  %v12789_v49 = vld [vmem:[#allocation5_spill] sm:$0xff] }
 0x7b4   : > { %7295 = vst.msk [vmem:[%s11441_s14 + $0xc0] sm:$0xff] %vm384_vm1, %v7172_v56  ;;  %v5877_v15 = vadd.f32 %v12789_v49, %v5708_v42  ;;  %v11922_v56 = vpop.f32.mrf.mxu0 }
 0x7b5   : > { %v9390_v55 = vpop.eup %9389  ;;  %v6471_v11 = vmul.f32 %v11890_v20, %v11890_v20  ;;  %v6726_v17 = vmul.f32 0.7978846, %v6662_v8 }
 0x7b6   : > { %v6043_v0 = vpop.f32.mrf.mxu3  ;;  %v6853_v19 = vadd.f32 1.0, %v9390_v55 }
 0x7b7   : > { %v6535_v33 = vmul.f32 %v6471_v11, %v11890_v20  ;;  %v6044_v45 = vadd.f32 %v6043_v0, %v5875_v16  ;;  %9391 = vtanh.f32 %v6726_v17 }
 0x7b8   : > { %v6917_v57 = vmul.f32 0.5, %v6853_v19  ;;  %v12791_v19 = vld [vmem:[#allocation273_spill] sm:$0xff] }
 0x7b9   : > { %v6599_v51 = vmul.f32 0.044715, %v6535_v33  ;;  %v6213_v23 = vadd.f32 %v11820_v48, %v6044_v45  ;;  %v7173_v9 = vpop.f32.mrf.mxu2  ;;  %v12788_v48 = vld [vmem:[#allocation152_spill] sm:$0xff]  ;;  %v5544_v33 = vadd.f32 %v12792_v38, %v12791_v19 }
 0x7ba   : > { %v7174_v46 = vadd.f32 %v11829_v7, %v7173_v9  ;;  %v6981_v47 = vmul.f32 %v6917_v57, %v11852_v44  ;;  %v5542_v14 = vadd.f32 %v12788_v48, %v12787_v50 }
 0x7bb   : > { %v11911_v36 = vadd.f32 %v11824_v22, %v6213_v23  ;;  %v6663_v41 = vadd.f32 %v6599_v51, %v11890_v20  ;;  %v11926_v40 = vpop.f32.mrf.mxu1 }
 0x7bc   : > { %7296 = vst.msk [vmem:[%s11441_s14 + $0xc8] sm:$0xff] %vm384_vm1, %v7174_v46  ;;  %v7023_v5 = vpack.c.bf16 %v6981_v47, %v6980_v1  ;;  %v5711_v31 = vadd.f32 %v12790_v39, %v5542_v14  ;;  %v11943_v50 = vpop.f32.mrf.mxu0 }
 0x7bd   : > { %v6472_v25 = vmul.f32 %v11911_v36, %v11911_v36  ;;  %v6727_v61 = vmul.f32 0.7978846, %v6663_v41  ;;  %v9392_v44 = vpop.eup %9391  ;;  %v12793_v41 = vld [vmem:[#allocation202_spill] sm:$0xff] }
 0x7be   : > { %v6045_v30 = vpop.f32.mrf.mxu3  ;;  %7215 = vmatmul.bf16.gmra.mxu2 %v7023_v5  ;;  %v6854_v10 = vadd.f32 1.0, %v9392_v44  ;;  %v5880_v45 = vadd.f32 %v11093_v21, %v5711_v31  ;;  %v5713_v5 = vadd.f32 %v12793_v41, %v5544_v33 }
 0x7bf   : > { %v6536_v22 = vmul.f32 %v6472_v25, %v11911_v36  ;;  %v6046_v43 = vadd.f32 %v6045_v30, %v5877_v15  ;;  %9393 = vtanh.f32 %v6727_v61  ;;  %v12794_v61 = vld [vmem:[#allocation275_spill] sm:$0xff]  ;;  %v12795_v30 = vld [vmem:[#allocation157_spill] sm:$0xff] }
 0x7c0   : > { %v6918_v9 = vmul.f32 0.5, %v6854_v10  ;;  %v5547_v44 = vadd.f32 %v12795_v30, %v12794_v61 }
 0x7c1   : > { %v6600_v3 = vmul.f32 0.044715, %v6536_v22  ;;  %v6215_v8 = vadd.f32 %v11848_v35, %v6046_v43  ;;  %v7176_v55 = vpop.f32.mrf.mxu2 }
 0x7c2   : > { %v7177_v11 = vadd.f32 %v11829_v7, %v7176_v55  ;;  %v6982_v48 = vmul.f32 %v6918_v9, %v11871_v62  ;;  %v5882_v62 = vadd.f32 %v11116_v53, %v5713_v5 }
 0x7c3   : > { %v11930_v16 = vadd.f32 %v11855_v6, %v6215_v8  ;;  %v6664_v17 = vadd.f32 %v6600_v3, %v11911_v36  ;;  %v11952_v15 = vpop.f32.mrf.mxu1 }
 0x7c4   : > { %7297 = vst.msk [vmem:[%s11441_s14 + $0xd0] sm:$0xff] %vm384_vm1, %v7177_v11  ;;  %v12796_v11 = vld [vmem:[#allocation204_spill] sm:$0xff]  ;;  %v6227_v38 = vpop.f32.mrf.mxu0 }
 0x7c5   : > { %v9394_v0 = vpop.eup %9393  ;;  %v6473_v35 = vmul.f32 %v11930_v16, %v11930_v16  ;;  %v6728_v57 = vmul.f32 0.7978846, %v6664_v17  ;;  %v5716_v10 = vadd.f32 %v12796_v11, %v5547_v44  ;;  %v12800_v44 = vld [vmem:[#allocation123_spill] sm:$0xff]  ;;  %v12802_v11 = vld [vmem:[#allocation208_spill] sm:$0xff] }
 0x7c6   : > { %v6048_v51 = vpop.f32.mrf.mxu3  ;;  %v6855_v23 = vadd.f32 1.0, %v9394_v0 }
 0x7c7   : > { %v6537_v6 = vmul.f32 %v6473_v35, %v11930_v16  ;;  %v6049_v63 = vadd.f32 %v6048_v51, %v5880_v45  ;;  %9395 = vtanh.f32 %v6728_v57  ;;  %v12797_v35 = vld [vmem:[#allocation276_spill] sm:$0xff]  ;;  %v5885_v51 = vadd.f32 %v11136_v2, %v5716_v10 }
 0x7c8   : > { %v6919_v42 = vmul.f32 0.5, %v6855_v23  ;;  %v12798_v45 = vld [vmem:[#allocation160_spill] sm:$0xff] }
 0x7c9   : > { %v6601_v46 = vmul.f32 0.044715, %v6537_v6  ;;  %v6218_v1 = vadd.f32 %v11874_v32, %v6049_v63  ;;  %v7178_v47 = vpop.f32.mrf.mxu2  ;;  %v5549_v57 = vadd.f32 %v12798_v45, %v12797_v35  ;;  %v12803_v35 = vld [vmem:[#allocation127_spill] sm:$0xff]  ;;  %v12804_v45 = vld [vmem:[#allocation166_spill] sm:$0xff] }
 0x7ca   : > { %v7179_v21 = vadd.f32 %v11829_v7, %v7178_v47  ;;  %v6983_v14 = vmul.f32 %v6919_v42, %v11890_v20 }
 0x7cb   : > { %v11949_v25 = vadd.f32 %v11883_v37, %v6218_v1  ;;  %v6665_v49 = vadd.f32 %v6601_v46, %v11930_v16  ;;  %v6396_v9 = vpop.f32.mrf.mxu1 }
 0x7cc   : > { %7298 = vst.msk [vmem:[%s11441_s14 + $0xd8] sm:$0xff] %vm384_vm1, %v7179_v21  ;;  %v7024_v32 = vpack.c.bf16 %v6983_v14, %v6982_v48  ;;  %v12799_v21 = vld [vmem:[#allocation206_spill] sm:$0xff] }
 0x7cd   : > { %v6474_v22 = vmul.f32 %v11949_v25, %v11949_v25  ;;  %v6729_v43 = vmul.f32 0.7978846, %v6665_v49  ;;  %v9396_v37 = vpop.eup %9395  ;;  %v5718_v48 = vadd.f32 %v12799_v21, %v5549_v57  ;;  %v5554_v57 = vadd.f32 %v12804_v45, %v12803_v35 }
 0x7ce   : > { %v6050_v20 = vpop.f32.mrf.mxu3  ;;  %7220 = vmatmul.bf16.gmra.mxu2 %v7024_v32  ;;  %v6856_v0 = vadd.f32 1.0, %v9396_v37 }
 0x7cf   : > { %v6538_v3 = vmul.f32 %v6474_v22, %v11949_v25  ;;  %v6051_v8 = vadd.f32 %v6050_v20, %v5882_v62  ;;  %9397 = vtanh.f32 %v6729_v43  ;;  %v5887_v43 = vadd.f32 %v11159_v12, %v5718_v48 }
 0x7d0   : > { %v6920_v63 = vmul.f32 0.5, %v6856_v0 }
 0x7d1   : > { %v6602_v55 = vmul.f32 0.044715, %v6538_v3  ;;  %v6220_v39 = vadd.f32 %v11900_v13, %v6051_v8  ;;  %v7181_v31 = vpop.f32.mrf.mxu2 }
 0x7d2   : > { %v7182_v17 = vadd.f32 %v11829_v7, %v7181_v31  ;;  %v6984_v2 = vmul.f32 %v6920_v63, %v11911_v36  ;;  %v6229_v36 = vpop.f32.mrf.mxu0 }
 0x7d3   : > { %v11966_v53 = vadd.f32 %v11903_v58, %v6220_v39  ;;  %v6666_v19 = vadd.f32 %v6602_v55, %v11949_v25  ;;  %v6398_v8 = vpop.f32.mrf.mxu1 }
 0x7d4   : > { %7299 = vst.msk [vmem:[%s11441_s14 + $0xe0] sm:$0xff] %vm384_vm1, %v7182_v17 }
 0x7d5   : > { %v9398_v33 = vpop.eup %9397  ;;  %v6475_v13 = vmul.f32 %v11966_v53, %v11966_v53  ;;  %v6730_v23 = vmul.f32 0.7978846, %v6666_v19 }
 0x7d6   : > { %v6053_v6 = vpop.f32.mrf.mxu3  ;;  %v6857_v58 = vadd.f32 1.0, %v9398_v33 }
 0x7d7   : > { %v6539_v42 = vmul.f32 %v6475_v13, %v11966_v53  ;;  %v6054_v46 = vadd.f32 %v6053_v6, %v5885_v51  ;;  %9399 = vtanh.f32 %v6730_v23 }
 0x7d8   : > { %v6921_v1 = vmul.f32 0.5, %v6857_v58 }
 0x7d9   : > { %v6603_v47 = vmul.f32 0.044715, %v6539_v42  ;;  %v6223_v41 = vadd.f32 %v11922_v56, %v6054_v46  ;;  %v7183_v5 = vpop.f32.mrf.mxu2  ;;  %v12801_v56 = vld [vmem:[#allocation163_spill] sm:$0xff] }
 0x7da   : > { %v7184_v14 = vadd.f32 %v11829_v7, %v7183_v5  ;;  %v6985_v49 = vmul.f32 %v6921_v1, %v11930_v16  ;;  %v5552_v22 = vadd.f32 %v12801_v56, %v12800_v44  ;;  %v6232_v42 = vpop.f32.mrf.mxu0  ;;  %v12805_v5 = vld [vmem:[#allocation210_spill] sm:$0xff] }
 0x7db   : > { %v11983_v32 = vadd.f32 %v11926_v40, %v6223_v41  ;;  %v6667_v61 = vadd.f32 %v6603_v47, %v11966_v53  ;;  %v5723_v21 = vadd.f32 %v12805_v5, %v5554_v57  ;;  %v6401_v48 = vpop.f32.mrf.mxu1  ;;  %v12806_v44 = vld [vmem:[#allocation278_spill] sm:$0xff] }
 0x7dc   : > { %7300 = vst.msk [vmem:[%s11441_s14 + $0xe8] sm:$0xff] %vm384_vm1, %v7184_v14  ;;  %v7025_v30 = vpack.c.bf16 %v6985_v49, %v6984_v2  ;;  %v5721_v10 = vadd.f32 %v12802_v11, %v5552_v22 }
 0x7dd   : > { %v6476_v62 = vmul.f32 %v11983_v32, %v11983_v32  ;;  %v6731_v20 = vmul.f32 0.7978846, %v6667_v61  ;;  %v9400_v40 = vpop.eup %9399 }
 0x7de   : > { %v6055_v16 = vpop.f32.mrf.mxu3  ;;  %7225 = vmatmul.bf16.gmra.mxu2 %v7025_v30  ;;  %v6858_v12 = vadd.f32 1.0, %v9400_v40  ;;  %v5890_v13 = vadd.f32 %v11180_v24, %v5721_v10 }
 0x7df   : > { %v6540_v37 = vmul.f32 %v6476_v62, %v11983_v32  ;;  %v6056_v3 = vadd.f32 %v6055_v16, %v5887_v43  ;;  %9401 = vtanh.f32 %v6731_v20  ;;  %v5892_v62 = vadd.f32 %v11203_v18, %v5723_v21 }
 0x7e0   : > { %v6922_v58 = vmul.f32 0.5, %v6858_v12 }
 0x7e1   : > { %v6604_v55 = vmul.f32 0.044715, %v6540_v37  ;;  %v6225_v39 = vadd.f32 %v11943_v50, %v6056_v3  ;;  %v7186_v31 = vpop.f32.mrf.mxu2  ;;  %v12808_v3 = vld [vmem:[#allocation213_spill] sm:$0xff] }
 0x7e2   : > { %v7187_v17 = vadd.f32 %v11829_v7, %v7186_v31  ;;  %v6986_v24 = vmul.f32 %v6922_v58, %v11949_v25 }
 0x7e3   : > { %v11998_v0 = vadd.f32 %v11952_v15, %v6225_v39  ;;  %v6668_v19 = vadd.f32 %v6604_v55, %v11983_v32  ;;  %v6234_v39 = vpop.f32.mrf.mxu0 }
 0x7e4   : > { %7301 = vst.msk [vmem:[%s11441_s14 + $0xf0] sm:$0xff] %vm384_vm1, %v7187_v17  ;;  %v6403_v17 = vpop.f32.mrf.mxu1 }
 0x7e5   : > { %v9402_v33 = vpop.eup %9401  ;;  %v6477_v50 = vmul.f32 %v11998_v0, %v11998_v0  ;;  %v6732_v51 = vmul.f32 0.7978846, %v6668_v19  ;;  %v12809_v19 = vld [vmem:[#allocation280_spill] sm:$0xff] }
 0x7e6   : > { %v6058_v23 = vpop.f32.mrf.mxu3  ;;  %v6859_v6 = vadd.f32 1.0, %v9402_v33  ;;  %v12810_v33 = vld [vmem:[#allocation172_spill] sm:$0xff] }
 0x7e7   : > { %v6541_v15 = vmul.f32 %v6477_v50, %v11998_v0  ;;  %v6059_v63 = vadd.f32 %v6058_v23, %v5890_v13  ;;  %9403 = vtanh.f32 %v6732_v51  ;;  %v5559_v35 = vadd.f32 %v12810_v33, %v12809_v19 }
 0x7e8   : > { %v6923_v46 = vmul.f32 0.5, %v6859_v6 }
 0x7e9   : > { %v6605_v1 = vmul.f32 0.044715, %v6541_v15  ;;  %v6228_v47 = vadd.f32 %v6227_v38, %v6059_v63  ;;  %v7188_v41 = vpop.f32.mrf.mxu2  ;;  %v12807_v38 = vld [vmem:[#allocation168_spill] sm:$0xff] }
 0x7ea   : > { %v7189_v14 = vadd.f32 %v11829_v7, %v7188_v41  ;;  %v6987_v2 = vmul.f32 %v6923_v46, %v11966_v53  ;;  %v5557_v56 = vadd.f32 %v12807_v38, %v12806_v44  ;;  %v12811_v46 = vld [vmem:[#allocation215_spill] sm:$0xff] }
 0x7eb   : > { %v12013_v49 = vadd.f32 %v6396_v9, %v6228_v47  ;;  %v6669_v61 = vadd.f32 %v6605_v1, %v11998_v0  ;;  %v5728_v1 = vadd.f32 %v12811_v46, %v5559_v35 }
 0x7ec   : > { %7302 = vst.msk [vmem:[%s11441_s14 + $0xf8] sm:$0xff] %vm384_vm1, %v7189_v14  ;;  %v7026_v30 = vpack.c.bf16 %v6987_v2, %v6986_v24  ;;  %v5726_v55 = vadd.f32 %v12808_v3, %v5557_v56  ;;  %v6237_v14 = vpop.f32.mrf.mxu0  ;;  %v12812_v2 = vld [vmem:[#allocation283_spill] sm:$0xff]  ;;  %v12815_v3 = vld [vmem:[#allocation286_spill] sm:$0xff] }
 0x7ed   : > { %v6478_v22 = vmul.f32 %v12013_v49, %v12013_v49  ;;  %v6733_v43 = vmul.f32 0.7978846, %v6669_v61  ;;  %v9404_v25 = vpop.eup %9403  ;;  %v5897_v44 = vadd.f32 %v11244_v29, %v5728_v1  ;;  %v12818_v1 = vld [vmem:[#allocation289_spill] sm:$0xff] }
 0x7ee   : > { %v6060_v20 = vpop.f32.mrf.mxu3  ;;  %7230 = vmatmul.bf16.gmra.mxu2 %v7026_v30  ;;  %v6860_v11 = vadd.f32 1.0, %v9404_v25  ;;  %v5895_v45 = vadd.f32 %v11227_v52, %v5726_v55  ;;  %v12814_v25 = vld [vmem:[#allocation217_spill] sm:$0xff]  ;;  %v12816_v55 = vld [vmem:[#allocation179_spill] sm:$0xff] }
 0x7ef   : > { %v6542_v53 = vmul.f32 %v6478_v22, %v12013_v49  ;;  %v6061_v9 = vadd.f32 %v6060_v20, %v5892_v62  ;;  %9405 = vtanh.f32 %v6733_v43 }
 0x7f1   : > { %v6606_v16 = vmul.f32 0.044715, %v6542_v53  ;;  %v6230_v40 = vadd.f32 %v6229_v36, %v6061_v9  ;;  %v7191_v37 = vpop.f32.mrf.mxu2 }
 0x7f2   : > { %v7192_v31 = vadd.f32 %v11829_v7, %v7191_v37 }
 0x7f3   : > { %v12026_v10 = vadd.f32 %v6398_v8, %v6230_v40  ;;  %v6670_v18 = vadd.f32 %v6606_v16, %v12013_v49  ;;  %v6924_v8 = vmul.f32 0.5, %v6860_v11 }
 0x7f4   : > { %7303 = vst.msk [vmem:[%s11441_s14 + $0x100] sm:$0xff] %vm384_vm1, %v7192_v31  ;;  %v5564_v31 = vadd.f32 %v12816_v55, %v12815_v3 }
 0x7f5   : > { %v9406_v12 = vpop.eup %9405  ;;  %v6479_v36 = vmul.f32 %v12026_v10, %v12026_v10  ;;  %v6734_v57 = vmul.f32 0.7978846, %v6670_v18  ;;  %v6988_v41 = vmul.f32 %v6924_v8, %v11983_v32  ;;  %v6406_v32 = vpop.f32.mrf.mxu1 }
 0x7f6   : > { %v6063_v50 = vpop.f32.mrf.mxu3  ;;  %v6861_v13 = vadd.f32 1.0, %v9406_v12  ;;  %v6239_v12 = vpop.f32.mrf.mxu0 }
 0x7f7   : > { %v6543_v51 = vmul.f32 %v6479_v36, %v12026_v10  ;;  %v6064_v23 = vadd.f32 %v6063_v50, %v5895_v45  ;;  %9407 = vtanh.f32 %v6734_v57 }
 0x7f8   : > { %v6925_v6 = vmul.f32 0.5, %v6861_v13 }
 0x7f9   : > { %v6607_v58 = vmul.f32 0.044715, %v6543_v51  ;;  %v6233_v15 = vadd.f32 %v6232_v42, %v6064_v23  ;;  %v7193_v63 = vpop.f32.mrf.mxu2  ;;  %v12813_v42 = vld [vmem:[#allocation175_spill] sm:$0xff]  ;;  %v12817_v51 = vld [vmem:[#allocation220_spill] sm:$0xff] }
 0x7fa   : > { %v7194_v47 = vadd.f32 %v11829_v7, %v7193_v63  ;;  %v6989_v52 = vmul.f32 %v6925_v6, %v11998_v0  ;;  %v5562_v61 = vadd.f32 %v12813_v42, %v12812_v2  ;;  %v5733_v23 = vadd.f32 %v12817_v51, %v5564_v31  ;;  %v12825_v51 = vld [vmem:[#allocation189_spill] sm:$0xff] }
 0x7fb   : > { %v12041_v5 = vadd.f32 %v6401_v48, %v6233_v15  ;;  %v6671_v21 = vadd.f32 %v6607_v58, %v12026_v10 }
 0x7fc   : > { %7304 = vst.msk [vmem:[%s11441_s14 + $0x108] sm:$0xff] %vm384_vm1, %v7194_v47  ;;  %v7027_v24 = vpack.c.bf16 %v6989_v52, %v6988_v41  ;;  %v5731_v53 = vadd.f32 %v12814_v25, %v5562_v61  ;;  %v12819_v47 = vld [vmem:[#allocation182_spill] sm:$0xff] }
 0x7fd   : > { %v6480_v30 = vmul.f32 %v12041_v5, %v12041_v5  ;;  %v6735_v38 = vmul.f32 0.7978846, %v6671_v21  ;;  %v9408_v48 = vpop.eup %9407  ;;  %v6408_v45 = vpop.f32.mrf.mxu1  ;;  %v5567_v41 = vadd.f32 %v12819_v47, %v12818_v1  ;;  %v5902_v21 = vadd.f32 %v11289_v26, %v5733_v23 }
 0x7fe   : > { %v6065_v0 = vpop.f32.mrf.mxu3  ;;  %7235 = vmatmul.bf16.gmra.mxu2 %v7027_v24  ;;  %v6862_v16 = vadd.f32 1.0, %v9408_v48  ;;  %v6242_v42 = vpop.f32.mrf.mxu0 }
 0x7ff   : > { %v6544_v56 = vmul.f32 %v6480_v30, %v12041_v5  ;;  %v6066_v22 = vadd.f32 %v6065_v0, %v5897_v44  ;;  %9409 = vtanh.f32 %v6735_v38  ;;  %v12820_v38 = vld [vmem:[#allocation222_spill] sm:$0xff] }
 0x801   : > { %v6608_v62 = vmul.f32 0.044715, %v6544_v56  ;;  %v6235_v43 = vadd.f32 %v6234_v39, %v6066_v22  ;;  %v7196_v20 = vpop.f32.mrf.mxu2  ;;  %v5900_v39 = vadd.f32 %v11266_v4, %v5731_v53 }
 0x802   : > { %v7197_v9 = vadd.f32 %v11829_v7, %v7196_v20  ;;  %v12822_v20 = vld [vmem:[#allocation185_spill] sm:$0xff] }
 0x803   : > { %v12054_v40 = vadd.f32 %v6403_v17, %v6235_v43  ;;  %v6672_v29 = vadd.f32 %v6608_v62, %v12041_v5  ;;  %v6926_v17 = vmul.f32 0.5, %v6862_v16  ;;  %v12821_v43 = vld [vmem:[#allocation290_spill] sm:$0xff] }
 0x804   : > { %7305 = vst.msk [vmem:[%s11441_s14 + $0x110] sm:$0xff] %vm384_vm1, %v7197_v9  ;;  %v5569_v25 = vadd.f32 %v12822_v20, %v12821_v43 }
 0x805   : > { %v9410_v37 = vpop.eup %9409  ;;  %v6481_v11 = vmul.f32 %v12054_v40, %v12054_v40  ;;  %v6736_v18 = vmul.f32 0.7978846, %v6672_v29  ;;  %v6990_v4 = vmul.f32 %v6926_v17, %v12013_v49  ;;  %v6411_v0 = vpop.f32.mrf.mxu1 }
 0x806   : > { %v6068_v19 = vpop.f32.mrf.mxu3  ;;  %v6863_v33 = vadd.f32 1.0, %v9410_v37  ;;  %v6244_v17 = vpop.f32.mrf.mxu0 }
 0x807   : > { %v6545_v35 = vmul.f32 %v6481_v11, %v12054_v40  ;;  %v6069_v36 = vadd.f32 %v6068_v19, %v5900_v39  ;;  %9411 = vtanh.f32 %v6736_v18  ;;  %v12823_v19 = vld [vmem:[#allocation224_spill] sm:$0xff] }
 0x808   : > { %v6927_v57 = vmul.f32 0.5, %v6863_v33  ;;  %v5738_v33 = vadd.f32 %v12823_v19, %v5569_v25 }
 0x809   : > { %v6609_v50 = vmul.f32 0.044715, %v6545_v35  ;;  %v6238_v13 = vadd.f32 %v6237_v14, %v6069_v36  ;;  %v7198_v8 = vpop.f32.mrf.mxu2 }
 0x80a   : > { %v7199_v6 = vadd.f32 %v11829_v7, %v7198_v8  ;;  %v6991_v58 = vmul.f32 %v6927_v57, %v12026_v10  ;;  %v12824_v8 = vld [vmem:[#allocation292_spill] sm:$0xff] }
 0x80b   : > { %v12069_v15 = vadd.f32 %v6406_v32, %v6238_v13  ;;  %v6673_v63 = vadd.f32 %v6609_v50, %v12054_v40  ;;  %v5736_v32 = vadd.f32 %v12820_v38, %v5567_v41  ;;  %v5572_v23 = vadd.f32 %v12825_v51, %v12824_v8  ;;  %v12832_v51 = vld [vmem:[#allocation233_spill] sm:$0xff] }
 0x80c   : > { %7306 = vst.msk [vmem:[%s11441_s14 + $0x118] sm:$0xff] %vm384_vm1, %v7199_v6  ;;  %v7028_v46 = vpack.c.bf16 %v6991_v58, %v6990_v4  ;;  %v5907_v4 = vadd.f32 %v11328_v60, %v5738_v33 }
 0x80d   : > { %v6482_v52 = vmul.f32 %v12069_v15, %v12069_v15  ;;  %v6737_v14 = vmul.f32 0.7978846, %v6673_v63  ;;  %v9412_v49 = vpop.eup %9411  ;;  %v5905_v9 = vadd.f32 %v11307_v54, %v5736_v32  ;;  %v6413_v50 = vpop.f32.mrf.mxu1 }
 0x80e   : > { %v6070_v24 = vpop.f32.mrf.mxu3  ;;  %7240 = vmatmul.bf16.gmra.mxu2 %v7028_v46  ;;  %v6864_v56 = vadd.f32 1.0, %v9412_v49 }
 0x80f   : > { %v6546_v10 = vmul.f32 %v6482_v52, %v12069_v15  ;;  %v6071_v2 = vadd.f32 %v6070_v24, %v5902_v21  ;;  %9413 = vtanh.f32 %v6737_v14  ;;  %v12826_v52 = vld [vmem:[#allocation227_spill] sm:$0xff] }
 0x810   : > { %v6928_v3 = vmul.f32 0.5, %v6864_v56  ;;  %v5741_v21 = vadd.f32 %v12826_v52, %v5572_v23 }
 0x811   : > { %v6610_v61 = vmul.f32 0.044715, %v6546_v10  ;;  %v6240_v30 = vadd.f32 %v6239_v12, %v6071_v2  ;;  %v7201_v44 = vpop.f32.mrf.mxu2  ;;  %v6247_v10 = vpop.f32.mrf.mxu0 }
 0x812   : > { %v7202_v48 = vadd.f32 %v11829_v7, %v7201_v44  ;;  %v6992_v54 = vmul.f32 %v6928_v3, %v12041_v5  ;;  %v5910_v38 = vadd.f32 %v11352_v27, %v5741_v21 }
 0x813   : > { %v12082_v26 = vadd.f32 %v6408_v45, %v6240_v30  ;;  %v6674_v22 = vadd.f32 %v6610_v61, %v12069_v15  ;;  %v12828_v61 = vld [vmem:[#allocation192_spill] sm:$0xff] }
 0x814   : > { %7307 = vst.msk [vmem:[%s11441_s14 + $0x120] sm:$0xff] %vm384_vm1, %v7202_v48 }
 0x815   : > { %v9414_v62 = vpop.eup %9413  ;;  %v6483_v53 = vmul.f32 %v12082_v26, %v12082_v26  ;;  %v6738_v16 = vmul.f32 0.7978846, %v6674_v22 }
 0x816   : > { %v6073_v29 = vpop.f32.mrf.mxu3  ;;  %v6865_v37 = vadd.f32 1.0, %v9414_v62 }
 0x817   : > { %v6547_v55 = vmul.f32 %v6483_v53, %v12082_v26  ;;  %v6074_v31 = vadd.f32 %v6073_v29, %v5905_v9  ;;  %9415 = vtanh.f32 %v6738_v16  ;;  %v12829_v16 = vld [vmem:[#allocation230_spill] sm:$0xff] }
 0x818   : > { %v6929_v11 = vmul.f32 0.5, %v6865_v37 }
 0x819   : > { %v6611_v39 = vmul.f32 0.044715, %v6547_v55  ;;  %v6243_v18 = vadd.f32 %v6242_v42, %v6074_v31  ;;  %v7203_v12 = vpop.f32.mrf.mxu2  ;;  %v12827_v42 = vld [vmem:[#allocation294_spill] sm:$0xff] }
 0x81a   : > { %v7204_v35 = vadd.f32 %v11829_v7, %v7203_v12  ;;  %v6993_v36 = vmul.f32 %v6929_v11, %v12054_v40  ;;  %v5574_v30 = vadd.f32 %v12828_v61, %v12827_v42 }
 0x81b   : > { %v12097_v45 = vadd.f32 %v6411_v0, %v6243_v18  ;;  %v6675_v57 = vadd.f32 %v6611_v39, %v12082_v26  ;;  %v6416_v0 = vpop.f32.mrf.mxu1  ;;  %v12830_v39 = vld [vmem:[#allocation297_spill] sm:$0xff]  ;;  %v12831_v18 = vld [vmem:[#allocation195_spill] sm:$0xff] }
 0x81c   : > { %7308 = vst.msk [vmem:[%s11441_s14 + $0x128] sm:$0xff] %vm384_vm1, %v7204_v35  ;;  %v7029_v13 = vpack.c.bf16 %v6993_v36, %v6992_v54  ;;  %v5743_v29 = vadd.f32 %v12829_v16, %v5574_v30  ;;  %v5577_v12 = vadd.f32 %v12831_v18, %v12830_v39  ;;  %v6249_v35 = vpop.f32.mrf.mxu0 }
 0x81d   : > { %v6484_v6 = vmul.f32 %v12097_v45, %v12097_v45  ;;  %v6739_v58 = vmul.f32 0.7978846, %v6675_v57  ;;  %v9416_v40 = vpop.eup %9415 }
 0x81e   : > { %v6075_v5 = vpop.f32.mrf.mxu3  ;;  %7245 = vmatmul.bf16.gmra.mxu2 %v7029_v13  ;;  %v6866_v24 = vadd.f32 1.0, %v9416_v40  ;;  %v5912_v33 = vadd.f32 %v11373_v28, %v5743_v29  ;;  %v5746_v23 = vadd.f32 %v12832_v51, %v5577_v12  ;;  %v12833_v40 = vld [vmem:[#allocation36_spill] sm:$0xff] }
 0x81f   : > { %v6548_v63 = vmul.f32 %v6484_v6, %v12097_v45  ;;  %v6076_v46 = vadd.f32 %v6075_v5, %v5907_v4  ;;  %9417 = vtanh.f32 %v6739_v58 }
 0x820   : > { %v6930_v22 = vmul.f32 0.5, %v6866_v24 }
 0x821   : > { %v6612_v1 = vmul.f32 0.044715, %v6548_v63  ;;  %v6245_v47 = vadd.f32 %v6244_v17, %v6076_v46  ;;  %v7206_v41 = vpop.f32.mrf.mxu2  ;;  %v12834_v63 = vld [vmem:[#allocation198_spill] sm:$0xff] }
 0x822   : > { %v7207_v14 = vadd.f32 %v11829_v7, %v7206_v41  ;;  %v6994_v27 = vmul.f32 %v6930_v22, %v12069_v15  ;;  %v5579_v46 = vadd.f32 %v12834_v63, %v12833_v40 }
 0x823   : > { %v12110_v49 = vadd.f32 %v6413_v50, %v6245_v47  ;;  %v6676_v60 = vadd.f32 %v6612_v1, %v12097_v45  ;;  %v6418_v57 = vpop.f32.mrf.mxu1  ;;  %v5915_v47 = vadd.f32 %v11395_v34, %v5746_v23 }
 0x824   : > { %7309 = vst.msk [vmem:[%s11441_s14 + $0x130] sm:$0xff] %vm384_vm1, %v7207_v14  ;;  %v6252_v52 = vpop.f32.mrf.mxu0 }
 0x825   : > { %v9418_v2 = vpop.eup %9417  ;;  %v6485_v44 = vmul.f32 %v12110_v49, %v12110_v49  ;;  %v6740_v32 = vmul.f32 0.7978846, %v6676_v60 }
 0x826   : > { %v6078_v48 = vpop.f32.mrf.mxu3  ;;  %v6867_v56 = vadd.f32 1.0, %v9418_v2 }
 0x827   : > { %v6549_v62 = vmul.f32 %v6485_v44, %v12110_v49  ;;  %v6079_v43 = vadd.f32 %v6078_v48, %v5910_v38  ;;  %9419 = vtanh.f32 %v6740_v32  ;;  %v12835_v38 = vld [vmem:[#allocation236_spill] sm:$0xff] }
 0x828   : > { %v6931_v20 = vmul.f32 0.5, %v6867_v56  ;;  %v5748_v32 = vadd.f32 %v12835_v38, %v5579_v46 }
 0x829   : > { %v6613_v25 = vmul.f32 0.044715, %v6549_v62  ;;  %v6248_v53 = vadd.f32 %v6247_v10, %v6079_v43  ;;  %v7208_v9 = vpop.f32.mrf.mxu2 }
 0x82a   : > { %v7209_v37 = vadd.f32 %v11829_v7, %v7208_v9  ;;  %v6995_v3 = vmul.f32 %v6931_v20, %v12082_v26  ;;  %v5917_v20 = vadd.f32 %v11410_v59, %v5748_v32 }
 0x82b   : > { %v12125_v55 = vadd.f32 %v6416_v0, %v6248_v53  ;;  %v6677_v31 = vadd.f32 %v6613_v25, %v12110_v49  ;;  %v6421_v2 = vpop.f32.mrf.mxu1 }
 0x82c   : > { %7310 = vst.msk [vmem:[%s11441_s14 + $0x138] sm:$0xff] %vm384_vm1, %v7209_v37  ;;  %v7030_v11 = vpack.c.bf16 %v6995_v3, %v6994_v27  ;;  %v6254_v37 = vpop.f32.mrf.mxu0 }
 0x82d   : > { %v6486_v19 = vmul.f32 %v12125_v55, %v12125_v55  ;;  %v6741_v17 = vmul.f32 0.7978846, %v6677_v31  ;;  %v9420_v26 = vpop.eup %9419 }
 0x82e   : > { %v6080_v15 = vpop.f32.mrf.mxu3  ;;  %7250 = vmatmul.bf16.gmra.mxu2 %v7030_v11  ;;  %v6868_v4 = vadd.f32 1.0, %v9420_v26 }
 0x82f   : > { %v6550_v54 = vmul.f32 %v6486_v19, %v12125_v55  ;;  %v6081_v36 = vadd.f32 %v6080_v15, %v5912_v33  ;;  %9421 = vtanh.f32 %v6741_v17 }
 0x830   : > { %v6932_v24 = vmul.f32 0.5, %v6868_v4  ;;  %v12161_v4 = vld [vmem:[%s12232_s6] ss:$0 sm:$0xff] }
 0x831   : > { %v6614_v50 = vmul.f32 0.044715, %v6550_v54  ;;  %v6250_v13 = vadd.f32 %v6249_v35, %v6081_v36  ;;  %v7211_v8 = vpop.f32.mrf.mxu2 }
 0x832   : > { %v7212_v6 = vadd.f32 %v11829_v7, %v7211_v8  ;;  %v6996_v34 = vmul.f32 %v6932_v24, %v12097_v45 }
 0x833   : > { %v6419_v28 = vadd.f32 %v6418_v57, %v6250_v13  ;;  %v6678_v58 = vadd.f32 %v6614_v50, %v12125_v55  ;;  %v6423_v3 = vpop.f32.mrf.mxu1 }
 0x834   : > { %7311 = vst.msk [vmem:[%s11441_s14 + $0x140] sm:$0xff] %vm384_vm1, %v7212_v6 }
 0x835   : > { %v9422_v5 = vpop.eup %9421  ;;  %v6487_v1 = vmul.f32 %v6419_v28, %v6419_v28  ;;  %v6742_v41 = vmul.f32 0.7978846, %v6678_v58 }
 0x836   : > { %v6083_v21 = vpop.f32.mrf.mxu3  ;;  %v6869_v14 = vadd.f32 1.0, %v9422_v5 }
 0x837   : > { %v6551_v60 = vmul.f32 %v6487_v1, %v6419_v28  ;;  %v6084_v10 = vadd.f32 %v6083_v21, %v5915_v47  ;;  %9423 = vtanh.f32 %v6742_v41 }
 0x838   : > { %v6933_v42 = vmul.f32 0.5, %v6869_v14 }
 0x839   : > { %v6615_v61 = vmul.f32 0.044715, %v6551_v60  ;;  %v6253_v30 = vadd.f32 %v6252_v52, %v6084_v10  ;;  %v7213_v44 = vpop.f32.mrf.mxu2 }
 0x83a   : > { %v7214_v0 = vadd.f32 %v11829_v7, %v7213_v44  ;;  %v6997_v48 = vmul.f32 %v6933_v42, %v12110_v49 }
 0x83b   : > { %v6422_v56 = vadd.f32 %v6421_v2, %v6253_v30  ;;  %v6679_v22 = vadd.f32 %v6615_v61, %v6419_v28 }
 0x83c   : > { %7312 = vst.msk [vmem:[%s11441_s14 + $0x148] sm:$0xff] %vm384_vm1, %v7214_v0  ;;  %v7031_v62 = vpack.c.bf16 %v6997_v48, %v6996_v34 }
 0x83d   : > { %v6488_v43 = vmul.f32 %v6422_v56, %v6422_v56  ;;  %v6743_v25 = vmul.f32 0.7978846, %v6679_v22  ;;  %v9424_v9 = vpop.eup %9423 }
 0x83e   : > { %v6085_v53 = vpop.f32.mrf.mxu3  ;;  %7255 = vmatmul.bf16.gmra.mxu2 %v7031_v62  ;;  %v6870_v11 = vadd.f32 1.0, %v9424_v9 }
 0x83f   : > { %v6552_v16 = vmul.f32 %v6488_v43, %v6422_v56  ;;  %v6086_v29 = vadd.f32 %v6085_v53, %v5917_v20  ;;  %9425 = vtanh.f32 %v6743_v25 }
 0x840   : > { %v6934_v17 = vmul.f32 0.5, %v6870_v11 }
 0x841   : > { %v6616_v45 = vmul.f32 0.044715, %v6552_v16  ;;  %v6255_v27 = vadd.f32 %v6254_v37, %v6086_v29  ;;  %v7216_v49 = vpop.f32.mrf.mxu2 }
 0x842   : > { %v7217_v31 = vadd.f32 %v11829_v7, %v7216_v49  ;;  %v6998_v57 = vmul.f32 %v6934_v17, %v12125_v55 }
 0x843   : > { %v6424_v39 = vadd.f32 %v6423_v3, %v6255_v27  ;;  %v6680_v18 = vadd.f32 %v6616_v45, %v6422_v56 }
 0x844   : > { %7313 = vst.msk [vmem:[%s11441_s14 + $0x150] sm:$0xff] %vm384_vm1, %v7217_v31 }
 0x845   : > { %v9426_v59 = vpop.eup %9425  ;;  %v6489_v12 = vmul.f32 %v6424_v39, %v6424_v39  ;;  %v6744_v19 = vmul.f32 0.7978846, %v6680_v18 }
 0x846   : > { %v6871_v33 = vadd.f32 1.0, %v9426_v59 }
 0x847   : > { %v6553_v35 = vmul.f32 %v6489_v12, %v6424_v39  ;;  %9427 = vtanh.f32 %v6744_v19 }
 0x848   : > { %v6935_v15 = vmul.f32 0.5, %v6871_v33 }
 0x849   : > { %v6617_v26 = vmul.f32 0.044715, %v6553_v35  ;;  %v7218_v54 = vpop.f32.mrf.mxu2 }
 0x84a   : > { %v7219_v36 = vadd.f32 %v11829_v7, %v7218_v54  ;;  %v6999_v50 = vmul.f32 %v6935_v15, %v6419_v28 }
 0x84b   : > { %v6681_v13 = vadd.f32 %v6617_v26, %v6424_v39 }
 0x84c   : > { %7314 = vst.msk [vmem:[%s11441_s14 + $0x158] sm:$0xff] %vm384_vm1, %v7219_v36  ;;  %v7032_v8 = vpack.c.bf16 %v6999_v50, %v6998_v57 }
 0x84d   : > { %v6745_v51 = vmul.f32 0.7978846, %v6681_v13  ;;  %v9428_v23 = vpop.eup %9427 }
 0x84e   : > { %7260 = vmatmul.bf16.gmra.mxu2 %v7032_v8  ;;  %v6872_v55 = vadd.f32 1.0, %v9428_v23 }
 0x84f   : > { %9429 = vtanh.f32 %v6745_v51 }
 0x850   : > { %v6936_v5 = vmul.f32 0.5, %v6872_v55 }
 0x851   : > { %v7221_v6 = vpop.f32.mrf.mxu2 }
 0x852   : > { %v7222_v7 = vadd.f32 %v12161_v4, %v7221_v6  ;;  %v7000_v1 = vmul.f32 %v6936_v5, %v6422_v56 }
 0x854   : > { %7315 = vst.msk [vmem:[%s11441_s14 + $0x160] sm:$0xff] %vm384_vm1, %v7222_v7 }
 0x855   : > { %v9430_v28 = vpop.eup %9429 }
 0x856   : > { %v6873_v58 = vadd.f32 1.0, %v9430_v28 }
 0x858   : > { %v6937_v40 = vmul.f32 0.5, %v6873_v58 }
 0x859   : > { %v7223_v63 = vpop.f32.mrf.mxu2 }
 0x85a   : > { %v7224_v46 = vadd.f32 %v12161_v4, %v7223_v63  ;;  %v7001_v47 = vmul.f32 %v6937_v40, %v6424_v39 }
 0x85c   : > { %7316 = vst.msk [vmem:[%s11441_s14 + $0x168] sm:$0xff] %vm384_vm1, %v7224_v46  ;;  %v7033_v41 = vpack.c.bf16 %v7001_v47, %v7000_v1 }
 0x85e   : > { %7265 = vmatmul.bf16.gmra.mxu2 %v7033_v41 }
 0x861   : > { %v7226_v52 = vpop.f32.mrf.mxu2 }
 0x862   : > { %v7227_v21 = vadd.f32 %v12161_v4, %v7226_v52 }
 0x864   : > { %7317 = vst.msk [vmem:[%s11441_s14 + $0x170] sm:$0xff] %vm384_vm1, %v7227_v21 }
 0x869   : > { %v7228_v14 = vpop.f32.mrf.mxu2 }
 0x86a   : > { %v7229_v24 = vadd.f32 %v12161_v4, %v7228_v14 }
 0x86c   : > { %7318 = vst.msk [vmem:[%s11441_s14 + $0x178] sm:$0xff] %vm384_vm1, %v7229_v24 }
 0x871   : > { %v7231_v60 = vpop.f32.mrf.mxu2 }
 0x872   : > { %v7232_v10 = vadd.f32 %v12161_v4, %v7231_v60 }
 0x874   : > { %7319 = vst.msk [vmem:[%s11441_s14 + $0x180] sm:$0xff] %vm384_vm1, %v7232_v10 }
 0x879   : > { %v7233_v2 = vpop.f32.mrf.mxu2 }
 0x87a   : > { %v7234_v42 = vadd.f32 %v12161_v4, %v7233_v2 }
 0x87c   : > { %7320 = vst.msk [vmem:[%s11441_s14 + $0x188] sm:$0xff] %vm384_vm1, %v7234_v42 }
 0x881   : > { %v7236_v61 = vpop.f32.mrf.mxu2 }
 0x882   : > { %v7237_v30 = vadd.f32 %v12161_v4, %v7236_v61 }
 0x884   : > { %7321 = vst.msk [vmem:[%s11441_s14 + $0x190] sm:$0xff] %vm384_vm1, %v7237_v30 }
 0x889   : > { %v7238_v44 = vpop.f32.mrf.mxu2 }
 0x88a   : > { %v7239_v38 = vadd.f32 %v12161_v4, %v7238_v44 }
 0x88c   : > { %7322 = vst.msk [vmem:[%s11441_s14 + $0x198] sm:$0xff] %vm384_vm1, %v7239_v38 }
 0x891   : > { %v7241_v32 = vpop.f32.mrf.mxu2 }
 0x892   : > { %v7242_v0 = vadd.f32 %v12161_v4, %v7241_v32 }
 0x894   : > { %7323 = vst.msk [vmem:[%s11441_s14 + $0x1a0] sm:$0xff] %vm384_vm1, %v7242_v0 }
 0x899   : > { %v7243_v34 = vpop.f32.mrf.mxu2 }
 0x89a   : > { %v7244_v48 = vadd.f32 %v12161_v4, %v7243_v34 }
 0x89c   : > { %7324 = vst.msk [vmem:[%s11441_s14 + $0x1a8] sm:$0xff] %vm384_vm1, %v7244_v48 }
 0x8a1   : > { %v7246_v56 = vpop.f32.mrf.mxu2 }
 0x8a2   : > { %v7247_v22 = vadd.f32 %v12161_v4, %v7246_v56 }
 0x8a4   : > { %7325 = vst.msk [vmem:[%s11441_s14 + $0x1b0] sm:$0xff] %vm384_vm1, %v7247_v22 }
 0x8a9   : > { %v7248_v62 = vpop.f32.mrf.mxu2 }
 0x8aa   : > { %v7249_v43 = vadd.f32 %v12161_v4, %v7248_v62 }
 0x8ac   : > { %7326 = vst.msk [vmem:[%s11441_s14 + $0x1b8] sm:$0xff] %vm384_vm1, %v7249_v43 }
 0x8b1   : > { %v7251_v20 = vpop.f32.mrf.mxu2 }
 0x8b2   : > { %v7252_v25 = vadd.f32 %v12161_v4, %v7251_v20 }
 0x8b4   : > { %7327 = vst.msk [vmem:[%s11441_s14 + $0x1c0] sm:$0xff] %vm384_vm1, %v7252_v25 }
 0x8b9   : > { %v7253_v53 = vpop.f32.mrf.mxu2 }
 0x8ba   : > { %v7254_v9 = vadd.f32 %v12161_v4, %v7253_v53 }
 0x8bc   : > { %7328 = vst.msk [vmem:[%s11441_s14 + $0x1c8] sm:$0xff] %vm384_vm1, %v7254_v9 }
 0x8c1   : > { %v7256_v16 = vpop.f32.mrf.mxu2 }
 0x8c2   : > { %v7257_v29 = vadd.f32 %v12161_v4, %v7256_v16 }
 0x8c4   : > { %7329 = vst.msk [vmem:[%s11441_s14 + $0x1d0] sm:$0xff] %vm384_vm1, %v7257_v29 }
 0x8c9   : > { %v7258_v37 = vpop.f32.mrf.mxu2 }
 0x8ca   : > { %v7259_v45 = vadd.f32 %v12161_v4, %v7258_v37 }
 0x8cc   : > { %7330 = vst.msk [vmem:[%s11441_s14 + $0x1d8] sm:$0xff] %vm384_vm1, %v7259_v45 }
 0x8d1   : > { %v7261_v27 = vpop.f32.mrf.mxu2 }
 0x8d2   : > { %v7262_v49 = vadd.f32 %v12161_v4, %v7261_v27 }
 0x8d4   : > { %7331 = vst.msk [vmem:[%s11441_s14 + $0x1e0] sm:$0xff] %vm384_vm1, %v7262_v49 }
 0x8d9   : > { %v7263_v3 = vpop.f32.mrf.mxu2 }
 0x8da   : > { %v7264_v31 = vadd.f32 %v12161_v4, %v7263_v3 }
 0x8dc   : > { %7332 = vst.msk [vmem:[%s11441_s14 + $0x1e8] sm:$0xff] %vm384_vm1, %v7264_v31 }
 0x8e1   : > { %v7266_v11 = vpop.f32.mrf.mxu2 }
 0x8e2   : > { %v7267_v39 = vadd.f32 %v12161_v4, %v7266_v11 }
 0x8e4   : > { %7333 = vst.msk [vmem:[%s11441_s14 + $0x1f0] sm:$0xff] %vm384_vm1, %v7267_v39 }
 0x8e9   : > { %v7268_v18 = vpop.f32.mrf.mxu2 }
 0x8ea   : > { %v7269_v59 = vadd.f32 %v12161_v4, %v7268_v18 }
 0x8ec   : > { %7334 = vst.msk [vmem:[%s11441_s14 + $0x1f8] sm:$0xff] %vm384_vm1, %v7269_v59 }
 0x8ed PF: > { %s17_s24 = sadd.s32 1, %s9458_s24  }
 0x8ee   : > { %p14_p4 = scmp.ge.s32.totalorder %s17_s24, 4  }
 0x8f0   :  { %16 = sbr.rel (!%p14_p4) target bundleno = 1 (0x1), region = 81 }

</bundles_post_ra>
